<compile_context>
chip_gen: v5e
topology: v5e:2x2
jax: 0.10.0
libtpu: 0.0.40
codegen_flags: <defaults>
</compile_context>

<pallas_src>
import jax
import jax.numpy as jnp
from jax import lax
from jax.experimental import pallas as pl
from jax.experimental.pallas import tpu as pltpu

LEAKY_SLOPE = 0.2


# ------------------------------ Fused kernel --------------------------------
def _glow_step_kernel(x_ref, mask_ref, mmat_ref, mbias_ref, const_ref,
                      w1_ref, b1_ref, w2_ref, b2_ref, w3_ref, b3_ref,
                      y_ref, ld_ref):
    x = x_ref[...]                 # (C, T)   f32   (batch dim squeezed)
    mask = mask_ref[...]           # (1, T)   f32
    c, tdim = x.shape
    half = c // 2

    # Fused ActNorm + InvCov channel mix:  y1 = (M' x + b') * mask
    y1 = (jnp.dot(mmat_ref[...], x, preferred_element_type=jnp.float32)
          + mbias_ref[...]) * mask
    xa = y1[:half, :]              # (C/2, T)
    xb = y1[half:, :]              # (C/2, T)

    # Column masks implementing the zero padding of the k=3 convs.
    col = lax.broadcasted_iota(jnp.int32, (1, tdim), 1)
    keep_first = (col > 0).astype(jnp.float32)          # zeroes column 0
    keep_last = (col < tdim - 1).astype(jnp.float32)    # zeroes column T-1

    # ---- conv1d(C/2 -> hidden, k=3, pad=1): small im2col matmul (K=3*C/2) --
    xb_prev = pltpu.roll(xb, 1, axis=1) * keep_first          # xb[:, t-1]
    xb_next = pltpu.roll(xb, tdim - 1, axis=1) * keep_last    # xb[:, t+1]
    im1 = jnp.concatenate([xb_prev, xb, xb_next], axis=0).astype(jnp.bfloat16)
    h1 = jnp.dot(w1_ref[...], im1,
                 preferred_element_type=jnp.float32) + b1_ref[...]
    h1 = jnp.maximum(h1, LEAKY_SLOPE * h1)

    # ---- conv1d(hidden -> hidden, k=1): plain matmul ------------------------
    h2 = jnp.dot(w2_ref[...], h1.astype(jnp.bfloat16),
                 preferred_element_type=jnp.float32) + b2_ref[...]
    h2 = jnp.maximum(h2, LEAKY_SLOPE * h2)

    # ---- conv1d(hidden -> C, k=3, pad=1): taps stacked on OUTPUT axis -------
    #   h3s = W3_stacked @ h2  -> (3C, T);  out[:,t] = p0[:,t-1]+p1[:,t]+p2[:,t+1]
    h3s = jnp.dot(w3_ref[...], h2.astype(jnp.bfloat16),
                  preferred_element_type=jnp.float32)          # (3C, T)
    p0 = h3s[:c, :]
    p1 = h3s[c:2 * c, :]
    p2 = h3s[2 * c:, :]
    h3 = (pltpu.roll(p0, 1, axis=1) * keep_first
          + p1
          + pltpu.roll(p2, tdim - 1, axis=1) * keep_last
          + b3_ref[...])

    # ---- affine couple ------------------------------------------------------
    logs = h3[:half, :]
    t_out = h3[half:, :]
    z = logs + 2.0
    denom = 1.0 + jnp.exp(-z)      # shared between sigmoid and log-sigmoid
    s = 1.0 / denom                # sigmoid(z)
    y_ref[:half, :] = s * xa + t_out
    y_ref[half:, :] = xb

    # logdet = (sum(logs_actnorm) + logdet(W)*C/4) * x_len + sum(log(s))
    #   with log(s) = -log(1 + exp(-z))   (matches the unmasked torch sum)
    x_len = jnp.sum(mask)
    logdet2 = -jnp.sum(jnp.log(denom))
    ld_ref[...] = jnp.reshape(const_ref[0, 0] * x_len + logdet2, (1, 1))


# -------------------------------- Wrapper ------------------------------------
def glow_step_forward(x, x_mask, params):
    logs_p, bias_p, M, const0, w1, b1, w2, b2, w3, b3 = params
    B, C, T = x.shape
    half = C // 2
    hidden = w1.shape[1]

    # Fold ActNorm into the InvCov matrix:  M' = M @ diag(exp(logs)), b' = M @ bias
    mmat = (M * jnp.exp(logs_p).reshape(1, C)).astype(jnp.float32)    # (C, C)
    mbias = (M @ bias_p).astype(jnp.float32)                          # (C, 1)

    # conv1 im2col weight (rows = out channels, cols = [tap0|tap1|tap2] inputs)
    w1_f = jnp.transpose(w1, (1, 0, 2)).reshape(hidden, 3 * half).astype(jnp.bfloat16)
    # conv3 tap-stacked weight: rows = [tap0 outs | tap1 outs | tap2 outs]
    w3_s = w3.reshape(3 * C, hidden).astype(jnp.bfloat16)
    w2_b = w2.astype(jnp.bfloat16)

    y, ld = pl.pallas_call(
        _glow_step_kernel,
        out_shape=(jax.ShapeDtypeStruct((B, C, T), jnp.float32),
                   jax.ShapeDtypeStruct((B, 1, 1), jnp.float32)),
        grid=(B,),
        in_specs=[
            pl.BlockSpec((None, C, T), lambda b: (b, 0, 0)),        # x
            pl.BlockSpec((None, 1, T), lambda b: (b, 0, 0)),        # mask
            pl.BlockSpec((C, C), lambda b: (0, 0)),                 # M'
            pl.BlockSpec((C, 1), lambda b: (0, 0)),                 # b'
            pl.BlockSpec(memory_space=pltpu.MemorySpace.SMEM),      # logdet const (scalar)
            pl.BlockSpec((hidden, 3 * half), lambda b: (0, 0)),     # w1 (im2col, bf16)
            pl.BlockSpec((hidden, 1), lambda b: (0, 0)),            # b1
            pl.BlockSpec((hidden, hidden), lambda b: (0, 0)),       # w2 (bf16)
            pl.BlockSpec((hidden, 1), lambda b: (0, 0)),            # b2
            pl.BlockSpec((3 * C, hidden), lambda b: (0, 0)),        # w3 (tap-stacked, bf16)
            pl.BlockSpec((C, 1), lambda b: (0, 0)),                 # b3
        ],
        out_specs=(
            pl.BlockSpec((None, C, T), lambda b: (b, 0, 0)),
            pl.BlockSpec((None, 1, 1), lambda b: (b, 0, 0)),
        ),
        compiler_params=pltpu.CompilerParams(
            dimension_semantics=("parallel",)),
    )(x, x_mask, mmat, mbias, const0, w1_f, b1, w2_b, b2, w3_s, b3)

    return y, ld[:, 0, 0]


# -------------------------- Parameter setup (glue) ---------------------------
def init_params(x, x_mask, feature_dim, hidden=512, seed=0):
    C = feature_dim
    n_split = 4
    G = C // n_split
    half = C // 2
    key = jax.random.PRNGKey(seed)
    kw, k1, kb1, k2, kb2, k3, kb3 = jax.random.split(key, 7)

    # ActNorm data-dependent init (mirrors ActNorm.initialize_parameters).
    denom = jnp.sum(x_mask, axis=(0, 2))
    m = jnp.sum(x * x_mask, axis=(0, 2)) / denom
    m_sq = jnp.sum(x * x * x_mask, axis=(0, 2)) / denom
    v = m_sq - m ** 2
    logs_data = 0.5 * jnp.log(jnp.maximum(v, 1e-6))
    bias_p = (-m * jnp.exp(-logs_data)).reshape(C, 1).astype(jnp.float32)
    logs_p = (-logs_data).reshape(C, 1).astype(jnp.float32)

    # InvCov: orthogonal 4x4 from QR, forced to det > 0 (like the torch code).
    w_raw = jax.random.normal(kw, (n_split, n_split), dtype=jnp.float32)
    q, _ = jnp.linalg.qr(w_raw)
    flip = jnp.where(jnp.linalg.det(q) < 0, -1.0, 1.0)
    q = q.at[:, 0].multiply(flip)
    _, logdet_w = jnp.linalg.slogdet(q)

    # Fold InvCov's view/permute/conv2d(1x1)/permute/view into one CxC matrix.
    ch = jnp.arange(C)
    a = ch // half
    rem = ch % half
    g = rem // 2
    h = rem % 2
    s = 2 * a + h
    perm_idx = s * G + g
    P = jnp.zeros((C, C), jnp.float32).at[perm_idx, ch].set(1.0)
    K = jnp.kron(q, jnp.eye(G, dtype=jnp.float32))
    M = (P.T @ K @ P).astype(jnp.float32)

    const0 = (jnp.sum(logs_p) + logdet_w * (C / n_split)).reshape(1, 1)

    # AffineCouple net weights (deterministic synthetic init, fan-in scaled).
    w1 = jax.random.normal(k1, (3, hidden, half), jnp.float32) / jnp.sqrt(3.0 * half)
    b1 = 0.01 * jax.random.normal(kb1, (hidden, 1), jnp.float32)
    w2 = jax.random.normal(k2, (hidden, hidden), jnp.float32) / jnp.sqrt(float(hidden))
    b2 = 0.01 * jax.random.normal(kb2, (hidden, 1), jnp.float32)
    w3 = jax.random.normal(k3, (3, C, hidden), jnp.float32) / jnp.sqrt(3.0 * hidden)
    b3 = 0.01 * jax.random.normal(kb3, (C, 1), jnp.float32)

    return (logs_p, bias_p, M, const0, w1, b1, w2, b2, w3, b3)


# ---------------------------- Pure-JAX reference -----------------------------
def glow_step_reference(x, x_mask, params):
    logs_p, bias_p, M, const0, w1, b1, w2, b2, w3, b3 = params
    B, C, T = x.shape
    half = C // 2

    ya = (bias_p[None] + jnp.exp(logs_p)[None] * x) * x_mask
    y1 = jnp.einsum('ij,bjt->bit', M, ya) * x_mask
    x_len = jnp.sum(x_mask, axis=(1, 2))
    ld01 = const0[0, 0] * x_len

    def conv1d(xin, w_koi, b, pad):
        w_oik = jnp.transpose(w_koi, (1, 2, 0))
        out = lax.conv_general_dilated(
            xin, w_oik, window_strides=(1,), padding=[(pad, pad)],
            dimension_numbers=('NCH', 'OIH', 'NCH'))
        return out + b.reshape(1, -1, 1)

    xa, xb = y1[:, :half], y1[:, half:]
    h = conv1d(xb, w1, b1, 1)
    h = jnp.where(h > 0, h, LEAKY_SLOPE * h)
    h = jnp.einsum('oc,bct->bot', w2, h) + b2.reshape(1, -1, 1)
    h = jnp.where(h > 0, h, LEAKY_SLOPE * h)
    h = conv1d(h, w3, b3, 1)
    logs = h[:, :half]
    t = h[:, half:]
    s = jax.nn.sigmoid(logs + 2.0)
    y_out = jnp.concatenate([s * xa + t, xb], axis=1)
    ld2 = jnp.sum(jnp.log(s).reshape(B, -1), axis=1)
    return y_out, ld01 + ld2


if __name__ == "__main__":
    # feature_dim=16 matches module defaults; T=256 keeps lanes dense (>=128).
    B, C, T = 2, 16, 256
    x = jax.random.normal(jax.random.PRNGKey(0), (B, C, T), dtype=jnp.float32)
    lengths = jnp.array([T, T - 64])
    x_mask = (jnp.arange(T)[None, None, :]
              < lengths[:, None, None]).astype(jnp.float32)   # (B, 1, T)

    params = init_params(x, x_mask, C)

    y, l = glow_step_forward(x, x_mask, params)
    jax.block_until_ready((y, l))

    y_ref, l_ref = glow_step_reference(x, x_mask, params)
    # bf16 MXU operands in the kernel vs full-f32 reference -> 2e-2 tolerance.
    assert jnp.allclose(y, y_ref, atol=2e-2, rtol=2e-2), "y mismatch"
    assert jnp.allclose(l, l_ref, atol=2e-2, rtol=2e-2), "logdet mismatch"

    print("KERNEL_OK")
</pallas_src>

<mosaic_0001>
module attributes {stable_mosaic.version = 11 : i64} {
  func.func @_glow_step_kernel(%arg0: i32, %arg1: memref<1x16x256xf32, #tpu.memory_space<vmem>>, %arg2: memref<1x1x256xf32, #tpu.memory_space<vmem>>, %arg3: memref<16x16xf32, #tpu.memory_space<vmem>>, %arg4: memref<16x1xf32, #tpu.memory_space<vmem>>, %arg5: memref<1x1xf32, #tpu.memory_space<smem>>, %arg6: memref<512x24xbf16, #tpu.memory_space<vmem>>, %arg7: memref<512x1xf32, #tpu.memory_space<vmem>>, %arg8: memref<512x512xbf16, #tpu.memory_space<vmem>>, %arg9: memref<512x1xf32, #tpu.memory_space<vmem>>, %arg10: memref<48x512xbf16, #tpu.memory_space<vmem>>, %arg11: memref<16x1xf32, #tpu.memory_space<vmem>>, %arg12: memref<1x16x256xf32, #tpu.memory_space<vmem>>, %arg13: memref<1x1x1xf32, #tpu.memory_space<vmem>>) attributes {dimension_semantics = [#tpu.dimension_semantics<parallel>], iteration_bounds = array<i64: 2>, scalar_prefetch = 0 : i64, scratch_operands = 0 : i64, tpu.core_type = #tpu.core_type<tc>, window_params = [{transform_indices = @transform_0, window_bounds = array<i64: 1, 16, 256>}, {transform_indices = @transform_1, window_bounds = array<i64: 1, 1, 256>}, {pipeline_mode = #tpu.pipeline_mode<synchronous>, transform_indices = @transform_2, window_bounds = array<i64: 16, 16>}, {pipeline_mode = #tpu.pipeline_mode<synchronous>, transform_indices = @transform_3, window_bounds = array<i64: 16, 1>}, {transform_indices = @transform_4, window_bounds = array<i64: 1, 1>}, {pipeline_mode = #tpu.pipeline_mode<synchronous>, transform_indices = @transform_5, window_bounds = array<i64: 512, 24>}, {pipeline_mode = #tpu.pipeline_mode<synchronous>, transform_indices = @transform_6, window_bounds = array<i64: 512, 1>}, {pipeline_mode = #tpu.pipeline_mode<synchronous>, transform_indices = @transform_7, window_bounds = array<i64: 512, 512>}, {pipeline_mode = #tpu.pipeline_mode<synchronous>, transform_indices = @transform_8, window_bounds = array<i64: 512, 1>}, {pipeline_mode = #tpu.pipeline_mode<synchronous>, transform_indices = @transform_9, window_bounds = array<i64: 48, 512>}, {pipeline_mode = #tpu.pipeline_mode<synchronous>, transform_indices = @transform_10, window_bounds = array<i64: 16, 1>}, {transform_indices = @transform_11, window_bounds = array<i64: 1, 16, 256>}, {transform_indices = @transform_12, window_bounds = array<i64: 1, 1, 1>}]} {
    %c0 = arith.constant 0 : index
    %c0_0 = arith.constant 0 : index
    %c0_1 = arith.constant 0 : index
    %0 = vector.load %arg1[%c0, %c0_0, %c0_1] : memref<1x16x256xf32, #tpu.memory_space<vmem>>, vector<1x16x256xf32>
    %1 = vector.shape_cast %0 : vector<1x16x256xf32> to vector<16x256xf32>
    %c0_2 = arith.constant 0 : index
    %c0_3 = arith.constant 0 : index
    %c0_4 = arith.constant 0 : index
    %2 = vector.load %arg2[%c0_2, %c0_3, %c0_4] : memref<1x1x256xf32, #tpu.memory_space<vmem>>, vector<1x1x256xf32>
    %3 = vector.shape_cast %2 : vector<1x1x256xf32> to vector<1x256xf32>
    %c0_5 = arith.constant 0 : index
    %c0_6 = arith.constant 0 : index
    %4 = vector.load %arg3[%c0_5, %c0_6] : memref<16x16xf32, #tpu.memory_space<vmem>>, vector<16x16xf32>
    %cst = arith.constant dense<0.000000e+00> : vector<16x256xf32>
    %5 = tpu.matmul %4, %1, %cst {dimension_numbers = #tpu.dot_dimension_numbers<[1], [0], [0], [1], [0, 0, 1, 1], [], []>} : vector<16x16xf32>, vector<16x256xf32>, vector<16x256xf32> -> vector<16x256xf32>
    %c0_7 = arith.constant 0 : index
    %c0_8 = arith.constant 0 : index
    %6 = vector.load %arg4[%c0_7, %c0_8] : memref<16x1xf32, #tpu.memory_space<vmem>>, vector<16x1xf32>
    %7 = vector.broadcast %6 : vector<16x1xf32> to vector<16x256xf32>
    %8 = arith.addf %5, %7 : vector<16x256xf32>
    %9 = vector.broadcast %3 : vector<1x256xf32> to vector<16x256xf32>
    %10 = arith.mulf %8, %9 : vector<16x256xf32>
    %11 = vector.extract_strided_slice %10 {offsets = [0, 0], sizes = [8, 256], strides = [1, 1]} : vector<16x256xf32> to vector<8x256xf32>
    %12 = vector.extract_strided_slice %10 {offsets = [8, 0], sizes = [8, 256], strides = [1, 1]} : vector<16x256xf32> to vector<8x256xf32>
    %13 = tpu.iota {dimensions = array<i32: 1>} : vector<1x256xi32>
    %c0_i32 = arith.constant 0 : i32
    %14 = vector.broadcast %c0_i32 : i32 to vector<1x256xi32>
    %15 = arith.cmpi sgt, %13, %14 : vector<1x256xi32>
    %16 = arith.extui %15 : vector<1x256xi1> to vector<1x256xi32>
    %17 = arith.sitofp %16 : vector<1x256xi32> to vector<1x256xf32>
    %c255_i32 = arith.constant 255 : i32
    %18 = vector.broadcast %c255_i32 : i32 to vector<1x256xi32>
    %19 = arith.cmpi slt, %13, %18 : vector<1x256xi32>
    %20 = arith.extui %19 : vector<1x256xi1> to vector<1x256xi32>
    %21 = arith.sitofp %20 : vector<1x256xi32> to vector<1x256xf32>
    %c1_i32 = arith.constant 1 : i32
    %22 = tpu.dynamic_rotate %12 by %c1_i32 dim 1 : vector<8x256xf32>, i32 -> vector<8x256xf32>
    %23 = vector.broadcast %17 : vector<1x256xf32> to vector<8x256xf32>
    %24 = arith.mulf %22, %23 : vector<8x256xf32>
    %c255_i32_9 = arith.constant 255 : i32
    %25 = tpu.dynamic_rotate %12 by %c255_i32_9 dim 1 : vector<8x256xf32>, i32 -> vector<8x256xf32>
    %26 = vector.broadcast %21 : vector<1x256xf32> to vector<8x256xf32>
    %27 = arith.mulf %25, %26 : vector<8x256xf32>
    %28 = tpu.concatenate %24, %12, %27 in 0 : vector<8x256xf32>, vector<8x256xf32>, vector<8x256xf32> -> vector<24x256xf32>
    %29 = arith.truncf %28 : vector<24x256xf32> to vector<24x256xbf16>
    %c0_10 = arith.constant 0 : index
    %c0_11 = arith.constant 0 : index
    %30 = vector.load %arg6[%c0_10, %c0_11] : memref<512x24xbf16, #tpu.memory_space<vmem>>, vector<512x24xbf16>
    %cst_12 = arith.constant dense<0.000000e+00> : vector<512x256xf32>
    %31 = tpu.matmul %30, %29, %cst_12 {dimension_numbers = #tpu.dot_dimension_numbers<[1], [0], [0], [1], [0, 0, 1, 1], [], []>} : vector<512x24xbf16>, vector<24x256xbf16>, vector<512x256xf32> -> vector<512x256xf32>
    %c0_13 = arith.constant 0 : index
    %c0_14 = arith.constant 0 : index
    %32 = vector.load %arg7[%c0_13, %c0_14] : memref<512x1xf32, #tpu.memory_space<vmem>>, vector<512x1xf32>
    %33 = vector.broadcast %32 : vector<512x1xf32> to vector<512x256xf32>
    %34 = arith.addf %31, %33 : vector<512x256xf32>
    %cst_15 = arith.constant 2.000000e-01 : f32
    %35 = vector.broadcast %cst_15 : f32 to vector<512x256xf32>
    %36 = arith.mulf %35, %34 : vector<512x256xf32>
    %37 = arith.maximumf %34, %36 : vector<512x256xf32>
    %c0_16 = arith.constant 0 : index
    %c0_17 = arith.constant 0 : index
    %38 = vector.load %arg8[%c0_16, %c0_17] : memref<512x512xbf16, #tpu.memory_space<vmem>>, vector<512x512xbf16>
    %39 = arith.truncf %37 : vector<512x256xf32> to vector<512x256xbf16>
    %cst_18 = arith.constant dense<0.000000e+00> : vector<512x256xf32>
    %40 = tpu.matmul %38, %39, %cst_18 {dimension_numbers = #tpu.dot_dimension_numbers<[1], [0], [0], [1], [0, 0, 1, 1], [], []>} : vector<512x512xbf16>, vector<512x256xbf16>, vector<512x256xf32> -> vector<512x256xf32>
    %c0_19 = arith.constant 0 : index
    %c0_20 = arith.constant 0 : index
    %41 = vector.load %arg9[%c0_19, %c0_20] : memref<512x1xf32, #tpu.memory_space<vmem>>, vector<512x1xf32>
    %42 = vector.broadcast %41 : vector<512x1xf32> to vector<512x256xf32>
    %43 = arith.addf %40, %42 : vector<512x256xf32>
    %cst_21 = arith.constant 2.000000e-01 : f32
    %44 = vector.broadcast %cst_21 : f32 to vector<512x256xf32>
    %45 = arith.mulf %44, %43 : vector<512x256xf32>
    %46 = arith.maximumf %43, %45 : vector<512x256xf32>
    %c0_22 = arith.constant 0 : index
    %c0_23 = arith.constant 0 : index
    %47 = vector.load %arg10[%c0_22, %c0_23] : memref<48x512xbf16, #tpu.memory_space<vmem>>, vector<48x512xbf16>
    %48 = arith.truncf %46 : vector<512x256xf32> to vector<512x256xbf16>
    %cst_24 = arith.constant dense<0.000000e+00> : vector<48x256xf32>
    %49 = tpu.matmul %47, %48, %cst_24 {dimension_numbers = #tpu.dot_dimension_numbers<[1], [0], [0], [1], [0, 0, 1, 1], [], []>} : vector<48x512xbf16>, vector<512x256xbf16>, vector<48x256xf32> -> vector<48x256xf32>
    %50 = vector.extract_strided_slice %49 {offsets = [0, 0], sizes = [16, 256], strides = [1, 1]} : vector<48x256xf32> to vector<16x256xf32>
    %51 = vector.extract_strided_slice %49 {offsets = [16, 0], sizes = [16, 256], strides = [1, 1]} : vector<48x256xf32> to vector<16x256xf32>
    %52 = vector.extract_strided_slice %49 {offsets = [32, 0], sizes = [16, 256], strides = [1, 1]} : vector<48x256xf32> to vector<16x256xf32>
    %c1_i32_25 = arith.constant 1 : i32
    %53 = tpu.dynamic_rotate %50 by %c1_i32_25 dim 1 : vector<16x256xf32>, i32 -> vector<16x256xf32>
    %54 = vector.broadcast %17 : vector<1x256xf32> to vector<16x256xf32>
    %55 = arith.mulf %53, %54 : vector<16x256xf32>
    %56 = arith.addf %55, %51 : vector<16x256xf32>
    %c255_i32_26 = arith.constant 255 : i32
    %57 = tpu.dynamic_rotate %52 by %c255_i32_26 dim 1 : vector<16x256xf32>, i32 -> vector<16x256xf32>
    %58 = vector.broadcast %21 : vector<1x256xf32> to vector<16x256xf32>
    %59 = arith.mulf %57, %58 : vector<16x256xf32>
    %60 = arith.addf %56, %59 : vector<16x256xf32>
    %c0_27 = arith.constant 0 : index
    %c0_28 = arith.constant 0 : index
    %61 = vector.load %arg11[%c0_27, %c0_28] : memref<16x1xf32, #tpu.memory_space<vmem>>, vector<16x1xf32>
    %62 = vector.broadcast %61 : vector<16x1xf32> to vector<16x256xf32>
    %63 = arith.addf %60, %62 : vector<16x256xf32>
    %64 = vector.extract_strided_slice %63 {offsets = [0, 0], sizes = [8, 256], strides = [1, 1]} : vector<16x256xf32> to vector<8x256xf32>
    %65 = vector.extract_strided_slice %63 {offsets = [8, 0], sizes = [8, 256], strides = [1, 1]} : vector<16x256xf32> to vector<8x256xf32>
    %cst_29 = arith.constant 2.000000e+00 : f32
    %66 = vector.broadcast %cst_29 : f32 to vector<8x256xf32>
    %67 = arith.addf %64, %66 : vector<8x256xf32>
    %cst_30 = arith.constant 0.000000e+00 : f32
    %68 = vector.broadcast %cst_30 : f32 to vector<8x256xf32>
    %69 = arith.subf %68, %67 : vector<8x256xf32>
    %70 = math.exp %69 : vector<8x256xf32>
    %cst_31 = arith.constant 1.000000e+00 : f32
    %71 = vector.broadcast %cst_31 : f32 to vector<8x256xf32>
    %72 = arith.addf %71, %70 : vector<8x256xf32>
    %cst_32 = arith.constant 1.000000e+00 : f32
    %73 = vector.broadcast %cst_32 : f32 to vector<8x256xf32>
    %74 = arith.divf %73, %72 : vector<8x256xf32>
    %75 = arith.mulf %74, %11 : vector<8x256xf32>
    %76 = arith.addf %75, %65 : vector<8x256xf32>
    %c0_33 = arith.constant 0 : index
    %c0_34 = arith.constant 0 : index
    %c0_35 = arith.constant 0 : index
    %77 = vector.load %arg12[%c0_33, %c0_34, %c0_35] : memref<1x16x256xf32, #tpu.memory_space<vmem>>, vector<1x8x256xf32>
    %78 = vector.shape_cast %77 : vector<1x8x256xf32> to vector<8x256xf32>
    %79 = vector.shape_cast %76 : vector<8x256xf32> to vector<1x8x256xf32>
    tpu.vector_store %arg12[%c0_33, %c0_34, %c0_35], %79 {strides = array<i32>} : memref<1x16x256xf32, #tpu.memory_space<vmem>>, vector<1x8x256xf32>,
    %c0_36 = arith.constant 0 : index
    %c8 = arith.constant 8 : index
    %c0_37 = arith.constant 0 : index
    %80 = vector.load %arg12[%c0_36, %c8, %c0_37] : memref<1x16x256xf32, #tpu.memory_space<vmem>>, vector<1x8x256xf32>
    %81 = vector.shape_cast %80 : vector<1x8x256xf32> to vector<8x256xf32>
    %82 = vector.shape_cast %12 : vector<8x256xf32> to vector<1x8x256xf32>
    tpu.vector_store %arg12[%c0_36, %c8, %c0_37], %82 {strides = array<i32>} : memref<1x16x256xf32, #tpu.memory_space<vmem>>, vector<1x8x256xf32>,
    %83 = vector.shape_cast %3 : vector<1x256xf32> to vector<1x1x256xf32>
    %cst_38 = arith.constant dense<0.000000e+00> : vector<1xf32>
    %84 = vector.multi_reduction <add>, %83, %cst_38 [1, 2] : vector<1x1x256xf32> to vector<1xf32>
    %85 = vector.shape_cast %84 : vector<1xf32> to vector<1x1x1xf32>
    %86 = vector.extract %85[0, 0, 0] : f32 from vector<1x1x1xf32>
    %87 = math.log %72 : vector<8x256xf32>
    %88 = vector.shape_cast %87 : vector<8x256xf32> to vector<1x8x256xf32>
    %cst_39 = arith.constant dense<0.000000e+00> : vector<1xf32>
    %89 = vector.multi_reduction <add>, %88, %cst_39 [1, 2] : vector<1x8x256xf32> to vector<1xf32>
    %90 = vector.shape_cast %89 : vector<1xf32> to vector<1x1x1xf32>
    %91 = vector.extract %90[0, 0, 0] : f32 from vector<1x1x1xf32>
    %cst_40 = arith.constant 0.000000e+00 : f32
    %92 = arith.subf %cst_40, %91 : f32
    %c0_41 = arith.constant 0 : index
    %c0_42 = arith.constant 0 : index
    %93 = memref.load %arg5[%c0_41, %c0_42] : memref<1x1xf32, #tpu.memory_space<smem>>
    %94 = arith.mulf %93, %86 : f32
    %95 = arith.addf %94, %92 : f32
    %96 = vector.broadcast %95 : f32 to vector<1x1xf32>
    %c0_43 = arith.constant 0 : index
    %c0_44 = arith.constant 0 : index
    %c0_45 = arith.constant 0 : index
    %97 = vector.load %arg13[%c0_43, %c0_44, %c0_45] : memref<1x1x1xf32, #tpu.memory_space<vmem>>, vector<1x1x1xf32>
    %98 = vector.shape_cast %97 : vector<1x1x1xf32> to vector<1x1xf32>
    %99 = vector.shape_cast %96 : vector<1x1xf32> to vector<1x1x1xf32>
    tpu.vector_store %arg13[%c0_43, %c0_44, %c0_45], %99 {strides = array<i32>} : memref<1x1x1xf32, #tpu.memory_space<vmem>>, vector<1x1x1xf32>,
    return
  }
  func.func @transform_0(%arg0: i32) -> (i32, i32, i32) {
    %c0_i32 = arith.constant 0 : i32
    %c0_i32_0 = arith.constant 0 : i32
    %c0_i32_1 = arith.constant 0 : i32
    return %arg0, %c0_i32, %c0_i32_0 : i32, i32, i32
  }
  func.func @transform_1(%arg0: i32) -> (i32, i32, i32) {
    %c0_i32 = arith.constant 0 : i32
    %c0_i32_0 = arith.constant 0 : i32
    %c0_i32_1 = arith.constant 0 : i32
    return %arg0, %c0_i32, %c0_i32_0 : i32, i32, i32
  }
  func.func @transform_2(%arg0: i32) -> (i32, i32) {
    %c0_i32 = arith.constant 0 : i32
    %c0_i32_0 = arith.constant 0 : i32
    %c0_i32_1 = arith.constant 0 : i32
    return %c0_i32, %c0_i32_0 : i32, i32
  }
  func.func @transform_3(%arg0: i32) -> (i32, i32) {
    %c0_i32 = arith.constant 0 : i32
    %c0_i32_0 = arith.constant 0 : i32
    %c0_i32_1 = arith.constant 0 : i32
    return %c0_i32, %c0_i32_0 : i32, i32
  }
  func.func @transform_4(%arg0: i32) -> (i32, i32) {
    %c0_i32 = arith.constant 0 : i32
    %c0_i32_0 = arith.constant 0 : i32
    %c0_i32_1 = arith.constant 0 : i32
    return %c0_i32, %c0_i32_0 : i32, i32
  }
  func.func @transform_5(%arg0: i32) -> (i32, i32) {
    %c0_i32 = arith.constant 0 : i32
    %c0_i32_0 = arith.constant 0 : i32
    %c0_i32_1 = arith.constant 0 : i32
    return %c0_i32, %c0_i32_0 : i32, i32
  }
  func.func @transform_6(%arg0: i32) -> (i32, i32) {
    %c0_i32 = arith.constant 0 : i32
    %c0_i32_0 = arith.constant 0 : i32
    %c0_i32_1 = arith.constant 0 : i32
    return %c0_i32, %c0_i32_0 : i32, i32
  }
  func.func @transform_7(%arg0: i32) -> (i32, i32) {
    %c0_i32 = arith.constant 0 : i32
    %c0_i32_0 = arith.constant 0 : i32
    %c0_i32_1 = arith.constant 0 : i32
    return %c0_i32, %c0_i32_0 : i32, i32
  }
  func.func @transform_8(%arg0: i32) -> (i32, i32) {
    %c0_i32 = arith.constant 0 : i32
    %c0_i32_0 = arith.constant 0 : i32
    %c0_i32_1 = arith.constant 0 : i32
    return %c0_i32, %c0_i32_0 : i32, i32
  }
  func.func @transform_9(%arg0: i32) -> (i32, i32) {
    %c0_i32 = arith.constant 0 : i32
    %c0_i32_0 = arith.constant 0 : i32
    %c0_i32_1 = arith.constant 0 : i32
    return %c0_i32, %c0_i32_0 : i32, i32
  }
  func.func @transform_10(%arg0: i32) -> (i32, i32) {
    %c0_i32 = arith.constant 0 : i32
    %c0_i32_0 = arith.constant 0 : i32
    %c0_i32_1 = arith.constant 0 : i32
    return %c0_i32, %c0_i32_0 : i32, i32
  }
  func.func @transform_11(%arg0: i32) -> (i32, i32, i32) {
    %c0_i32 = arith.constant 0 : i32
    %c0_i32_0 = arith.constant 0 : i32
    %c0_i32_1 = arith.constant 0 : i32
    return %arg0, %c0_i32, %c0_i32_0 : i32, i32, i32
  }
  func.func @transform_12(%arg0: i32) -> (i32, i32, i32) {
    %c0_i32 = arith.constant 0 : i32
    %c0_i32_0 = arith.constant 0 : i32
    %c0_i32_1 = arith.constant 0 : i32
    return %arg0, %c0_i32, %c0_i32_0 : i32, i32, i32
  }
}

</mosaic_0001>

<bundles_post_ra>
// kernel: tpu_custom_call.1
= control target key start
LH: loop header
LB: loop body
LE: loop exit
PB: predicated region body
PF: predicated region fallthrough
CT: control target
= control target key end

     0   :  { %s10433_s0 = inlined_call_operand.vmem [shape: f32[2,16,256], index: 0, kind: input, shape index: {}]   ;;  %s10434_s1 = inlined_call_operand.vmem [shape: f32[2,1,256], index: 1, kind: input, shape index: {}]   ;;  %s10435_s2 = inlined_call_operand.vmem [shape: f32[16,16], index: 2, kind: input, shape index: {}]   ;;  %s10436_s3 = inlined_call_operand.vmem [shape: f32[16,1], index: 3, kind: input, shape index: {}]   ;;  %s10437_s4 = inlined_call_operand.<no memory space> [shape: f32[1,1], index: 4, kind: input, shape index: {}]   ;;  %s10438_s5 = inlined_call_operand.vmem [shape: bf16[512,24], index: 5, kind: input, shape index: {}]   ;;  %s10439_s6 = inlined_call_operand.vmem [shape: f32[512,1], index: 6, kind: input, shape index: {}]   ;;  %s10440_s7 = inlined_call_operand.vmem [shape: bf16[512,512], index: 7, kind: input, shape index: {}]   ;;  %s10441_s8 = inlined_call_operand.vmem [shape: f32[512,1], index: 8, kind: input, shape index: {}]   ;;  %s10442_s9 = inlined_call_operand.vmem [shape: bf16[48,512], index: 9, kind: input, shape index: {}]   ;;  %s10443_s10 = inlined_call_operand.vmem [shape: f32[16,1], index: 10, kind: input, shape index: {}]   ;;  %s10444_s11 = inlined_call_operand.hbm [shape: f32[2,16,256], index: 11, kind: output, shape index: {0}]   ;;  %s10445_s12 = inlined_call_operand.vmem [shape: f32[2,1,1], index: 12, kind: output, shape index: {1}]  }
   0x1   :  { %10683 = sst [smem:[#allocation180_spill]] %s10433_s0 }
   0x2   :  { %10684 = sst [smem:[#allocation181_spill]] %s10434_s1 }
   0x3   :  { %10685 = sst [smem:[#allocation182_spill]] %s10435_s2 }
   0x4   :  { %10686 = sst [smem:[#allocation183_spill]] %s10436_s3 }
   0x5   :  { %10687 = sst [smem:[#allocation184_spill]] %s10438_s5 }
   0x6   :  { %18 = sst [smem:[#allocation2]] %s10437_s4 }
   0x7   :  { %19 = vsyncpa [#allocation4], 0 }
   0x8   :  { %21 = vsyncpa [#allocation4 + $0x1], 0  ;;  %s6420_s23 = smov 0   ;;  %s6422_s24 = smov 0  }
   0x9   :  { %s6424_s25 = smov 0   ;;  %s6426_s26 = smov 0  }
   0xa LB: > { %s6441_s4 = sadd.s32 4294967295, %s6344_s26   ;;  %s5269_s27 = sadd.s32 4294967294, %s6344_s26   ;;  %s6344_s26 = sphi %s6426_s26, %s11291_s26   ;;  %s6340_s25 = sphi %s6424_s25, %s11290_s25   ;;  %s6336_s24 = sphi %s6422_s24, %s11289_s24   ;;  %s6332_s23 = sphi %s6420_s23, %s11288_s23  }
   0xb   : > { %s6445_s28 = sadd.s32 1, %s6344_s26   ;;  %s275_s29 = sadd.s32 1, %s6340_s25 }
   0xc   : > { %s272_s30 = ssub.s32 %s6344_s26, %s6445_s28  ;;  %p285_p0 = scmp.ne.s32.totalorder %s6340_s25, %s6336_s24 }
   0xd   : > { %p273_p1 = scmp.eq.s32.totalorder %s272_s30, 0  ;;  %p286_p2 = scmp.eq.s32.totalorder %s6441_s4, 1 }
   0xe   : > { %p291_p3 = scmp.ne.s32.totalorder %s6336_s24, %s6332_s23  ;;  %p292_p4 = scmp.eq.s32.totalorder %s5269_s27, 1 }
   0xf   : > { %s6456_s13 = scalar_select %p273_p1, %s6340_s25, %s275_s29  }
  0x10   : > { %p6458_p5 = por %p286_p2, %p285_p0  ;;  %p6462_p6 = por %p292_p4, %p291_p3 }
  0x11   : > { %p5272_p7 = scmp.ge.s32.totalorder %s6344_s26, 1  ;;  %p378_p8 = scmp.lt.s32.totalorder %s6344_s26, 3 }
  0x13   : > { %p379_p9 = pnand %p5272_p7, %p378_p8 }
  0x15   : > { %382 = sbr.rel (%p379_p9) target bundleno = 2518 (0x9d6), region = 64 }
  0x1a   : > { %p427_p10 = scmp.lt.s32.totalorder %s6441_s4, 1  ;;  %s10690_s3 = sld [smem:[#allocation183_spill]]  ;;  %v6346_v1 = vmov 0   ;;  %vm459_vm0 = vcmask 130048   ;;  %v668_v20 = vld [vmem:[%s10439_s6 + $0x170] sm:$0xff]  ;;  %v669_v21 = vld [vmem:[%s10439_s6 + $0x178] sm:$0xff]  ;;  %v521_v57 = vlaneseq }
  0x1b   : > { %6267 = vset.pattern.permute.xlu0 %v6346_v1  ;;  %6269 = vset.pattern.permute.xlu1 %v6346_v1  ;;  %s10691_s0 = sld [smem:[#allocation180_spill]]  ;;  %s10449_s30 = smov 1   ;;  %v636_v22 = vld [vmem:[%s10439_s6 + $0x70] sm:$0xff]  ;;  %v637_v23 = vld [vmem:[%s10439_s6 + $0x78] sm:$0xff]  ;;  %v666_v28 = vld [vmem:[%s10439_s6 + $0x160] sm:$0xff]  ;;  %vm1263_vm3 = vcmask 1043456  }
  0x1c   : > { %s6473_s18 = scalar_select %p427_p10, %s6441_s4, 1  ;;  %6268 = vset.pattern.permute.xlu2 %v6346_v1  ;;  %v684_v24 = vld [vmem:[%s10439_s6 + $0x1f0] sm:$0xff]  ;;  %v685_v25 = vld [vmem:[%s10439_s6 + $0x1f8] sm:$0xff]  ;;  %v667_v29 = vld [vmem:[%s10439_s6 + $0x168] sm:$0xff]  ;;  %v6636_v61 = vand.u32 127, %v521_v57  ;;  %vm1166_vm6 = vcmask 195584  }
  0x1d   : > { %s10692_s2 = sld [smem:[#allocation182_spill]]  ;;  %s10447_s16 = smov 127   ;;  %v652_v26 = vld [vmem:[%s10439_s6 + $0xf0] sm:$0xff]  ;;  %v653_v27 = vld [vmem:[%s10439_s6 + $0xf8] sm:$0xff]  ;;  %v634_v30 = vld [vmem:[%s10439_s6 + $0x60] sm:$0xff]  ;;  %vm5120_vm7 = vcmask 1040384  }
  0x1e   : > { %s6040_s19 = sshll.u32 %s6473_s18, 5  ;;  %s5276_s17 = sshll.u32 %s6473_s18, 1  ;;  %v635_v31 = vld [vmem:[%s10439_s6 + $0x68] sm:$0xff]  ;;  %v682_v32 = vld [vmem:[%s10439_s6 + $0x1e0] sm:$0xff]  ;;  %v664_v36 = vld [vmem:[%s10439_s6 + $0x150] sm:$0xff]  ;;  %10699 = vst [vmem:[#allocation11_spill] sm:$0xff] %v6636_v61 }
  0x1f   : > { %s10695_s1 = sld [smem:[#allocation181_spill]]  ;;  %v683_v33 = vld [vmem:[%s10439_s6 + $0x1e8] sm:$0xff]  ;;  %v650_v34 = vld [vmem:[%s10439_s6 + $0xe0] sm:$0xff]  ;;  %v665_v37 = vld [vmem:[%s10439_s6 + $0x158] sm:$0xff]  ;;  %v523_v63 = vadd.s32 128, %v6636_v61  ;;  %vm549_vm2 = vcmp.lt.s32.totalorder %v6636_v61, 127 }
  0x20   : > { %v448_v0 = vld [vmem:[%s10690_s3 + $0x8] sm:$0xff]  ;;  %v632_v38 = vld [vmem:[%s10439_s6 + $0x50] sm:$0xff]  ;;  %v633_v39 = vld [vmem:[%s10439_s6 + $0x58] sm:$0xff]  ;;  %vm524_vm4 = vcmp.gt.s32.totalorder %v6636_v61, 0  ;;  %vm540_vm5 = vcmp.lt.s32.totalorder %v6636_v61, 1  ;;  %s10704_s5 = sld [smem:[#allocation184_spill]] }
  0x21   : > { %456 = vperm.xlu0 %6267, %v448_v0   ;;  %s431_s22 = scalar_lea.vmem %s10691_s0, %s6040_s19  ;;  %v651_v35 = vld [vmem:[%s10439_s6 + $0xe8] sm:$0xff]  ;;  %v680_v40 = vld [vmem:[%s10439_s6 + $0x1d0] sm:$0xff]  ;;  %v681_v41 = vld [vmem:[%s10439_s6 + $0x1d8] sm:$0xff]  ;;  %vm531_vm1 = vcmp.lt.s32.totalorder %v523_v63, 255  ;;  %s11272_s19 = smov 1  }
  0x22   : > { %v442_v2 = vld [vmem:[%s431_s22 + $0x10] sm:$0xff]  ;;  %v443_v3 = vld [vmem:[%s431_s22 + $0x18] sm:$0xff]  ;;  %v440_v4 = vld [vmem:[%s431_s22] sm:$0xff]  ;;  %s11279_s20 = smov 127  }
  0x23   : > { %480 = vmatpush.msra.mxu0 %v442_v2  ;;  %503 = vmatpush.msra.mxu1 %v443_v3  ;;  %v441_v5 = vld [vmem:[%s431_s22 + $0x8] sm:$0xff]  ;;  %v445_v6 = vld [vmem:[%s10692_s2] sm:$0xff]  ;;  %s10446_s22 = sand.u32 1, %s6336_s24   ;;  %v648_v42 = vld [vmem:[%s10439_s6 + $0xd0] sm:$0xff] }
  0x24   : > { %v446_v7 = vld [vmem:[%s10692_s2 + $0x8] sm:$0xff]  ;;  %s5273_s27 = sshll.u32 %s10446_s22, 5  ;;  %v649_v43 = vld [vmem:[%s10439_s6 + $0xd8] sm:$0xff]  ;;  %v662_v44 = vld [vmem:[%s10439_s6 + $0x140] sm:$0xff]  ;;  %s11287_s22 = sand.u32 1, %s6336_s24  }
  0x25   : > { %481 = vmatpush.msra.mxu0 %v440_v4  ;;  %504 = vmatpush.msra.mxu1 %v441_v5  ;;  %s435_s21 = scalar_lea.vmem %s10695_s1, %s5276_s17  ;;  %s6506_s29 = scalar_lea.vmem [#allocation3], %s5273_s27  ;;  %v663_v45 = vld [vmem:[%s10439_s6 + $0x148] sm:$0xff]  ;;  %v630_v46 = vld [vmem:[%s10439_s6 + $0x40] sm:$0xff]  ;;  %v660_v53 = vld [vmem:[%s10439_s6 + $0x130] sm:$0xff]  ;;  %v6349_v4 = vmov 0.0  }
  0x26   : > { %5277 = vmatmul.msk.f32.vlgmr.msra.gmra.mxu0 %vm459_vm0, %v445_v6  ;;  %5279 = vmatmul.msk.f32.vlgmr.msra.gmra.mxu1 %vm459_vm0, %v445_v6  ;;  %v444_v10 = vld [vmem:[%s435_s21] sm:$0x3]  ;;  %v631_v47 = vld [vmem:[%s10439_s6 + $0x48] sm:$0xff]  ;;  %v661_v54 = vld [vmem:[%s10439_s6 + $0x138] sm:$0xff]  ;;  %v6651_v5 = vsel %vm531_vm1, 1.0, %v6349_v4  ;;  %s5155_s27 = scalar_lea.sflag [#allocation4], %s11287_s22 }
  0x27   : > { %v6496_v12 = vperm.slane %v444_v10, 0  ;;  %v6498_v13 = vperm.slane %v444_v10, 1  ;;  %v678_v48 = vld [vmem:[%s10439_s6 + $0x1c0] sm:$0xff]  ;;  %v679_v49 = vld [vmem:[%s10439_s6 + $0x1c8] sm:$0xff]  ;;  %v628_v55 = vld [vmem:[%s10439_s6 + $0x30] sm:$0xff]  ;;  %10700 = vst [vmem:[#allocation12_spill] sm:$0xff] %v6651_v5 }
  0x28   : > { %v646_v50 = vld [vmem:[%s10439_s6 + $0xc0] sm:$0xff]  ;;  %v647_v51 = vld [vmem:[%s10439_s6 + $0xc8] sm:$0xff]  ;;  %v629_v58 = vld [vmem:[%s10439_s6 + $0x38] sm:$0xff] }
  0x29   : > { %10696 = vst [vmem:[#allocation8_spill] sm:$0xff] %v6496_v12  ;;  %v676_v59 = vld [vmem:[%s10439_s6 + $0x1b0] sm:$0xff]  ;;  %v677_v60 = vld [vmem:[%s10439_s6 + $0x1b8] sm:$0xff]  ;;  %v658_v2 = vld [vmem:[%s10439_s6 + $0x120] sm:$0xff] }
  0x2a   : > { %10697 = vst [vmem:[#allocation9_spill] sm:$0xff] %v6498_v13  ;;  %v644_v0 = vld [vmem:[%s10439_s6 + $0xb0] sm:$0xff]  ;;  %v645_v1 = vld [vmem:[%s10439_s6 + $0xb8] sm:$0xff]  ;;  %v622_v63 = vld [vmem:[%s10439_s6] sm:$0xff] }
  0x2e   : > { %5278 = vmatmul.msk.f32.gmra.mxu0 %vm459_vm0, %v446_v7  ;;  %5280 = vmatmul.msk.f32.gmra.mxu1 %vm459_vm0, %v446_v7 }
  0x93   : > { %v457_v11 = vpop.permute.xlu0 %456 }
  0xa3   : > { %v6486_v8 = vpop.f32.mrf.mxu0  ;;  %v6488_v9 = vpop.f32.mrf.mxu1 }
  0xa4   : > { %10693 = vst [vmem:[#allocation6_spill] sm:$0xff] %v6486_v8 }
  0xa5   : > { %10694 = vst [vmem:[#allocation7_spill] sm:$0xff] %v6488_v9 }
  0xab   : > { %v486_v14 = vpop.f32.mrf.mxu0  ;;  %v509_v15 = vpop.f32.mrf.mxu1 }
  0xac   : > { %v487_v16 = vadd.f32 %v486_v14, %v457_v11  ;;  %v510_v17 = vadd.f32 %v509_v15, %v457_v11 }
  0xae   : > { %v6501_v18 = vmul.f32 %v6496_v12, %v487_v16  ;;  %v6504_v19 = vmul.f32 %v6498_v13, %v510_v17  ;;  %v659_v16 = vld [vmem:[%s10439_s6 + $0x128] sm:$0xff] }
  0xaf   : > { %v627_v17 = vld [vmem:[%s10439_s6 + $0x28] sm:$0xff] }
  0xb0   : > { %5118 = vst [vmem:[%s6506_s29 + $0x10] sm:$0xff] %v6501_v18  ;;  %538 = vrot.lane.b32.xlu2 %v6504_v19, %s10449_s30  ;;  %547 = vrot.lane.b32.xlu1 %v6504_v19, %s10447_s16 }
  0xb1   : > { %5119 = vst [vmem:[%s6506_s29 + $0x18] sm:$0xff] %v6504_v19  ;;  %545 = vrot.lane.b32.xlu0 %v6501_v18, %s10447_s16  ;;  %s6213_s16 = sshll.u32 %s6441_s4, 5  ;;  %s6302_s4 = scalar_lea.hbm %s10444_s11, 64 }
  0xb8   : > { %536 = vrot.lane.b32.xlu1 %v6501_v18, %s10449_s30  ;;  %918 = vperm.xlu2 %6268, %v668_v20   ;;  %s5170_s30 = sshll.u32 %s6506_s29, 4  ;;  %s5171_s30 = int_to_ptr.vmem [resolvable:$true] %s5170_s30 }
  0xb9   : > { %923 = vperm.xlu0 %6267, %v669_v21  }
  0xc0   : > { %758 = vperm.xlu1 %6269, %v636_v22   ;;  %763 = vperm.xlu2 %6268, %v637_v23   ;;  %v626_v22 = vld [vmem:[%s10439_s6 + $0x20] sm:$0xff] }
  0xc1   : > { %998 = vperm.xlu0 %6267, %v684_v24   ;;  %v6671_v24 = vsel %vm524_vm4, 1.0, %v6349_v4 }
  0xc2   : > { %10701 = vst [vmem:[#allocation13_spill] sm:$0xff] %v6671_v24 }
  0xc8   : > { %1003 = vperm.xlu1 %6269, %v685_v25   ;;  %838 = vperm.xlu2 %6268, %v652_v26  }
  0xc9   : > { %843 = vperm.xlu0 %6267, %v653_v27  }
  0xd0   : > { %908 = vperm.xlu1 %6269, %v666_v28   ;;  %913 = vperm.xlu2 %6268, %v667_v29  }
  0xd1   : > { %748 = vperm.xlu0 %6267, %v634_v30  }
  0xd8   : > { %753 = vperm.xlu1 %6269, %v635_v31   ;;  %988 = vperm.xlu2 %6268, %v682_v32   ;;  %v674_v32 = vld [vmem:[%s10439_s6 + $0x1a0] sm:$0xff] }
  0xd9   : > { %993 = vperm.xlu0 %6267, %v683_v33   ;;  %v642_v33 = vld [vmem:[%s10439_s6 + $0xa0] sm:$0xff] }
  0xe0   : > { %828 = vperm.xlu1 %6269, %v650_v34   ;;  %833 = vperm.xlu2 %6268, %v651_v35   ;;  %v6041_v35 = vld [vmem:[%s10704_s5] sm:$0xff] }
  0xe1   : > { %898 = vperm.xlu0 %6267, %v664_v36   ;;  %v675_v36 = vld [vmem:[%s10439_s6 + $0x1a8] sm:$0xff] }
  0xe8   : > { %903 = vperm.xlu1 %6269, %v665_v37   ;;  %738 = vperm.xlu2 %6268, %v632_v38  }
  0xe9   : > { %743 = vperm.xlu0 %6267, %v633_v39   ;;  %v643_v39 = vld [vmem:[%s10439_s6 + $0xa8] sm:$0xff] }
  0xf0   : > { %978 = vperm.xlu1 %6269, %v680_v40   ;;  %983 = vperm.xlu2 %6268, %v681_v41   ;;  %v657_v40 = vld [vmem:[%s10439_s6 + $0x118] sm:$0xff]  ;;  %v656_v41 = vld [vmem:[%s10439_s6 + $0x110] sm:$0xff] }
  0xf1   : > { %818 = vperm.xlu0 %6267, %v648_v42  }
  0xf8   : > { %823 = vperm.xlu1 %6269, %v649_v43   ;;  %888 = vperm.xlu2 %6268, %v662_v44  }
  0xf9   : > { %893 = vperm.xlu0 %6267, %v663_v45   ;;  %v624_v45 = vld [vmem:[%s10439_s6 + $0x10] sm:$0xff] }
 0x100   : > { %728 = vperm.xlu1 %6269, %v630_v46   ;;  %733 = vperm.xlu2 %6268, %v631_v47   ;;  %v672_v46 = vld [vmem:[%s10439_s6 + $0x190] sm:$0xff]  ;;  %v6042_v47 = vld [vmem:[%s10704_s5 + $0x8] sm:$0xff] }
 0x101   : > { %968 = vperm.xlu0 %6267, %v678_v48   ;;  %v6051_v48 = vld [vmem:[%s10704_s5 + $0x50] sm:$0xff] }
 0x108   : > { %973 = vperm.xlu1 %6269, %v679_v49   ;;  %808 = vperm.xlu2 %6268, %v646_v50   ;;  %v625_v49 = vld [vmem:[%s10439_s6 + $0x18] sm:$0xff] }
 0x109   : > { %813 = vperm.xlu0 %6267, %v647_v51  }
 0x10a   : > { %v539_v52 = vpop.permute.xlu2 %538 }
 0x110   : > { %878 = vperm.xlu1 %6269, %v660_v53   ;;  %883 = vperm.xlu2 %6268, %v661_v54   ;;  %v673_v53 = vld [vmem:[%s10439_s6 + $0x198] sm:$0xff] }
 0x111   : > { %718 = vperm.xlu0 %6267, %v628_v55   ;;  %v641_v54 = vld [vmem:[%s10439_s6 + $0x98] sm:$0xff]  ;;  %v640_v55 = vld [vmem:[%s10439_s6 + $0x90] sm:$0xff] }
 0x112   : > { %v6625_v56 = vpop.permute.xlu2 %918 }
 0x113   : > { %10698 = vst [vmem:[#allocation10_spill] sm:$0xff] %v6625_v56 }
 0x118   : > { %723 = vperm.xlu1 %6269, %v629_v58   ;;  %958 = vperm.xlu2 %6268, %v676_v59  }
 0x119   : > { %963 = vperm.xlu0 %6267, %v677_v60   ;;  %v654_v60 = vld [vmem:[%s10439_s6 + $0x100] sm:$0xff] }
 0x11a   : > { %v6638_v62 = vpop.permute.xlu2 %763 }
 0x120   : > { %798 = vperm.xlu1 %6269, %v644_v0   ;;  %803 = vperm.xlu2 %6268, %v645_v1   ;;  %v6043_v0 = vld [vmem:[%s10704_s5 + $0x10] sm:$0xff]  ;;  %v6052_v1 = vld [vmem:[%s10704_s5 + $0x58] sm:$0xff] }
 0x121   : > { %868 = vperm.xlu0 %6267, %v658_v2  }
 0x122   : > { %v548_v3 = vpop.permute.xlu1 %547  ;;  %v6653_v6 = vpop.permute.xlu2 %838 }
 0x123   : > { %v546_v7 = vpop.permute.xlu0 %545 }
 0x124   : > { %v550_v10 = vsel %vm549_vm2, %v546_v7, %v548_v3  ;;  %v551_v11 = vsel %vm549_vm2, %v548_v3, %v546_v7  ;;  %v623_v7 = vld [vmem:[%s10439_s6 + $0x8] sm:$0xff] }
 0x125   : > { %v553_v14 = vmul.f32 %v6651_v5, %v551_v11  ;;  %v556_v15 = vpack.c.bf16 %v550_v10, %v550_v10  ;;  %v671_v10 = vld [vmem:[%s10439_s6 + $0x188] sm:$0xff] }
 0x127   : > { %v1265_v20 = vsel %vm1263_vm3, %v556_v15, 0  ;;  %v557_v21 = vpack.c.bf16 %v553_v14, %v553_v14 }
 0x128   : > { %1276 = vmatpush.bf16.msrb.mxu0 %v1265_v20  ;;  %6214 = vmatpush.bf16.msra.mxu2 %v1265_v20  ;;  %v6053_v20 = vld [vmem:[%s10704_s5 + $0x60] sm:$0xff] }
 0x129   : > { %873 = vperm.xlu1 %6269, %v659_v16   ;;  %713 = vperm.xlu0 %6267, %v627_v17   ;;  %v1268_v23 = vsel %vm1263_vm3, %v557_v21, 0  ;;  %v2070_v16 = vld [vmem:[%s10441_s8 + $0x70] sm:$0xff]  ;;  %v6044_v17 = vld [vmem:[%s10704_s5 + $0x18] sm:$0xff] }
 0x12a   : > { %1445 = vmatpush.bf16.msrb.mxu1 %v1268_v23  ;;  %6216 = vmatpush.bf16.msra.mxu3 %v1268_v23  ;;  %v537_v25 = vpop.permute.xlu1 %536  ;;  %v6673_v26 = vpop.permute.xlu2 %913  ;;  %v655_v23 = vld [vmem:[%s10439_s6 + $0x108] sm:$0xff] }
 0x12b   : > { %10702 = vst [vmem:[#allocation14_spill] sm:$0xff] %v6673_v26  ;;  %v541_v27 = vsel %vm540_vm5, %v537_v25, %v539_v52  ;;  %v542_v28 = vsel %vm540_vm5, %v539_v52, %v537_v25  ;;  %v6679_v29 = vpop.permute.xlu0 %923  ;;  %708 = vperm.xlu2 %6268, %v626_v22   ;;  %v638_v22 = vld [vmem:[%s10439_s6 + $0x80] sm:$0xff] }
 0x12c   : > { %10703 = vst [vmem:[#allocation15_spill] sm:$0xff] %v6679_v29  ;;  %v543_v30 = vmul.f32 %v6671_v24, %v542_v28  ;;  %v555_v31 = vpack.c.bf16 %v6504_v19, %v541_v27  ;;  %v6050_v19 = vld [vmem:[%s10704_s5 + $0x48] sm:$0xff]  ;;  %v2087_v27 = vld [vmem:[%s10441_s8 + $0xf8] sm:$0xff] }
 0x12d   : > { %v2103_v24 = vld [vmem:[%s10441_s8 + $0x178] sm:$0xff] }
 0x12e   : > { %1446 = vmatpush.bf16.msrb.mxu1 %v555_v31  ;;  %6217 = vmatpush.bf16.msra.mxu3 %v555_v31  ;;  %v554_v34 = vpack.c.bf16 %v6501_v18, %v543_v30  ;;  %v670_v31 = vld [vmem:[%s10439_s6 + $0x180] sm:$0xff]  ;;  %v2111_v29 = vld [vmem:[%s10441_s8 + $0x1b8] sm:$0xff] }
 0x130   : > { %1277 = vmatpush.bf16.msrb.mxu0 %v554_v34  ;;  %6215 = vmatpush.bf16.msra.mxu2 %v554_v34  ;;  %v2084_v34 = vld [vmem:[%s10441_s8 + $0xe0] sm:$0xff] }
 0x131   : > { %948 = vperm.xlu1 %6269, %v674_v32   ;;  %788 = vperm.xlu0 %6267, %v642_v33   ;;  %v2071_v32 = vld [vmem:[%s10441_s8 + $0x78] sm:$0xff] }
 0x132   : > { %5443 = vmatmul.msk.bf16.vlgmr.msrb.gmra.mxu1 %vm1166_vm6, %v6041_v35  ;;  %5452 = vmatmul.msk.bf16.vlgmr.msra.gmra.mxu3 %vm1166_vm6, %v6050_v19  ;;  %v6701_v18 = vpop.permute.xlu1 %758  ;;  %v6703_v37 = vpop.permute.xlu2 %988 }
 0x133   : > { %10705 = vst [vmem:[#allocation16_spill] sm:$0xff] %v6703_v37  ;;  %v6705_v38 = vpop.permute.xlu0 %998  ;;  %5411 = vmatmul.msk.bf16.vlgmr.msrb.gmra.mxu0 %vm1166_vm6, %v6041_v35  ;;  %5420 = vmatmul.msk.bf16.vlgmr.msra.gmra.mxu2 %vm1166_vm6, %v6050_v19  ;;  %v6045_v35 = vld [vmem:[%s10704_s5 + $0x20] sm:$0xff]  ;;  %v6054_v19 = vld [vmem:[%s10704_s5 + $0x68] sm:$0xff]  ;;  %v2118_v37 = vld [vmem:[%s10441_s8 + $0x1f0] sm:$0xff] }
 0x134   : > { %10706 = vst [vmem:[#allocation17_spill] sm:$0xff] %v6705_v38  ;;  %953 = vperm.xlu2 %6268, %v675_v36  }
 0x139   : > { %793 = vperm.xlu1 %6269, %v643_v39   ;;  %863 = vperm.xlu0 %6267, %v657_v40   ;;  %v639_v40 = vld [vmem:[%s10439_s6 + $0x88] sm:$0xff] }
 0x13a   : > { %v6718_v42 = vpop.permute.xlu1 %1003  ;;  %v6720_v43 = vpop.permute.xlu2 %833 }
 0x13b   : > { %10707 = vst [vmem:[#allocation18_spill] sm:$0xff] %v6718_v42  ;;  %v6722_v44 = vpop.permute.xlu0 %843 }
 0x13c   : > { %10708 = vst [vmem:[#allocation19_spill] sm:$0xff] %v6720_v43  ;;  %858 = vperm.xlu2 %6268, %v656_v41   ;;  %v2068_v41 = vld [vmem:[%s10441_s8 + $0x60] sm:$0xff] }
 0x141   : > { %698 = vperm.xlu1 %6269, %v624_v45   ;;  %938 = vperm.xlu0 %6267, %v672_v46   ;;  %v2067_v46 = vld [vmem:[%s10441_s8 + $0x58] sm:$0xff] }
 0x142   : > { %5444 = vmatmul.msk.bf16.gmra.mxu1 %vm1166_vm6, %v6042_v47  ;;  %5453 = vmatmul.msk.bf16.gmra.mxu3 %vm1166_vm6, %v6051_v48  ;;  %v6741_v50 = vpop.permute.xlu1 %908  ;;  %v6743_v51 = vpop.permute.xlu2 %738 }
 0x143   : > { %10709 = vst [vmem:[#allocation20_spill] sm:$0xff] %v6741_v50  ;;  %v6745_v52 = vpop.permute.xlu0 %748  ;;  %5412 = vmatmul.msk.bf16.gmra.mxu0 %vm1166_vm6, %v6042_v47  ;;  %5421 = vmatmul.msk.bf16.gmra.mxu2 %vm1166_vm6, %v6051_v48  ;;  %v2085_v48 = vld [vmem:[%s10441_s8 + $0xe8] sm:$0xff] }
 0x144   : > { %10710 = vst [vmem:[#allocation21_spill] sm:$0xff] %v6743_v51  ;;  %703 = vperm.xlu2 %6268, %v625_v49   ;;  %v2086_v49 = vld [vmem:[%s10441_s8 + $0xf0] sm:$0xff] }
 0x149   : > { %943 = vperm.xlu1 %6269, %v673_v53   ;;  %783 = vperm.xlu0 %6267, %v641_v54  }
 0x14a   : > { %v6758_v57 = vpop.permute.xlu1 %753  ;;  %v6760_v58 = vpop.permute.xlu2 %983 }
 0x14b   : > { %10711 = vst [vmem:[#allocation22_spill] sm:$0xff] %v6760_v58  ;;  %v6762_v59 = vpop.permute.xlu0 %993 }
 0x14c   : > { %10712 = vst [vmem:[#allocation23_spill] sm:$0xff] %v6762_v59  ;;  %778 = vperm.xlu2 %6268, %v640_v55   ;;  %v2064_v55 = vld [vmem:[%s10441_s8 + $0x40] sm:$0xff] }
 0x151   : > { %848 = vperm.xlu1 %6269, %v654_v60   ;;  %688 = vperm.xlu0 %6267, %v622_v63   ;;  %v6046_v60 = vld [vmem:[%s10704_s5 + $0x28] sm:$0xff]  ;;  %v6055_v63 = vld [vmem:[%s10704_s5 + $0x70] sm:$0xff] }
 0x152   : > { %5445 = vmatmul.msk.bf16.gmra.mxu1 %vm1166_vm6, %v6043_v0  ;;  %5454 = vmatmul.msk.bf16.gmra.mxu3 %vm1166_vm6, %v6052_v1  ;;  %v6778_v2 = vpop.permute.xlu1 %828  ;;  %v6784_v4 = vpop.permute.xlu2 %888 }
 0x153   : > { %10713 = vst [vmem:[#allocation24_spill] sm:$0xff] %v6778_v2  ;;  %v6780_v3 = vpop.permute.xlu0 %898  ;;  %5413 = vmatmul.msk.bf16.gmra.mxu0 %vm1166_vm6, %v6043_v0  ;;  %5422 = vmatmul.msk.bf16.gmra.mxu2 %vm1166_vm6, %v6052_v1  ;;  %v2082_v0 = vld [vmem:[%s10441_s8 + $0xd0] sm:$0xff]  ;;  %v2069_v1 = vld [vmem:[%s10441_s8 + $0x68] sm:$0xff] }
 0x154   : > { %10714 = vst [vmem:[#allocation25_spill] sm:$0xff] %v6780_v3  ;;  %853 = vperm.xlu2 %6268, %v655_v23  }
 0x155   : > { %10715 = vst [vmem:[#allocation26_spill] sm:$0xff] %v6784_v4 }
 0x159   : > { %693 = vperm.xlu1 %6269, %v623_v7   ;;  %933 = vperm.xlu0 %6267, %v671_v10  }
 0x15a   : > { %v6792_v11 = vpop.permute.xlu1 %903  ;;  %v6796_v15 = vpop.permute.xlu2 %733 }
 0x15b   : > { %10716 = vst [vmem:[#allocation27_spill] sm:$0xff] %v6792_v11  ;;  %v6794_v14 = vpop.permute.xlu0 %743 }
 0x15c   : > { %10717 = vst [vmem:[#allocation28_spill] sm:$0xff] %v6794_v14  ;;  %928 = vperm.xlu2 %6268, %v670_v31   ;;  %v2078_v31 = vld [vmem:[%s10441_s8 + $0xb0] sm:$0xff] }
 0x161   : > { %2192 = vperm.xlu0 %6267, %v2070_v16   ;;  %768 = vperm.xlu1 %6269, %v638_v22   ;;  %v2066_v22 = vld [vmem:[%s10441_s8 + $0x50] sm:$0xff] }
 0x162   : > { %5446 = vmatmul.msk.bf16.gmra.mxu1 %vm1166_vm6, %v6044_v17  ;;  %5455 = vmatmul.msk.bf16.gmra.mxu3 %vm1166_vm6, %v6053_v20  ;;  %v6809_v21 = vpop.permute.xlu1 %978  ;;  %v6824_v28 = vpop.permute.xlu2 %808 }
 0x163   : > { %10718 = vst [vmem:[#allocation29_spill] sm:$0xff] %v6809_v21  ;;  %v6817_v25 = vpop.permute.xlu0 %818  ;;  %5414 = vmatmul.msk.bf16.gmra.mxu0 %vm1166_vm6, %v6044_v17  ;;  %5423 = vmatmul.msk.bf16.gmra.mxu2 %vm1166_vm6, %v6053_v20  ;;  %v2081_v17 = vld [vmem:[%s10441_s8 + $0xc8] sm:$0xff] }
 0x164   : > { %10719 = vst [vmem:[#allocation30_spill] sm:$0xff] %v6817_v25  ;;  %773 = vperm.xlu2 %6268, %v639_v40   ;;  %v2065_v20 = vld [vmem:[%s10441_s8 + $0x48] sm:$0xff]  ;;  %v2083_v40 = vld [vmem:[%s10441_s8 + $0xd8] sm:$0xff] }
 0x169   : > { %2277 = vperm.xlu0 %6267, %v2087_v27   ;;  %2197 = vperm.xlu1 %6269, %v2071_v32   ;;  %v6047_v32 = vld [vmem:[%s10704_s5 + $0x30] sm:$0xff] }
 0x16a   : > { %v6826_v30 = vpop.permute.xlu1 %823  ;;  %v6845_v36 = vpop.permute.xlu2 %883 }
 0x16b   : > { %10720 = vst [vmem:[#allocation31_spill] sm:$0xff] %v6826_v30  ;;  %v6834_v33 = vpop.permute.xlu0 %893 }
 0x16c   : > { %10721 = vst [vmem:[#allocation32_spill] sm:$0xff] %v6834_v33  ;;  %2272 = vperm.xlu2 %6268, %v2086_v49  }
 0x16d   : > { %10722 = vst [vmem:[#allocation33_spill] sm:$0xff] %v6845_v36  ;;  %v2088_v36 = vld [vmem:[%s10441_s8 + $0x100] sm:$0xff] }
 0x171   : > { %2262 = vperm.xlu0 %6267, %v2084_v34   ;;  %2182 = vperm.xlu1 %6269, %v2068_v41   ;;  %v6056_v34 = vld [vmem:[%s10704_s5 + $0x78] sm:$0xff] }
 0x172   : > { %5447 = vmatmul.msk.bf16.gmra.mxu1 %vm1166_vm6, %v6045_v35  ;;  %5456 = vmatmul.msk.bf16.gmra.mxu3 %vm1166_vm6, %v6054_v19  ;;  %v6849_v39 = vpop.permute.xlu1 %728  ;;  %v6874_v54 = vpop.permute.xlu2 %958 }
 0x173   : > { %v6857_v45 = vpop.permute.xlu0 %968  ;;  %5415 = vmatmul.msk.bf16.gmra.mxu0 %vm1166_vm6, %v6045_v35  ;;  %5424 = vmatmul.msk.bf16.gmra.mxu2 %vm1166_vm6, %v6054_v19  ;;  %10725 = vst [vmem:[#allocation36_spill] sm:$0xff] %v6874_v54  ;;  %v2062_v19 = vld [vmem:[%s10441_s8 + $0x30] sm:$0xff] }
 0x174   : > { %10723 = vst [vmem:[#allocation34_spill] sm:$0xff] %v6857_v45  ;;  %2187 = vperm.xlu2 %6268, %v2069_v1   ;;  %v6057_v1 = vld [vmem:[%s10704_s5 + $0x80] sm:$0xff] }
 0x179   : > { %2177 = vperm.xlu0 %6267, %v2067_v46   ;;  %2267 = vperm.xlu1 %6269, %v2085_v48   ;;  %v2061_v46 = vld [vmem:[%s10441_s8 + $0x28] sm:$0xff] }
 0x17a   : > { %v6864_v47 = vpop.permute.xlu1 %973  ;;  %v6899_v16 = vpop.permute.xlu2 %803 }
 0x17b   : > { %10724 = vst [vmem:[#allocation35_spill] sm:$0xff] %v6864_v47  ;;  %v6872_v53 = vpop.permute.xlu0 %813 }
 0x17c   : > { %2172 = vperm.xlu2 %6268, %v2066_v22   ;;  %v2076_v22 = vld [vmem:[%s10441_s8 + $0xa0] sm:$0xff] }
 0x181   : > { %2162 = vperm.xlu0 %6267, %v2064_v55   ;;  %2252 = vperm.xlu1 %6269, %v2082_v0   ;;  %v2079_v55 = vld [vmem:[%s10441_s8 + $0xb8] sm:$0xff]  ;;  %v2058_v0 = vld [vmem:[%s10441_s8 + $0x10] sm:$0xff] }
 0x182   : > { %5448 = vmatmul.msk.bf16.gmra.mxu1 %vm1166_vm6, %v6046_v60  ;;  %5457 = vmatmul.msk.bf16.gmra.mxu3 %vm1166_vm6, %v6055_v63  ;;  %v6893_v7 = vpop.permute.xlu1 %878 }
 0x183   : > { %10726 = vst [vmem:[#allocation37_spill] sm:$0xff] %v6893_v7  ;;  %v6895_v10 = vpop.permute.xlu0 %718  ;;  %5416 = vmatmul.msk.bf16.gmra.mxu0 %vm1166_vm6, %v6046_v60  ;;  %5425 = vmatmul.msk.bf16.gmra.mxu2 %vm1166_vm6, %v6055_v63  ;;  %v2080_v60 = vld [vmem:[%s10441_s8 + $0xc0] sm:$0xff] }
 0x184   : > { %2257 = vperm.xlu2 %6268, %v2083_v40   ;;  %v2059_v40 = vld [vmem:[%s10441_s8 + $0x18] sm:$0xff] }
 0x185   : > { %v6923_v35 = vpop.permute.xlu2 %708 }
 0x189   : > { %2247 = vperm.xlu0 %6267, %v2081_v17   ;;  %2167 = vperm.xlu1 %6269, %v2065_v20   ;;  %v6048_v17 = vld [vmem:[%s10704_s5 + $0x38] sm:$0xff] }
 0x18a   : > { %v6912_v27 = vpop.permute.xlu1 %723 }
 0x18b   : > { %v6910_v23 = vpop.permute.xlu0 %963 }
 0x18c   : > { %10727 = vst [vmem:[#allocation38_spill] sm:$0xff] %v6910_v23  ;;  %2242 = vperm.xlu2 %6268, %v2080_v60  }
 0x18e   : > { %v6942_v49 = vpop.permute.xlu2 %953 }
 0x18f   : > { %10729 = vst [vmem:[#allocation40_spill] sm:$0xff] %v6942_v49 }
 0x191   : > { %2232 = vperm.xlu0 %6267, %v2078_v31   ;;  %2152 = vperm.xlu1 %6269, %v2062_v19   ;;  %v2063_v31 = vld [vmem:[%s10441_s8 + $0x38] sm:$0xff] }
 0x192   : > { %5449 = vmatmul.msk.bf16.gmra.mxu1 %vm1166_vm6, %v6047_v32  ;;  %5458 = vmatmul.msk.bf16.gmra.mxu3 %vm1166_vm6, %v6056_v34  ;;  %v6940_v48 = vpop.permute.xlu1 %798  ;;  %v2075_v19 = vld [vmem:[%s10441_s8 + $0x98] sm:$0xff] }
 0x193   : > { %v6933_v41 = vpop.permute.xlu0 %868  ;;  %5417 = vmatmul.msk.bf16.gmra.mxu0 %vm1166_vm6, %v6047_v32  ;;  %5426 = vmatmul.msk.bf16.gmra.mxu2 %vm1166_vm6, %v6056_v34 }
 0x194   : > { %10728 = vst [vmem:[#allocation39_spill] sm:$0xff] %v6933_v41  ;;  %2157 = vperm.xlu2 %6268, %v2063_v31   ;;  %v6049_v31 = vld [vmem:[%s10704_s5 + $0x40] sm:$0xff]  ;;  %v2107_v41 = vld [vmem:[%s10441_s8 + $0x198] sm:$0xff] }
 0x196   : > { %v6975_v34 = vpop.permute.xlu2 %858 }
 0x197   : > { %10731 = vst [vmem:[#allocation42_spill] sm:$0xff] %v6975_v34 }
 0x199   : > { %2147 = vperm.xlu0 %6267, %v2061_v46   ;;  %2237 = vperm.xlu1 %6269, %v2079_v55   ;;  %v2060_v46 = vld [vmem:[%s10441_s8 + $0x20] sm:$0xff] }
 0x19b   : > { %v6950_v63 = vpop.permute.xlu0 %713  ;;  %v6961_v20 = vpop.permute.xlu1 %873 }
 0x19c   : > { %10730 = vst [vmem:[#allocation41_spill] sm:$0xff] %v6961_v20  ;;  %2142 = vperm.xlu2 %6268, %v2060_v46   ;;  %v2077_v46 = vld [vmem:[%s10441_s8 + $0xa8] sm:$0xff]  ;;  %v6064_v20 = vld [vmem:[%s10704_s5 + $0xb8] sm:$0xff] }
 0x1a1   : > { %2132 = vperm.xlu0 %6267, %v2058_v0   ;;  %2222 = vperm.xlu1 %6269, %v2076_v22   ;;  %v6990_v0 = vpop.permute.xlu2 %703 }
 0x1a2   : > { %5459 = vmatmul.msk.bf16.gmra.mxu3 %vm1166_vm6, %v6057_v1  ;;  %5450 = vmatmul.msk.bf16.gmra.mxu1 %vm1166_vm6, %v6048_v17 }
 0x1a3   : > { %v6971_v32 = vpop.permute.xlu0 %788  ;;  %5418 = vmatmul.msk.bf16.gmra.mxu0 %vm1166_vm6, %v6048_v17  ;;  %5427 = vmatmul.msk.bf16.gmra.mxu2 %vm1166_vm6, %v6057_v1  ;;  %v6986_v55 = vpop.permute.xlu1 %948  ;;  %v2072_v1 = vld [vmem:[%s10441_s8 + $0x80] sm:$0xff]  ;;  %v6058_v17 = vld [vmem:[%s10704_s5 + $0x88] sm:$0xff] }
 0x1a4   : > { %10732 = vst [vmem:[#allocation43_spill] sm:$0xff] %v6986_v55  ;;  %2227 = vperm.xlu2 %6268, %v2077_v46  }
 0x1a9   : > { %2217 = vperm.xlu0 %6267, %v2075_v19   ;;  %2137 = vperm.xlu1 %6269, %v2059_v40   ;;  %v2056_v40 = vld [vmem:[%s10441_s8] sm:$0xff]  ;;  %v779_v13 = vpop.permute.xlu2 %778 }
 0x1ab   : > { %v6988_v60 = vpop.permute.xlu0 %863 }
 0x1ac   : > { %10733 = vst [vmem:[#allocation44_spill] sm:$0xff] %v6988_v60 }
 0x1af   : > { %v6998_v22 = vpop.f32.mrf.mxu1 }
 0x1b0   : > { %10734 = vst [vmem:[#allocation45_spill] sm:$0xff] %v6998_v22  ;;  %v7003_v19 = vpop.f32.mrf.mxu0 }
 0x1b1   : > { %2202 = vperm.xlu0 %6267, %v2072_v1   ;;  %2122 = vperm.xlu1 %6269, %v2056_v40   ;;  %v794_v1 = vpop.permute.xlu1 %793 }
 0x1b2   : > { %5460 = vmatmul.msk.bf16.gmra.mxu3 %vm1166_vm6, %v6058_v17  ;;  %5451 = vmatmul.msk.bf16.gmra.mxu1 %vm1166_vm6, %v6049_v31 }
 0x1b3   : > { %v7013_v9 = vpop.permute.xlu0 %938  ;;  %5428 = vmatmul.msk.bf16.gmra.mxu2 %vm1166_vm6, %v6058_v17  ;;  %5419 = vmatmul.msk.bf16.gmra.mxu0 %vm1166_vm6, %v6049_v31  ;;  %v2073_v17 = vld [vmem:[%s10441_s8 + $0x88] sm:$0xff]  ;;  %v2074_v31 = vld [vmem:[%s10441_s8 + $0x90] sm:$0xff] }
 0x1b4   : > { %10735 = vst [vmem:[#allocation46_spill] sm:$0xff] %v7013_v9  ;;  %2212 = vperm.xlu2 %6268, %v2074_v31  }
 0x1b5   : > { %v1493_v8 = vpop.f32.mrf.mxu3 }
 0x1b6   : > { %v1324_v5 = vpop.f32.mrf.mxu2  ;;  %v1494_v61 = vadd.f32 %v1493_v8, %v779_v13  ;;  %v2100_v8 = vld [vmem:[%s10441_s8 + $0x160] sm:$0xff] }
 0x1b7   : > { %v7020_v12 = vpop.f32.mrf.mxu1  ;;  %v1325_v40 = vadd.f32 %v1324_v5, %v779_v13 }
 0x1b8   : > { %10736 = vst [vmem:[#allocation47_spill] sm:$0xff] %v7020_v12  ;;  %v7022_v55 = vpop.f32.mrf.mxu0  ;;  %v1645_v46 = vmul.f32 0.2, %v1494_v61 }
 0x1b9   : > { %2357 = vperm.xlu0 %6267, %v2103_v24   ;;  %2207 = vperm.xlu1 %6269, %v2073_v17   ;;  %v6059_v24 = vld [vmem:[%s10704_s5 + $0x90] sm:$0xff]  ;;  %v7036_v45 = vpop.permute.xlu1 %698  ;;  %v1644_v47 = vmul.f32 0.2, %v1325_v40 }
 0x1ba   : > { %v1773_v5 = vmax.f32 %v1494_v61, %v1645_v46 }
 0x1bb   : > { %v784_v9 = vpop.permute.xlu0 %783  ;;  %v1772_v61 = vmax.f32 %v1325_v40, %v1644_v47 }
 0x1bd   : > { %v1495_v49 = vpop.f32.mrf.mxu3 }
 0x1be   : > { %v1496_v54 = vadd.f32 %v1495_v49, %v784_v9  ;;  %v1326_v23 = vpop.f32.mrf.mxu2 }
 0x1bf   : > { %v1327_v21 = vadd.f32 %v1326_v23, %v784_v9  ;;  %v1453_v13 = vpop.f32.mrf.mxu1  ;;  %v2057_v9 = vld [vmem:[%s10441_s8 + $0x8] sm:$0xff] }
 0x1c0   : > { %v1647_v17 = vmul.f32 0.2, %v1496_v54  ;;  %v7039_v31 = vadd.f32 %v1453_v13, %v7036_v45  ;;  %v7041_v49 = vpop.f32.mrf.mxu0  ;;  %2127 = vperm.xlu2 %6268, %v2057_v9   ;;  %v2114_v9 = vld [vmem:[%s10441_s8 + $0x1d0] sm:$0xff] }
 0x1c1   : > { %v1646_v58 = vmul.f32 0.2, %v1327_v21  ;;  %2342 = vperm.xlu0 %6267, %v2100_v8   ;;  %2432 = vperm.xlu1 %6269, %v2118_v37   ;;  %v2101_v37 = vld [vmem:[%s10441_s8 + $0x168] sm:$0xff] }
 0x1c2   : > { %v1775_v42 = vmax.f32 %v1496_v54, %v1647_v17  ;;  %5461 = vmatmul.msk.bf16.gmra.mxu3 %vm1166_vm6, %v6059_v24  ;;  %v2117_v17 = vld [vmem:[%s10441_s8 + $0x1e8] sm:$0xff] }
 0x1c3   : > { %v1774_v23 = vmax.f32 %v1327_v21, %v1646_v58  ;;  %5429 = vmatmul.msk.bf16.gmra.mxu2 %vm1166_vm6, %v6059_v24 }
 0x1c4   : > { %v7051_v46 = vpack.c.bf16 %v1775_v42, %v1773_v5  ;;  %v2102_v42 = vld [vmem:[%s10441_s8 + $0x170] sm:$0xff] }
 0x1c5   : > { %v1498_v13 = vpop.f32.mrf.mxu3  ;;  %v7053_v8 = vpack.c.bf16 %v1774_v23, %v1772_v61  ;;  %v6060_v61 = vld [vmem:[%s10704_s5 + $0x98] sm:$0xff] }
 0x1c6   : > { %10737 = vst [vmem:[#allocation48_spill] sm:$0xff] %v7051_v46  ;;  %v1329_v54 = vpop.f32.mrf.mxu2  ;;  %v1499_v58 = vadd.f32 %v1498_v13, %v6971_v32 }
 0x1c7   : > { %10738 = vst [vmem:[#allocation49_spill] sm:$0xff] %v7053_v8  ;;  %v7058_v59 = vpop.f32.mrf.mxu1  ;;  %v1330_v21 = vadd.f32 %v1329_v54, %v6971_v32 }
 0x1c8   : > { %v7060_v38 = vpop.f32.mrf.mxu0  ;;  %2352 = vperm.xlu2 %6268, %v2102_v42   ;;  %v1649_v40 = vmul.f32 0.2, %v1499_v58 }
 0x1c9   : > { %2427 = vperm.xlu0 %6267, %v2117_v17   ;;  %2347 = vperm.xlu1 %6269, %v2101_v37   ;;  %v1648_v23 = vmul.f32 0.2, %v1330_v21 }
 0x1ca   : > { %v1777_v54 = vmax.f32 %v1499_v58, %v1649_v40 }
 0x1cd   : > { %v1500_v47 = vpop.f32.mrf.mxu3 }
 0x1ce   : > { %v1501_v24 = vadd.f32 %v1500_v47, %v794_v1  ;;  %v1331_v5 = vpop.f32.mrf.mxu2  ;;  %v2098_v47 = vld [vmem:[%s10441_s8 + $0x150] sm:$0xff] }
 0x1cf   : > { %v1332_v13 = vadd.f32 %v1331_v5, %v794_v1  ;;  %v1458_v17 = vpop.f32.mrf.mxu1  ;;  %v2119_v1 = vld [vmem:[%s10441_s8 + $0x1f8] sm:$0xff]  ;;  %v1776_v5 = vmax.f32 %v1330_v21, %v1648_v23 }
 0x1d0   : > { %v1651_v4 = vmul.f32 0.2, %v1501_v24  ;;  %v7076_v33 = vpop.f32.mrf.mxu0  ;;  %v1459_v42 = vadd.f32 %v1458_v17, %v6923_v35  ;;  %2437 = vperm.xlu2 %6268, %v2119_v1   ;;  %v2097_v17 = vld [vmem:[%s10441_s8 + $0x148] sm:$0xff] }
 0x1d1   : > { %v1650_v32 = vmul.f32 0.2, %v1332_v13  ;;  %2412 = vperm.xlu0 %6267, %v2114_v9   ;;  %2332 = vperm.xlu1 %6269, %v2098_v47  }
 0x1d2   : > { %v1779_v37 = vmax.f32 %v1501_v24, %v1651_v4  ;;  %5462 = vmatmul.msk.bf16.gmra.mxu3 %vm1166_vm6, %v6060_v61  ;;  %v1617_v40 = vmul.f32 0.2, %v1459_v42 }
 0x1d3   : > { %v1778_v3 = vmax.f32 %v1332_v13, %v1650_v32  ;;  %5430 = vmatmul.msk.bf16.gmra.mxu2 %vm1166_vm6, %v6060_v61 }
 0x1d4   : > { %v7087_v11 = vpack.c.bf16 %v1779_v37, %v1777_v54  ;;  %v1745_v13 = vmax.f32 %v1459_v42, %v1617_v40  ;;  %v2116_v54 = vld [vmem:[%s10441_s8 + $0x1e0] sm:$0xff]  ;;  %v2094_v42 = vld [vmem:[%s10441_s8 + $0x130] sm:$0xff] }
 0x1d5   : > { %v1503_v4 = vpop.f32.mrf.mxu3  ;;  %v7089_v58 = vpack.c.bf16 %v1778_v3, %v1776_v5  ;;  %v2115_v3 = vld [vmem:[%s10441_s8 + $0x1d8] sm:$0xff] }
 0x1d6   : > { %10739 = vst [vmem:[#allocation50_spill] sm:$0xff] %v7087_v11  ;;  %v7092_v24 = vadd.f32 %v1503_v4, %v6940_v48  ;;  %v1334_v9 = vpop.f32.mrf.mxu2  ;;  %v6061_v4 = vld [vmem:[%s10704_s5 + $0xa0] sm:$0xff] }
 0x1d7   : > { %10740 = vst [vmem:[#allocation51_spill] sm:$0xff] %v7089_v58  ;;  %v1460_v21 = vpop.f32.mrf.mxu1  ;;  %v1335_v37 = vadd.f32 %v1334_v9, %v6940_v48 }
 0x1d8   : > { %v1461_v23 = vadd.f32 %v1460_v21, %v6950_v63  ;;  %v7098_v61 = vpop.f32.mrf.mxu0  ;;  %2422 = vperm.xlu2 %6268, %v2116_v54  }
 0x1d9   : > { %2327 = vperm.xlu0 %6267, %v2097_v17   ;;  %2417 = vperm.xlu1 %6269, %v2115_v3   ;;  %v1652_v17 = vmul.f32 0.2, %v1335_v37 }
 0x1da   : > { %v1619_v32 = vmul.f32 0.2, %v1461_v23 }
 0x1db   : > { %v1780_v3 = vmax.f32 %v1335_v37, %v1652_v17  ;;  %v2095_v37 = vld [vmem:[%s10441_s8 + $0x138] sm:$0xff] }
 0x1dc   : > { %v1747_v47 = vmax.f32 %v1461_v23, %v1619_v32  ;;  %v2112_v23 = vld [vmem:[%s10441_s8 + $0x1c0] sm:$0xff]  ;;  %v2099_v32 = vld [vmem:[%s10441_s8 + $0x158] sm:$0xff] }
 0x1dd   : > { %v7107_v1 = vpop.f32.mrf.mxu3 }
 0x1de   : > { %v1336_v5 = vpop.f32.mrf.mxu2  ;;  %v7115_v40 = vpack.c.bf16 %v1747_v47, %v1745_v13 }
 0x1df   : > { %v1337_v21 = vadd.f32 %v1336_v5, %v6899_v16  ;;  %v7127_v54 = vpop.f32.mrf.mxu1 }
 0x1e0   : > { %10741 = vst [vmem:[#allocation52_spill] sm:$0xff] %v7115_v40  ;;  %v7118_v48 = vpop.f32.mrf.mxu0  ;;  %2337 = vperm.xlu2 %6268, %v2099_v32   ;;  %v2109_v40 = vld [vmem:[%s10441_s8 + $0x1a8] sm:$0xff] }
 0x1e1   : > { %v1654_v9 = vmul.f32 0.2, %v1337_v21  ;;  %2312 = vperm.xlu0 %6267, %v2094_v42   ;;  %10742 = vst [vmem:[#allocation53_spill] sm:$0xff] %v7127_v54  ;;  %2402 = vperm.xlu1 %6269, %v2112_v23   ;;  %v6062_v23 = vld [vmem:[%s10704_s5 + $0xa8] sm:$0xff] }
 0x1e2   : > { %5463 = vmatmul.msk.bf16.gmra.mxu3 %vm1166_vm6, %v6061_v4  ;;  %v2089_v54 = vld [vmem:[%s10441_s8 + $0x108] sm:$0xff] }
 0x1e3   : > { %v1782_v13 = vmax.f32 %v1337_v21, %v1654_v9  ;;  %5431 = vmatmul.msk.bf16.gmra.mxu2 %vm1166_vm6, %v6061_v4  ;;  %v2096_v4 = vld [vmem:[%s10441_s8 + $0x140] sm:$0xff] }
 0x1e5   : > { %v7130_v47 = vpop.f32.mrf.mxu3  ;;  %v7132_v5 = vpack.c.bf16 %v1782_v13, %v1780_v3  ;;  %v2092_v3 = vld [vmem:[%s10441_s8 + $0x120] sm:$0xff]  ;;  %v2113_v13 = vld [vmem:[%s10441_s8 + $0x1c8] sm:$0xff] }
 0x1e6   : > { %10743 = vst [vmem:[#allocation54_spill] sm:$0xff] %v7130_v47  ;;  %v7134_v42 = vpop.f32.mrf.mxu2 }
 0x1e7   : > { %10744 = vst [vmem:[#allocation55_spill] sm:$0xff] %v7132_v5  ;;  %v7147_v17 = vpop.f32.mrf.mxu1 }
 0x1e8   : > { %v7139_v50 = vpop.f32.mrf.mxu0  ;;  %10745 = vst [vmem:[#allocation56_spill] sm:$0xff] %v7147_v17  ;;  %2322 = vperm.xlu2 %6268, %v2096_v4  }
 0x1e9   : > { %2397 = vperm.xlu0 %6267, %v2111_v29   ;;  %2317 = vperm.xlu1 %6269, %v2095_v37   ;;  %v2108_v29 = vld [vmem:[%s10441_s8 + $0x1a0] sm:$0xff] }
 0x1ed   : > { %v7149_v21 = vpop.f32.mrf.mxu3 }
 0x1ee   : > { %10746 = vst [vmem:[#allocation57_spill] sm:$0xff] %v7149_v21  ;;  %v7151_v9 = vpop.f32.mrf.mxu2  ;;  %v2104_v21 = vld [vmem:[%s10441_s8 + $0x180] sm:$0xff] }
 0x1ef   : > { %v7176_v26 = vpop.f32.mrf.mxu1 }
 0x1f0   : > { %v7159_v32 = vpop.f32.mrf.mxu0  ;;  %2407 = vperm.xlu2 %6268, %v2113_v13   ;;  %10748 = vst [vmem:[#allocation59_spill] sm:$0xff] %v7176_v26 }
 0x1f1   : > { %2382 = vperm.xlu0 %6267, %v2108_v29   ;;  %2302 = vperm.xlu1 %6269, %v2092_v3   ;;  %v2091_v29 = vld [vmem:[%s10441_s8 + $0x118] sm:$0xff] }
 0x1f2   : > { %5464 = vmatmul.msk.bf16.gmra.mxu3 %vm1166_vm6, %v6062_v23 }
 0x1f3   : > { %5432 = vmatmul.msk.bf16.gmra.mxu2 %vm1166_vm6, %v6062_v23  ;;  %v2110_v23 = vld [vmem:[%s10441_s8 + $0x1b0] sm:$0xff] }
 0x1f5   : > { %v7169_v37 = vpop.f32.mrf.mxu3 }
 0x1f6   : > { %10747 = vst [vmem:[#allocation58_spill] sm:$0xff] %v7169_v37  ;;  %v7171_v4 = vpop.f32.mrf.mxu2 }
 0x1f7   : > { %v7196_v46 = vpop.f32.mrf.mxu1 }
 0x1f8   : > { %v7178_v56 = vpop.f32.mrf.mxu0  ;;  %2392 = vperm.xlu2 %6268, %v2110_v23   ;;  %10750 = vst [vmem:[#allocation61_spill] sm:$0xff] %v7196_v46  ;;  %v2093_v23 = vld [vmem:[%s10441_s8 + $0x128] sm:$0xff] }
 0x1f9   : > { %2297 = vperm.xlu0 %6267, %v2091_v29   ;;  %2387 = vperm.xlu1 %6269, %v2109_v40   ;;  %v6063_v29 = vld [vmem:[%s10704_s5 + $0xb0] sm:$0xff] }
 0x1fa   : > { %v2106_v40 = vld [vmem:[%s10441_s8 + $0x190] sm:$0xff] }
 0x1fd   : > { %v7186_v3 = vpop.f32.mrf.mxu3 }
 0x1fe   : > { %10749 = vst [vmem:[#allocation60_spill] sm:$0xff] %v7186_v3  ;;  %v1346_v13 = vpop.f32.mrf.mxu2 }
 0x1ff   : > { %v1347_v34 = vadd.f32 %v1346_v13, %v6826_v30  ;;  %v7273_v13 = vadd.f32 %v7151_v9, %v6872_v53  ;;  %v7275_v30 = vpop.permute.xlu2 %853  ;;  %v7291_v9 = vadd.f32 %v7107_v1, %v6899_v16 }
 0x200   : > { %v7194_v22 = vpop.f32.mrf.mxu0  ;;  %2307 = vperm.xlu2 %6268, %v2093_v23  }
 0x201   : > { %2282 = vperm.xlu0 %6267, %v2088_v36   ;;  %2372 = vperm.xlu1 %6269, %v2106_v40   ;;  %v2105_v36 = vld [vmem:[%s10441_s8 + $0x188] sm:$0xff]  ;;  %v7219_v40 = vpop.f32.mrf.mxu1  ;;  %v1658_v16 = vmul.f32 0.2, %v7273_v13 }
 0x202   : > { %5465 = vmatmul.msk.bf16.gmra.mxu3 %vm1166_vm6, %v6063_v29  ;;  %10752 = vst [vmem:[#allocation63_spill] sm:$0xff] %v7219_v40 }
 0x203   : > { %5433 = vmatmul.msk.bf16.gmra.mxu2 %vm1166_vm6, %v6063_v29  ;;  %v2090_v29 = vld [vmem:[%s10441_s8 + $0x110] sm:$0xff] }
 0x205   : > { %v7206_v12 = vpop.f32.mrf.mxu3 }
 0x206   : > { %10751 = vst [vmem:[#allocation62_spill] sm:$0xff] %v7206_v12  ;;  %v1349_v7 = vpop.f32.mrf.mxu2 }
 0x208   : > { %v7211_v11 = vpop.f32.mrf.mxu0  ;;  %2292 = vperm.xlu2 %6268, %v2090_v29   ;;  %v7235_v29 = vpop.permute.xlu1 %943 }
 0x209   : > { %2367 = vperm.xlu0 %6267, %v2105_v36   ;;  %2287 = vperm.xlu1 %6269, %v2089_v54   ;;  %v7231_v46 = vpop.f32.mrf.mxu1  ;;  %10755 = vst [vmem:[#allocation66_spill] sm:$0xff] %v7235_v29  ;;  %v1350_v29 = vadd.f32 %v1349_v7, %v6778_v2  ;;  %v1345_v7 = vadd.f32 %v7171_v4, %v6817_v25  ;;  %v1662_v25 = vmul.f32 0.2, %v1347_v34 }
 0x20a   : > { %10754 = vst [vmem:[#allocation65_spill] sm:$0xff] %v7231_v46 }
 0x20b   : > { %v1790_v4 = vmax.f32 %v1347_v34, %v1662_v25 }
 0x20d   : > { %v7221_v23 = vpop.f32.mrf.mxu3 }
 0x20e   : > { %10753 = vst [vmem:[#allocation64_spill] sm:$0xff] %v7221_v23  ;;  %v1351_v17 = vpop.f32.mrf.mxu2 }
 0x20f   : > { %v1352_v37 = vadd.f32 %v1351_v17, %v6720_v43 }
 0x210   : > { %v1309_v36 = vpop.f32.mrf.mxu0  ;;  %2377 = vperm.xlu2 %6268, %v2107_v41   ;;  %v6065_v41 = vld [vmem:[%s10704_s5 + $0xc0] sm:$0xff]  ;;  %v7255_v17 = vpop.permute.xlu1 %848 }
 0x211   : > { %v7248_v46 = vpop.f32.mrf.mxu1  ;;  %v1666_v23 = vmul.f32 0.2, %v1352_v37  ;;  %v1310_v1 = vadd.f32 %v1309_v36, %v6745_v52 }
 0x212   : > { %5466 = vmatmul.msk.bf16.gmra.mxu3 %vm1166_vm6, %v6064_v20  ;;  %10756 = vst [vmem:[#allocation67_spill] sm:$0xff] %v7248_v46  ;;  %v1664_v46 = vmul.f32 0.2, %v1350_v29 }
 0x213   : > { %5434 = vmatmul.msk.bf16.gmra.mxu2 %vm1166_vm6, %v6064_v20  ;;  %v1794_v5 = vmax.f32 %v1352_v37, %v1666_v23  ;;  %v1340_v37 = vadd.f32 %v7134_v42, %v6824_v28  ;;  %v1660_v23 = vmul.f32 0.2, %v1345_v7 }
 0x215   : > { %v7233_v54 = vpop.f32.mrf.mxu3  ;;  %v1656_v34 = vmul.f32 0.2, %v1340_v37 }
 0x216   : > { %v1354_v26 = vpop.f32.mrf.mxu2 }
 0x217   : > { %v1355_v8 = vadd.f32 %v1354_v26, %v6653_v6  ;;  %v7253_v26 = vadd.f32 %v7041_v49, %v7036_v45 }
 0x218   : > { %v1311_v40 = vpop.f32.mrf.mxu0  ;;  %2362 = vperm.xlu2 %6268, %v2104_v21   ;;  %v7258_v21 = vmul.f32 0.2, %v7039_v31 }
 0x219   : > { %v1668_v3 = vmul.f32 0.2, %v1355_v8  ;;  %v7269_v2 = vmul.f32 0.2, %v7253_v26  ;;  %v7309_v42 = vpop.f32.mrf.mxu1 }
 0x21b   : > { %v1796_v45 = vmax.f32 %v1355_v8, %v1668_v3  ;;  %v7294_v3 = vadd.f32 %v1311_v40, %v6758_v57 }
 0x21d   : > { %v7242_v60 = vpop.f32.mrf.mxu3  ;;  %v1634_v36 = vmul.f32 0.2, %v7294_v3 }
 0x21e   : > { %v1356_v20 = vpop.f32.mrf.mxu2 }
 0x21f   : > { %v1357_v47 = vadd.f32 %v1356_v20, %v6722_v44  ;;  %v7264_v20 = vpop.permute.xlu0 %688 }
 0x220   : > { %v1314_v58 = vpop.f32.mrf.mxu0  ;;  %10757 = vst [vmem:[#allocation68_spill] sm:$0xff] %v7264_v20 }
 0x221   : > { %v1670_v43 = vmul.f32 0.2, %v1357_v47  ;;  %v1315_v12 = vadd.f32 %v1314_v58, %v6701_v18  ;;  %v7283_v58 = vadd.f32 %v7003_v19, %v7264_v20  ;;  %v7300_v19 = vadd.f32 %v7060_v38, %v6990_v0 }
 0x222   : > { %5467 = vmatmul.msk.bf16.gmra.mxu3 %vm1166_vm6, %v6065_v41  ;;  %v1655_v38 = vmul.f32 0.2, %v7291_v9 }
 0x223   : > { %v1798_v49 = vmax.f32 %v1357_v47, %v1670_v43  ;;  %5435 = vmatmul.msk.bf16.gmra.mxu2 %vm1166_vm6, %v6065_v41  ;;  %v7287_v47 = vadd.f32 %v7058_v59, %v6990_v0  ;;  %v1653_v59 = vmul.f32 0.2, %v7092_v24  ;;  %v7317_v0 = vadd.f32 %v7211_v11, %v6794_v14 }
 0x224   : > { %v1632_v11 = vmul.f32 0.2, %v1310_v1  ;;  %v7332_v14 = vadd.f32 %v7178_v56, %v6796_v15  ;;  %v7343_v56 = vpop.permute.xlu2 %928 }
 0x225   : > { %v2022_v8 = vpack.c.bf16 %v1798_v49, %v1796_v45  ;;  %v7279_v43 = vpop.f32.mrf.mxu3  ;;  %v1792_v45 = vmax.f32 %v1350_v29, %v1664_v46  ;;  %v1636_v49 = vmul.f32 0.2, %v1315_v12  ;;  %10759 = vst [vmem:[#allocation70_spill] sm:$0xff] %v7343_v56 }
 0x226   : > { %10758 = vst [vmem:[#allocation69_spill] sm:$0xff] %v7279_v43  ;;  %v1359_v41 = vpop.f32.mrf.mxu2  ;;  %v7307_v43 = vadd.f32 %v7194_v22, %v6743_v51  ;;  %v1788_v22 = vmax.f32 %v1345_v7, %v1660_v23 }
 0x227   : > { %3249 = vmatpush.bf16.msra.mxu1 %v2022_v8  ;;  %v2020_v29 = vpack.c.bf16 %v1794_v5, %v1792_v45  ;;  %v7312_v8 = vpop.permute.xlu1 %693  ;;  %v1360_v25 = vadd.f32 %v1359_v41, %v7255_v17  ;;  %v1764_v20 = vmax.f32 %v1315_v12, %v1636_v49  ;;  %v7323_v5 = vadd.f32 %v7076_v33, %v6923_v35 }
 0x228   : > { %v1316_v40 = vpop.f32.mrf.mxu0  ;;  %v1786_v45 = vmax.f32 %v7273_v13, %v1658_v16  ;;  %v1628_v7 = vmul.f32 0.2, %v7307_v43  ;;  %v2018_v23 = vpack.c.bf16 %v1790_v4, %v1788_v22  ;;  %v1781_v33 = vmax.f32 %v7092_v24, %v1653_v59  ;;  %v6066_v16 = vld [vmem:[%s10704_s5 + $0xc8] sm:$0xff] }
 0x229   : > { %v1317_v46 = vadd.f32 %v1316_v40, %v6638_v62  ;;  %v7328_v40 = vadd.f32 %v7159_v32, %v6849_v39  ;;  %v1630_v35 = vmul.f32 0.2, %v7317_v0  ;;  %v1762_v13 = vmax.f32 %v7294_v3, %v1634_v36 }
 0x22a   : > { %v1672_v49 = vmul.f32 0.2, %v1360_v25  ;;  %v7349_v24 = vadd.f32 %v7098_v61, %v6950_v63  ;;  %v7353_v3 = vadd.f32 %v7118_v48, %v6895_v10  ;;  %v1760_v36 = vmax.f32 %v1310_v1, %v1632_v11 }
 0x22b   : > { %v1638_v51 = vmul.f32 0.2, %v1317_v46  ;;  %3250 = vmatpush.bf16.msra.mxu1 %v2020_v29  ;;  %v1783_v29 = vmax.f32 %v7291_v9, %v1655_v38  ;;  %v1624_v59 = vmul.f32 0.2, %v7328_v40  ;;  %v7358_v9 = vadd.f32 %v7139_v50, %v6912_v27 }
 0x22c   : > { %v1756_v63 = vmax.f32 %v7307_v43, %v1628_v7  ;;  %v1758_v61 = vmax.f32 %v7317_v0, %v1630_v35  ;;  %v1800_v48 = vmax.f32 %v1360_v25, %v1672_v49  ;;  %v2004_v1 = vpack.c.bf16 %v1762_v13, %v1760_v36 }
 0x22d   : > { %v1766_v12 = vmax.f32 %v1317_v46, %v1638_v51  ;;  %v7335_v41 = vpop.f32.mrf.mxu3  ;;  %v1784_v51 = vmax.f32 %v1340_v37, %v1656_v34  ;;  %v7361_v34 = vpop.f32.mrf.mxu1  ;;  %v7369_v50 = vmul.f32 0.2, %v7287_v47  ;;  %v7380_v25 = vmul.f32 0.2, %v7283_v58 }
 0x22e   : > { %v1361_v32 = vpop.f32.mrf.mxu2  ;;  %v7383_v7 = vmul.f32 0.2, %v7300_v19  ;;  %v7389_v13 = vadd.f32 %v7233_v54, %v6653_v6  ;;  %v1622_v6 = vmul.f32 0.2, %v7358_v9 }
 0x22f   : > { %v2006_v46 = vpack.c.bf16 %v1766_v12, %v1764_v20  ;;  %v1362_v4 = vadd.f32 %v1361_v32, %v7275_v30  ;;  %3251 = vmatpush.bf16.msra.mxu1 %v2018_v23  ;;  %v1626_v20 = vmul.f32 0.2, %v7332_v14  ;;  %v2016_v38 = vpack.c.bf16 %v1786_v45, %v1784_v51  ;;  %v7366_v11 = vpop.permute.xlu1 %768 }
 0x230   : > { %v1319_v22 = vpop.f32.mrf.mxu0  ;;  %v7375_v12 = vpack.c.bf16 %v1783_v29, %v1781_v33  ;;  %v1752_v23 = vmax.f32 %v7328_v40, %v1624_v59  ;;  %v7393_v33 = vadd.f32 %v7242_v60, %v6722_v44  ;;  %v7402_v40 = vmul.f32 0.2, %v7323_v5  ;;  %v10760_v29 = vld [vmem:[#allocation55_spill] sm:$0xff]  ;;  %v10762_v59 = vld [vmem:[#allocation62_spill] sm:$0xff] }
 0x231   : > { %v1674_v37 = vmul.f32 0.2, %v1362_v4  ;;  %3080 = vmatpush.bf16.msra.mxu0 %v2006_v46  ;;  %v7373_v45 = vadd.f32 %v1319_v22, %v7366_v11  ;;  %v1754_v35 = vmax.f32 %v7332_v14, %v1626_v20  ;;  %v7405_v14 = vmul.f32 0.2, %v7349_v24  ;;  %v10763_v22 = vld [vmem:[#allocation19_spill] sm:$0xff]  ;;  %v10764_v20 = vld [vmem:[#allocation64_spill] sm:$0xff] }
 0x232   : > { %5468 = vmatmul.msk.bf16.gmra.mxu3 %vm1166_vm6, %v6066_v16  ;;  %v1620_v60 = vmul.f32 0.2, %v7353_v3  ;;  %v2002_v51 = vpack.c.bf16 %v1758_v61, %v1756_v63  ;;  %v1669_v63 = vmul.f32 0.2, %v7389_v13  ;;  %v1671_v61 = vmul.f32 0.2, %v7393_v33 }
 0x233   : > { %5436 = vmatmul.msk.bf16.gmra.mxu2 %vm1166_vm6, %v6066_v16  ;;  %3252 = vmatpush.bf16.msra.mxu1 %v2016_v38  ;;  %v1802_v43 = vmax.f32 %v1362_v4, %v1674_v37  ;;  %v7399_v16 = vadd.f32 %v7022_v55, %v7312_v8  ;;  %v1640_v55 = vmul.f32 0.2, %v7373_v45  ;;  %v10761_v4 = vld [vmem:[#allocation24_spill] sm:$0xff]  ;;  %v7421_v37 = vadd.f32 %v10764_v20, %v10763_v22  ;;  %v10765_v38 = vld [vmem:[#allocation42_spill] sm:$0xff] }
 0x234   : > { %v7417_v36 = vadd.f32 %v10762_v59, %v10761_v4  ;;  %v2000_v44 = vpack.c.bf16 %v1754_v35, %v1752_v23  ;;  %v1744_v59 = vmax.f32 %v7323_v5, %v7402_v40  ;;  %v1750_v22 = vmax.f32 %v7358_v9, %v1622_v6  ;;  %v10767_v35 = vld [vmem:[#allocation54_spill] sm:$0xff]  ;;  %v10768_v40 = vld [vmem:[#allocation31_spill] sm:$0xff] }
 0x235   : > { %v1533_v49 = vpop.f32.mrf.mxu3  ;;  %3081 = vmatpush.bf16.msra.mxu0 %v2004_v1  ;;  %v7395_v32 = vpack.c.bf16 %v1802_v43, %v1800_v48  ;;  %v7426_v1 = vpop.permute.xlu2 %773  ;;  %v7432_v4 = vmul.f32 0.2, %v7399_v16  ;;  %v1748_v20 = vmax.f32 %v7353_v3, %v1620_v60  ;;  %v7445_v56 = vadd.f32 %v10767_v35, %v6824_v28  ;;  %v10769_v3 = vld [vmem:[#allocation60_spill] sm:$0xff] }
 0x236   : > { %v1364_v54 = vpop.f32.mrf.mxu2  ;;  %v7424_v48 = vadd.f32 %v1533_v49, %v10765_v38  ;;  %v1746_v49 = vmax.f32 %v7349_v24, %v7405_v14  ;;  %v1485_v23 = vpop.f32.mrf.mxu1  ;;  %v1665_v5 = vmul.f32 0.2, %v7417_v36  ;;  %v1667_v24 = vmul.f32 0.2, %v7421_v37  ;;  %v6067_v35 = vld [vmem:[%s10704_s5 + $0xd0] sm:$0xff] }
 0x237   : > { %3253 = vmatpush.bf16.msra.mxu1 %v10760_v29  ;;  %v1365_v46 = vadd.f32 %v1364_v54, %v10765_v38  ;;  %v7452_v14 = vadd.f32 %v10769_v3, %v10768_v40  ;;  %v1799_v6 = vmax.f32 %v7393_v33, %v1671_v61  ;;  %v7459_v38 = vadd.f32 %v7361_v34, %v6701_v18  ;;  %v10773_v61 = vld [vmem:[#allocation49_spill] sm:$0xff]  ;;  %v6073_v18 = vld [vmem:[%s10440_s7 + $0x4] sm:$0xf]  ;;  %v5479_v34 = vld [vmem:[%s10440_s7 + $0x10] sm:$0xf0] }
 0x238   : > { %v1321_v43 = vpop.f32.mrf.mxu0  ;;  %v1677_v9 = vmul.f32 0.2, %v7424_v48  ;;  %v1998_v40 = vpack.c.bf16 %v1750_v22, %v1748_v20  ;;  %v1486_v3 = vadd.f32 %v1485_v23, %v6638_v62  ;;  %v1793_v22 = vmax.f32 %v7417_v36, %v1665_v5 }
 0x239   : > { %3082 = vmatpush.bf16.msra.mxu0 %v2002_v51  ;;  %v1322_v29 = vadd.f32 %v1321_v43, %v7426_v1  ;;  %v1768_v51 = vmax.f32 %v7373_v45, %v1640_v55  ;;  %v10766_v43 = vld [vmem:[#allocation51_spill] sm:$0xff]  ;;  %v1797_v45 = vmax.f32 %v7389_v13, %v1669_v63  ;;  %v10770_v55 = vld [vmem:[#allocation44_spill] sm:$0xff]  ;;  %v10771_v13 = vld [vmem:[#allocation30_spill] sm:$0xff]  ;;  %v1795_v62 = vmax.f32 %v7421_v37, %v1667_v24 }
 0x23a   : > { %v10772_v63 = vld [vmem:[#allocation58_spill] sm:$0xff]  ;;  %v1805_v20 = vmax.f32 %v7424_v48, %v1677_v9  ;;  %v1639_v36 = vmul.f32 0.2, %v1486_v3  ;;  %v7485_v5 = vor.u32 %v6073_v18, %v5479_v34  ;;  %v1657_v37 = vmul.f32 0.2, %v7445_v56 }
 0x23b   : > { %v1642_v0 = vmul.f32 0.2, %v1322_v29  ;;  %3254 = vmatpush.bf16.msra.mxu1 %v10766_v43  ;;  %v1514_v33 = vadd.f32 %v10772_v63, %v10771_v13  ;;  %v1637_v63 = vmul.f32 0.2, %v7459_v38 }
 0x23c   : > { %10775 = vst [vmem:[#allocation55_spill] sm:$0xff] %v7485_v5 }
 0x23d   : > { %v1770_v54 = vmax.f32 %v1322_v29, %v1642_v0  ;;  %v1535_v60 = vpop.f32.mrf.mxu3  ;;  %3083 = vmatpush.bf16.msra.mxu0 %v2000_v44  ;;  %v1676_v0 = vmul.f32 0.2, %v1365_v46  ;;  %v1661_v9 = vmul.f32 0.2, %v1514_v33 }
 0x23e   : > { %v1536_v28 = vadd.f32 %v1535_v60, %v10770_v55  ;;  %v1366_v43 = vpop.f32.mrf.mxu2  ;;  %v10774_v60 = vld [vmem:[#allocation57_spill] sm:$0xff] }
 0x23f   : > { %v1367_v44 = vadd.f32 %v1366_v43, %v10770_v55  ;;  %3255 = vmatpush.bf16.msra.mxu1 %v10773_v61  ;;  %v2008_v29 = vpack.c.bf16 %v1770_v54, %v1768_v51  ;;  %v7480_v55 = vadd.f32 %v10774_v60, %v6872_v53  ;;  %v1663_v51 = vmul.f32 0.2, %v7452_v14  ;;  %v10787_v60 = vld [vmem:[#allocation39_spill] sm:$0xff] }
 0x240   : > { %v1679_v23 = vmul.f32 0.2, %v1536_v28  ;;  %v2023_v54 = vpack.c.bf16 %v1799_v6, %v1797_v45  ;;  %v1804_v48 = vmax.f32 %v1365_v46, %v1676_v0  ;;  %v1996_v53 = vpack.c.bf16 %v1746_v49, %v1744_v59 }
 0x241   : > { %v1678_v43 = vmul.f32 0.2, %v1367_v44  ;;  %3084 = vmatpush.bf16.msra.mxu0 %v1998_v40  ;;  %v7491_v45 = vadd.f32 %v7309_v42, %v6758_v57  ;;  %v2021_v6 = vpack.c.bf16 %v1795_v62, %v1793_v22  ;;  %v1659_v40 = vmul.f32 0.2, %v7480_v55  ;;  %v10784_v22 = vld [vmem:[#allocation65_spill] sm:$0xff] }
 0x242   : > { %v1807_v13 = vmax.f32 %v1536_v28, %v1679_v23  ;;  %5469 = vmatmul.msk.bf16.gmra.mxu3 %vm1166_vm6, %v6067_v35  ;;  %v10776_v46 = vmax.f32 %v7253_v26, %v7269_v2  ;;  %v10777_v59 = vmax.f32 %v7300_v19, %v7383_v7  ;;  %v10779_v57 = vmax.f32 %v7287_v47, %v7369_v50  ;;  %v10781_v50 = vld [vmem:[#allocation21_spill] sm:$0xff]  ;;  %v10782_v7 = vld [vmem:[#allocation63_spill] sm:$0xff] }
 0x243   : > { %5437 = vmatmul.msk.bf16.gmra.mxu2 %vm1166_vm6, %v6067_v35  ;;  %3256 = vmatpush.bf16.msra.mxu1 %v2008_v29  ;;  %v1806_v24 = vmax.f32 %v1367_v44, %v1678_v43  ;;  %v10778_v35 = vmax.f32 %v7039_v31, %v7258_v21  ;;  %v1791_v44 = vmax.f32 %v7452_v14, %v1663_v51  ;;  %v10780_v29 = vld [vmem:[#allocation67_spill] sm:$0xff]  ;;  %v10783_v14 = vld [vmem:[#allocation28_spill] sm:$0xff] }
 0x244   : > { %v7493_v28 = vpack.c.bf16 %v1807_v13, %v1805_v20  ;;  %v1994_v49 = vpack.c.bf16 %v10777_v59, %v10776_v46  ;;  %v1479_v18 = vadd.f32 %v10780_v29, %v6745_v52  ;;  %v1765_v2 = vmax.f32 %v7459_v38, %v1637_v63  ;;  %v10785_v20 = vld [vmem:[#allocation59_spill] sm:$0xff]  ;;  %v6068_v46 = vld [vmem:[%s10704_s5 + $0xd8] sm:$0xff] }
 0x245   : > { %v1538_v61 = vpop.f32.mrf.mxu3  ;;  %3085 = vmatpush.bf16.msra.mxu0 %v1996_v53  ;;  %v7508_v42 = vpack.c.bf16 %v10779_v57, %v10778_v35  ;;  %v7510_v0 = vpack.c.bf16 %v1806_v24, %v1804_v48  ;;  %v1767_v26 = vmax.f32 %v1486_v3, %v1639_v36  ;;  %v1736_v31 = vmax.f32 %v7283_v58, %v7380_v25  ;;  %v10786_v25 = vld [vmem:[#allocation61_spill] sm:$0xff]  ;;  %v6077_v57 = vld [vmem:[%s10440_s7 + $0x24] sm:$0xf] }
 0x246   : > { %v1369_v19 = vpop.f32.mrf.mxu2  ;;  %3257 = vmatmul.bf16.vlgmr.msra.gmra.mxu1 %v7485_v5  ;;  %v1738_v21 = vmax.f32 %v7399_v16, %v7432_v4  ;;  %v1789_v47 = vmax.f32 %v1514_v33, %v1661_v9  ;;  %v1474_v34 = vadd.f32 %v10782_v7, %v10781_v50  ;;  %v1476_v62 = vadd.f32 %v10784_v22, %v10783_v14  ;;  %v5477_v4 = vld [vmem:[%s10440_s7] sm:$0xf]  ;;  %v6075_v33 = vld [vmem:[%s10440_s7 + $0xc] sm:$0xf0]  ;;  %v10789_v9 = vld [vmem:[#allocation41_spill] sm:$0xff] }
 0x247   : > { %3925 = vmatpush.bf16.msrb.mxu1 %v2023_v54  ;;  %v1635_v52 = vmul.f32 0.2, %v7491_v45  ;;  %v1785_v38 = vmax.f32 %v7445_v56, %v1657_v37  ;;  %v1787_v3 = vmax.f32 %v7480_v55, %v1659_v40  ;;  %v1469_v58 = vadd.f32 %v10785_v20, %v6849_v39 }
 0x248   : > { %v1471_v16 = vadd.f32 %v10786_v25, %v6796_v15  ;;  %v1633_v23 = vmul.f32 0.2, %v1479_v18  ;;  %v1539_v56 = vadd.f32 %v1538_v61, %v10787_v60  ;;  %v2007_v51 = vpack.c.bf16 %v1767_v26, %v1765_v2 }
 0x249   : > { %3086 = vmatpush.bf16.msra.mxu0 %v1994_v49  ;;  %v2019_v55 = vpack.c.bf16 %v1791_v44, %v1789_v47  ;;  %v1370_v54 = vadd.f32 %v1369_v19, %v10787_v60  ;;  %v1992_v39 = vpack.c.bf16 %v1738_v21, %v1736_v31  ;;  %v1629_v43 = vmul.f32 0.2, %v1474_v34  ;;  %v5495_v44 = vld [vmem:[%s10440_s7 + $0x30] sm:$0xf0]  ;;  %v10794_v60 = vld [vmem:[#allocation37_spill] sm:$0xff] }
 0x24a   : > { %v1631_v13 = vmul.f32 0.2, %v1476_v62  ;;  %v1763_v15 = vmax.f32 %v7491_v45, %v1635_v52  ;;  %v7541_v63 = vor.u32 %v6075_v33, %v5477_v4  ;;  %v1625_v36 = vmul.f32 0.2, %v1469_v58  ;;  %v10790_v45 = vld [vmem:[#allocation56_spill] sm:$0xff]  ;;  %v10793_v4 = vld [vmem:[#allocation50_spill] sm:$0xff] }
 0x24b   : > { %3926 = vmatpush.bf16.msrb.mxu1 %v2021_v6  ;;  %v1627_v37 = vmul.f32 0.2, %v1471_v16  ;;  %v1761_v53 = vmax.f32 %v1479_v18, %v1633_v23  ;;  %v1681_v24 = vmul.f32 0.2, %v1539_v56  ;;  %v2017_v61 = vpack.c.bf16 %v1787_v3, %v1785_v38  ;;  %v5493_v33 = vld [vmem:[%s10440_s7 + $0x20] sm:$0xf] }
 0x24c   : > { %10788 = vst [vmem:[#allocation24_spill] sm:$0xff] %v7541_v63  ;;  %v1466_v59 = vadd.f32 %v10790_v45, %v6912_v27  ;;  %v1680_v49 = vmul.f32 0.2, %v1370_v54  ;;  %v1757_v29 = vmax.f32 %v1474_v34, %v1629_v43  ;;  %v1759_v18 = vmax.f32 %v1476_v62, %v1631_v13  ;;  %v10791_v27 = vld [vmem:[#allocation53_spill] sm:$0xff] }
 0x24d   : > { %v1540_v48 = vpop.f32.mrf.mxu3  ;;  %3087 = vmatpush.bf16.msra.mxu0 %v1992_v39  ;;  %v2005_v26 = vpack.c.bf16 %v1763_v15, %v1761_v53  ;;  %v1464_v19 = vadd.f32 %v10791_v27, %v6895_v10  ;;  %v1753_v31 = vmax.f32 %v1469_v58, %v1625_v36  ;;  %v1755_v21 = vmax.f32 %v1471_v16, %v1627_v37  ;;  %v10798_v15 = vld [vmem:[#allocation68_spill] sm:$0xff]  ;;  %v10799_v36 = vld [vmem:[#allocation45_spill] sm:$0xff]  ;;  %v6069_v53 = vld [vmem:[%s10704_s5 + $0xe0] sm:$0xff] }
 0x24e   : > { %v1541_v6 = vadd.f32 %v1540_v48, %v10789_v9  ;;  %v1371_v40 = vpop.f32.mrf.mxu2  ;;  %v1809_v50 = vmax.f32 %v1539_v56, %v1681_v24  ;;  %v7560_v14 = vor.u32 %v6077_v57, %v5495_v44  ;;  %v1808_v34 = vmax.f32 %v1370_v54, %v1680_v49  ;;  %v10796_v54 = vld [vmem:[#allocation48_spill] sm:$0xff] }
 0x24f   : > { %3927 = vmatpush.bf16.msrb.mxu1 %v2019_v55  ;;  %v1372_v35 = vadd.f32 %v1371_v40, %v10789_v9  ;;  %v1623_v62 = vmul.f32 0.2, %v1466_v59  ;;  %v2003_v52 = vpack.c.bf16 %v1759_v18, %v1757_v29  ;;  %v1621_v20 = vmul.f32 0.2, %v1464_v19  ;;  %v10800_v9 = vld [vmem:[#allocation33_spill] sm:$0xff] }
 0x250   : > { %v1683_v2 = vmul.f32 0.2, %v1541_v6  ;;  %3088 = vmatmul.bf16.vlgmr.msra.gmra.mxu0 %v7541_v63  ;;  %10792 = vst [vmem:[#allocation62_spill] sm:$0xff] %v7560_v14  ;;  %v2001_v25 = vpack.c.bf16 %v1755_v21, %v1753_v31  ;;  %v1449_v37 = vadd.f32 %v10799_v36, %v10798_v15  ;;  %v5511_v40 = vld [vmem:[%s10440_s7 + $0x50] sm:$0xf0]  ;;  %v1488_v21 = vpop.f32.mrf.mxu1 }
 0x251   : > { %3756 = vmatpush.bf16.msrb.mxu0 %v2007_v51  ;;  %v1682_v47 = vmul.f32 0.2, %v1372_v35  ;;  %v1751_v16 = vmax.f32 %v1466_v59, %v1623_v62  ;;  %v1749_v23 = vmax.f32 %v1464_v19, %v1621_v20  ;;  %v10795_v51 = vld [vmem:[#allocation47_spill] sm:$0xff]  ;;  %v10801_v59 = vld [vmem:[#allocation52_spill] sm:$0xff]  ;;  %v5509_v19 = vld [vmem:[%s10440_s7 + $0x40] sm:$0xf] }
 0x252   : > { %v1811_v7 = vmax.f32 %v1541_v6, %v1683_v2  ;;  %5470 = vmatmul.msk.bf16.gmra.mxu3 %vm1166_vm6, %v6068_v46  ;;  %v1451_v55 = vadd.f32 %v10795_v51, %v7312_v8  ;;  %v6081_v8 = vld [vmem:[%s10440_s7 + $0x44] sm:$0xf]  ;;  %v1609_v45 = vmul.f32 0.2, %v1449_v37  ;;  %v6083_v31 = vld [vmem:[%s10440_s7 + $0x4c] sm:$0xf0] }
 0x253   : > { %3928 = vmatpush.bf16.msrb.mxu1 %v2017_v61  ;;  %5438 = vmatmul.msk.bf16.gmra.mxu2 %vm1166_vm6, %v6068_v46  ;;  %v1810_v22 = vmax.f32 %v1372_v35, %v1682_v47  ;;  %v1999_v39 = vpack.c.bf16 %v1751_v16, %v1749_v23  ;;  %v7597_v49 = vor.u32 %v6081_v8, %v5511_v40  ;;  %v6070_v20 = vld [vmem:[%s10704_s5 + $0xe8] sm:$0xff] }
 0x254   : > { %v7564_v38 = vpack.c.bf16 %v1811_v7, %v1809_v50  ;;  %v1611_v61 = vmul.f32 0.2, %v1451_v55  ;;  %v1737_v2 = vmax.f32 %v1449_v37, %v1609_v45  ;;  %v7614_v47 = vor.u32 %v6083_v31, %v5509_v19  ;;  %v10804_v50 = vld [vmem:[#allocation69_spill] sm:$0xff]  ;;  %v6089_v45 = vld [vmem:[%s10440_s7 + $0x84] sm:$0xf] }
 0x255   : > { %3757 = vmatpush.bf16.msrb.mxu0 %v2005_v26  ;;  %v1543_v10 = vpop.f32.mrf.mxu3  ;;  %v7566_v3 = vpack.c.bf16 %v1810_v22, %v1808_v34  ;;  %10802 = vst [vmem:[#allocation64_spill] sm:$0xff] %v7597_v49  ;;  %v1529_v7 = vadd.f32 %v10804_v50, %v7255_v17  ;;  %v5541_v31 = vld [vmem:[%s10440_s7 + $0x80] sm:$0xf] }
 0x256   : > { %v1374_v58 = vpop.f32.mrf.mxu2  ;;  %3262 = vmatmul.bf16.gmra.mxu1 %v7560_v14  ;;  %v1739_v44 = vmax.f32 %v1451_v55, %v1611_v61  ;;  %10803 = vst [vmem:[#allocation42_spill] sm:$0xff] %v7614_v47  ;;  %v1544_v22 = vadd.f32 %v1543_v10, %v10794_v60  ;;  %v5573_v14 = vld [vmem:[%s10440_s7 + $0xc0] sm:$0xf] }
 0x257   : > { %3929 = vmatpush.bf16.msrb.mxu1 %v7375_v12  ;;  %v6079_v12 = vld [vmem:[%s10440_s7 + $0x2c] sm:$0xf0]  ;;  %v1375_v56 = vadd.f32 %v1374_v58, %v10794_v60  ;;  %v6085_v58 = vld [vmem:[%s10440_s7 + $0x64] sm:$0xf]  ;;  %v1673_v17 = vmul.f32 0.2, %v1529_v7 }
 0x258   : > { %v7580_v43 = vor.u32 %v6079_v12, %v5493_v33  ;;  %v1993_v27 = vpack.c.bf16 %v1739_v44, %v1737_v2  ;;  %v1685_v10 = vmul.f32 0.2, %v1544_v22  ;;  %v1490_v33 = vpop.f32.mrf.mxu1  ;;  %v1489_v12 = vadd.f32 %v1488_v21, %v7366_v11  ;;  %v5525_v11 = vld [vmem:[%s10440_s7 + $0x60] sm:$0xf]  ;;  %v6091_v21 = vld [vmem:[%s10440_s7 + $0x8c] sm:$0xf0] }
 0x259   : > { %3758 = vmatpush.bf16.msrb.mxu0 %v2003_v52  ;;  %v1684_v24 = vmul.f32 0.2, %v1375_v56  ;;  %v1491_v23 = vadd.f32 %v1490_v33, %v7426_v1  ;;  %v1801_v60 = vmax.f32 %v1529_v7, %v1673_v17  ;;  %v6087_v1 = vld [vmem:[%s10440_s7 + $0x6c] sm:$0xf0]  ;;  %v7696_v50 = vor.u32 %v6091_v21, %v5541_v31  ;;  %v6097_v31 = vld [vmem:[%s10440_s7 + $0xc4] sm:$0xf] }
 0x25a   : > { %10797 = vst [vmem:[#allocation19_spill] sm:$0xff] %v7580_v43  ;;  %v1813_v55 = vmax.f32 %v1544_v22, %v1685_v10  ;;  %v5575_v21 = vld [vmem:[%s10440_s7 + $0xd0] sm:$0xf0] }
 0x25b   : > { %3930 = vmatpush.bf16.msrb.mxu1 %v10793_v4  ;;  %v1812_v35 = vmax.f32 %v1375_v56, %v1684_v24  ;;  %v7640_v4 = vpop.permute.xlu1 %2197  ;;  %v1643_v15 = vmul.f32 0.2, %v1491_v23  ;;  %10813 = vst [vmem:[#allocation57_spill] sm:$0xff] %v7696_v50 }
 0x25c   : > { %10806 = vst [vmem:[#allocation54_spill] sm:$0xff] %v7640_v4 }
 0x25d   : > { %3759 = vmatpush.bf16.msrb.mxu0 %v2001_v25  ;;  %v1545_v13 = vpop.f32.mrf.mxu3  ;;  %v1771_v37 = vmax.f32 %v1491_v23, %v1643_v15  ;;  %v5557_v23 = vld [vmem:[%s10440_s7 + $0xa0] sm:$0xf] }
 0x25e   : > { %v1376_v48 = vpop.f32.mrf.mxu2  ;;  %v1546_v62 = vadd.f32 %v1545_v13, %v10800_v9  ;;  %v1641_v13 = vmul.f32 0.2, %v1489_v12  ;;  %v10823_v15 = vld [vmem:[#allocation14_spill] sm:$0xff] }
 0x25f   : > { %3931 = vmatpush.bf16.msrb.mxu1 %v10796_v54  ;;  %v1377_v6 = vadd.f32 %v1376_v48, %v10800_v9  ;;  %v7659_v9 = vpop.permute.xlu2 %2272 }
 0x260   : > { %3093 = vmatmul.bf16.gmra.mxu0 %v7580_v43  ;;  %v1687_v25 = vmul.f32 0.2, %v1546_v62  ;;  %v1769_v36 = vmax.f32 %v1489_v12, %v1641_v13  ;;  %10807 = vst [vmem:[#allocation31_spill] sm:$0xff] %v7659_v9 }
 0x261   : > { %3760 = vmatpush.bf16.msrb.mxu0 %v1999_v39  ;;  %v1686_v46 = vmul.f32 0.2, %v1377_v6 }
 0x262   : > { %5471 = vmatmul.msk.bf16.gmra.mxu3 %vm1166_vm6, %v6069_v53  ;;  %v1815_v54 = vmax.f32 %v1546_v62, %v1687_v25  ;;  %v6072_v62 = vld [vmem:[%s10704_s5 + $0xf8] sm:$0xff] }
 0x263   : > { %5439 = vmatmul.msk.bf16.gmra.mxu2 %vm1166_vm6, %v6069_v53  ;;  %v1814_v57 = vmax.f32 %v1377_v6, %v1686_v46  ;;  %v2009_v53 = vpack.c.bf16 %v1771_v37, %v1769_v36  ;;  %v7661_v6 = vor.u32 %v6087_v1, %v5525_v11  ;;  %v7665_v40 = vpop.permute.xlu1 %2182  ;;  %v6071_v46 = vld [vmem:[%s10704_s5 + $0xf0] sm:$0xff] }
 0x264   : > { %v7655_v48 = vpack.c.bf16 %v1815_v54, %v1813_v55  ;;  %10809 = vst [vmem:[#allocation44_spill] sm:$0xff] %v7665_v40  ;;  %v10821_v55 = vld [vmem:[#allocation10_spill] sm:$0xff]  ;;  %v10824_v1 = vld [vmem:[#allocation20_spill] sm:$0xff] }
 0x265   : > { %3761 = vmatpush.bf16.msrb.mxu0 %v10801_v59  ;;  %v7600_v29 = vpop.f32.mrf.mxu3  ;;  %v7602_v18 = vpack.c.bf16 %v1814_v57, %v1812_v35  ;;  %10808 = vst [vmem:[#allocation60_spill] sm:$0xff] %v7661_v6  ;;  %3932 = vmatpush.bf16.msrb.mxu1 %v2009_v53  ;;  %v5543_v59 = vld [vmem:[%s10440_s7 + $0x90] sm:$0xf0]  ;;  %v7680_v57 = vpop.permute.xlu0 %933 }
 0x266   : > { %v7604_v26 = vpop.f32.mrf.mxu2  ;;  %3267 = vmatmul.bf16.gmra.mxu1 %v7597_v49  ;;  %v7678_v35 = vor.u32 %v6089_v45, %v5543_v59  ;;  %v10825_v45 = vld [vmem:[#allocation15_spill] sm:$0xff] }
 0x267   : > { %v7683_v44 = vpop.permute.xlu2 %2187 }
 0x268   : > { %10810 = vst [vmem:[#allocation30_spill] sm:$0xff] %v7678_v35 }
 0x269   : > { %3762 = vmatpush.bf16.msrb.mxu0 %v7508_v42  ;;  %v1531_v42 = vadd.f32 %v7335_v41, %v7275_v30  ;;  %v5527_v30 = vld [vmem:[%s10440_s7 + $0x70] sm:$0xf0]  ;;  %10811 = vst [vmem:[#allocation58_spill] sm:$0xff] %v7683_v44 }
 0x26a   : > { %v7637_v16 = vor.u32 %v6085_v58, %v5527_v30  ;;  %v6093_v58 = vld [vmem:[%s10440_s7 + $0xa4] sm:$0xf]  ;;  %v5559_v30 = vld [vmem:[%s10440_s7 + $0xb0] sm:$0xf0] }
 0x26b   : > { %v1675_v41 = vmul.f32 0.2, %v1531_v42  ;;  %v7688_v19 = vpop.permute.xlu1 %2267 }
 0x26c   : > { %10805 = vst [vmem:[#allocation51_spill] sm:$0xff] %v7637_v16 }
 0x26d   : > { %3763 = vmatpush.bf16.msrb.mxu0 %v1993_v27  ;;  %v7620_v34 = vpop.f32.mrf.mxu3  ;;  %v1803_v56 = vmax.f32 %v1531_v42, %v1675_v41  ;;  %10812 = vst [vmem:[#allocation49_spill] sm:$0xff] %v7688_v19  ;;  %v7698_v7 = vpop.permute.xlu0 %2192  ;;  %v7717_v41 = vor.u32 %v6093_v58, %v5559_v30 }
 0x26e   : > { %v7624_v52 = vpop.f32.mrf.mxu2  ;;  %10814 = vst [vmem:[#allocation67_spill] sm:$0xff] %v7698_v7 }
 0x26f   : > { %v7657_v24 = vpack.c.bf16 %v1803_v56, %v1801_v60  ;;  %10817 = vst [vmem:[#allocation28_spill] sm:$0xff] %v7717_v41  ;;  %v6095_v60 = vld [vmem:[%s10440_s7 + $0xac] sm:$0xf0] }
 0x270   : > { %3098 = vmatmul.bf16.gmra.mxu0 %v7614_v47  ;;  %v7736_v13 = vor.u32 %v6095_v60, %v5557_v23  ;;  %v10829_v23 = vld [vmem:[#allocation25_spill] sm:$0xff] }
 0x272   : > { %5472 = vmatmul.msk.bf16.gmra.mxu3 %vm1166_vm6, %v6070_v20  ;;  %10822 = vst [vmem:[#allocation39_spill] sm:$0xff] %v7736_v13 }
 0x273   : > { %5440 = vmatmul.msk.bf16.gmra.mxu2 %vm1166_vm6, %v6070_v20  ;;  %v7705_v20 = vpop.permute.xlu2 %2172  ;;  %v7714_v17 = vpop.permute.xlu1 %2252 }
 0x274   : > { %10815 = vst [vmem:[#allocation21_spill] sm:$0xff] %v7705_v20 }
 0x275   : > { %v7644_v51 = vpop.f32.mrf.mxu3  ;;  %10816 = vst [vmem:[#allocation63_spill] sm:$0xff] %v7714_v17  ;;  %v7723_v33 = vpop.permute.xlu0 %2277 }
 0x276   : > { %v7646_v39 = vpop.f32.mrf.mxu2  ;;  %3272 = vmatmul.bf16.gmra.mxu1 %v7637_v16  ;;  %10818 = vst [vmem:[#allocation65_spill] sm:$0xff] %v7723_v33 }
 0x277   : > { %v1385_v60 = vadd.f32 %v7646_v39, %v10829_v23  ;;  %v10834_v39 = vld [vmem:[#allocation26_spill] sm:$0xff] }
 0x27b   : > { %v7725_v12 = vpop.permute.xlu2 %2257  ;;  %v7733_v56 = vpop.permute.xlu1 %2167 }
 0x27c   : > { %10819 = vst [vmem:[#allocation59_spill] sm:$0xff] %v7725_v12 }
 0x27d   : > { %v7663_v8 = vpop.f32.mrf.mxu3  ;;  %10820 = vst [vmem:[#allocation61_spill] sm:$0xff] %v7733_v56 }
 0x27e   : > { %v1386_v61 = vpop.f32.mrf.mxu2 }
 0x280   : > { %3103 = vmatmul.bf16.gmra.mxu0 %v7661_v6  ;;  %v10831_v6 = vld [vmem:[#allocation32_spill] sm:$0xff] }
 0x281   : > { %v1382_v16 = vadd.f32 %v7624_v52, %v10831_v6 }
 0x282   : > { %5473 = vmatmul.msk.bf16.gmra.mxu3 %vm1166_vm6, %v6071_v46 }
 0x283   : > { %5441 = vmatmul.msk.bf16.gmra.mxu2 %vm1166_vm6, %v6071_v46  ;;  %v7759_v47 = vpop.permute.xlu1 %2152 }
 0x284   : > { %10832 = vst [vmem:[#allocation50_spill] sm:$0xff] %v7759_v47 }
 0x285   : > { %v7685_v2 = vpop.f32.mrf.mxu3 }
 0x286   : > { %v1389_v27 = vpop.f32.mrf.mxu2  ;;  %3277 = vmatmul.bf16.gmra.mxu1 %v7678_v35 }
 0x287   : > { %v1390_v53 = vadd.f32 %v1389_v27, %v10824_v1  ;;  %v7751_v27 = vor.u32 %v6097_v31, %v5575_v21 }
 0x289   : > { %10828 = vst [vmem:[#allocation56_spill] sm:$0xff] %v7751_v27 }
 0x28d   : > { %v7700_v42 = vpop.f32.mrf.mxu3 }
 0x28e   : > { %v1391_v22 = vpop.f32.mrf.mxu2 }
 0x28f   : > { %v1392_v36 = vadd.f32 %v1391_v22, %v10823_v15  ;;  %v10827_v22 = vld [vmem:[#allocation27_spill] sm:$0xff] }
 0x290   : > { %3108 = vmatmul.bf16.gmra.mxu0 %v7696_v50  ;;  %v1387_v58 = vadd.f32 %v1386_v61, %v10827_v22  ;;  %v7755_v50 = vpop.permute.xlu2 %2242 }
 0x291   : > { %v1698_v30 = vmul.f32 0.2, %v1392_v36  ;;  %10830 = vst [vmem:[#allocation53_spill] sm:$0xff] %v7755_v50 }
 0x292   : > { %5474 = vmatmul.msk.bf16.gmra.mxu3 %vm1166_vm6, %v6072_v62 }
 0x293   : > { %5442 = vmatmul.msk.bf16.gmra.mxu2 %vm1166_vm6, %v6072_v62  ;;  %v7748_v62 = vpop.permute.xlu0 %2262  ;;  %v1826_v43 = vmax.f32 %v1392_v36, %v1698_v30 }
 0x294   : > { %10826 = vst [vmem:[#allocation41_spill] sm:$0xff] %v7748_v62 }
 0x295   : > { %v7720_v10 = vpop.f32.mrf.mxu3 }
 0x296   : > { %v1394_v25 = vpop.f32.mrf.mxu2  ;;  %3282 = vmatmul.bf16.gmra.mxu1 %v7717_v41 }
 0x297   : > { %v1395_v54 = vadd.f32 %v1394_v25, %v10821_v55 }
 0x299   : > { %v1700_v46 = vmul.f32 0.2, %v1395_v54 }
 0x29b   : > { %v1828_v41 = vmax.f32 %v1395_v54, %v1700_v46  ;;  %v1380_v54 = vadd.f32 %v7604_v26, %v10834_v39  ;;  %v1692_v46 = vmul.f32 0.2, %v1385_v60 }
 0x29d   : > { %v1565_v37 = vpop.f32.mrf.mxu3  ;;  %v1688_v36 = vmul.f32 0.2, %v1380_v54  ;;  %v1820_v30 = vmax.f32 %v1385_v60, %v1692_v46 }
 0x29e   : > { %v1396_v11 = vpop.f32.mrf.mxu2 }
 0x29f   : > { %v1397_v59 = vadd.f32 %v1396_v11, %v10825_v45  ;;  %v1696_v11 = vmul.f32 0.2, %v1390_v53 }
 0x2a0   : > { %3113 = vmatmul.bf16.gmra.mxu0 %v7736_v13  ;;  %v1694_v13 = vmul.f32 0.2, %v1387_v58 }
 0x2a1   : > { %v1702_v25 = vmul.f32 0.2, %v1397_v59  ;;  %v1824_v21 = vmax.f32 %v1390_v53, %v1696_v11  ;;  %v7778_v53 = vpop.permute.xlu2 %2157 }
 0x2a2   : > { %v1822_v52 = vmax.f32 %v1387_v58, %v1694_v13  ;;  %10837 = vst [vmem:[#allocation68_spill] sm:$0xff] %v7778_v53 }
 0x2a3   : > { %v1830_v35 = vmax.f32 %v1397_v59, %v1702_v25  ;;  %v1690_v59 = vmul.f32 0.2, %v1382_v16  ;;  %v2036_v25 = vpack.c.bf16 %v1826_v43, %v1824_v21  ;;  %v7784_v21 = vpop.permute.xlu1 %2237 }
 0x2a4   : > { %v2034_v43 = vpack.c.bf16 %v1822_v52, %v1820_v30  ;;  %10838 = vst [vmem:[#allocation45_spill] sm:$0xff] %v7784_v21  ;;  %v1561_v30 = vadd.f32 %v7700_v42, %v10823_v15  ;;  %v5485_v42 = vld [vmem:[%s10440_s7 + $0x8] sm:$0xf] }
 0x2a5   : > { %v7761_v49 = vpop.f32.mrf.mxu3  ;;  %v2038_v61 = vpack.c.bf16 %v1830_v35, %v1828_v41  ;;  %v6099_v35 = vld [vmem:[%s10440_s7 + $0xcc] sm:$0xf0]  ;;  %v7774_v41 = vpop.permute.xlu0 %2177  ;;  %v1818_v13 = vmax.f32 %v1382_v16, %v1690_v59  ;;  %v1566_v59 = vadd.f32 %v1565_v37, %v10825_v45  ;;  %v5589_v37 = vld [vmem:[%s10440_s7 + $0xe0] sm:$0xf] }
 0x2a6   : > { %10833 = vst [vmem:[#allocation37_spill] sm:$0xff] %v7761_v49  ;;  %v7763_v31 = vpop.f32.mrf.mxu2  ;;  %3287 = vmatmul.bf16.gmra.mxu1 %v7751_v27  ;;  %v7776_v26 = vor.u32 %v6099_v35, %v5573_v14  ;;  %v6101_v27 = vld [vmem:[%s10440_s7 + $0xe4] sm:$0xf]  ;;  %v5591_v14 = vld [vmem:[%s10440_s7 + $0xf0] sm:$0xf0]  ;;  %v1564_v35 = vadd.f32 %v7720_v10, %v10821_v55  ;;  %v10889_v49 = vld [vmem:[#allocation35_spill] sm:$0xff] }
 0x2a7   : > { %3418 = vmatpush.bf16.msrb.mxu2 %v2038_v61  ;;  %10835 = vst [vmem:[#allocation47_spill] sm:$0xff] %v7774_v41  ;;  %v1816_v61 = vmax.f32 %v1380_v54, %v1688_v36  ;;  %v7793_v46 = vor.u32 %v6101_v27, %v5591_v14  ;;  %v1559_v27 = vadd.f32 %v7685_v2, %v10824_v1  ;;  %v6103_v45 = vld [vmem:[%s10440_s7 + $0xec] sm:$0xf0] }
 0x2a8   : > { %10836 = vst [vmem:[#allocation48_spill] sm:$0xff] %v7776_v26  ;;  %v1701_v10 = vmul.f32 0.2, %v1564_v35  ;;  %v7821_v55 = vor.u32 %v6103_v45, %v5589_v37  ;;  %v1556_v2 = vadd.f32 %v7663_v8, %v10827_v22  ;;  %v6105_v8 = vld [vmem:[%s10440_s7 + $0x104] sm:$0xf]  ;;  %v1551_v37 = vadd.f32 %v7620_v34, %v10831_v6 }
 0x2a9   : > { %v2032_v60 = vpack.c.bf16 %v1818_v13, %v1816_v61  ;;  %10839 = vst [vmem:[#allocation33_spill] sm:$0xff] %v7793_v46  ;;  %v7803_v52 = vpop.permute.xlu2 %2142  ;;  %v1697_v1 = vmul.f32 0.2, %v1559_v27  ;;  %v1699_v13 = vmul.f32 0.2, %v1561_v30 }
 0x2aa   : > { %10841 = vst [vmem:[#allocation69_spill] sm:$0xff] %v7803_v52  ;;  %v5607_v22 = vld [vmem:[%s10440_s7 + $0x110] sm:$0xf0]  ;;  %v1695_v45 = vmul.f32 0.2, %v1556_v2 }
 0x2ab   : > { %3419 = vmatpush.bf16.msrb.mxu2 %v2036_v25  ;;  %v7810_v36 = vpop.permute.xlu1 %2222  ;;  %10843 = vst [vmem:[#allocation14_spill] sm:$0xff] %v7821_v55  ;;  %v7855_v33 = vor.u32 %v6105_v8, %v5607_v22  ;;  %v1691_v6 = vmul.f32 0.2, %v1551_v37 }
 0x2ac   : > { %10842 = vst [vmem:[#allocation10_spill] sm:$0xff] %v7810_v36 }
 0x2ad   : > { %v7780_v11 = vpop.f32.mrf.mxu3  ;;  %v7795_v16 = vpop.permute.xlu0 %2162  ;;  %10847 = vst [vmem:[#allocation25_spill] sm:$0xff] %v7855_v33 }
 0x2ae   : > { %v7782_v58 = vpop.f32.mrf.mxu2  ;;  %10840 = vst [vmem:[#allocation52_spill] sm:$0xff] %v7795_v16 }
 0x2af   : > { %3420 = vmatpush.bf16.msrb.mxu2 %v2034_v43 }
 0x2b0   : > { %3118 = vmatmul.bf16.gmra.mxu0 %v7776_v26  ;;  %v1827_v26 = vmax.f32 %v1561_v30, %v1699_v13  ;;  %v1819_v13 = vmax.f32 %v1551_v37, %v1691_v6 }
 0x2b3   : > { %3421 = vmatpush.bf16.msrb.mxu2 %v2032_v60  ;;  %v1554_v60 = vadd.f32 %v7644_v51, %v10829_v23  ;;  %v7857_v51 = vpop.permute.xlu1 %2137 }
 0x2b4   : > { %10848 = vst [vmem:[#allocation32_spill] sm:$0xff] %v7857_v51 }
 0x2b5   : > { %v7797_v54 = vpop.f32.mrf.mxu3  ;;  %v7832_v15 = vpop.permute.xlu0 %2247 }
 0x2b6   : > { %v7800_v25 = vpop.f32.mrf.mxu2  ;;  %3292 = vmatmul.bf16.gmra.mxu1 %v7793_v46  ;;  %10844 = vst [vmem:[#allocation20_spill] sm:$0xff] %v7832_v15  ;;  %v7851_v46 = vpop.permute.xlu2 %2227 }
 0x2b7   : > { %3422 = vmatpush.bf16.msrb.mxu2 %v7602_v18  ;;  %v1703_v18 = vmul.f32 0.2, %v1566_v59  ;;  %10845 = vst [vmem:[#allocation15_spill] sm:$0xff] %v7851_v46 }
 0x2b9   : > { %v1831_v61 = vmax.f32 %v1566_v59, %v1703_v18  ;;  %v1829_v59 = vmax.f32 %v1564_v35, %v1701_v10  ;;  %v1825_v18 = vmax.f32 %v1559_v27, %v1697_v1  ;;  %v1693_v35 = vmul.f32 0.2, %v1554_v60 }
 0x2bb   : > { %3423 = vmatpush.bf16.msrb.mxu2 %v7566_v3  ;;  %v6076_v3 = vld [vmem:[%s10440_s7 + $0x14] sm:$0xf0]  ;;  %v2039_v63 = vpack.c.bf16 %v1831_v61, %v1829_v59  ;;  %v2037_v30 = vpack.c.bf16 %v1827_v26, %v1825_v18  ;;  %v1821_v10 = vmax.f32 %v1554_v60, %v1693_v35  ;;  %v7878_v8 = vpop.permute.xlu1 %2122  ;;  %v6109_v35 = vld [vmem:[%s10440_s7 + $0x124] sm:$0xf] }
 0x2bc   : > { %v7853_v5 = vor.u32 %v6076_v3, %v5485_v42  ;;  %10852 = vst [vmem:[#allocation73_spill] sm:$0xff] %v7878_v8  ;;  %v6080_v18 = vld [vmem:[%s10440_s7 + $0x34] sm:$0xf0] }
 0x2bd   : > { %v7825_v43 = vpop.f32.mrf.mxu3  ;;  %v7866_v1 = vpop.permute.xlu0 %2232 }
 0x2be   : > { %v7827_v14 = vpop.f32.mrf.mxu2  ;;  %10846 = vst [vmem:[#allocation27_spill] sm:$0xff] %v7853_v5  ;;  %v7874_v42 = vpop.permute.xlu2 %2212 }
 0x2bf   : > { %3424 = vmatpush.bf16.msrb.mxu2 %v7510_v0  ;;  %v1549_v0 = vadd.f32 %v7600_v29, %v10834_v39  ;;  %v1823_v39 = vmax.f32 %v1556_v2, %v1695_v45  ;;  %10849 = vst [vmem:[#allocation26_spill] sm:$0xff] %v7866_v1 }
 0x2c0   : > { %3123 = vmatmul.bf16.gmra.mxu0 %v7821_v55  ;;  %10850 = vst [vmem:[#allocation71_spill] sm:$0xff] %v7874_v42 }
 0x2c1   : > { %v1689_v34 = vmul.f32 0.2, %v1549_v0  ;;  %v2035_v61 = vpack.c.bf16 %v1823_v39, %v1821_v10 }
 0x2c3   : > { %3425 = vmatpush.bf16.msrb.mxu2 %v7395_v32  ;;  %v3258_v23 = vpop.f32.mrf.mxu1  ;;  %v5605_v32 = vld [vmem:[%s10440_s7 + $0x100] sm:$0xf]  ;;  %v1817_v2 = vmax.f32 %v1549_v0, %v1689_v34  ;;  %v5501_v0 = vld [vmem:[%s10440_s7 + $0x28] sm:$0xf]  ;;  %v5623_v34 = vld [vmem:[%s10440_s7 + $0x130] sm:$0xf0] }
 0x2c4   : > { %v7900_v39 = vor.u32 %v6080_v18, %v5501_v0 }
 0x2c5   : > { %v7860_v29 = vpop.f32.mrf.mxu3  ;;  %v2033_v45 = vpack.c.bf16 %v1819_v13, %v1817_v2  ;;  %v7904_v10 = vpop.permute.xlu0 %2147 }
 0x2c6   : > { %v7862_v27 = vpop.f32.mrf.mxu2  ;;  %3426 = vmatmul.bf16.vlgmr.msrb.gmra.mxu2 %v7853_v5  ;;  %3297 = vmatmul.bf16.gmra.mxu1 %v7855_v33  ;;  %10853 = vst [vmem:[#allocation74_spill] sm:$0xff] %v7900_v39 }
 0x2c7   : > { %4094 = vmatpush.bf16.msra.mxu2 %v2039_v63  ;;  %v6107_v63 = vld [vmem:[%s10440_s7 + $0x10c] sm:$0xf0]  ;;  %10855 = vst [vmem:[#allocation76_spill] sm:$0xff] %v7904_v10 }
 0x2c8   : > { %v7876_v3 = vor.u32 %v6107_v63, %v5605_v32  ;;  %v7907_v63 = vpop.permute.xlu2 %2127 }
 0x2c9   : > { %10856 = vst [vmem:[#allocation77_spill] sm:$0xff] %v7907_v63 }
 0x2ca   : > { %10851 = vst [vmem:[#allocation72_spill] sm:$0xff] %v7876_v3 }
 0x2cb   : > { %4095 = vmatpush.bf16.msra.mxu2 %v2037_v30  ;;  %v3260_v26 = vpop.f32.mrf.mxu1  ;;  %v7902_v30 = vor.u32 %v6109_v35, %v5623_v34  ;;  %v5517_v34 = vld [vmem:[%s10440_s7 + $0x48] sm:$0xf] }
 0x2cd   : > { %v3089_v22 = vpop.f32.mrf.mxu0  ;;  %v7886_v37 = vpop.f32.mrf.mxu3  ;;  %10854 = vst [vmem:[#allocation75_spill] sm:$0xff] %v7902_v30 }
 0x2ce   : > { %v3090_v60 = vadd.f32 %v3089_v22, %v7878_v8  ;;  %v7881_v59 = vpop.f32.mrf.mxu2  ;;  %v7928_v18 = vpop.permute.xlu0 %2132 }
 0x2cf   : > { %4096 = vmatpush.bf16.msra.mxu2 %v2035_v61  ;;  %10859 = vst [vmem:[#allocation80_spill] sm:$0xff] %v7928_v18 }
 0x2d0   : > { %v7897_v6 = vadd.f32 %v3258_v23, %v3090_v60  ;;  %3128 = vmatmul.bf16.gmra.mxu0 %v7876_v3  ;;  %v6111_v60 = vld [vmem:[%s10440_s7 + $0x12c] sm:$0xf0] }
 0x2d3   : > { %4097 = vmatpush.bf16.msra.mxu2 %v2033_v45  ;;  %v3263_v32 = vpop.f32.mrf.mxu1 }
 0x2d5   : > { %v3091_v2 = vpop.f32.mrf.mxu0  ;;  %v7917_v22 = vpop.f32.mrf.mxu3 }
 0x2d6   : > { %v3092_v13 = vadd.f32 %v3091_v2, %v7907_v63  ;;  %v7910_v61 = vpop.f32.mrf.mxu2  ;;  %3431 = vmatmul.bf16.gmra.mxu2 %v7900_v39  ;;  %3302 = vmatmul.bf16.gmra.mxu1 %v7902_v30  ;;  %v6084_v2 = vld [vmem:[%s10440_s7 + $0x54] sm:$0xf0] }
 0x2d7   : > { %4098 = vmatpush.bf16.msra.mxu2 %v7655_v48  ;;  %v5621_v48 = vld [vmem:[%s10440_s7 + $0x120] sm:$0xf] }
 0x2d8   : > { %v7914_v23 = vadd.f32 %v3260_v26, %v3092_v13  ;;  %v7926_v0 = vor.u32 %v6111_v60, %v5621_v48  ;;  %v5639_v13 = vld [vmem:[%s10440_s7 + $0x150] sm:$0xf0]  ;;  %v7949_v60 = vor.u32 %v6084_v2, %v5517_v34 }
 0x2da   : > { %10857 = vst [vmem:[#allocation78_spill] sm:$0xff] %v7914_v23 }
 0x2db   : > { %4099 = vmatpush.bf16.msra.mxu2 %v7564_v38  ;;  %v3265_v45 = vpop.f32.mrf.mxu1  ;;  %10858 = vst [vmem:[#allocation79_spill] sm:$0xff] %v7926_v0 }
 0x2dc   : > { %10861 = vst [vmem:[#allocation82_spill] sm:$0xff] %v7949_v60 }
 0x2dd   : > { %v3094_v26 = vpop.f32.mrf.mxu0 }
 0x2de   : > { %v3095_v38 = vadd.f32 %v3094_v26, %v7928_v18  ;;  %v7931_v35 = vpop.f32.mrf.mxu2  ;;  %v7953_v18 = vpop.f32.mrf.mxu3 }
 0x2df   : > { %4100 = vmatpush.bf16.msra.mxu2 %v7493_v28  ;;  %v6113_v28 = vld [vmem:[%s10440_s7 + $0x144] sm:$0xf] }
 0x2e0   : > { %v7945_v48 = vadd.f32 %v3263_v32, %v3095_v38  ;;  %3133 = vmatmul.bf16.gmra.mxu0 %v7926_v0  ;;  %v7951_v26 = vor.u32 %v6113_v28, %v5639_v13  ;;  %v6115_v38 = vld [vmem:[%s10440_s7 + $0x14c] sm:$0xf0] }
 0x2e2   : > { %10860 = vst [vmem:[#allocation81_spill] sm:$0xff] %v7945_v48 }
 0x2e3   : > { %4101 = vmatpush.bf16.msra.mxu2 %v7657_v24  ;;  %10862 = vst [vmem:[#allocation83_spill] sm:$0xff] %v7951_v26  ;;  %v3268_v30 = vpop.f32.mrf.mxu1  ;;  %v5637_v24 = vld [vmem:[%s10440_s7 + $0x140] sm:$0xf] }
 0x2e4   : > { %v7968_v2 = vor.u32 %v6115_v38, %v5637_v24  ;;  %v6117_v24 = vld [vmem:[%s10440_s7 + $0x164] sm:$0xf]  ;;  %v5655_v38 = vld [vmem:[%s10440_s7 + $0x170] sm:$0xf0] }
 0x2e5   : > { %v3096_v39 = vpop.f32.mrf.mxu0 }
 0x2e6   : > { %v3097_v63 = vadd.f32 %v3096_v39, %v7857_v51  ;;  %v7956_v3 = vpop.f32.mrf.mxu2  ;;  %3436 = vmatmul.bf16.gmra.mxu2 %v7949_v60  ;;  %3307 = vmatmul.bf16.gmra.mxu1 %v7951_v26  ;;  %10864 = vst [vmem:[#allocation85_spill] sm:$0xff] %v7968_v2  ;;  %v7970_v39 = vpop.f32.mrf.mxu3 }
 0x2e8   : > { %v7960_v32 = vadd.f32 %v3265_v45, %v3097_v63  ;;  %v5533_v63 = vld [vmem:[%s10440_s7 + $0x68] sm:$0xf]  ;;  %v6088_v45 = vld [vmem:[%s10440_s7 + $0x74] sm:$0xf0] }
 0x2ea   : > { %10863 = vst [vmem:[#allocation84_spill] sm:$0xff] %v7960_v32 }
 0x2eb   : > { %v3270_v34 = vpop.f32.mrf.mxu1 }
 0x2ed   : > { %v3099_v28 = vpop.f32.mrf.mxu0 }
 0x2ee   : > { %v3100_v13 = vadd.f32 %v3099_v28, %v7803_v52  ;;  %v7973_v60 = vpop.f32.mrf.mxu2  ;;  %v7990_v28 = vor.u32 %v6088_v45, %v5533_v63  ;;  %v7992_v52 = vor.u32 %v6117_v24, %v5655_v38  ;;  %v7999_v5 = vpop.f32.mrf.mxu3  ;;  %v6119_v63 = vld [vmem:[%s10440_s7 + $0x16c] sm:$0xf0] }
 0x2f0   : > { %v7987_v26 = vadd.f32 %v3268_v30, %v3100_v13  ;;  %3138 = vmatmul.bf16.gmra.mxu0 %v7968_v2  ;;  %10866 = vst [vmem:[#allocation87_spill] sm:$0xff] %v7990_v28  ;;  %v5653_v13 = vld [vmem:[%s10440_s7 + $0x160] sm:$0xf] }
 0x2f1   : > { %10867 = vst [vmem:[#allocation88_spill] sm:$0xff] %v7992_v52 }
 0x2f2   : > { %10865 = vst [vmem:[#allocation86_spill] sm:$0xff] %v7987_v26 }
 0x2f3   : > { %v3273_v51 = vpop.f32.mrf.mxu1 }
 0x2f5   : > { %v3101_v0 = vpop.f32.mrf.mxu0 }
 0x2f6   : > { %v3102_v8 = vadd.f32 %v3101_v0, %v7904_v10  ;;  %v7995_v33 = vpop.f32.mrf.mxu2  ;;  %3441 = vmatmul.bf16.gmra.mxu2 %v7990_v28  ;;  %3312 = vmatmul.bf16.gmra.mxu1 %v7992_v52  ;;  %v8009_v0 = vor.u32 %v6119_v63, %v5653_v13  ;;  %v6121_v52 = vld [vmem:[%s10440_s7 + $0x184] sm:$0xf]  ;;  %v5671_v13 = vld [vmem:[%s10440_s7 + $0x190] sm:$0xf0] }
 0x2f7   : > { %v8031_v10 = vor.u32 %v6121_v52, %v5671_v13  ;;  %v6123_v52 = vld [vmem:[%s10440_s7 + $0x18c] sm:$0xf0] }
 0x2f8   : > { %v8001_v30 = vadd.f32 %v3270_v34, %v3102_v8  ;;  %10869 = vst [vmem:[#allocation90_spill] sm:$0xff] %v8009_v0  ;;  %v5549_v8 = vld [vmem:[%s10440_s7 + $0x88] sm:$0xf]  ;;  %v6092_v34 = vld [vmem:[%s10440_s7 + $0x94] sm:$0xf0] }
 0x2f9   : > { %10872 = vst [vmem:[#allocation93_spill] sm:$0xff] %v8031_v10 }
 0x2fa   : > { %10868 = vst [vmem:[#allocation89_spill] sm:$0xff] %v8001_v30 }
 0x2fb   : > { %v3275_v45 = vpop.f32.mrf.mxu1 }
 0x2fd   : > { %v3104_v24 = vpop.f32.mrf.mxu0 }
 0x2fe   : > { %v3105_v38 = vadd.f32 %v3104_v24, %v7759_v47  ;;  %v1426_v28 = vpop.f32.mrf.mxu2  ;;  %v8027_v24 = vpop.f32.mrf.mxu3  ;;  %v8029_v47 = vor.u32 %v6092_v34, %v5549_v8 }
 0x300   : > { %v8024_v63 = vadd.f32 %v3273_v51, %v3105_v38  ;;  %3143 = vmatmul.bf16.gmra.mxu0 %v8009_v0  ;;  %10871 = vst [vmem:[#allocation92_spill] sm:$0xff] %v8029_v47  ;;  %v5669_v51 = vld [vmem:[%s10440_s7 + $0x180] sm:$0xf] }
 0x301   : > { %v8046_v34 = vor.u32 %v6123_v52, %v5669_v51  ;;  %v5687_v51 = vld [vmem:[%s10440_s7 + $0x1b0] sm:$0xf0] }
 0x302   : > { %10870 = vst [vmem:[#allocation91_spill] sm:$0xff] %v8024_v63 }
 0x303   : > { %v3278_v2 = vpop.f32.mrf.mxu1  ;;  %10874 = vst [vmem:[#allocation95_spill] sm:$0xff] %v8046_v34 }
 0x305   : > { %v3106_v55 = vpop.f32.mrf.mxu0 }
 0x306   : > { %v3107_v9 = vadd.f32 %v3106_v55, %v7778_v53  ;;  %v1429_v19 = vpop.f32.mrf.mxu2  ;;  %3446 = vmatmul.bf16.gmra.mxu2 %v8029_v47  ;;  %3317 = vmatmul.bf16.gmra.mxu1 %v8031_v10  ;;  %v8044_v38 = vpop.f32.mrf.mxu3  ;;  %v6125_v10 = vld [vmem:[%s10440_s7 + $0x1a4] sm:$0xf] }
 0x308   : > { %v8036_v62 = vadd.f32 %v3275_v45, %v3107_v9  ;;  %v5565_v9 = vld [vmem:[%s10440_s7 + $0xa8] sm:$0xf]  ;;  %v6096_v45 = vld [vmem:[%s10440_s7 + $0xb4] sm:$0xf0] }
 0x30a   : > { %10873 = vst [vmem:[#allocation94_spill] sm:$0xff] %v8036_v62  ;;  %v10885_v62 = vld [vmem:[#allocation22_spill] sm:$0xff] }
 0x30b   : > { %v3280_v8 = vpop.f32.mrf.mxu1  ;;  %v1427_v1 = vadd.f32 %v1426_v28, %v10885_v62 }
 0x30d   : > { %v3109_v55 = vpop.f32.mrf.mxu0 }
 0x30e   : > { %v3110_v13 = vadd.f32 %v3109_v55, %v7795_v16  ;;  %v1431_v47 = vpop.f32.mrf.mxu2  ;;  %v8064_v55 = vor.u32 %v6096_v45, %v5565_v9  ;;  %v8066_v16 = vor.u32 %v6125_v10, %v5687_v51  ;;  %v8068_v0 = vpop.f32.mrf.mxu3  ;;  %v6127_v10 = vld [vmem:[%s10440_s7 + $0x1ac] sm:$0xf0] }
 0x310   : > { %v8061_v52 = vadd.f32 %v3278_v2, %v3110_v13  ;;  %3148 = vmatmul.bf16.gmra.mxu0 %v8046_v34  ;;  %10876 = vst [vmem:[#allocation97_spill] sm:$0xff] %v8064_v55  ;;  %v5685_v2 = vld [vmem:[%s10440_s7 + $0x1a0] sm:$0xf]  ;;  %v10879_v13 = vld [vmem:[#allocation17_spill] sm:$0xff] }
 0x311   : > { %10877 = vst [vmem:[#allocation98_spill] sm:$0xff] %v8066_v16  ;;  %v8082_v51 = vor.u32 %v6127_v10, %v5685_v2  ;;  %v6100_v34 = vld [vmem:[%s10440_s7 + $0xd4] sm:$0xf0]  ;;  %v10883_v10 = vld [vmem:[#allocation18_spill] sm:$0xff] }
 0x312   : > { %10875 = vst [vmem:[#allocation96_spill] sm:$0xff] %v8061_v52 }
 0x313   : > { %v3283_v53 = vpop.f32.mrf.mxu1  ;;  %10880 = vst [vmem:[#allocation17_spill] sm:$0xff] %v8082_v51 }
 0x315   : > { %v3111_v12 = vpop.f32.mrf.mxu0 }
 0x316   : > { %v3112_v17 = vadd.f32 %v3111_v12, %v7733_v56  ;;  %v1434_v15 = vpop.f32.mrf.mxu2  ;;  %3451 = vmatmul.bf16.gmra.mxu2 %v8064_v55  ;;  %3322 = vmatmul.bf16.gmra.mxu1 %v8066_v16  ;;  %v10881_v12 = vld [vmem:[#allocation23_spill] sm:$0xff] }
 0x317   : > { %v1435_v9 = vadd.f32 %v1434_v15, %v10879_v13  ;;  %v1432_v56 = vadd.f32 %v1431_v47, %v10881_v12  ;;  %v8093_v15 = vpop.f32.mrf.mxu3  ;;  %v6129_v47 = vld [vmem:[%s10440_s7 + $0x1c4] sm:$0xf] }
 0x318   : > { %v8073_v50 = vadd.f32 %v3280_v8, %v3112_v17  ;;  %v5581_v8 = vld [vmem:[%s10440_s7 + $0xc8] sm:$0xf] }
 0x319   : > { %v1732_v2 = vmul.f32 0.2, %v1435_v9  ;;  %v8106_v46 = vor.u32 %v6100_v34, %v5581_v8  ;;  %v10890_v34 = vld [vmem:[#allocation34_spill] sm:$0xff] }
 0x31a   : > { %10878 = vst [vmem:[#allocation99_spill] sm:$0xff] %v8073_v50  ;;  %v10882_v50 = vld [vmem:[#allocation16_spill] sm:$0xff] }
 0x31b   : > { %v3285_v45 = vpop.f32.mrf.mxu1  ;;  %v1430_v52 = vadd.f32 %v1429_v19, %v10882_v50  ;;  %v1730_v19 = vmul.f32 0.2, %v1432_v56  ;;  %10886 = vst [vmem:[#allocation16_spill] sm:$0xff] %v8106_v46  ;;  %v1860_v32 = vmax.f32 %v1435_v9, %v1732_v2 }
 0x31d   : > { %v3114_v55 = vpop.f32.mrf.mxu0  ;;  %v1728_v26 = vmul.f32 0.2, %v1430_v52  ;;  %v1858_v28 = vmax.f32 %v1432_v56, %v1730_v19 }
 0x31e   : > { %v3115_v16 = vadd.f32 %v3114_v55, %v7705_v20  ;;  %v1436_v17 = vpop.f32.mrf.mxu2  ;;  %v5703_v55 = vld [vmem:[%s10440_s7 + $0x1d0] sm:$0xf0] }
 0x31f   : > { %v1437_v21 = vadd.f32 %v1436_v17, %v10883_v10  ;;  %v8108_v30 = vor.u32 %v6129_v47, %v5703_v55  ;;  %v10888_v17 = vld [vmem:[#allocation29_spill] sm:$0xff]  ;;  %v1856_v9 = vmax.f32 %v1430_v52, %v1728_v26  ;;  %v10893_v47 = vld [vmem:[#allocation36_spill] sm:$0xff] }
 0x320   : > { %v8102_v20 = vadd.f32 %v3283_v53, %v3115_v16  ;;  %3153 = vmatmul.bf16.gmra.mxu0 %v8082_v51  ;;  %v1425_v36 = vadd.f32 %v7995_v33, %v10888_v17  ;;  %v1422_v53 = vadd.f32 %v7973_v60, %v10889_v49  ;;  %v1726_v16 = vmul.f32 0.2, %v1427_v1 }
 0x321   : > { %v1734_v63 = vmul.f32 0.2, %v1437_v21  ;;  %10887 = vst [vmem:[#allocation18_spill] sm:$0xff] %v8108_v30  ;;  %v1420_v33 = vadd.f32 %v7956_v3, %v10890_v34  ;;  %v2052_v56 = vpack.c.bf16 %v1858_v28, %v1856_v9  ;;  %v6131_v3 = vld [vmem:[%s10440_s7 + $0x1cc] sm:$0xf0] }
 0x322   : > { %10884 = vst [vmem:[#allocation23_spill] sm:$0xff] %v8102_v20  ;;  %v1724_v8 = vmul.f32 0.2, %v1425_v36  ;;  %v1722_v2 = vmul.f32 0.2, %v1422_v53 }
 0x323   : > { %v1862_v42 = vmax.f32 %v1437_v21, %v1734_v63  ;;  %v3288_v48 = vpop.f32.mrf.mxu1  ;;  %v10892_v63 = vld [vmem:[#allocation38_spill] sm:$0xff] }
 0x324   : > { %v1417_v60 = vadd.f32 %v7931_v35, %v10892_v63  ;;  %v1852_v26 = vmax.f32 %v1425_v36, %v1724_v8  ;;  %v1850_v28 = vmax.f32 %v1422_v53, %v1722_v2  ;;  %v6133_v53 = vld [vmem:[%s10440_s7 + $0x1e4] sm:$0xf]  ;;  %v5719_v2 = vld [vmem:[%s10440_s7 + $0x1f0] sm:$0xf0] }
 0x325   : > { %v3116_v51 = vpop.f32.mrf.mxu0  ;;  %v2054_v20 = vpack.c.bf16 %v1862_v42, %v1860_v32  ;;  %v1603_v42 = vpop.f32.mrf.mxu3  ;;  %v1854_v32 = vmax.f32 %v1427_v1, %v1726_v16 }
 0x326   : > { %v3117_v23 = vadd.f32 %v3116_v51, %v7774_v41  ;;  %3456 = vmatmul.bf16.gmra.mxu2 %v8106_v46  ;;  %3327 = vmatmul.bf16.gmra.mxu1 %v8108_v30  ;;  %v5701_v51 = vld [vmem:[%s10440_s7 + $0x1c0] sm:$0xf]  ;;  %v1718_v55 = vmul.f32 0.2, %v1417_v60  ;;  %v10896_v46 = vld [vmem:[#allocation43_spill] sm:$0xff] }
 0x327   : > { %3587 = vmatpush.bf16.msrb.mxu3 %v2054_v20  ;;  %v1415_v20 = vadd.f32 %v7910_v61, %v10893_v47  ;;  %v8131_v35 = vor.u32 %v6131_v3, %v5701_v51  ;;  %v2050_v16 = vpack.c.bf16 %v1854_v32, %v1852_v26  ;;  %v5597_v61 = vld [vmem:[%s10440_s7 + $0xe8] sm:$0xf]  ;;  %v1410_v36 = vadd.f32 %v7862_v27, %v10896_v46  ;;  %v10898_v32 = vld [vmem:[#allocation66_spill] sm:$0xff] }
 0x328   : > { %v8119_v21 = vadd.f32 %v3285_v45, %v3117_v23  ;;  %v1720_v23 = vmul.f32 0.2, %v1420_v33  ;;  %v10895_v45 = vld [vmem:[#allocation40_spill] sm:$0xff]  ;;  %v1407_v27 = vadd.f32 %v7827_v14, %v10898_v32  ;;  %v1846_v3 = vmax.f32 %v1417_v60, %v1718_v55 }
 0x329   : > { %10894 = vst [vmem:[#allocation29_spill] sm:$0xff] %v8131_v35  ;;  %v1412_v1 = vadd.f32 %v7881_v59, %v10895_v45  ;;  %v1716_v9 = vmul.f32 0.2, %v1415_v20  ;;  %v6104_v59 = vld [vmem:[%s10440_s7 + $0xf4] sm:$0xf0]  ;;  %v8157_v26 = vor.u32 %v6133_v53, %v5719_v2  ;;  %v1596_v2 = vadd.f32 %v8044_v38, %v10885_v62 }
 0x32a   : > { %10891 = vst [vmem:[#allocation22_spill] sm:$0xff] %v8119_v21  ;;  %v1848_v8 = vmax.f32 %v1420_v33, %v1720_v23  ;;  %v8155_v23 = vor.u32 %v6104_v59, %v5597_v61  ;;  %v6074_v62 = vld [vmem:[%s10440_s7 + $0xc] sm:$0xf]  ;;  %v1594_v38 = vadd.f32 %v8027_v24, %v10888_v17 }
 0x32b   : > { %3588 = vmatpush.bf16.msrb.mxu3 %v2052_v56  ;;  %v3290_v52 = vpop.f32.mrf.mxu1  ;;  %v1714_v33 = vmul.f32 0.2, %v1412_v1  ;;  %10900 = vst [vmem:[#allocation38_spill] sm:$0xff] %v8157_v26  ;;  %v1844_v41 = vmax.f32 %v1415_v20, %v1716_v9 }
 0x32c   : > { %v2048_v51 = vpack.c.bf16 %v1850_v28, %v1848_v8  ;;  %10899 = vst [vmem:[#allocation34_spill] sm:$0xff] %v8155_v23 }
 0x32d   : > { %v3119_v19 = vpop.f32.mrf.mxu0  ;;  %v1605_v21 = vpop.f32.mrf.mxu3  ;;  %v1842_v28 = vmax.f32 %v1412_v1, %v1714_v33 }
 0x32e   : > { %v3120_v30 = vadd.f32 %v3119_v19, %v7665_v40  ;;  %v10901_v19 = vld [vmem:[#allocation46_spill] sm:$0xff]  ;;  %v1712_v40 = vmul.f32 0.2, %v1410_v36  ;;  %v1606_v60 = vadd.f32 %v1605_v21, %v10883_v10  ;;  %v6135_v21 = vld [vmem:[%s10440_s7 + $0x1ec] sm:$0xf0] }
 0x32f   : > { %3589 = vmatpush.bf16.msrb.mxu3 %v2050_v16  ;;  %v1405_v16 = vadd.f32 %v7800_v25, %v10901_v19  ;;  %v10902_v25 = vld [vmem:[#allocation70_spill] sm:$0xff] }
 0x330   : > { %v8150_v56 = vadd.f32 %v3288_v48, %v3120_v30  ;;  %3158 = vmatmul.bf16.gmra.mxu0 %v8131_v35  ;;  %v1402_v30 = vadd.f32 %v7782_v58, %v7680_v57  ;;  %v1710_v35 = vmul.f32 0.2, %v1407_v27  ;;  %v1400_v20 = vadd.f32 %v7763_v31, %v10902_v25  ;;  %v5717_v10 = vld [vmem:[%s10440_s7 + $0x1e0] sm:$0xf] }
 0x331   : > { %v1708_v9 = vmul.f32 0.2, %v1405_v16  ;;  %v1840_v61 = vmax.f32 %v1410_v36, %v1712_v40  ;;  %v1604_v58 = vadd.f32 %v1603_v42, %v10879_v13  ;;  %v1601_v31 = vadd.f32 %v8093_v15, %v10881_v12  ;;  %v5613_v15 = vld [vmem:[%s10440_s7 + $0x108] sm:$0xf] }
 0x332   : > { %10897 = vst [vmem:[#allocation35_spill] sm:$0xff] %v8150_v56  ;;  %v2046_v56 = vpack.c.bf16 %v1846_v3, %v1844_v41  ;;  %v1706_v41 = vmul.f32 0.2, %v1402_v30  ;;  %v1838_v59 = vmax.f32 %v1407_v27, %v1710_v35  ;;  %v1735_v40 = vmul.f32 0.2, %v1606_v60 }
 0x333   : > { %3590 = vmatpush.bf16.msrb.mxu3 %v2048_v51  ;;  %v3293_v48 = vpop.f32.mrf.mxu1  ;;  %v2044_v1 = vpack.c.bf16 %v1842_v28, %v1840_v61  ;;  %v1704_v36 = vmul.f32 0.2, %v1400_v20  ;;  %v1836_v53 = vmax.f32 %v1405_v16, %v1708_v9  ;;  %v1599_v42 = vadd.f32 %v8068_v0, %v10882_v50  ;;  %v6108_v50 = vld [vmem:[%s10440_s7 + $0x114] sm:$0xf0]  ;;  %v5487_v0 = vld [vmem:[%s10440_s7 + $0x18] sm:$0xf0] }
 0x334   : > { %v8182_v35 = vor.u32 %v6135_v21, %v5717_v10  ;;  %v1834_v33 = vmax.f32 %v1402_v30, %v1706_v41  ;;  %v1731_v51 = vmul.f32 0.2, %v1601_v31  ;;  %v1863_v3 = vmax.f32 %v1606_v60, %v1735_v40  ;;  %v6137_v60 = vld [vmem:[%s10440_s7 + $0x204] sm:$0xf]  ;;  %v8216_v41 = vpop.permute.xlu0 %2217 }
 0x335   : > { %v3121_v14 = vpop.f32.mrf.mxu0  ;;  %v2042_v27 = vpack.c.bf16 %v1838_v59, %v1836_v53  ;;  %v1832_v16 = vmax.f32 %v1400_v20, %v1704_v36  ;;  %v1729_v30 = vmul.f32 0.2, %v1599_v42  ;;  %v1591_v20 = vadd.f32 %v7999_v5, %v10889_v49  ;;  %10906 = vst [vmem:[#allocation66_spill] sm:$0xff] %v8216_v41 }
 0x336   : > { %v3122_v55 = vadd.f32 %v3121_v14, %v7683_v44  ;;  %3461 = vmatmul.bf16.gmra.mxu2 %v8155_v23  ;;  %3332 = vmatmul.bf16.gmra.mxu1 %v8157_v26  ;;  %10903 = vst [vmem:[#allocation36_spill] sm:$0xff] %v8182_v35  ;;  %v1727_v9 = vmul.f32 0.2, %v1596_v2  ;;  %v1859_v24 = vmax.f32 %v1601_v31, %v1731_v51  ;;  %v1725_v21 = vmul.f32 0.2, %v1594_v38  ;;  %v10978_v26 = vld [vmem:[#allocation49_spill] sm:$0xff] }
 0x337   : > { %3591 = vmatpush.bf16.msrb.mxu3 %v2046_v56  ;;  %v2040_v61 = vpack.c.bf16 %v1834_v33, %v1832_v16  ;;  %v1589_v10 = vadd.f32 %v7970_v39, %v10890_v34  ;;  %v1857_v40 = vmax.f32 %v1599_v42, %v1729_v30  ;;  %v1586_v5 = vadd.f32 %v7953_v18, %v10892_v63  ;;  %v6078_v30 = vld [vmem:[%s10440_s7 + $0x2c] sm:$0xf] }
 0x338   : > { %v8170_v8 = vadd.f32 %v3290_v52, %v3122_v55  ;;  %v1733_v52 = vmul.f32 0.2, %v1604_v58  ;;  %v5735_v55 = vld [vmem:[%s10440_s7 + $0x210] sm:$0xf0]  ;;  %v1723_v31 = vmul.f32 0.2, %v1591_v20  ;;  %v1855_v36 = vmax.f32 %v1596_v2, %v1727_v9 }
 0x339   : > { %v8218_v59 = vor.u32 %v6137_v60, %v5735_v55  ;;  %v1584_v39 = vadd.f32 %v7917_v22, %v10893_v47  ;;  %v1721_v34 = vmul.f32 0.2, %v1589_v10  ;;  %v1853_v42 = vmax.f32 %v1594_v38, %v1725_v21  ;;  %v5733_v2 = vld [vmem:[%s10440_s7 + $0x200] sm:$0xf]  ;;  %v5751_v9 = vld [vmem:[%s10440_s7 + $0x230] sm:$0xf0] }
 0x33a   : > { %v1861_v14 = vmax.f32 %v1604_v58, %v1733_v52  ;;  %v8212_v58 = vor.u32 %v6108_v50, %v5613_v15  ;;  %v2053_v52 = vpack.c.bf16 %v1859_v24, %v1857_v40  ;;  %v1581_v18 = vadd.f32 %v7886_v37, %v10895_v45 }
 0x33b   : > { %3592 = vmatpush.bf16.msrb.mxu3 %v2044_v1  ;;  %v3295_v13 = vpop.f32.mrf.mxu1  ;;  %10907 = vst [vmem:[#allocation46_spill] sm:$0xff] %v8218_v59  ;;  %v1719_v33 = vmul.f32 0.2, %v1586_v5  ;;  %v1851_v51 = vmax.f32 %v1591_v20, %v1723_v31  ;;  %v2051_v47 = vpack.c.bf16 %v1855_v36, %v1853_v42  ;;  %v1717_v37 = vmul.f32 0.2, %v1584_v39  ;;  %v10914_v31 = vld [vmem:[#allocation37_spill] sm:$0xff] }
 0x33c   : > { %v2055_v17 = vpack.c.bf16 %v1863_v3, %v1861_v14  ;;  %10904 = vst [vmem:[#allocation40_spill] sm:$0xff] %v8212_v58  ;;  %v1579_v3 = vadd.f32 %v7860_v29, %v10896_v46  ;;  %v1849_v45 = vmax.f32 %v1589_v10, %v1721_v34  ;;  %v8247_v15 = vpop.permute.xlu0 %2202  ;;  %v1576_v16 = vadd.f32 %v7825_v43, %v10898_v32  ;;  %v5629_v46 = vld [vmem:[%s10440_s7 + $0x128] sm:$0xf]  ;;  %v6112_v29 = vld [vmem:[%s10440_s7 + $0x134] sm:$0xf0] }
 0x33d   : > { %v3124_v56 = vpop.f32.mrf.mxu0  ;;  %10909 = vst [vmem:[#allocation100_spill] sm:$0xff] %v8247_v15  ;;  %v1715_v50 = vmul.f32 0.2, %v1581_v18  ;;  %v5503_v43 = vld [vmem:[%s10440_s7 + $0x38] sm:$0xf0]  ;;  %v1574_v32 = vadd.f32 %v7797_v54, %v10901_v19  ;;  %v1845_v60 = vmax.f32 %v1584_v39, %v1717_v37  ;;  %v8280_v21 = vor.u32 %v6112_v29, %v5629_v46 }
 0x33e   : > { %v3125_v12 = vadd.f32 %v3124_v56, %v7698_v7  ;;  %v2049_v38 = vpack.c.bf16 %v1851_v51, %v1849_v45  ;;  %v1713_v14 = vmul.f32 0.2, %v1579_v3  ;;  %v6141_v20 = vld [vmem:[%s10440_s7 + $0x224] sm:$0xf]  ;;  %v1711_v24 = vmul.f32 0.2, %v1576_v16 }
 0x33f   : > { %3593 = vmatpush.bf16.msrb.mxu3 %v2042_v27  ;;  %v6139_v27 = vld [vmem:[%s10440_s7 + $0x20c] sm:$0xf0]  ;;  %v1843_v54 = vmax.f32 %v1581_v18, %v1715_v50  ;;  %v8282_v40 = vor.u32 %v6078_v30, %v5503_v43  ;;  %v1569_v36 = vadd.f32 %v10914_v31, %v10902_v25  ;;  %v5645_v46 = vld [vmem:[%s10440_s7 + $0x148] sm:$0xf]  ;;  %v6116_v29 = vld [vmem:[%s10440_s7 + $0x154] sm:$0xf0] }
 0x340   : > { %v8201_v28 = vadd.f32 %v3293_v48, %v3125_v12  ;;  %3163 = vmatmul.bf16.gmra.mxu0 %v8182_v35  ;;  %v8214_v48 = vor.u32 %v6074_v62, %v5487_v0  ;;  %v8245_v12 = vor.u32 %v6139_v27, %v5733_v2  ;;  %v1847_v0 = vmax.f32 %v1586_v5, %v1719_v33  ;;  %v5749_v33 = vld [vmem:[%s10440_s7 + $0x220] sm:$0xf]  ;;  %v6143_v51 = vld [vmem:[%s10440_s7 + $0x22c] sm:$0xf0]  ;;  %v6082_v30 = vld [vmem:[%s10440_s7 + $0x4c] sm:$0xf] }
 0x341   : > { %10912 = vst [vmem:[#allocation101_spill] sm:$0xff] %v8282_v40  ;;  %v1839_v34 = vmax.f32 %v1576_v16, %v1711_v24  ;;  %v5519_v43 = vld [vmem:[%s10440_s7 + $0x58] sm:$0xf0]  ;;  %v8332_v24 = vor.u32 %v6116_v29, %v5645_v46 }
 0x342   : > { %10905 = vst [vmem:[#allocation43_spill] sm:$0xff] %v8214_v48  ;;  %v2047_v10 = vpack.c.bf16 %v1847_v0, %v1845_v60  ;;  %v10918_v0 = vld [vmem:[#allocation71_spill] sm:$0xff]  ;;  %v5767_v60 = vld [vmem:[%s10440_s7 + $0x250] sm:$0xf0] }
 0x343   : > { %3594 = vmatpush.bf16.msrb.mxu3 %v2040_v61  ;;  %v3298_v1 = vpop.f32.mrf.mxu1  ;;  %10908 = vst [vmem:[#allocation70_spill] sm:$0xff] %v8245_v12  ;;  %v1571_v61 = vadd.f32 %v7780_v11, %v7680_v57  ;;  %v8288_v57 = vpop.permute.xlu1 %2207 }
 0x344   : > { %10915 = vst [vmem:[#allocation37_spill] sm:$0xff] %v8288_v57  ;;  %v8384_v29 = vpop.permute.xlu0 %2357 }
 0x345   : > { %v3126_v49 = vpop.f32.mrf.mxu0  ;;  %v1707_v39 = vmul.f32 0.2, %v1571_v61  ;;  %10929 = vst [vmem:[#allocation106_spill] sm:$0xff] %v8384_v29 }
 0x346   : > { %v3127_v53 = vadd.f32 %v3126_v49, %v7640_v4  ;;  %3466 = vmatmul.bf16.gmra.mxu2 %v8212_v58  ;;  %3595 = vmatmul.bf16.vlgmr.msrb.gmra.mxu3 %v8214_v48  ;;  %v8284_v49 = vor.u32 %v6141_v20, %v5751_v9  ;;  %v10919_v9 = vld [vmem:[#allocation84_spill] sm:$0xff]  ;;  %v6136_v48 = vld [vmem:[%s10440_s7 + $0x1f4] sm:$0xf0] }
 0x347   : > { %4263 = vmatpush.bf16.msra.mxu3 %v2055_v17  ;;  %3337 = vmatmul.bf16.gmra.mxu1 %v8218_v59  ;;  %v10910_v17 = vld [vmem:[#allocation78_spill] sm:$0xff]  ;;  %10920 = vst [vmem:[#allocation84_spill] sm:$0xff] %v8332_v24 }
 0x348   : > { %v8230_v56 = vadd.f32 %v3295_v13, %v3127_v53  ;;  %10911 = vst [vmem:[#allocation78_spill] sm:$0xff] %v8280_v21  ;;  %v1709_v53 = vmul.f32 0.2, %v1574_v32 }
 0x349   : > { %v3427_v63 = vpop.f32.mrf.mxu2  ;;  %10913 = vst [vmem:[#allocation102_spill] sm:$0xff] %v8284_v49 }
 0x34a   : > { %v8241_v22 = vadd.f32 %v3427_v63, %v7897_v6  ;;  %v1705_v63 = vmul.f32 0.2, %v1569_v36  ;;  %v1837_v2 = vmax.f32 %v1574_v32, %v1709_v53  ;;  %v5765_v53 = vld [vmem:[%s10440_s7 + $0x240] sm:$0xf] }
 0x34b   : > { %4264 = vmatpush.bf16.msra.mxu3 %v2053_v52  ;;  %v3300_v13 = vpop.f32.mrf.mxu1  ;;  %v1841_v52 = vmax.f32 %v1579_v3, %v1713_v14  ;;  %v10916_v3 = vld [vmem:[#allocation81_spill] sm:$0xff]  ;;  %v6145_v14 = vld [vmem:[%s10440_s7 + $0x244] sm:$0xf] }
 0x34c   : > { %v2043_v45 = vpack.c.bf16 %v1839_v34, %v1837_v2  ;;  %v1833_v50 = vmax.f32 %v1569_v36, %v1705_v63  ;;  %v10925_v63 = vld [vmem:[#allocation10_spill] sm:$0xff] }
 0x34d   : > { %v3129_v62 = vpop.f32.mrf.mxu0  ;;  %v2045_v18 = vpack.c.bf16 %v1843_v54, %v1841_v52  ;;  %v8334_v54 = vor.u32 %v6082_v30, %v5519_v43  ;;  %v6147_v52 = vld [vmem:[%s10440_s7 + $0x24c] sm:$0xf0] }
 0x34e   : > { %v3130_v6 = vadd.f32 %v3129_v62, %v8247_v15  ;;  %v10968_v15 = vld [vmem:[#allocation59_spill] sm:$0xff] }
 0x34f   : > { %4265 = vmatpush.bf16.msra.mxu3 %v2051_v47  ;;  %v1835_v47 = vmax.f32 %v1571_v61, %v1707_v39  ;;  %10921 = vst [vmem:[#allocation103_spill] sm:$0xff] %v8334_v54 }
 0x350   : > { %v8266_v55 = vadd.f32 %v3298_v1, %v3130_v6  ;;  %3168 = vmatmul.bf16.gmra.mxu0 %v8245_v12 }
 0x351   : > { %v3429_v19 = vpop.f32.mrf.mxu2 }
 0x352   : > { %v8278_v1 = vadd.f32 %v3429_v19, %v10910_v17  ;;  %v8336_v17 = vor.u32 %v6145_v14, %v5767_v60  ;;  %v10931_v60 = vld [vmem:[#allocation15_spill] sm:$0xff] }
 0x353   : > { %4266 = vmatpush.bf16.msra.mxu3 %v2049_v38  ;;  %v3303_v5 = vpop.f32.mrf.mxu1  ;;  %v2041_v38 = vpack.c.bf16 %v1835_v47, %v1833_v50  ;;  %v5535_v47 = vld [vmem:[%s10440_s7 + $0x78] sm:$0xf0] }
 0x354   : > { %10922 = vst [vmem:[#allocation104_spill] sm:$0xff] %v8336_v17 }
 0x355   : > { %v3131_v11 = vpop.f32.mrf.mxu0 }
 0x356   : > { %v3132_v42 = vadd.f32 %v3131_v11, %v8288_v57  ;;  %3471 = vmatmul.bf16.gmra.mxu2 %v8280_v21  ;;  %3600 = vmatmul.bf16.gmra.mxu3 %v8282_v40  ;;  %v10923_v11 = vld [vmem:[#allocation86_spill] sm:$0xff] }
 0x357   : > { %4267 = vmatpush.bf16.msra.mxu3 %v2047_v10  ;;  %3342 = vmatmul.bf16.gmra.mxu1 %v8284_v49 }
 0x358   : > { %v8294_v25 = vadd.f32 %v3300_v13, %v3132_v42  ;;  %v8305_v13 = vor.u32 %v6143_v51, %v5749_v33  ;;  %v8353_v42 = vor.u32 %v6147_v52, %v5765_v53  ;;  %v6120_v33 = vld [vmem:[%s10440_s7 + $0x174] sm:$0xf0]  ;;  %v6086_v51 = vld [vmem:[%s10440_s7 + $0x6c] sm:$0xf]  ;;  %v8403_v52 = vpop.permute.xlu1 %2432 }
 0x359   : > { %v3432_v27 = vpop.f32.mrf.mxu2  ;;  %v8382_v46 = vor.u32 %v6086_v51, %v5535_v47  ;;  %v5677_v51 = vld [vmem:[%s10440_s7 + $0x188] sm:$0xf]  ;;  %v6124_v47 = vld [vmem:[%s10440_s7 + $0x194] sm:$0xf0] }
 0x35a   : > { %v8303_v37 = vadd.f32 %v3432_v27, %v10916_v3  ;;  %10917 = vst [vmem:[#allocation81_spill] sm:$0xff] %v8305_v13  ;;  %v5661_v27 = vld [vmem:[%s10440_s7 + $0x168] sm:$0xf] }
 0x35b   : > { %4268 = vmatpush.bf16.msra.mxu3 %v2045_v18  ;;  %v3305_v16 = vpop.f32.mrf.mxu1  ;;  %10924 = vst [vmem:[#allocation86_spill] sm:$0xff] %v8353_v42 }
 0x35c   : > { %10928 = vst [vmem:[#allocation105_spill] sm:$0xff] %v8382_v46 }
 0x35d   : > { %v3134_v62 = vpop.f32.mrf.mxu0 }
 0x35e   : > { %v3135_v6 = vadd.f32 %v3134_v62, %v10918_v0  ;;  %v10926_v62 = vld [vmem:[#allocation89_spill] sm:$0xff]  ;;  %v10962_v0 = vld [vmem:[#allocation22_spill] sm:$0xff] }
 0x35f   : > { %4269 = vmatpush.bf16.msra.mxu3 %v2043_v45  ;;  %v6149_v45 = vld [vmem:[%s10440_s7 + $0x264] sm:$0xf] }
 0x360   : > { %v8320_v32 = vadd.f32 %v3303_v5, %v3135_v6  ;;  %3173 = vmatmul.bf16.gmra.mxu0 %v8305_v13 }
 0x361   : > { %v3434_v20 = vpop.f32.mrf.mxu2 }
 0x362   : > { %v8330_v61 = vadd.f32 %v3434_v20, %v10919_v9 }
 0x363   : > { %4270 = vmatpush.bf16.msra.mxu3 %v2041_v38  ;;  %v3308_v19 = vpop.f32.mrf.mxu1  ;;  %v8380_v38 = vor.u32 %v6120_v33, %v5661_v27  ;;  %v10936_v27 = vld [vmem:[#allocation26_spill] sm:$0xff] }
 0x365   : > { %v3136_v10 = vpop.f32.mrf.mxu0  ;;  %10927 = vst [vmem:[#allocation89_spill] sm:$0xff] %v8380_v38 }
 0x366   : > { %v3137_v5 = vadd.f32 %v3136_v10, %v8216_v41  ;;  %3476 = vmatmul.bf16.gmra.mxu2 %v8332_v24  ;;  %3605 = vmatmul.bf16.gmra.mxu3 %v8334_v54  ;;  %v5781_v10 = vld [vmem:[%s10440_s7 + $0x260] sm:$0xf]  ;;  %v10955_v24 = vld [vmem:[#allocation20_spill] sm:$0xff] }
 0x367   : > { %3347 = vmatmul.bf16.gmra.mxu1 %v8336_v17 }
 0x368   : > { %v8342_v31 = vadd.f32 %v3305_v16, %v3137_v5  ;;  %v5783_v16 = vld [vmem:[%s10440_s7 + $0x270] sm:$0xf0]  ;;  %v6151_v5 = vld [vmem:[%s10440_s7 + $0x26c] sm:$0xf0] }
 0x369   : > { %v3437_v36 = vpop.f32.mrf.mxu2  ;;  %v8386_v43 = vor.u32 %v6149_v45, %v5783_v16  ;;  %v6090_v45 = vld [vmem:[%s10440_s7 + $0x8c] sm:$0xf]  ;;  %v5551_v16 = vld [vmem:[%s10440_s7 + $0x98] sm:$0xf0] }
 0x36a   : > { %v8351_v39 = vadd.f32 %v3437_v36, %v10923_v11  ;;  %v10932_v36 = vld [vmem:[#allocation91_spill] sm:$0xff] }
 0x36b   : > { %v3310_v34 = vpop.f32.mrf.mxu1  ;;  %10930 = vst [vmem:[#allocation107_spill] sm:$0xff] %v8386_v43 }
 0x36c   : > { %10933 = vst [vmem:[#allocation91_spill] sm:$0xff] %v8403_v52 }
 0x36d   : > { %v3139_v18 = vpop.f32.mrf.mxu0 }
 0x36e   : > { %v3140_v2 = vadd.f32 %v3139_v18, %v10925_v63  ;;  %v8405_v18 = vor.u32 %v6151_v5, %v5781_v10  ;;  %v8434_v5 = vor.u32 %v6124_v47, %v5677_v51 }
 0x370   : > { %v8368_v3 = vadd.f32 %v3308_v19, %v3140_v2  ;;  %3178 = vmatmul.bf16.gmra.mxu0 %v8353_v42  ;;  %10934 = vst [vmem:[#allocation108_spill] sm:$0xff] %v8405_v18  ;;  %v8407_v2 = vpop.permute.xlu0 %2342 }
 0x371   : > { %v3439_v50 = vpop.f32.mrf.mxu2  ;;  %10935 = vst [vmem:[#allocation109_spill] sm:$0xff] %v8407_v2 }
 0x372   : > { %v8378_v6 = vadd.f32 %v3439_v50, %v10926_v62  ;;  %v6153_v62 = vld [vmem:[%s10440_s7 + $0x284] sm:$0xf] }
 0x373   : > { %v3313_v30 = vpop.f32.mrf.mxu1 }
 0x375   : > { %v3141_v14 = vpop.f32.mrf.mxu0 }
 0x376   : > { %v3142_v20 = vadd.f32 %v3141_v14, %v10931_v60  ;;  %3481 = vmatmul.bf16.gmra.mxu2 %v8380_v38  ;;  %3610 = vmatmul.bf16.gmra.mxu3 %v8382_v46  ;;  %v5799_v14 = vld [vmem:[%s10440_s7 + $0x290] sm:$0xf0]  ;;  %v10950_v60 = vld [vmem:[#allocation99_spill] sm:$0xff] }
 0x377   : > { %3352 = vmatmul.bf16.gmra.mxu1 %v8386_v43 }
 0x378   : > { %v8392_v9 = vadd.f32 %v3310_v34, %v3142_v20  ;;  %v8445_v46 = vpop.permute.xlu0 %2427 }
 0x379   : > { %v3442_v19 = vpop.f32.mrf.mxu2  ;;  %10943 = vst [vmem:[#allocation113_spill] sm:$0xff] %v8445_v46 }
 0x37a   : > { %v8401_v53 = vadd.f32 %v3442_v19, %v10932_v36  ;;  %v10937_v19 = vld [vmem:[#allocation94_spill] sm:$0xff]  ;;  %v8436_v36 = vor.u32 %v6090_v45, %v5551_v16  ;;  %v6155_v16 = vld [vmem:[%s10440_s7 + $0x28c] sm:$0xf0] }
 0x37b   : > { %v3315_v11 = vpop.f32.mrf.mxu1  ;;  %10938 = vst [vmem:[#allocation94_spill] sm:$0xff] %v8434_v5  ;;  %v5797_v45 = vld [vmem:[%s10440_s7 + $0x280] sm:$0xf] }
 0x37c   : > { %10939 = vst [vmem:[#allocation110_spill] sm:$0xff] %v8436_v36 }
 0x37d   : > { %v3144_v34 = vpop.f32.mrf.mxu0 }
 0x37e   : > { %v3145_v33 = vadd.f32 %v3144_v34, %v10936_v27  ;;  %v8438_v34 = vor.u32 %v6153_v62, %v5799_v14  ;;  %v10942_v27 = vld [vmem:[#allocation45_spill] sm:$0xff] }
 0x380   : > { %v8422_v50 = vadd.f32 %v3313_v30, %v3145_v33  ;;  %3183 = vmatmul.bf16.gmra.mxu0 %v8405_v18  ;;  %10940 = vst [vmem:[#allocation111_spill] sm:$0xff] %v8438_v34  ;;  %v8440_v33 = vpop.permute.xlu1 %2347 }
 0x381   : > { %v3444_v20 = vpop.f32.mrf.mxu2  ;;  %10941 = vst [vmem:[#allocation112_spill] sm:$0xff] %v8440_v33 }
 0x382   : > { %v8432_v10 = vadd.f32 %v3444_v20, %v10937_v19  ;;  %v8459_v20 = vpop.permute.xlu2 %2352  ;;  %v8461_v19 = vor.u32 %v6155_v16, %v5797_v45  ;;  %v5567_v45 = vld [vmem:[%s10440_s7 + $0xb8] sm:$0xf0] }
 0x383   : > { %v3318_v30 = vpop.f32.mrf.mxu1 }
 0x384   : > { %10946 = vst [vmem:[#allocation114_spill] sm:$0xff] %v8461_v19 }
 0x385   : > { %v3146_v18 = vpop.f32.mrf.mxu0 }
 0x386   : > { %v3147_v43 = vadd.f32 %v3146_v18, %v10942_v27  ;;  %3486 = vmatmul.bf16.gmra.mxu2 %v8434_v5  ;;  %3615 = vmatmul.bf16.gmra.mxu3 %v8436_v36  ;;  %v10944_v18 = vld [vmem:[#allocation96_spill] sm:$0xff]  ;;  %v5693_v36 = vld [vmem:[%s10440_s7 + $0x1a8] sm:$0xf]  ;;  %v6128_v27 = vld [vmem:[%s10440_s7 + $0x1b4] sm:$0xf0] }
 0x387   : > { %3357 = vmatmul.bf16.gmra.mxu1 %v8438_v34  ;;  %10945 = vst [vmem:[#allocation96_spill] sm:$0xff] %v8459_v20  ;;  %v8492_v63 = vor.u32 %v6128_v27, %v5693_v36  ;;  %v5813_v36 = vld [vmem:[%s10440_s7 + $0x2a0] sm:$0xf] }
 0x388   : > { %v8448_v51 = vadd.f32 %v3315_v11, %v3147_v43  ;;  %v10947_v43 = vld [vmem:[#allocation53_spill] sm:$0xff]  ;;  %v8467_v5 = vpop.permute.xlu1 %2332 }
 0x389   : > { %v3447_v47 = vpop.f32.mrf.mxu2  ;;  %10948 = vst [vmem:[#allocation115_spill] sm:$0xff] %v8467_v5 }
 0x38a   : > { %v8457_v62 = vadd.f32 %v3447_v47, %v10944_v18  ;;  %v6094_v47 = vld [vmem:[%s10440_s7 + $0xac] sm:$0xf]  ;;  %v5815_v18 = vld [vmem:[%s10440_s7 + $0x2b0] sm:$0xf0]  ;;  %10951 = vst [vmem:[#allocation99_spill] sm:$0xff] %v8492_v63  ;;  %v8498_v54 = vpop.permute.xlu2 %2437 }
 0x38b   : > { %v3320_v14 = vpop.f32.mrf.mxu1  ;;  %10954 = vst [vmem:[#allocation119_spill] sm:$0xff] %v8498_v54 }
 0x38d   : > { %v3149_v34 = vpop.f32.mrf.mxu0 }
 0x38e   : > { %v3150_v11 = vadd.f32 %v3149_v34, %v10947_v43  ;;  %v6157_v34 = vld [vmem:[%s10440_s7 + $0x2a4] sm:$0xf]  ;;  %v8487_v43 = vpop.permute.xlu0 %2412 }
 0x38f   : > { %10949 = vst [vmem:[#allocation116_spill] sm:$0xff] %v8487_v43 }
 0x390   : > { %v8478_v16 = vadd.f32 %v3318_v30, %v3150_v11  ;;  %3188 = vmatmul.bf16.gmra.mxu0 %v8461_v19  ;;  %v8494_v30 = vor.u32 %v6094_v47, %v5567_v45  ;;  %v8496_v19 = vor.u32 %v6157_v34, %v5815_v18  ;;  %v6159_v47 = vld [vmem:[%s10440_s7 + $0x2ac] sm:$0xf0] }
 0x391   : > { %v3449_v38 = vpop.f32.mrf.mxu2 }
 0x392   : > { %v8490_v42 = vadd.f32 %v3449_v38, %v10950_v60  ;;  %10952 = vst [vmem:[#allocation117_spill] sm:$0xff] %v8494_v30  ;;  %v8506_v60 = vpop.permute.xlu1 %2417 }
 0x393   : > { %v3323_v11 = vpop.f32.mrf.mxu1  ;;  %10953 = vst [vmem:[#allocation118_spill] sm:$0xff] %v8496_v19 }
 0x394   : > { %10956 = vst [vmem:[#allocation120_spill] sm:$0xff] %v8506_v60  ;;  %v10988_v60 = vld [vmem:[#allocation65_spill] sm:$0xff] }
 0x395   : > { %v3151_v17 = vpop.f32.mrf.mxu0 }
 0x396   : > { %v3152_v41 = vadd.f32 %v3151_v17, %v10955_v24  ;;  %3491 = vmatmul.bf16.gmra.mxu2 %v8492_v63  ;;  %3620 = vmatmul.bf16.gmra.mxu3 %v8494_v30  ;;  %v10957_v17 = vld [vmem:[#allocation23_spill] sm:$0xff]  ;;  %v8517_v34 = vpop.permute.xlu0 %2327  ;;  %v6132_v24 = vld [vmem:[%s10440_s7 + $0x1d4] sm:$0xf0] }
 0x397   : > { %3362 = vmatmul.bf16.gmra.mxu1 %v8496_v19  ;;  %10958 = vst [vmem:[#allocation23_spill] sm:$0xff] %v8517_v34  ;;  %v8519_v19 = vor.u32 %v6159_v47, %v5813_v36  ;;  %v5709_v63 = vld [vmem:[%s10440_s7 + $0x1c8] sm:$0xf]  ;;  %v5583_v36 = vld [vmem:[%s10440_s7 + $0xd8] sm:$0xf0]  ;;  %v8534_v47 = vpop.permute.xlu2 %2422 }
 0x398   : > { %v8504_v38 = vadd.f32 %v3320_v14, %v3152_v41  ;;  %v10960_v14 = vld [vmem:[#allocation63_spill] sm:$0xff]  ;;  %10961 = vst [vmem:[#allocation122_spill] sm:$0xff] %v8534_v47  ;;  %v8548_v40 = vor.u32 %v6132_v24, %v5709_v63  ;;  %v5829_v24 = vld [vmem:[%s10440_s7 + $0x2c0] sm:$0xf]  ;;  %v6163_v63 = vld [vmem:[%s10440_s7 + $0x2cc] sm:$0xf0] }
 0x399   : > { %v3452_v27 = vpop.f32.mrf.mxu2  ;;  %10959 = vst [vmem:[#allocation121_spill] sm:$0xff] %v8519_v19 }
 0x39a   : > { %v8515_v45 = vadd.f32 %v3452_v27, %v10957_v17  ;;  %v6098_v27 = vld [vmem:[%s10440_s7 + $0xcc] sm:$0xf]  ;;  %10963 = vst [vmem:[#allocation22_spill] sm:$0xff] %v8548_v40 }
 0x39b   : > { %v3325_v18 = vpop.f32.mrf.mxu1  ;;  %v8550_v21 = vor.u32 %v6098_v27, %v5583_v36 }
 0x39d   : > { %v3154_v41 = vpop.f32.mrf.mxu0  ;;  %10964 = vst [vmem:[#allocation123_spill] sm:$0xff] %v8550_v21 }
 0x39e   : > { %v3155_v30 = vadd.f32 %v3154_v41, %v10960_v14  ;;  %v6161_v41 = vld [vmem:[%s10440_s7 + $0x2c4] sm:$0xf]  ;;  %v5831_v14 = vld [vmem:[%s10440_s7 + $0x2d0] sm:$0xf0]  ;;  %v8556_v57 = vpop.permute.xlu0 %2312 }
 0x39f   : > { %10967 = vst [vmem:[#allocation126_spill] sm:$0xff] %v8556_v57 }
 0x3a0   : > { %v8536_v17 = vadd.f32 %v3323_v11, %v3155_v30  ;;  %3193 = vmatmul.bf16.gmra.mxu0 %v8519_v19  ;;  %v8552_v30 = vpop.permute.xlu1 %2402  ;;  %v8554_v19 = vor.u32 %v6161_v41, %v5831_v14  ;;  %v8570_v14 = vpop.permute.xlu2 %2337  ;;  %v8575_v41 = vor.u32 %v6163_v63, %v5829_v24  ;;  %v5599_v24 = vld [vmem:[%s10440_s7 + $0xf8] sm:$0xf0] }
 0x3a1   : > { %v3454_v13 = vpop.f32.mrf.mxu2  ;;  %10965 = vst [vmem:[#allocation124_spill] sm:$0xff] %v8552_v30 }
 0x3a2   : > { %v8546_v49 = vadd.f32 %v3454_v13, %v10962_v0  ;;  %10966 = vst [vmem:[#allocation125_spill] sm:$0xff] %v8554_v19 }
 0x3a3   : > { %v3328_v11 = vpop.f32.mrf.mxu1  ;;  %10969 = vst [vmem:[#allocation127_spill] sm:$0xff] %v8570_v14 }
 0x3a5   : > { %v3156_v12 = vpop.f32.mrf.mxu0 }
 0x3a6   : > { %v3157_v59 = vadd.f32 %v3156_v12, %v10968_v15  ;;  %3496 = vmatmul.bf16.gmra.mxu2 %v8548_v40  ;;  %3625 = vmatmul.bf16.gmra.mxu3 %v8550_v21  ;;  %v10970_v12 = vld [vmem:[#allocation35_spill] sm:$0xff]  ;;  %v8583_v15 = vpop.permute.xlu0 %2397 }
 0x3a7   : > { %3367 = vmatmul.bf16.gmra.mxu1 %v8554_v19  ;;  %10971 = vst [vmem:[#allocation35_spill] sm:$0xff] %v8575_v41  ;;  %v5725_v40 = vld [vmem:[%s10440_s7 + $0x1e8] sm:$0xf] }
 0x3a8   : > { %v8562_v13 = vadd.f32 %v3325_v18, %v3157_v59  ;;  %v8577_v19 = vpop.permute.xlu1 %2317  ;;  %v10972_v18 = vld [vmem:[#allocation41_spill] sm:$0xff]  ;;  %10973 = vst [vmem:[#allocation128_spill] sm:$0xff] %v8583_v15  ;;  %v8606_v4 = vor.u32 %v6136_v48, %v5725_v40 }
 0x3a9   : > { %v3457_v0 = vpop.f32.mrf.mxu2 }
 0x3aa   : > { %v8573_v27 = vadd.f32 %v3457_v0, %v10970_v12  ;;  %v6102_v0 = vld [vmem:[%s10440_s7 + $0xec] sm:$0xf]  ;;  %v6165_v12 = vld [vmem:[%s10440_s7 + $0x2e4] sm:$0xf]  ;;  %10974 = vst [vmem:[#allocation129_spill] sm:$0xff] %v8606_v4 }
 0x3ab   : > { %v3330_v36 = vpop.f32.mrf.mxu1  ;;  %v8608_v35 = vor.u32 %v6102_v0, %v5599_v24 }
 0x3ad   : > { %v3159_v59 = vpop.f32.mrf.mxu0  ;;  %10975 = vst [vmem:[#allocation130_spill] sm:$0xff] %v8608_v35 }
 0x3ae   : > { %v3160_v21 = vadd.f32 %v3159_v59, %v10972_v18  ;;  %v5847_v59 = vld [vmem:[%s10440_s7 + $0x2f0] sm:$0xf0]  ;;  %v8622_v48 = vpop.permute.xlu0 %2382 }
 0x3af   : > { %10980 = vst [vmem:[#allocation134_spill] sm:$0xff] %v8622_v48 }
 0x3b0   : > { %v8594_v63 = vadd.f32 %v3328_v11, %v3160_v21  ;;  %3198 = vmatmul.bf16.gmra.mxu0 %v8575_v41  ;;  %v8610_v11 = vor.u32 %v6165_v12, %v5847_v59  ;;  %v8612_v41 = vpop.permute.xlu2 %2322  ;;  %v8617_v44 = vpop.permute.xlu1 %2302 }
 0x3b1   : > { %v3459_v18 = vpop.f32.mrf.mxu2  ;;  %10977 = vst [vmem:[#allocation132_spill] sm:$0xff] %v8612_v41 }
 0x3b2   : > { %v8604_v58 = vadd.f32 %v3459_v18, %v8170_v8  ;;  %10976 = vst [vmem:[#allocation131_spill] sm:$0xff] %v8610_v11  ;;  %v5845_v18 = vld [vmem:[%s10440_s7 + $0x2e0] sm:$0xf] }
 0x3b3   : > { %v3333_v21 = vpop.f32.mrf.mxu1  ;;  %10979 = vst [vmem:[#allocation133_spill] sm:$0xff] %v8617_v44 }
 0x3b5   : > { %v3161_v7 = vpop.f32.mrf.mxu0 }
 0x3b6   : > { %v3162_v23 = vadd.f32 %v3161_v7, %v10978_v26  ;;  %3501 = vmatmul.bf16.gmra.mxu2 %v8606_v4  ;;  %3630 = vmatmul.bf16.gmra.mxu3 %v8608_v35  ;;  %v6167_v7 = vld [vmem:[%s10440_s7 + $0x2ec] sm:$0xf0]  ;;  %v5741_v35 = vld [vmem:[%s10440_s7 + $0x208] sm:$0xf]  ;;  %v6140_v4 = vld [vmem:[%s10440_s7 + $0x214] sm:$0xf0] }
 0x3b7   : > { %3372 = vmatmul.bf16.gmra.mxu1 %v8610_v11  ;;  %v8633_v12 = vor.u32 %v6167_v7, %v5845_v18  ;;  %v6169_v7 = vld [vmem:[%s10440_s7 + $0x304] sm:$0xf]  ;;  %v8664_v52 = vor.u32 %v6140_v4, %v5741_v35 }
 0x3b8   : > { %v8620_v8 = vadd.f32 %v3330_v36, %v3162_v23  ;;  %v8635_v23 = vpop.permute.xlu2 %2407  ;;  %v10983_v36 = vld [vmem:[#allocation31_spill] sm:$0xff] }
 0x3b9   : > { %v3462_v40 = vpop.f32.mrf.mxu2  ;;  %10981 = vst [vmem:[#allocation135_spill] sm:$0xff] %v8633_v12 }
 0x3ba   : > { %v8631_v0 = vadd.f32 %v3462_v40, %v8201_v28  ;;  %10982 = vst [vmem:[#allocation136_spill] sm:$0xff] %v8635_v23  ;;  %v6106_v28 = vld [vmem:[%s10440_s7 + $0x10c] sm:$0xf]  ;;  %v5615_v40 = vld [vmem:[%s10440_s7 + $0x118] sm:$0xf0] }
 0x3bb   : > { %v3335_v24 = vpop.f32.mrf.mxu1  ;;  %10985 = vst [vmem:[#allocation138_spill] sm:$0xff] %v8664_v52 }
 0x3bd   : > { %v3164_v59 = vpop.f32.mrf.mxu0 }
 0x3be   : > { %v3165_v11 = vadd.f32 %v3164_v59, %v10983_v36  ;;  %v5863_v59 = vld [vmem:[%s10440_s7 + $0x310] sm:$0xf0]  ;;  %v8659_v36 = vpop.permute.xlu1 %2387 }
 0x3bf   : > { %10984 = vst [vmem:[#allocation137_spill] sm:$0xff] %v8659_v36 }
 0x3c0   : > { %v8650_v18 = vadd.f32 %v3333_v21, %v3165_v11  ;;  %3203 = vmatmul.bf16.gmra.mxu0 %v8633_v12  ;;  %v8666_v21 = vor.u32 %v6106_v28, %v5615_v40  ;;  %v8668_v11 = vpop.permute.xlu0 %2297  ;;  %v8670_v12 = vor.u32 %v6169_v7, %v5863_v59  ;;  %v5861_v28 = vld [vmem:[%s10440_s7 + $0x300] sm:$0xf] }
 0x3c1   : > { %v3464_v26 = vpop.f32.mrf.mxu2 }
 0x3c2   : > { %v8662_v54 = vadd.f32 %v3464_v26, %v8230_v56  ;;  %10986 = vst [vmem:[#allocation139_spill] sm:$0xff] %v8666_v21  ;;  %v8676_v26 = vpop.permute.xlu2 %2392 }
 0x3c3   : > { %10987 = vst [vmem:[#allocation140_spill] sm:$0xff] %v8670_v12 }
 0x3c4   : > { %v3338_v46 = vpop.f32.mrf.mxu1  ;;  %10989 = vst [vmem:[#allocation141_spill] sm:$0xff] %v8676_v26 }
 0x3c5   : > { %v3166_v47 = vpop.f32.mrf.mxu0 }
 0x3c6   : > { %v3167_v43 = vadd.f32 %v3166_v47, %v10988_v60  ;;  %3506 = vmatmul.bf16.gmra.mxu2 %v8664_v52  ;;  %3635 = vmatmul.bf16.gmra.mxu3 %v8666_v21  ;;  %v6171_v47 = vld [vmem:[%s10440_s7 + $0x30c] sm:$0xf0]  ;;  %v8690_v59 = vpop.permute.xlu1 %2372  ;;  %v5757_v60 = vld [vmem:[%s10440_s7 + $0x228] sm:$0xf] }
 0x3c7   : > { %3377 = vmatmul.bf16.gmra.mxu1 %v8670_v12  ;;  %10991 = vst [vmem:[#allocation143_spill] sm:$0xff] %v8690_v59  ;;  %v8692_v12 = vor.u32 %v6171_v47, %v5861_v28  ;;  %v5879_v28 = vld [vmem:[%s10440_s7 + $0x330] sm:$0xf0] }
 0x3c8   : > { %v8678_v4 = vadd.f32 %v3335_v24, %v3167_v43  ;;  %v8694_v24 = vpop.permute.xlu0 %2282 }
 0x3c9   : > { %v3467_v35 = vpop.f32.mrf.mxu2  ;;  %v3596_v56 = vpop.f32.mrf.mxu3  ;;  %10992 = vst [vmem:[#allocation144_spill] sm:$0xff] %v8692_v12 }
 0x3ca   : > { %v8687_v40 = vadd.f32 %v3467_v35, %v8266_v55  ;;  %v3597_v7 = vadd.f32 %v3596_v56, %v8241_v22  ;;  %10993 = vst [vmem:[#allocation145_spill] sm:$0xff] %v8694_v24  ;;  %v6144_v55 = vld [vmem:[%s10440_s7 + $0x234] sm:$0xf0]  ;;  %v6110_v22 = vld [vmem:[%s10440_s7 + $0x12c] sm:$0xf] }
 0x3cb   : > { %v5631_v35 = vld [vmem:[%s10440_s7 + $0x138] sm:$0xf0]  ;;  %v8718_v23 = vor.u32 %v6144_v55, %v5757_v60 }
 0x3cc   : > { %10990 = vst [vmem:[#allocation142_spill] sm:$0xff] %v8687_v40  ;;  %v3340_v43 = vpop.f32.mrf.mxu1  ;;  %v4432_v30 = vmul.f32 0.2, %v3597_v7 }
 0x3cd   : > { %v3169_v21 = vpop.f32.mrf.mxu0  ;;  %10995 = vst [vmem:[#allocation147_spill] sm:$0xff] %v8718_v23 }
 0x3ce   : > { %v3170_v52 = vadd.f32 %v3169_v21, %v8694_v24  ;;  %v6173_v21 = vld [vmem:[%s10440_s7 + $0x324] sm:$0xf]  ;;  %v8730_v59 = vpop.permute.xlu1 %2287 }
 0x3cf   : > { %v8728_v26 = vor.u32 %v6173_v21, %v5879_v28  ;;  %10998 = vst [vmem:[#allocation150_spill] sm:$0xff] %v8730_v59 }
 0x3d0   : > { %v8709_v56 = vadd.f32 %v3338_v46, %v3170_v52  ;;  %3208 = vmatmul.bf16.gmra.mxu0 %v8692_v12  ;;  %v8724_v52 = vor.u32 %v6110_v22, %v5631_v35  ;;  %v8726_v12 = vpop.permute.xlu2 %2307  ;;  %v5877_v35 = vld [vmem:[%s10440_s7 + $0x320] sm:$0xf] }
 0x3d1   : > { %v3469_v47 = vpop.f32.mrf.mxu2  ;;  %v3598_v24 = vpop.f32.mrf.mxu3  ;;  %10997 = vst [vmem:[#allocation149_spill] sm:$0xff] %v8728_v26 }
 0x3d2   : > { %10994 = vst [vmem:[#allocation146_spill] sm:$0xff] %v8709_v56  ;;  %v8721_v15 = vadd.f32 %v3469_v47, %v8294_v25  ;;  %v3599_v46 = vadd.f32 %v3598_v24, %v8278_v1  ;;  %v4560_v56 = vmax.f32 %v3597_v7, %v4432_v30  ;;  %v6175_v30 = vld [vmem:[%s10440_s7 + $0x32c] sm:$0xf0]  ;;  %v5773_v47 = vld [vmem:[%s10440_s7 + $0x248] sm:$0xf] }
 0x3d3   : > { %10996 = vst [vmem:[#allocation148_spill] sm:$0xff] %v8724_v52  ;;  %v8750_v7 = vor.u32 %v6175_v30, %v5877_v35 }
 0x3d4   : > { %v4434_v36 = vmul.f32 0.2, %v3599_v46  ;;  %v3343_v48 = vpop.f32.mrf.mxu1 }
 0x3d5   : > { %v3171_v40 = vpop.f32.mrf.mxu0  ;;  %11001 = vst [vmem:[#allocation153_spill] sm:$0xff] %v8750_v7 }
 0x3d6   : > { %v4562_v60 = vmax.f32 %v3599_v46, %v4434_v36  ;;  %v3172_v55 = vadd.f32 %v3171_v40, %v8730_v59  ;;  %3511 = vmatmul.bf16.gmra.mxu2 %v8718_v23  ;;  %3640 = vmatmul.bf16.gmra.mxu3 %v8724_v52  ;;  %v6148_v46 = vld [vmem:[%s10440_s7 + $0x254] sm:$0xf0] }
 0x3d7   : > { %3382 = vmatmul.bf16.gmra.mxu1 %v8728_v26  ;;  %v8776_v30 = vor.u32 %v6148_v46, %v5773_v47 }
 0x3d8   : > { %v8736_v1 = vadd.f32 %v3340_v43, %v3172_v55  ;;  %v8738_v25 = vpack.c.bf16 %v4562_v60, %v4560_v56  ;;  %v8752_v56 = vpop.permute.xlu2 %2292  ;;  %v6177_v55 = vld [vmem:[%s10440_s7 + $0x344] sm:$0xf] }
 0x3d9   : > { %v3472_v24 = vpop.f32.mrf.mxu2  ;;  %v3601_v22 = vpop.f32.mrf.mxu3  ;;  %11002 = vst [vmem:[#allocation154_spill] sm:$0xff] %v8752_v56 }
 0x3da   : > { %10999 = vst [vmem:[#allocation151_spill] sm:$0xff] %v8738_v25  ;;  %v8747_v36 = vadd.f32 %v3472_v24, %v8320_v32  ;;  %v3602_v40 = vadd.f32 %v3601_v22, %v8303_v37  ;;  %v6114_v37 = vld [vmem:[%s10440_s7 + $0x14c] sm:$0xf]  ;;  %v5647_v32 = vld [vmem:[%s10440_s7 + $0x158] sm:$0xf0] }
 0x3db   : > { %v5895_v24 = vld [vmem:[%s10440_s7 + $0x350] sm:$0xf0]  ;;  %11003 = vst [vmem:[#allocation155_spill] sm:$0xff] %v8776_v30 }
 0x3dc   : > { %11000 = vst [vmem:[#allocation152_spill] sm:$0xff] %v8747_v36  ;;  %v3345_v43 = vpop.f32.mrf.mxu1 }
 0x3dd   : > { %v3174_v21 = vpop.f32.mrf.mxu0 }
 0x3de   : > { %v3175_v28 = vadd.f32 %v3174_v21, %v8752_v56  ;;  %v4436_v21 = vmul.f32 0.2, %v3602_v40 }
 0x3e0   : > { %v8767_v60 = vadd.f32 %v3343_v48, %v3175_v28  ;;  %3213 = vmatmul.bf16.gmra.mxu0 %v8750_v7  ;;  %v8782_v28 = vor.u32 %v6114_v37, %v5647_v32  ;;  %v8784_v7 = vor.u32 %v6177_v55, %v5895_v24  ;;  %v4564_v59 = vmax.f32 %v3602_v40, %v4436_v21  ;;  %v5893_v37 = vld [vmem:[%s10440_s7 + $0x340] sm:$0xf]  ;;  %v6152_v55 = vld [vmem:[%s10440_s7 + $0x274] sm:$0xf0] }
 0x3e1   : > { %v3474_v22 = vpop.f32.mrf.mxu2  ;;  %v3603_v35 = vpop.f32.mrf.mxu3 }
 0x3e2   : > { %v8779_v56 = vadd.f32 %v3474_v22, %v8342_v31  ;;  %v3604_v48 = vadd.f32 %v3603_v35, %v8330_v61  ;;  %11004 = vst [vmem:[#allocation156_spill] sm:$0xff] %v8782_v28  ;;  %v6181_v22 = vld [vmem:[%s10440_s7 + $0x364] sm:$0xf]  ;;  %v5911_v35 = vld [vmem:[%s10440_s7 + $0x370] sm:$0xf0] }
 0x3e3   : > { %11005 = vst [vmem:[#allocation157_spill] sm:$0xff] %v8784_v7 }
 0x3e4   : > { %v4438_v26 = vmul.f32 0.2, %v3604_v48  ;;  %v3348_v52 = vpop.f32.mrf.mxu1 }
 0x3e5   : > { %v3176_v23 = vpop.f32.mrf.mxu0 }
 0x3e6   : > { %v4566_v25 = vmax.f32 %v3604_v48, %v4438_v26  ;;  %v3177_v36 = vadd.f32 %v3176_v23, %v8668_v11  ;;  %3516 = vmatmul.bf16.gmra.mxu2 %v8776_v30  ;;  %3645 = vmatmul.bf16.gmra.mxu3 %v8782_v28  ;;  %v6179_v23 = vld [vmem:[%s10440_s7 + $0x34c] sm:$0xf0] }
 0x3e7   : > { %3387 = vmatmul.bf16.gmra.mxu1 %v8784_v7  ;;  %v8804_v32 = vor.u32 %v6179_v23, %v5893_v37 }
 0x3e8   : > { %v8790_v31 = vadd.f32 %v3345_v43, %v3177_v36  ;;  %v8792_v61 = vpack.c.bf16 %v4566_v25, %v4564_v59  ;;  %v5789_v43 = vld [vmem:[%s10440_s7 + $0x268] sm:$0xf] }
 0x3e9   : > { %v3477_v47 = vpop.f32.mrf.mxu2  ;;  %v3606_v46 = vpop.f32.mrf.mxu3  ;;  %11006 = vst [vmem:[#allocation158_spill] sm:$0xff] %v8804_v32 }
 0x3ea   : > { %v8801_v26 = vadd.f32 %v3477_v47, %v8368_v3  ;;  %v3607_v40 = vadd.f32 %v3606_v46, %v8351_v39  ;;  %v6118_v3 = vld [vmem:[%s10440_s7 + $0x16c] sm:$0xf]  ;;  %v5663_v39 = vld [vmem:[%s10440_s7 + $0x178] sm:$0xf0]  ;;  %v8828_v47 = vor.u32 %v6152_v55, %v5789_v43 }
 0x3eb   : > { %v8834_v23 = vor.u32 %v6118_v3, %v5663_v39  ;;  %v5909_v3 = vld [vmem:[%s10440_s7 + $0x360] sm:$0xf] }
 0x3ec   : > { %v3350_v36 = vpop.f32.mrf.mxu1  ;;  %11007 = vst [vmem:[#allocation159_spill] sm:$0xff] %v8828_v47  ;;  %v4440_v46 = vmul.f32 0.2, %v3607_v40 }
 0x3ed   : > { %v3179_v59 = vpop.f32.mrf.mxu0  ;;  %11008 = vst [vmem:[#allocation160_spill] sm:$0xff] %v8834_v23 }
 0x3ee   : > { %v3180_v25 = vadd.f32 %v3179_v59, %v8617_v44  ;;  %v8836_v59 = vor.u32 %v6181_v22, %v5911_v35  ;;  %v4568_v7 = vmax.f32 %v3607_v40, %v4440_v46  ;;  %v6156_v35 = vld [vmem:[%s10440_s7 + $0x294] sm:$0xf0]  ;;  %v5927_v46 = vld [vmem:[%s10440_s7 + $0x390] sm:$0xf0] }
 0x3f0   : > { %v8819_v24 = vadd.f32 %v3348_v52, %v3180_v25  ;;  %3218 = vmatmul.bf16.gmra.mxu0 %v8804_v32  ;;  %11009 = vst [vmem:[#allocation161_spill] sm:$0xff] %v8836_v59 }
 0x3f1   : > { %v3479_v21 = vpop.f32.mrf.mxu2  ;;  %v3608_v48 = vpop.f32.mrf.mxu3 }
 0x3f2   : > { %v8831_v37 = vadd.f32 %v3479_v21, %v8392_v9  ;;  %v3609_v52 = vadd.f32 %v3608_v48, %v8378_v6  ;;  %v6185_v48 = vld [vmem:[%s10440_s7 + $0x384] sm:$0xf] }
 0x3f4   : > { %v4442_v25 = vmul.f32 0.2, %v3609_v52  ;;  %v3353_v32 = vpop.f32.mrf.mxu1 }
 0x3f5   : > { %v3181_v44 = vpop.f32.mrf.mxu0 }
 0x3f6   : > { %v4570_v28 = vmax.f32 %v3609_v52, %v4442_v25  ;;  %v3182_v30 = vadd.f32 %v3181_v44, %v8726_v12  ;;  %3521 = vmatmul.bf16.gmra.mxu2 %v8828_v47  ;;  %3650 = vmatmul.bf16.gmra.mxu3 %v8834_v23  ;;  %v6183_v44 = vld [vmem:[%s10440_s7 + $0x36c] sm:$0xf0] }
 0x3f7   : > { %3392 = vmatmul.bf16.gmra.mxu1 %v8836_v59  ;;  %v8856_v22 = vor.u32 %v6183_v44, %v5909_v3 }
 0x3f8   : > { %v8842_v9 = vadd.f32 %v3350_v36, %v3182_v30  ;;  %v8844_v6 = vpack.c.bf16 %v4570_v28, %v4568_v7  ;;  %v5805_v36 = vld [vmem:[%s10440_s7 + $0x288] sm:$0xf] }
 0x3f9   : > { %v3482_v43 = vpop.f32.mrf.mxu2  ;;  %v3611_v55 = vpop.f32.mrf.mxu3  ;;  %11010 = vst [vmem:[#allocation162_spill] sm:$0xff] %v8856_v22 }
 0x3fa   : > { %v8853_v40 = vadd.f32 %v3482_v43, %v8422_v50  ;;  %v3612_v39 = vadd.f32 %v3611_v55, %v8401_v53  ;;  %v6122_v50 = vld [vmem:[%s10440_s7 + $0x18c] sm:$0xf]  ;;  %v5679_v53 = vld [vmem:[%s10440_s7 + $0x198] sm:$0xf0]  ;;  %v8880_v43 = vor.u32 %v6156_v35, %v5805_v36 }
 0x3fb   : > { %v8886_v44 = vor.u32 %v6122_v50, %v5679_v53  ;;  %v5925_v50 = vld [vmem:[%s10440_s7 + $0x380] sm:$0xf] }
 0x3fc   : > { %v3355_v30 = vpop.f32.mrf.mxu1  ;;  %11011 = vst [vmem:[#allocation163_spill] sm:$0xff] %v8880_v43  ;;  %v4444_v55 = vmul.f32 0.2, %v3612_v39 }
 0x3fd   : > { %v3184_v7 = vpop.f32.mrf.mxu0  ;;  %11012 = vst [vmem:[#allocation164_spill] sm:$0xff] %v8886_v44 }
 0x3fe   : > { %v3185_v28 = vadd.f32 %v3184_v7, %v8556_v57  ;;  %v8888_v7 = vor.u32 %v6185_v48, %v5927_v46  ;;  %v4572_v59 = vmax.f32 %v3612_v39, %v4444_v55  ;;  %v6160_v46 = vld [vmem:[%s10440_s7 + $0x2b4] sm:$0xf0]  ;;  %v5943_v55 = vld [vmem:[%s10440_s7 + $0x3b0] sm:$0xf0] }
 0x400   : > { %v8871_v21 = vadd.f32 %v3353_v32, %v3185_v28  ;;  %3223 = vmatmul.bf16.gmra.mxu0 %v8856_v22  ;;  %11013 = vst [vmem:[#allocation165_spill] sm:$0xff] %v8888_v7 }
 0x401   : > { %v3484_v52 = vpop.f32.mrf.mxu2  ;;  %v3613_v25 = vpop.f32.mrf.mxu3 }
 0x402   : > { %v8883_v3 = vadd.f32 %v3484_v52, %v8448_v51  ;;  %v3614_v32 = vadd.f32 %v3613_v25, %v8432_v10  ;;  %v6189_v25 = vld [vmem:[%s10440_s7 + $0x3a4] sm:$0xf] }
 0x404   : > { %v4446_v28 = vmul.f32 0.2, %v3614_v32  ;;  %v3358_v22 = vpop.f32.mrf.mxu1 }
 0x405   : > { %v3186_v57 = vpop.f32.mrf.mxu0 }
 0x406   : > { %v4574_v23 = vmax.f32 %v3614_v32, %v4446_v28  ;;  %v3187_v47 = vadd.f32 %v3186_v57, %v8577_v19  ;;  %3526 = vmatmul.bf16.gmra.mxu2 %v8880_v43  ;;  %3655 = vmatmul.bf16.gmra.mxu3 %v8886_v44  ;;  %v6187_v57 = vld [vmem:[%s10440_s7 + $0x38c] sm:$0xf0] }
 0x407   : > { %3397 = vmatmul.bf16.gmra.mxu1 %v8888_v7  ;;  %v8908_v48 = vor.u32 %v6187_v57, %v5925_v50 }
 0x408   : > { %v8894_v51 = vadd.f32 %v3355_v30, %v3187_v47  ;;  %v8896_v10 = vpack.c.bf16 %v4574_v23, %v4572_v59  ;;  %v5821_v30 = vld [vmem:[%s10440_s7 + $0x2a8] sm:$0xf] }
 0x409   : > { %v3487_v36 = vpop.f32.mrf.mxu2  ;;  %v3616_v35 = vpop.f32.mrf.mxu3  ;;  %11014 = vst [vmem:[#allocation166_spill] sm:$0xff] %v8908_v48 }
 0x40a   : > { %v8905_v39 = vadd.f32 %v3487_v36, %v8478_v16  ;;  %v3617_v53 = vadd.f32 %v3616_v35, %v8457_v62  ;;  %v6126_v16 = vld [vmem:[%s10440_s7 + $0x1ac] sm:$0xf]  ;;  %v5695_v62 = vld [vmem:[%s10440_s7 + $0x1b8] sm:$0xf0]  ;;  %v8932_v36 = vor.u32 %v6160_v46, %v5821_v30 }
 0x40b   : > { %v8938_v57 = vor.u32 %v6126_v16, %v5695_v62  ;;  %v5941_v16 = vld [vmem:[%s10440_s7 + $0x3a0] sm:$0xf] }
 0x40c   : > { %v3360_v47 = vpop.f32.mrf.mxu1  ;;  %v4448_v35 = vmul.f32 0.2, %v3617_v53 }
 0x40d   : > { %v3189_v23 = vpop.f32.mrf.mxu0  ;;  %11015 = vst [vmem:[#allocation167_spill] sm:$0xff] %v8938_v57 }
 0x40e   : > { %v3190_v59 = vadd.f32 %v3189_v23, %v8612_v41  ;;  %v8940_v23 = vor.u32 %v6189_v25, %v5943_v55  ;;  %v4576_v7 = vmax.f32 %v3617_v53, %v4448_v35  ;;  %v6164_v55 = vld [vmem:[%s10440_s7 + $0x2d4] sm:$0xf0]  ;;  %v5959_v35 = vld [vmem:[%s10440_s7 + $0x3d0] sm:$0xf0] }
 0x410   : > { %v8923_v52 = vadd.f32 %v3358_v22, %v3190_v59  ;;  %3228 = vmatmul.bf16.gmra.mxu0 %v8908_v48  ;;  %11016 = vst [vmem:[#allocation168_spill] sm:$0xff] %v8940_v23 }
 0x411   : > { %v3489_v32 = vpop.f32.mrf.mxu2  ;;  %v3618_v28 = vpop.f32.mrf.mxu3 }
 0x412   : > { %v8935_v50 = vadd.f32 %v3489_v32, %v8504_v38  ;;  %v3619_v22 = vadd.f32 %v3618_v28, %v8490_v42  ;;  %v5711_v32 = vld [vmem:[%s10440_s7 + $0x1d8] sm:$0xf0] }
 0x414   : > { %v4450_v59 = vmul.f32 0.2, %v3619_v22  ;;  %v3363_v48 = vpop.f32.mrf.mxu1 }
 0x415   : > { %v3191_v41 = vpop.f32.mrf.mxu0 }
 0x416   : > { %v4578_v44 = vmax.f32 %v3619_v22, %v4450_v59  ;;  %v3192_v43 = vadd.f32 %v3191_v41, %v8517_v34  ;;  %3531 = vmatmul.bf16.gmra.mxu2 %v8932_v36  ;;  %3660 = vmatmul.bf16.gmra.mxu3 %v8938_v57  ;;  %v6191_v41 = vld [vmem:[%s10440_s7 + $0x3ac] sm:$0xf0] }
 0x417   : > { %3402 = vmatmul.bf16.gmra.mxu1 %v8940_v23  ;;  %v8959_v62 = vor.u32 %v6191_v41, %v5941_v16 }
 0x418   : > { %v8946_v38 = vadd.f32 %v3360_v47, %v3192_v43  ;;  %v8948_v42 = vpack.c.bf16 %v4578_v44, %v4576_v7  ;;  %v5837_v47 = vld [vmem:[%s10440_s7 + $0x2c8] sm:$0xf] }
 0x419   : > { %v3492_v30 = vpop.f32.mrf.mxu2  ;;  %v3621_v46 = vpop.f32.mrf.mxu3  ;;  %11017 = vst [vmem:[#allocation169_spill] sm:$0xff] %v8959_v62 }
 0x41a   : > { %v8957_v53 = vadd.f32 %v3492_v30, %v8536_v17  ;;  %v3622_v44 = vadd.f32 %v3621_v46, %v8515_v45  ;;  %v6130_v17 = vld [vmem:[%s10440_s7 + $0x1cc] sm:$0xf]  ;;  %v6193_v45 = vld [vmem:[%s10440_s7 + $0x3c4] sm:$0xf]  ;;  %v8984_v30 = vor.u32 %v6164_v55, %v5837_v47 }
 0x41b   : > { %v8990_v41 = vor.u32 %v6130_v17, %v5711_v32  ;;  %v5957_v17 = vld [vmem:[%s10440_s7 + $0x3c0] sm:$0xf] }
 0x41c   : > { %v3365_v25 = vpop.f32.mrf.mxu1  ;;  %v4452_v46 = vmul.f32 0.2, %v3622_v44 }
 0x41d   : > { %v3194_v43 = vpop.f32.mrf.mxu0  ;;  %11018 = vst [vmem:[#allocation170_spill] sm:$0xff] %v8990_v41 }
 0x41e   : > { %v3195_v7 = vadd.f32 %v3194_v43, %v8467_v5  ;;  %v8992_v43 = vor.u32 %v6193_v45, %v5959_v35  ;;  %v4580_v5 = vmax.f32 %v3622_v44, %v4452_v46  ;;  %v6168_v35 = vld [vmem:[%s10440_s7 + $0x2f4] sm:$0xf0]  ;;  %v5975_v46 = vld [vmem:[%s10440_s7 + $0x3f0] sm:$0xf0] }
 0x420   : > { %v8975_v28 = vadd.f32 %v3363_v48, %v3195_v7  ;;  %3233 = vmatmul.bf16.gmra.mxu0 %v8959_v62  ;;  %11019 = vst [vmem:[#allocation171_spill] sm:$0xff] %v8992_v43 }
 0x421   : > { %v3494_v22 = vpop.f32.mrf.mxu2  ;;  %v3623_v59 = vpop.f32.mrf.mxu3 }
 0x422   : > { %v8987_v16 = vadd.f32 %v3494_v22, %v8562_v13  ;;  %v3624_v48 = vadd.f32 %v3623_v59, %v8546_v49  ;;  %v5727_v22 = vld [vmem:[%s10440_s7 + $0x1f8] sm:$0xf0] }
 0x424   : > { %v4454_v7 = vmul.f32 0.2, %v3624_v48  ;;  %v3368_v34 = vpop.f32.mrf.mxu1 }
 0x425   : > { %v3196_v62 = vpop.f32.mrf.mxu0 }
 0x426   : > { %v4582_v23 = vmax.f32 %v3624_v48, %v4454_v7  ;;  %v3197_v57 = vadd.f32 %v3196_v62, %v8570_v14  ;;  %3536 = vmatmul.bf16.gmra.mxu2 %v8984_v30  ;;  %3665 = vmatmul.bf16.gmra.mxu3 %v8990_v41  ;;  %v6195_v62 = vld [vmem:[%s10440_s7 + $0x3cc] sm:$0xf0] }
 0x427   : > { %3407 = vmatmul.bf16.gmra.mxu1 %v8992_v43  ;;  %v9011_v32 = vor.u32 %v6195_v62, %v5957_v17 }
 0x428   : > { %v8998_v13 = vadd.f32 %v3365_v25, %v3197_v57  ;;  %v9000_v49 = vpack.c.bf16 %v4582_v23, %v4580_v5  ;;  %v5853_v25 = vld [vmem:[%s10440_s7 + $0x2e8] sm:$0xf] }
 0x429   : > { %v3497_v47 = vpop.f32.mrf.mxu2  ;;  %v3626_v55 = vpop.f32.mrf.mxu3  ;;  %11020 = vst [vmem:[#allocation172_spill] sm:$0xff] %v9011_v32 }
 0x42a   : > { %v9009_v44 = vadd.f32 %v3497_v47, %v8594_v63  ;;  %v3627_v5 = vadd.f32 %v3626_v55, %v8573_v27  ;;  %v6134_v63 = vld [vmem:[%s10440_s7 + $0x1ec] sm:$0xf]  ;;  %v6197_v27 = vld [vmem:[%s10440_s7 + $0x3e4] sm:$0xf]  ;;  %v9036_v47 = vor.u32 %v6168_v35, %v5853_v25 }
 0x42b   : > { %v9042_v62 = vor.u32 %v6134_v63, %v5727_v22  ;;  %v5973_v63 = vld [vmem:[%s10440_s7 + $0x3e0] sm:$0xf] }
 0x42c   : > { %v3370_v45 = vpop.f32.mrf.mxu1  ;;  %11021 = vst [vmem:[#allocation173_spill] sm:$0xff] %v9036_v47  ;;  %v4456_v55 = vmul.f32 0.2, %v3627_v5 }
 0x42d   : > { %v3199_v57 = vpop.f32.mrf.mxu0  ;;  %11022 = vst [vmem:[#allocation174_spill] sm:$0xff] %v9042_v62 }
 0x42e   : > { %v3200_v23 = vadd.f32 %v3199_v57, %v8407_v2  ;;  %v9044_v57 = vor.u32 %v6197_v27, %v5975_v46  ;;  %v4584_v2 = vmax.f32 %v3627_v5, %v4456_v55  ;;  %v6199_v5 = vld [vmem:[%s10440_s7 + $0x3ec] sm:$0xf0] }
 0x42f   : > { %v9061_v22 = vor.u32 %v6199_v5, %v5973_v63  ;;  %v9088_v5 = vpop.permute.xlu2 %2377 }
 0x430   : > { %v9027_v59 = vadd.f32 %v3368_v34, %v3200_v23  ;;  %3238 = vmatmul.bf16.gmra.mxu0 %v9011_v32  ;;  %11023 = vst [vmem:[#allocation175_spill] sm:$0xff] %v9044_v57 }
 0x431   : > { %v3499_v48 = vpop.f32.mrf.mxu2  ;;  %v3628_v7 = vpop.f32.mrf.mxu3  ;;  %11024 = vst [vmem:[#allocation176_spill] sm:$0xff] %v9061_v22 }
 0x432   : > { %v9039_v17 = vadd.f32 %v3499_v48, %v8620_v8  ;;  %v3629_v34 = vadd.f32 %v3628_v7, %v8604_v58  ;;  %v5743_v48 = vld [vmem:[%s10440_s7 + $0x218] sm:$0xf0]  ;;  %11027 = vst [vmem:[#allocation179_spill] sm:$0xff] %v9088_v5 }
 0x434   : > { %v4458_v23 = vmul.f32 0.2, %v3629_v34  ;;  %v3373_v14 = vpop.f32.mrf.mxu1 }
 0x435   : > { %v3201_v32 = vpop.f32.mrf.mxu0 }
 0x436   : > { %v4586_v43 = vmax.f32 %v3629_v34, %v4458_v23  ;;  %v3202_v41 = vadd.f32 %v3201_v32, %v8440_v33  ;;  %3541 = vmatmul.bf16.gmra.mxu2 %v9036_v47  ;;  %3670 = vmatmul.bf16.gmra.mxu3 %v9042_v62 }
 0x437   : > { %3412 = vmatmul.bf16.gmra.mxu1 %v9044_v57 }
 0x438   : > { %v9050_v8 = vadd.f32 %v3370_v45, %v3202_v41  ;;  %v4712_v58 = vpack.c.bf16 %v4586_v43, %v4584_v2  ;;  %v5869_v43 = vld [vmem:[%s10440_s7 + $0x308] sm:$0xf]  ;;  %v6172_v45 = vld [vmem:[%s10440_s7 + $0x314] sm:$0xf0] }
 0x439   : > { %v3502_v25 = vpop.f32.mrf.mxu2  ;;  %v3631_v35 = vpop.f32.mrf.mxu3  ;;  %v9080_v34 = vor.u32 %v6172_v45, %v5869_v43  ;;  %v11028_v43 = vld [vmem:[#allocation55_spill] sm:$0xff] }
 0x43a   : > { %v9059_v32 = vadd.f32 %v3502_v25, %v8650_v18  ;;  %v3632_v41 = vadd.f32 %v3631_v35, %v8631_v0  ;;  %v6138_v18 = vld [vmem:[%s10440_s7 + $0x20c] sm:$0xf] }
 0x43b   : > { %11025 = vst [vmem:[#allocation177_spill] sm:$0xff] %v9080_v34  ;;  %v9086_v63 = vor.u32 %v6138_v18, %v5743_v48  ;;  %v11029_v48 = vld [vmem:[#allocation146_spill] sm:$0xff] }
 0x43c   : > { %v3375_v27 = vpop.f32.mrf.mxu1  ;;  %v4460_v23 = vmul.f32 0.2, %v3632_v41 }
 0x43d   : > { %v3204_v46 = vpop.f32.mrf.mxu0  ;;  %11026 = vst [vmem:[#allocation178_spill] sm:$0xff] %v9086_v63 }
 0x43e   : > { %v3205_v2 = vadd.f32 %v3204_v46, %v8459_v20 }
 0x440   : > { %v9077_v7 = vadd.f32 %v3373_v14, %v3205_v2  ;;  %3243 = vmatmul.bf16.gmra.mxu0 %v9061_v22  ;;  %v4588_v2 = vmax.f32 %v3632_v41, %v4460_v23  ;;  %v9100_v23 = vpop.permute.xlu2 %2362 }
 0x441   : > { %v3504_v0 = vpop.f32.mrf.mxu2  ;;  %v3633_v55 = vpop.f32.mrf.mxu3  ;;  %11031 = vst [vmem:[#allocation55_spill] sm:$0xff] %v9100_v23 }
 0x442   : > { %v9083_v25 = vadd.f32 %v3504_v0, %v8678_v4  ;;  %v3634_v35 = vadd.f32 %v3633_v55, %v8662_v54  ;;  %v11030_v55 = vld [vmem:[#allocation142_spill] sm:$0xff] }
 0x444   : > { %v4462_v46 = vmul.f32 0.2, %v3634_v35  ;;  %v3378_v33 = vpop.f32.mrf.mxu1 }
 0x445   : > { %v3206_v14 = vpop.f32.mrf.mxu0 }
 0x446   : > { %v4590_v20 = vmax.f32 %v3634_v35, %v4462_v46  ;;  %v3207_v22 = vadd.f32 %v3206_v14, %v8384_v29  ;;  %3546 = vmatmul.bf16.gmra.mxu2 %v9080_v34  ;;  %3675 = vmatmul.bf16.gmra.mxu3 %v9086_v63  ;;  %v5759_v14 = vld [vmem:[%s10440_s7 + $0x238] sm:$0xf0] }
 0x447   : > { %3933 = vmatmul.bf16.vlgmr.msrb.gmra.mxu1 %v11028_v43  ;;  %v11032_v43 = vld [vmem:[#allocation24_spill] sm:$0xff] }
 0x448   : > { %v4714_v4 = vpack.c.bf16 %v4590_v20, %v4588_v2  ;;  %v9094_v45 = vadd.f32 %v3375_v27, %v3207_v22  ;;  %v5885_v20 = vld [vmem:[%s10440_s7 + $0x328] sm:$0xf]  ;;  %v6176_v22 = vld [vmem:[%s10440_s7 + $0x334] sm:$0xf0]  ;;  %v6142_v27 = vld [vmem:[%s10440_s7 + $0x22c] sm:$0xf] }
 0x449   : > { %v3507_v54 = vpop.f32.mrf.mxu2  ;;  %v3636_v18 = vpop.f32.mrf.mxu3 }
 0x44a   : > { %v9097_v0 = vadd.f32 %v3507_v54, %v11029_v48  ;;  %v3637_v57 = vadd.f32 %v3636_v18, %v11030_v55  ;;  %4824 = vmatpush.bf16.msra.mxu0 %v4714_v4  ;;  %v9118_v54 = vor.u32 %v6176_v22, %v5885_v20 }
 0x44c   : > { %v3380_v41 = vpop.f32.mrf.mxu1  ;;  %11033 = vst [vmem:[#allocation146_spill] sm:$0xff] %v9118_v54  ;;  %v4464_v18 = vmul.f32 0.2, %v3637_v57 }
 0x44d   : > { %v3209_v35 = vpop.f32.mrf.mxu0 }
 0x44e   : > { %v3210_v46 = vadd.f32 %v3209_v35, %v9100_v23  ;;  %4825 = vmatpush.bf16.msra.mxu0 %v4712_v58  ;;  %v9125_v35 = vor.u32 %v6142_v27, %v5759_v14 }
 0x450   : > { %v9115_v2 = vadd.f32 %v3378_v33, %v3210_v46  ;;  %3764 = vmatmul.bf16.vlgmr.msrb.gmra.mxu0 %v11032_v43  ;;  %11034 = vst [vmem:[#allocation142_spill] sm:$0xff] %v9125_v35  ;;  %v9127_v33 = vpop.permute.xlu0 %2367  ;;  %v4592_v43 = vmax.f32 %v3637_v57, %v4464_v18  ;;  %v11038_v18 = vld [vmem:[#allocation143_spill] sm:$0xff] }
 0x451   : > { %v3509_v58 = vpop.f32.mrf.mxu2  ;;  %v3638_v4 = vpop.f32.mrf.mxu3  ;;  %11035 = vst [vmem:[#allocation24_spill] sm:$0xff] %v9127_v33 }
 0x452   : > { %v9121_v48 = vadd.f32 %v3509_v58, %v8736_v1  ;;  %v3639_v55 = vadd.f32 %v3638_v4, %v8721_v15  ;;  %4826 = vmatpush.bf16.msra.mxu0 %v9000_v49  ;;  %v11036_v15 = vld [vmem:[#allocation62_spill] sm:$0xff] }
 0x454   : > { %v4466_v29 = vmul.f32 0.2, %v3639_v55  ;;  %v3383_v23 = vpop.f32.mrf.mxu1 }
 0x455   : > { %v3211_v46 = vpop.f32.mrf.mxu0 }
 0x456   : > { %v4594_v63 = vmax.f32 %v3639_v55, %v4466_v29  ;;  %v3212_v20 = vadd.f32 %v3211_v46, %v9127_v33  ;;  %3551 = vmatmul.bf16.gmra.mxu2 %v9118_v54  ;;  %3680 = vmatmul.bf16.gmra.mxu3 %v9125_v35  ;;  %v11037_v29 = vld [vmem:[#allocation152_spill] sm:$0xff]  ;;  %v11039_v46 = vld [vmem:[#allocation19_spill] sm:$0xff] }
 0x457   : > { %4827 = vmatpush.bf16.msra.mxu0 %v8948_v42  ;;  %3938 = vmatmul.bf16.gmra.mxu1 %v11036_v15  ;;  %v5901_v42 = vld [vmem:[%s10440_s7 + $0x348] sm:$0xf] }
 0x458   : > { %v9134_v1 = vadd.f32 %v3380_v41, %v3212_v20  ;;  %v9136_v49 = vpack.c.bf16 %v4594_v63, %v4592_v43  ;;  %v6180_v63 = vld [vmem:[%s10440_s7 + $0x354] sm:$0xf0] }
 0x459   : > { %v3512_v22 = vpop.f32.mrf.mxu2  ;;  %v3641_v27 = vpop.f32.mrf.mxu3  ;;  %v9160_v15 = vor.u32 %v6180_v63, %v5901_v42  ;;  %v11042_v42 = vld [vmem:[#allocation151_spill] sm:$0xff] }
 0x45a   : > { %v9139_v14 = vadd.f32 %v3512_v22, %v8767_v60  ;;  %v3642_v57 = vadd.f32 %v3641_v27, %v11037_v29  ;;  %v6146_v60 = vld [vmem:[%s10440_s7 + $0x24c] sm:$0xf] }
 0x45b   : > { %4828 = vmatpush.bf16.msra.mxu0 %v8896_v10  ;;  %v5775_v10 = vld [vmem:[%s10440_s7 + $0x258] sm:$0xf0]  ;;  %11040 = vst [vmem:[#allocation62_spill] sm:$0xff] %v9160_v15 }
 0x45c   : > { %v3385_v58 = vpop.f32.mrf.mxu1  ;;  %v4468_v22 = vmul.f32 0.2, %v3642_v57  ;;  %v9166_v29 = vor.u32 %v6146_v60, %v5775_v10 }
 0x45d   : > { %v3214_v4 = vpop.f32.mrf.mxu0 }
 0x45e   : > { %v3215_v55 = vadd.f32 %v3214_v4, %v11038_v18  ;;  %11041 = vst [vmem:[#allocation152_spill] sm:$0xff] %v9166_v29 }
 0x45f   : > { %4829 = vmatpush.bf16.msra.mxu0 %v8844_v6 }
 0x460   : > { %v9157_v41 = vadd.f32 %v3383_v23, %v3215_v55  ;;  %3769 = vmatmul.bf16.gmra.mxu0 %v11039_v46  ;;  %v4596_v55 = vmax.f32 %v3642_v57, %v4468_v22  ;;  %v11044_v22 = vld [vmem:[#allocation134_spill] sm:$0xff] }
 0x461   : > { %v3514_v43 = vpop.f32.mrf.mxu2  ;;  %v3643_v20 = vpop.f32.mrf.mxu3 }
 0x462   : > { %v9163_v27 = vadd.f32 %v3514_v43, %v8790_v31  ;;  %v3644_v6 = vadd.f32 %v3643_v20, %v8779_v56  ;;  %v11043_v31 = vld [vmem:[#allocation64_spill] sm:$0xff] }
 0x463   : > { %4830 = vmatpush.bf16.msra.mxu0 %v8792_v61 }
 0x464   : > { %v4470_v4 = vmul.f32 0.2, %v3644_v6  ;;  %v3388_v33 = vpop.f32.mrf.mxu1 }
 0x465   : > { %v3216_v23 = vpop.f32.mrf.mxu0 }
 0x466   : > { %v4598_v18 = vmax.f32 %v3644_v6, %v4470_v4  ;;  %v3217_v46 = vadd.f32 %v3216_v23, %v9088_v5  ;;  %3556 = vmatmul.bf16.gmra.mxu2 %v9160_v15  ;;  %3685 = vmatmul.bf16.gmra.mxu3 %v9166_v29  ;;  %v5917_v4 = vld [vmem:[%s10440_s7 + $0x368] sm:$0xf]  ;;  %v11045_v23 = vld [vmem:[#allocation42_spill] sm:$0xff] }
 0x467   : > { %4831 = vmatpush.bf16.msra.mxu0 %v11042_v42  ;;  %3943 = vmatmul.bf16.gmra.mxu1 %v11043_v31 }
 0x468   : > { %v9174_v56 = vadd.f32 %v3385_v58, %v3217_v46  ;;  %v9176_v63 = vpack.c.bf16 %v4598_v18, %v4596_v55  ;;  %v6184_v58 = vld [vmem:[%s10440_s7 + $0x374] sm:$0xf0]  ;;  %v6150_v18 = vld [vmem:[%s10440_s7 + $0x26c] sm:$0xf] }
 0x469   : > { %v3517_v61 = vpop.f32.mrf.mxu2  ;;  %v3646_v60 = vpop.f32.mrf.mxu3  ;;  %v9198_v42 = vor.u32 %v6184_v58, %v5917_v4  ;;  %v11049_v4 = vld [vmem:[#allocation51_spill] sm:$0xff] }
 0x46a   : > { %v9179_v10 = vadd.f32 %v3517_v61, %v8819_v24  ;;  %v3647_v57 = vadd.f32 %v3646_v60, %v8801_v26  ;;  %v5791_v26 = vld [vmem:[%s10440_s7 + $0x278] sm:$0xf0] }
 0x46b   : > { %11046 = vst [vmem:[#allocation19_spill] sm:$0xff] %v9198_v42 }
 0x46c   : > { %v3390_v43 = vpop.f32.mrf.mxu1  ;;  %v4472_v31 = vmul.f32 0.2, %v3647_v57 }
 0x46d   : > { %v3219_v20 = vpop.f32.mrf.mxu0 }
 0x46e   : > { %v3220_v6 = vadd.f32 %v3219_v20, %v11044_v22  ;;  %v9204_v20 = vor.u32 %v6150_v18, %v5791_v26  ;;  %v4600_v15 = vmax.f32 %v3647_v57, %v4472_v31 }
 0x470   : > { %v9195_v24 = vadd.f32 %v3388_v33, %v3220_v6  ;;  %3774 = vmatmul.bf16.gmra.mxu0 %v11045_v23  ;;  %11047 = vst [vmem:[#allocation151_spill] sm:$0xff] %v9204_v20  ;;  %v11048_v6 = vld [vmem:[#allocation137_spill] sm:$0xff] }
 0x471   : > { %v3519_v55 = vpop.f32.mrf.mxu2  ;;  %v3648_v46 = vpop.f32.mrf.mxu3 }
 0x472   : > { %v9201_v61 = vadd.f32 %v3519_v55, %v8842_v9  ;;  %v3649_v60 = vadd.f32 %v3648_v46, %v8831_v37  ;;  %v5933_v46 = vld [vmem:[%s10440_s7 + $0x388] sm:$0xf] }
 0x474   : > { %v4474_v5 = vmul.f32 0.2, %v3649_v60  ;;  %v3393_v22 = vpop.f32.mrf.mxu1 }
 0x475   : > { %v3221_v29 = vpop.f32.mrf.mxu0 }
 0x476   : > { %v4602_v33 = vmax.f32 %v3649_v60, %v4474_v5  ;;  %v3222_v35 = vadd.f32 %v3221_v29, %v11048_v6  ;;  %3561 = vmatmul.bf16.gmra.mxu2 %v9198_v42  ;;  %3690 = vmatmul.bf16.gmra.mxu3 %v9204_v20  ;;  %v11050_v29 = vld [vmem:[#allocation141_spill] sm:$0xff] }
 0x477   : > { %3948 = vmatmul.bf16.gmra.mxu1 %v11049_v4 }
 0x478   : > { %v9210_v58 = vadd.f32 %v3390_v43, %v3222_v35  ;;  %v9212_v9 = vpack.c.bf16 %v4602_v33, %v4600_v15  ;;  %v6188_v35 = vld [vmem:[%s10440_s7 + $0x394] sm:$0xf0]  ;;  %v6154_v15 = vld [vmem:[%s10440_s7 + $0x28c] sm:$0xf]  ;;  %v11051_v43 = vld [vmem:[#allocation60_spill] sm:$0xff] }
 0x479   : > { %v3522_v37 = vpop.f32.mrf.mxu2  ;;  %v3651_v18 = vpop.f32.mrf.mxu3  ;;  %v9234_v33 = vor.u32 %v6188_v35, %v5933_v46  ;;  %v11055_v46 = vld [vmem:[#allocation30_spill] sm:$0xff] }
 0x47a   : > { %v9215_v26 = vadd.f32 %v3522_v37, %v8871_v21  ;;  %v3652_v57 = vadd.f32 %v3651_v18, %v8853_v40  ;;  %v5807_v40 = vld [vmem:[%s10440_s7 + $0x298] sm:$0xf0] }
 0x47b   : > { %11052 = vst [vmem:[#allocation64_spill] sm:$0xff] %v9234_v33 }
 0x47c   : > { %v3395_v5 = vpop.f32.mrf.mxu1  ;;  %v4476_v4 = vmul.f32 0.2, %v3652_v57 }
 0x47d   : > { %v3224_v23 = vpop.f32.mrf.mxu0 }
 0x47e   : > { %v3225_v55 = vadd.f32 %v3224_v23, %v11050_v29  ;;  %v9240_v23 = vor.u32 %v6154_v15, %v5807_v40  ;;  %v4604_v42 = vmax.f32 %v3652_v57, %v4476_v4 }
 0x480   : > { %v9231_v21 = vadd.f32 %v3393_v22, %v3225_v55  ;;  %3779 = vmatmul.bf16.gmra.mxu0 %v11051_v43  ;;  %11053 = vst [vmem:[#allocation42_spill] sm:$0xff] %v9240_v23  ;;  %v11054_v55 = vld [vmem:[#allocation128_spill] sm:$0xff] }
 0x481   : > { %v3524_v31 = vpop.f32.mrf.mxu2  ;;  %v3653_v60 = vpop.f32.mrf.mxu3 }
 0x482   : > { %v9237_v37 = vadd.f32 %v3524_v31, %v8894_v51  ;;  %v3654_v18 = vadd.f32 %v3653_v60, %v8883_v3  ;;  %v5949_v60 = vld [vmem:[%s10440_s7 + $0x3a8] sm:$0xf] }
 0x484   : > { %v4478_v6 = vmul.f32 0.2, %v3654_v18  ;;  %v3398_v29 = vpop.f32.mrf.mxu1 }
 0x485   : > { %v3226_v20 = vpop.f32.mrf.mxu0 }
 0x486   : > { %v4606_v22 = vmax.f32 %v3654_v18, %v4478_v6  ;;  %v3227_v54 = vadd.f32 %v3226_v20, %v11054_v55  ;;  %3566 = vmatmul.bf16.gmra.mxu2 %v9234_v33  ;;  %3695 = vmatmul.bf16.gmra.mxu3 %v9240_v23  ;;  %v11056_v20 = vld [vmem:[#allocation124_spill] sm:$0xff] }
 0x487   : > { %3953 = vmatmul.bf16.gmra.mxu1 %v11055_v46 }
 0x488   : > { %v9246_v35 = vadd.f32 %v3395_v5, %v3227_v54  ;;  %v9248_v51 = vpack.c.bf16 %v4606_v22, %v4604_v42  ;;  %v6192_v54 = vld [vmem:[%s10440_s7 + $0x3b4] sm:$0xf0]  ;;  %v6158_v42 = vld [vmem:[%s10440_s7 + $0x2ac] sm:$0xf] }
 0x489   : > { %v3527_v3 = vpop.f32.mrf.mxu2  ;;  %v3656_v15 = vpop.f32.mrf.mxu3  ;;  %v11057_v5 = vld [vmem:[#allocation57_spill] sm:$0xff]  ;;  %v9270_v22 = vor.u32 %v6192_v54, %v5949_v60  ;;  %v11061_v60 = vld [vmem:[#allocation28_spill] sm:$0xff] }
 0x48a   : > { %v9251_v40 = vadd.f32 %v3527_v3, %v8923_v52  ;;  %v3657_v57 = vadd.f32 %v3656_v15, %v8905_v39  ;;  %v5823_v39 = vld [vmem:[%s10440_s7 + $0x2b8] sm:$0xf0] }
 0x48b   : > { %11058 = vst [vmem:[#allocation51_spill] sm:$0xff] %v9270_v22 }
 0x48c   : > { %v3400_v6 = vpop.f32.mrf.mxu1  ;;  %v4480_v46 = vmul.f32 0.2, %v3657_v57 }
 0x48d   : > { %v3229_v43 = vpop.f32.mrf.mxu0 }
 0x48e   : > { %v3230_v31 = vadd.f32 %v3229_v43, %v11056_v20  ;;  %v9276_v43 = vor.u32 %v6158_v42, %v5823_v39  ;;  %v4608_v33 = vmax.f32 %v3657_v57, %v4480_v46 }
 0x490   : > { %v9267_v52 = vadd.f32 %v3398_v29, %v3230_v31  ;;  %3784 = vmatmul.bf16.gmra.mxu0 %v11057_v5  ;;  %11059 = vst [vmem:[#allocation60_spill] sm:$0xff] %v9276_v43  ;;  %v11060_v31 = vld [vmem:[#allocation136_spill] sm:$0xff] }
 0x491   : > { %v3529_v4 = vpop.f32.mrf.mxu2  ;;  %v3658_v18 = vpop.f32.mrf.mxu3 }
 0x492   : > { %v9273_v3 = vadd.f32 %v3529_v4, %v8946_v38  ;;  %v3659_v15 = vadd.f32 %v3658_v18, %v8935_v50  ;;  %v5965_v18 = vld [vmem:[%s10440_s7 + $0x3c8] sm:$0xf] }
 0x494   : > { %v4482_v55 = vmul.f32 0.2, %v3659_v15  ;;  %v3403_v20 = vpop.f32.mrf.mxu1 }
 0x495   : > { %v3231_v23 = vpop.f32.mrf.mxu0 }
 0x496   : > { %v4610_v29 = vmax.f32 %v3659_v15, %v4482_v55  ;;  %v3232_v34 = vadd.f32 %v3231_v23, %v11060_v31  ;;  %3571 = vmatmul.bf16.gmra.mxu2 %v9270_v22  ;;  %3700 = vmatmul.bf16.gmra.mxu3 %v9276_v43  ;;  %v11062_v23 = vld [vmem:[#allocation116_spill] sm:$0xff] }
 0x497   : > { %3958 = vmatmul.bf16.gmra.mxu1 %v11061_v60 }
 0x498   : > { %v9282_v54 = vadd.f32 %v3400_v6, %v3232_v34  ;;  %v9284_v38 = vpack.c.bf16 %v4610_v29, %v4608_v33  ;;  %v6196_v34 = vld [vmem:[%s10440_s7 + $0x3d4] sm:$0xf0]  ;;  %v6162_v33 = vld [vmem:[%s10440_s7 + $0x2cc] sm:$0xf] }
 0x499   : > { %v3532_v50 = vpop.f32.mrf.mxu2  ;;  %v3661_v42 = vpop.f32.mrf.mxu3  ;;  %v9306_v29 = vor.u32 %v6196_v34, %v5965_v18  ;;  %v11067_v18 = vld [vmem:[#allocation56_spill] sm:$0xff] }
 0x49a   : > { %v9287_v39 = vadd.f32 %v3532_v50, %v8975_v28  ;;  %v3662_v55 = vadd.f32 %v3661_v42, %v8957_v53  ;;  %v5839_v28 = vld [vmem:[%s10440_s7 + $0x2d8] sm:$0xf0]  ;;  %v11063_v53 = vld [vmem:[#allocation39_spill] sm:$0xff] }
 0x49b   : > { %11064 = vst [vmem:[#allocation30_spill] sm:$0xff] %v9306_v29 }
 0x49c   : > { %v3405_v5 = vpop.f32.mrf.mxu1  ;;  %v4484_v60 = vmul.f32 0.2, %v3662_v55 }
 0x49d   : > { %v3234_v57 = vpop.f32.mrf.mxu0 }
 0x49e   : > { %v3235_v4 = vadd.f32 %v3234_v57, %v11062_v23  ;;  %v9312_v57 = vor.u32 %v6162_v33, %v5839_v28  ;;  %v4612_v22 = vmax.f32 %v3662_v55, %v4484_v60 }
 0x4a0   : > { %v9303_v6 = vadd.f32 %v3403_v20, %v3235_v4  ;;  %3789 = vmatmul.bf16.gmra.mxu0 %v11063_v53  ;;  %11065 = vst [vmem:[#allocation57_spill] sm:$0xff] %v9312_v57  ;;  %v11066_v4 = vld [vmem:[#allocation120_spill] sm:$0xff] }
 0x4a1   : > { %v3534_v46 = vpop.f32.mrf.mxu2  ;;  %v3663_v15 = vpop.f32.mrf.mxu3 }
 0x4a2   : > { %v9309_v50 = vadd.f32 %v3534_v46, %v8998_v13  ;;  %v3664_v42 = vadd.f32 %v3663_v15, %v8987_v16  ;;  %v5981_v15 = vld [vmem:[%s10440_s7 + $0x3e8] sm:$0xf] }
 0x4a4   : > { %v4486_v31 = vmul.f32 0.2, %v3664_v42  ;;  %v3408_v23 = vpop.f32.mrf.mxu1 }
 0x4a5   : > { %v3236_v43 = vpop.f32.mrf.mxu0 }
 0x4a6   : > { %v4614_v20 = vmax.f32 %v3664_v42, %v4486_v31  ;;  %v3237_v62 = vadd.f32 %v3236_v43, %v11066_v4  ;;  %3576 = vmatmul.bf16.gmra.mxu2 %v9306_v29  ;;  %3705 = vmatmul.bf16.gmra.mxu3 %v9312_v57  ;;  %v11068_v43 = vld [vmem:[#allocation122_spill] sm:$0xff] }
 0x4a7   : > { %3963 = vmatmul.bf16.gmra.mxu1 %v11067_v18 }
 0x4a8   : > { %v9318_v34 = vadd.f32 %v3405_v5, %v3237_v62  ;;  %v9320_v13 = vpack.c.bf16 %v4614_v20, %v4612_v22  ;;  %v6200_v62 = vld [vmem:[%s10440_s7 + $0x3f4] sm:$0xf0]  ;;  %v6166_v22 = vld [vmem:[%s10440_s7 + $0x2ec] sm:$0xf] }
 0x4a9   : > { %v3537_v16 = vpop.f32.mrf.mxu2  ;;  %v3666_v33 = vpop.f32.mrf.mxu3  ;;  %v9342_v20 = vor.u32 %v6200_v62, %v5981_v15  ;;  %v11073_v15 = vld [vmem:[#allocation33_spill] sm:$0xff] }
 0x4aa   : > { %v9323_v28 = vadd.f32 %v3537_v16, %v9027_v59  ;;  %v3667_v31 = vadd.f32 %v3666_v33, %v9009_v44  ;;  %v5855_v59 = vld [vmem:[%s10440_s7 + $0x2f8] sm:$0xf0]  ;;  %v11069_v44 = vld [vmem:[#allocation48_spill] sm:$0xff] }
 0x4ab   : > { %11070 = vst [vmem:[#allocation28_spill] sm:$0xff] %v9342_v20 }
 0x4ac   : > { %v3410_v53 = vpop.f32.mrf.mxu1  ;;  %v4488_v18 = vmul.f32 0.2, %v3667_v31 }
 0x4ad   : > { %v3239_v55 = vpop.f32.mrf.mxu0 }
 0x4ae   : > { %v3240_v46 = vadd.f32 %v3239_v55, %v11068_v43  ;;  %v9348_v55 = vor.u32 %v6166_v22, %v5855_v59  ;;  %v4616_v29 = vmax.f32 %v3667_v31, %v4488_v18  ;;  %v11074_v31 = vld [vmem:[#allocation91_spill] sm:$0xff] }
 0x4b0   : > { %v9339_v5 = vadd.f32 %v3408_v23, %v3240_v46  ;;  %3794 = vmatmul.bf16.gmra.mxu0 %v11069_v44  ;;  %11071 = vst [vmem:[#allocation39_spill] sm:$0xff] %v9348_v55  ;;  %v11072_v46 = vld [vmem:[#allocation113_spill] sm:$0xff] }
 0x4b1   : > { %v3539_v60 = vpop.f32.mrf.mxu2  ;;  %v3668_v42 = vpop.f32.mrf.mxu3 }
 0x4b2   : > { %v9345_v16 = vadd.f32 %v3539_v60, %v9050_v8  ;;  %v3669_v33 = vadd.f32 %v3668_v42, %v9039_v17  ;;  %v6170_v42 = vld [vmem:[%s10440_s7 + $0x30c] sm:$0xf] }
 0x4b4   : > { %v4490_v4 = vmul.f32 0.2, %v3669_v33  ;;  %v3413_v43 = vpop.f32.mrf.mxu1 }
 0x4b5   : > { %v3241_v57 = vpop.f32.mrf.mxu0 }
 0x4b6   : > { %v4618_v23 = vmax.f32 %v3669_v33, %v4490_v4  ;;  %v3242_v47 = vadd.f32 %v3241_v57, %v11072_v46  ;;  %3581 = vmatmul.bf16.gmra.mxu2 %v9342_v20  ;;  %3710 = vmatmul.bf16.gmra.mxu3 %v9348_v55  ;;  %v11076_v55 = vld [vmem:[#allocation119_spill] sm:$0xff] }
 0x4b7   : > { %3968 = vmatmul.bf16.gmra.mxu1 %v11073_v15 }
 0x4b8   : > { %v9354_v62 = vadd.f32 %v3410_v53, %v3242_v47  ;;  %v4728_v8 = vpack.c.bf16 %v4618_v23, %v4616_v29  ;;  %v5871_v47 = vld [vmem:[%s10440_s7 + $0x318] sm:$0xf0]  ;;  %v11075_v53 = vld [vmem:[#allocation14_spill] sm:$0xff] }
 0x4b9   : > { %v3542_v44 = vpop.f32.mrf.mxu2  ;;  %v3671_v17 = vpop.f32.mrf.mxu3  ;;  %v9374_v15 = vor.u32 %v6170_v42, %v5871_v47 }
 0x4ba   : > { %v9357_v22 = vadd.f32 %v3542_v44, %v9077_v7  ;;  %v3672_v4 = vadd.f32 %v3671_v17, %v9059_v32 }
 0x4bc   : > { %v3415_v59 = vpop.f32.mrf.mxu1  ;;  %v4492_v33 = vmul.f32 0.2, %v3672_v4 }
 0x4bd   : > { %v3244_v60 = vpop.f32.mrf.mxu0 }
 0x4be   : > { %v3245_v57 = vadd.f32 %v3244_v60, %v11074_v31  ;;  %v4620_v46 = vmax.f32 %v3672_v4, %v4492_v33  ;;  %v11079_v33 = vld [vmem:[#allocation73_spill] sm:$0xff] }
 0x4c0   : > { %v9367_v29 = vadd.f32 %v3413_v43, %v3245_v57  ;;  %3799 = vmatmul.bf16.gmra.mxu0 %v11075_v53  ;;  %v11077_v57 = vld [vmem:[#allocation27_spill] sm:$0xff]  ;;  %v11078_v53 = vld [vmem:[#allocation25_spill] sm:$0xff] }
 0x4c1   : > { %v3544_v7 = vpop.f32.mrf.mxu2  ;;  %v3673_v18 = vpop.f32.mrf.mxu3 }
 0x4c2   : > { %v9371_v23 = vadd.f32 %v3544_v7, %v9094_v45  ;;  %v3674_v32 = vadd.f32 %v3673_v18, %v9083_v25 }
 0x4c4   : > { %v4494_v44 = vmul.f32 0.2, %v3674_v32  ;;  %v3934_v17 = vpop.f32.mrf.mxu1 }
 0x4c5   : > { %v3246_v60 = vpop.f32.mrf.mxu0 }
 0x4c6   : > { %v4622_v31 = vmax.f32 %v3674_v32, %v4494_v44  ;;  %v3247_v43 = vadd.f32 %v3246_v60, %v11076_v55  ;;  %3715 = vmatmul.bf16.gmra.mxu3 %v9374_v15  ;;  %4102 = vmatmul.bf16.vlgmr.msra.gmra.mxu2 %v11077_v57  ;;  %v6174_v44 = vld [vmem:[%s10440_s7 + $0x32c] sm:$0xf]  ;;  %v11102_v55 = vld [vmem:[#allocation93_spill] sm:$0xff] }
 0x4c7   : > { %3973 = vmatmul.bf16.gmra.mxu1 %v11078_v53 }
 0x4c8   : > { %v4730_v20 = vpack.c.bf16 %v4622_v31, %v4620_v46  ;;  %v9380_v45 = vadd.f32 %v3415_v59, %v3247_v43  ;;  %v5887_v46 = vld [vmem:[%s10440_s7 + $0x338] sm:$0xf0] }
 0x4c9   : > { %v3547_v7 = vpop.f32.mrf.mxu2  ;;  %v3676_v25 = vpop.f32.mrf.mxu3  ;;  %v9401_v43 = vor.u32 %v6174_v44, %v5887_v46 }
 0x4ca   : > { %v9383_v42 = vadd.f32 %v3547_v7, %v9115_v2  ;;  %v3677_v47 = vadd.f32 %v3676_v25, %v9097_v0  ;;  %4848 = vmatpush.bf16.msra.mxu1 %v4730_v20  ;;  %v11080_v2 = vld [vmem:[#allocation72_spill] sm:$0xff] }
 0x4cb   : > { %11081 = vst [vmem:[#allocation56_spill] sm:$0xff] %v9401_v43 }
 0x4cc   : > { %v3936_v4 = vpop.f32.mrf.mxu1  ;;  %v4496_v20 = vmul.f32 0.2, %v3677_v47 }
 0x4cd   : > { %v3765_v18 = vpop.f32.mrf.mxu0 }
 0x4ce   : > { %v3766_v32 = vadd.f32 %v3765_v18, %v11079_v33  ;;  %4849 = vmatpush.bf16.msra.mxu1 %v4728_v8  ;;  %v4624_v25 = vmax.f32 %v3677_v47, %v4496_v20  ;;  %v11082_v18 = vld [vmem:[#allocation77_spill] sm:$0xff]  ;;  %v11085_v20 = vld [vmem:[#allocation80_spill] sm:$0xff] }
 0x4d0   : > { %v9393_v59 = vadd.f32 %v3934_v17, %v3766_v32  ;;  %3804 = vmatmul.bf16.gmra.mxu0 %v11080_v2  ;;  %v11083_v32 = vld [vmem:[#allocation74_spill] sm:$0xff] }
 0x4d1   : > { %v3549_v31 = vpop.f32.mrf.mxu2  ;;  %v3678_v0 = vpop.f32.mrf.mxu3 }
 0x4d2   : > { %v9397_v60 = vadd.f32 %v3549_v31, %v9134_v1  ;;  %v3679_v8 = vadd.f32 %v3678_v0, %v9121_v48  ;;  %4850 = vmatpush.bf16.msra.mxu1 %v9320_v13  ;;  %v11084_v48 = vld [vmem:[#allocation75_spill] sm:$0xff] }
 0x4d4   : > { %v4498_v57 = vmul.f32 0.2, %v3679_v8  ;;  %v3939_v53 = vpop.f32.mrf.mxu1 }
 0x4d5   : > { %v3767_v7 = vpop.f32.mrf.mxu0 }
 0x4d6   : > { %v4626_v17 = vmax.f32 %v3679_v8, %v4498_v57  ;;  %v3768_v33 = vadd.f32 %v3767_v7, %v11082_v18  ;;  %3720 = vmatmul.bf16.gmra.mxu3 %v9401_v43  ;;  %4107 = vmatmul.bf16.gmra.mxu2 %v11083_v32  ;;  %v11086_v57 = vld [vmem:[#allocation79_spill] sm:$0xff]  ;;  %v11120_v43 = vld [vmem:[#allocation38_spill] sm:$0xff] }
 0x4d7   : > { %4851 = vmatpush.bf16.msra.mxu1 %v9284_v38  ;;  %v6178_v38 = vld [vmem:[%s10440_s7 + $0x34c] sm:$0xf] }
 0x4d8   : > { %v9407_v1 = vadd.f32 %v3936_v4, %v3768_v33  ;;  %3978 = vmatmul.bf16.gmra.mxu1 %v11084_v48  ;;  %v9410_v13 = vpack.c.bf16 %v4626_v17, %v4624_v25  ;;  %v5903_v4 = vld [vmem:[%s10440_s7 + $0x358] sm:$0xf0] }
 0x4d9   : > { %v3552_v44 = vpop.f32.mrf.mxu2  ;;  %v3681_v46 = vpop.f32.mrf.mxu3  ;;  %v9432_v17 = vor.u32 %v6178_v38, %v5903_v4 }
 0x4da   : > { %v9413_v2 = vadd.f32 %v3552_v44, %v9157_v41  ;;  %v3682_v47 = vadd.f32 %v3681_v46, %v9139_v14  ;;  %v11088_v44 = vld [vmem:[#allocation32_spill] sm:$0xff] }
 0x4db   : > { %4852 = vmatpush.bf16.msra.mxu1 %v9248_v51  ;;  %11087 = vst [vmem:[#allocation48_spill] sm:$0xff] %v9432_v17 }
 0x4dc   : > { %v3941_v31 = vpop.f32.mrf.mxu1  ;;  %v4500_v7 = vmul.f32 0.2, %v3682_v47 }
 0x4dd   : > { %v3770_v0 = vpop.f32.mrf.mxu0 }
 0x4de   : > { %v3771_v8 = vadd.f32 %v3770_v0, %v11085_v20  ;;  %v4628_v48 = vmax.f32 %v3682_v47, %v4500_v7  ;;  %v11089_v0 = vld [vmem:[#allocation82_spill] sm:$0xff] }
 0x4df   : > { %4853 = vmatpush.bf16.msra.mxu1 %v9212_v9 }
 0x4e0   : > { %v9425_v41 = vadd.f32 %v3939_v53, %v3771_v8  ;;  %3809 = vmatmul.bf16.gmra.mxu0 %v11086_v57 }
 0x4e1   : > { %v3554_v14 = vpop.f32.mrf.mxu2  ;;  %v3683_v51 = vpop.f32.mrf.mxu3 }
 0x4e2   : > { %v9429_v25 = vadd.f32 %v3554_v14, %v9174_v56  ;;  %v3684_v9 = vadd.f32 %v3683_v51, %v9163_v27  ;;  %v11090_v27 = vld [vmem:[#allocation83_spill] sm:$0xff]  ;;  %v11091_v14 = vld [vmem:[#allocation69_spill] sm:$0xff] }
 0x4e3   : > { %4854 = vmatpush.bf16.msra.mxu1 %v9176_v63 }
 0x4e4   : > { %v4502_v18 = vmul.f32 0.2, %v3684_v9  ;;  %v3944_v33 = vpop.f32.mrf.mxu1 }
 0x4e5   : > { %v3772_v32 = vpop.f32.mrf.mxu0 }
 0x4e6   : > { %v4630_v53 = vmax.f32 %v3684_v9, %v4502_v18  ;;  %v3773_v46 = vadd.f32 %v3772_v32, %v11088_v44  ;;  %3725 = vmatmul.bf16.gmra.mxu3 %v9432_v17  ;;  %4112 = vmatmul.bf16.gmra.mxu2 %v11089_v0  ;;  %v11092_v9 = vld [vmem:[#allocation85_spill] sm:$0xff]  ;;  %v11114_v17 = vld [vmem:[#allocation18_spill] sm:$0xff] }
 0x4e7   : > { %4855 = vmatpush.bf16.msra.mxu1 %v9136_v49  ;;  %v6182_v49 = vld [vmem:[%s10440_s7 + $0x36c] sm:$0xf] }
 0x4e8   : > { %v9439_v56 = vadd.f32 %v3941_v31, %v3773_v46  ;;  %3983 = vmatmul.bf16.gmra.mxu1 %v11090_v27  ;;  %v9442_v20 = vpack.c.bf16 %v4630_v53, %v4628_v48  ;;  %v5919_v31 = vld [vmem:[%s10440_s7 + $0x378] sm:$0xf0] }
 0x4e9   : > { %v3557_v63 = vpop.f32.mrf.mxu2  ;;  %v3686_v8 = vpop.f32.mrf.mxu3  ;;  %v9462_v53 = vor.u32 %v6182_v49, %v5919_v31 }
 0x4ea   : > { %v9445_v38 = vadd.f32 %v3557_v63, %v9195_v24  ;;  %v3687_v47 = vadd.f32 %v3686_v8, %v9179_v10  ;;  %v11094_v8 = vld [vmem:[#allocation76_spill] sm:$0xff] }
 0x4eb   : > { %11093 = vst [vmem:[#allocation33_spill] sm:$0xff] %v9462_v53 }
 0x4ec   : > { %v3946_v4 = vpop.f32.mrf.mxu1  ;;  %v4504_v32 = vmul.f32 0.2, %v3687_v47 }
 0x4ed   : > { %v3775_v57 = vpop.f32.mrf.mxu0 }
 0x4ee   : > { %v3776_v51 = vadd.f32 %v3775_v57, %v11091_v14  ;;  %v4632_v27 = vmax.f32 %v3687_v47, %v4504_v32  ;;  %v11095_v57 = vld [vmem:[#allocation87_spill] sm:$0xff] }
 0x4f0   : > { %v9455_v7 = vadd.f32 %v3944_v33, %v3776_v51  ;;  %3814 = vmatmul.bf16.gmra.mxu0 %v11092_v9  ;;  %v11096_v51 = vld [vmem:[#allocation88_spill] sm:$0xff] }
 0x4f1   : > { %v3559_v24 = vpop.f32.mrf.mxu2  ;;  %v3688_v18 = vpop.f32.mrf.mxu3 }
 0x4f2   : > { %v9459_v10 = vadd.f32 %v3559_v24, %v9210_v58  ;;  %v3689_v48 = vadd.f32 %v3688_v18, %v9201_v61  ;;  %v11097_v18 = vld [vmem:[#allocation50_spill] sm:$0xff] }
 0x4f4   : > { %v4506_v44 = vmul.f32 0.2, %v3689_v48  ;;  %v3949_v46 = vpop.f32.mrf.mxu1 }
 0x4f5   : > { %v3777_v0 = vpop.f32.mrf.mxu0 }
 0x4f6   : > { %v4634_v63 = vmax.f32 %v3689_v48, %v4506_v44  ;;  %v3778_v33 = vadd.f32 %v3777_v0, %v11094_v8  ;;  %3730 = vmatmul.bf16.gmra.mxu3 %v9462_v53  ;;  %4117 = vmatmul.bf16.gmra.mxu2 %v11095_v57  ;;  %v5935_v48 = vld [vmem:[%s10440_s7 + $0x398] sm:$0xf0]  ;;  %v11098_v0 = vld [vmem:[#allocation90_spill] sm:$0xff] }
 0x4f7   : > { %v11108_v53 = vld [vmem:[#allocation98_spill] sm:$0xff] }
 0x4f8   : > { %v9467_v14 = vadd.f32 %v3946_v4, %v3778_v33  ;;  %3988 = vmatmul.bf16.gmra.mxu1 %v11096_v51  ;;  %v9470_v58 = vpack.c.bf16 %v4634_v63, %v4632_v27  ;;  %v6186_v4 = vld [vmem:[%s10440_s7 + $0x38c] sm:$0xf] }
 0x4f9   : > { %v3562_v61 = vpop.f32.mrf.mxu2  ;;  %v3691_v49 = vpop.f32.mrf.mxu3  ;;  %v9490_v33 = vor.u32 %v6186_v4, %v5935_v48 }
 0x4fa   : > { %v9473_v31 = vadd.f32 %v3562_v61, %v9231_v21  ;;  %v3692_v47 = vadd.f32 %v3691_v49, %v9215_v26 }
 0x4fb   : > { %11099 = vst [vmem:[#allocation14_spill] sm:$0xff] %v9490_v33 }
 0x4fc   : > { %v3951_v9 = vpop.f32.mrf.mxu1  ;;  %v4508_v63 = vmul.f32 0.2, %v3692_v47 }
 0x4fd   : > { %v3780_v24 = vpop.f32.mrf.mxu0 }
 0x4fe   : > { %v3781_v32 = vadd.f32 %v3780_v24, %v11097_v18  ;;  %v4636_v49 = vmax.f32 %v3692_v47, %v4508_v63  ;;  %v11100_v18 = vld [vmem:[#allocation68_spill] sm:$0xff] }
 0x4ff   : > { %v11103_v63 = vld [vmem:[#allocation52_spill] sm:$0xff] }
 0x500   : > { %v9483_v44 = vadd.f32 %v3949_v46, %v3781_v32  ;;  %3819 = vmatmul.bf16.gmra.mxu0 %v11098_v0  ;;  %v11101_v32 = vld [vmem:[#allocation92_spill] sm:$0xff] }
 0x501   : > { %v3564_v21 = vpop.f32.mrf.mxu2  ;;  %v3693_v27 = vpop.f32.mrf.mxu3 }
 0x502   : > { %v9487_v26 = vadd.f32 %v3564_v21, %v9246_v35  ;;  %v3694_v8 = vadd.f32 %v3693_v27, %v9237_v37 }
 0x504   : > { %v4510_v57 = vmul.f32 0.2, %v3694_v8  ;;  %v3954_v51 = vpop.f32.mrf.mxu1 }
 0x505   : > { %v3782_v61 = vpop.f32.mrf.mxu0 }
 0x506   : > { %v4638_v24 = vmax.f32 %v3694_v8, %v4510_v57  ;;  %v3783_v46 = vadd.f32 %v3782_v61, %v11100_v18  ;;  %3735 = vmatmul.bf16.gmra.mxu3 %v9490_v33  ;;  %4122 = vmatmul.bf16.gmra.mxu2 %v11101_v32  ;;  %v11104_v61 = vld [vmem:[#allocation95_spill] sm:$0xff]  ;;  %v11106_v33 = vld [vmem:[#allocation61_spill] sm:$0xff] }
 0x508   : > { %v9495_v0 = vadd.f32 %v3951_v9, %v3783_v46  ;;  %3993 = vmatmul.bf16.gmra.mxu1 %v11102_v55  ;;  %v9498_v35 = vpack.c.bf16 %v4638_v24, %v4636_v49  ;;  %v6190_v9 = vld [vmem:[%s10440_s7 + $0x3ac] sm:$0xf]  ;;  %v5951_v55 = vld [vmem:[%s10440_s7 + $0x3b8] sm:$0xf0] }
 0x509   : > { %v3567_v37 = vpop.f32.mrf.mxu2  ;;  %v3696_v4 = vpop.f32.mrf.mxu3  ;;  %v9518_v46 = vor.u32 %v6190_v9, %v5951_v55 }
 0x50a   : > { %v9501_v48 = vadd.f32 %v3567_v37, %v9267_v52  ;;  %v3697_v47 = vadd.f32 %v3696_v4, %v9251_v40 }
 0x50b   : > { %11105 = vst [vmem:[#allocation27_spill] sm:$0xff] %v9518_v46 }
 0x50c   : > { %v3956_v21 = vpop.f32.mrf.mxu1  ;;  %v4512_v24 = vmul.f32 0.2, %v3697_v47 }
 0x50d   : > { %v3785_v27 = vpop.f32.mrf.mxu0 }
 0x50e   : > { %v3786_v8 = vadd.f32 %v3785_v27, %v11103_v63  ;;  %v4640_v27 = vmax.f32 %v3697_v47, %v4512_v24 }
 0x510   : > { %v9511_v57 = vadd.f32 %v3954_v51, %v3786_v8  ;;  %3824 = vmatmul.bf16.gmra.mxu0 %v11104_v61  ;;  %v11107_v8 = vld [vmem:[#allocation97_spill] sm:$0xff] }
 0x511   : > { %v3569_v52 = vpop.f32.mrf.mxu2  ;;  %v3698_v49 = vpop.f32.mrf.mxu3 }
 0x512   : > { %v9515_v40 = vadd.f32 %v3569_v52, %v9282_v54  ;;  %v3699_v18 = vadd.f32 %v3698_v49, %v9273_v3 }
 0x514   : > { %v4514_v32 = vmul.f32 0.2, %v3699_v18  ;;  %v3959_v37 = vpop.f32.mrf.mxu1 }
 0x515   : > { %v3787_v4 = vpop.f32.mrf.mxu0 }
 0x516   : > { %v4642_v63 = vmax.f32 %v3699_v18, %v4514_v32  ;;  %v3788_v51 = vadd.f32 %v3787_v4, %v11106_v33  ;;  %3740 = vmatmul.bf16.gmra.mxu3 %v9518_v46  ;;  %4127 = vmatmul.bf16.gmra.mxu2 %v11107_v8  ;;  %v11109_v33 = vld [vmem:[#allocation21_spill] sm:$0xff]  ;;  %v11112_v46 = vld [vmem:[#allocation47_spill] sm:$0xff] }
 0x517   : > { %v11110_v32 = vld [vmem:[#allocation17_spill] sm:$0xff] }
 0x518   : > { %v9523_v61 = vadd.f32 %v3956_v21, %v3788_v51  ;;  %3998 = vmatmul.bf16.gmra.mxu1 %v11108_v53  ;;  %v9526_v54 = vpack.c.bf16 %v4642_v63, %v4640_v27  ;;  %v6194_v21 = vld [vmem:[%s10440_s7 + $0x3cc] sm:$0xf]  ;;  %v5967_v53 = vld [vmem:[%s10440_s7 + $0x3d8] sm:$0xf0] }
 0x519   : > { %v3572_v3 = vpop.f32.mrf.mxu2  ;;  %v3701_v9 = vpop.f32.mrf.mxu3  ;;  %v9546_v51 = vor.u32 %v6194_v21, %v5967_v53 }
 0x51a   : > { %v9529_v55 = vadd.f32 %v3572_v3, %v9303_v6  ;;  %v3702_v49 = vadd.f32 %v3701_v9, %v9287_v39 }
 0x51b   : > { %11111 = vst [vmem:[#allocation25_spill] sm:$0xff] %v9546_v51 }
 0x51c   : > { %v3961_v52 = vpop.f32.mrf.mxu1  ;;  %v4516_v27 = vmul.f32 0.2, %v3702_v49 }
 0x51d   : > { %v3790_v47 = vpop.f32.mrf.mxu0 }
 0x51e   : > { %v3791_v24 = vadd.f32 %v3790_v47, %v11109_v33  ;;  %v4644_v47 = vmax.f32 %v3702_v49, %v4516_v27 }
 0x520   : > { %v9539_v18 = vadd.f32 %v3959_v37, %v3791_v24  ;;  %3829 = vmatmul.bf16.gmra.mxu0 %v11110_v32  ;;  %v11113_v24 = vld [vmem:[#allocation16_spill] sm:$0xff] }
 0x521   : > { %v3574_v6 = vpop.f32.mrf.mxu2  ;;  %v3703_v4 = vpop.f32.mrf.mxu3 }
 0x522   : > { %v9543_v63 = vadd.f32 %v3574_v6, %v9318_v34  ;;  %v3704_v39 = vadd.f32 %v3703_v4, %v9309_v50 }
 0x524   : > { %v4518_v8 = vmul.f32 0.2, %v3704_v39  ;;  %v3964_v3 = vpop.f32.mrf.mxu1 }
 0x525   : > { %v3792_v9 = vpop.f32.mrf.mxu0 }
 0x526   : > { %v4646_v33 = vmax.f32 %v3704_v39, %v4518_v8  ;;  %v3793_v37 = vadd.f32 %v3792_v9, %v11112_v46  ;;  %3745 = vmatmul.bf16.gmra.mxu3 %v9546_v51  ;;  %4132 = vmatmul.bf16.gmra.mxu2 %v11113_v24  ;;  %v11115_v46 = vld [vmem:[#allocation44_spill] sm:$0xff]  ;;  %v11116_v8 = vld [vmem:[#allocation29_spill] sm:$0xff]  ;;  %v11118_v51 = vld [vmem:[#allocation58_spill] sm:$0xff] }
 0x528   : > { %v9551_v32 = vadd.f32 %v3961_v52, %v3793_v37  ;;  %4003 = vmatmul.bf16.gmra.mxu1 %v11114_v17  ;;  %v9554_v34 = vpack.c.bf16 %v4646_v33, %v4644_v47  ;;  %v6198_v52 = vld [vmem:[%s10440_s7 + $0x3ec] sm:$0xf]  ;;  %v5983_v17 = vld [vmem:[%s10440_s7 + $0x3f8] sm:$0xf0] }
 0x529   : > { %v3577_v50 = vpop.f32.mrf.mxu2  ;;  %v3706_v21 = vpop.f32.mrf.mxu3  ;;  %v9574_v37 = vor.u32 %v6198_v52, %v5983_v17 }
 0x52a   : > { %v9557_v53 = vadd.f32 %v3577_v50, %v9339_v5  ;;  %v3707_v4 = vadd.f32 %v3706_v21, %v9323_v28 }
 0x52b   : > { %11117 = vst [vmem:[#allocation73_spill] sm:$0xff] %v9574_v37 }
 0x52c   : > { %v3966_v6 = vpop.f32.mrf.mxu1  ;;  %v4520_v47 = vmul.f32 0.2, %v3707_v4 }
 0x52d   : > { %v3795_v49 = vpop.f32.mrf.mxu0 }
 0x52e   : > { %v3796_v27 = vadd.f32 %v3795_v49, %v11115_v46  ;;  %v4648_v49 = vmax.f32 %v3707_v4, %v4520_v47  ;;  %v11121_v47 = vld [vmem:[#allocation67_spill] sm:$0xff] }
 0x530   : > { %v9567_v39 = vadd.f32 %v3964_v3, %v3796_v27  ;;  %3834 = vmatmul.bf16.gmra.mxu0 %v11116_v8  ;;  %v11119_v27 = vld [vmem:[#allocation34_spill] sm:$0xff] }
 0x531   : > { %v3579_v5 = vpop.f32.mrf.mxu2  ;;  %v3708_v9 = vpop.f32.mrf.mxu3 }
 0x532   : > { %v9571_v33 = vadd.f32 %v3579_v5, %v9354_v62  ;;  %v3709_v28 = vadd.f32 %v3708_v9, %v9345_v16 }
 0x534   : > { %v4522_v24 = vmul.f32 0.2, %v3709_v28  ;;  %v3969_v50 = vpop.f32.mrf.mxu1 }
 0x535   : > { %v3797_v21 = vpop.f32.mrf.mxu0 }
 0x536   : > { %v4650_v46 = vmax.f32 %v3709_v28, %v4522_v24  ;;  %v3798_v3 = vadd.f32 %v3797_v21, %v11118_v51  ;;  %3750 = vmatmul.bf16.gmra.mxu3 %v9574_v37  ;;  %4137 = vmatmul.bf16.gmra.mxu2 %v11119_v27  ;;  %v11122_v24 = vld [vmem:[#allocation36_spill] sm:$0xff] }
 0x538   : > { %v9579_v8 = vadd.f32 %v3966_v6, %v3798_v3  ;;  %4008 = vmatmul.bf16.gmra.mxu1 %v11120_v43  ;;  %v4744_v62 = vpack.c.bf16 %v4650_v46, %v4648_v49 }
 0x539   : > { %v3582_v5 = vpop.f32.mrf.mxu2  ;;  %v3711_v16 = vpop.f32.mrf.mxu3 }
 0x53a   : > { %v9583_v52 = vadd.f32 %v3582_v5, %v9367_v29  ;;  %v3712_v4 = vadd.f32 %v3711_v16, %v9357_v22  ;;  %v11123_v22 = vld [vmem:[#allocation54_spill] sm:$0xff] }
 0x53c   : > { %v3971_v17 = vpop.f32.mrf.mxu1  ;;  %v4524_v3 = vmul.f32 0.2, %v3712_v4 }
 0x53d   : > { %v3800_v9 = vpop.f32.mrf.mxu0 }
 0x53e   : > { %v3801_v51 = vadd.f32 %v3800_v9, %v11121_v47  ;;  %v4652_v5 = vmax.f32 %v3712_v4, %v4524_v3  ;;  %v11124_v9 = vld [vmem:[#allocation40_spill] sm:$0xff] }
 0x540   : > { %v9587_v28 = vadd.f32 %v3969_v50, %v3801_v51  ;;  %3839 = vmatmul.bf16.gmra.mxu0 %v11122_v24  ;;  %v11125_v50 = vld [vmem:[#allocation43_spill] sm:$0xff]  ;;  %v11126_v24 = vld [vmem:[#allocation46_spill] sm:$0xff] }
 0x541   : > { %v3584_v6 = vpop.f32.mrf.mxu2  ;;  %v3713_v21 = vpop.f32.mrf.mxu3 }
 0x542   : > { %v9591_v43 = vadd.f32 %v3584_v6, %v9380_v45  ;;  %v3714_v49 = vadd.f32 %v3713_v21, %v9371_v23 }
 0x544   : > { %v4526_v29 = vmul.f32 0.2, %v3714_v49  ;;  %v3974_v46 = vpop.f32.mrf.mxu1 }
 0x545   : > { %v3802_v27 = vpop.f32.mrf.mxu0 }
 0x546   : > { %v4654_v37 = vmax.f32 %v3714_v49, %v4526_v29  ;;  %v3803_v16 = vadd.f32 %v3802_v27, %v11123_v22  ;;  %4142 = vmatmul.bf16.gmra.mxu2 %v11124_v9  ;;  %4271 = vmatmul.bf16.vlgmr.msra.gmra.mxu3 %v11125_v50  ;;  %v11127_v49 = vld [vmem:[#allocation100_spill] sm:$0xff] }
 0x548   : > { %v4746_v47 = vpack.c.bf16 %v4654_v37, %v4652_v5  ;;  %v9597_v51 = vadd.f32 %v3971_v17, %v3803_v16  ;;  %4013 = vmatmul.bf16.gmra.mxu1 %v11126_v24  ;;  %v11128_v37 = vld [vmem:[#allocation70_spill] sm:$0xff] }
 0x549   : > { %v3716_v45 = vpop.f32.mrf.mxu3  ;;  %v4103_v6 = vpop.f32.mrf.mxu2 }
 0x54a   : > { %v3717_v23 = vadd.f32 %v3716_v45, %v9383_v42  ;;  %v9602_v21 = vadd.f32 %v4103_v6, %v9393_v59  ;;  %4872 = vmatpush.bf16.msrb.mxu0 %v4746_v47  ;;  %v11130_v45 = vld [vmem:[#allocation78_spill] sm:$0xff]  ;;  %v11131_v6 = vld [vmem:[#allocation101_spill] sm:$0xff] }
 0x54c   : > { %v3976_v4 = vpop.f32.mrf.mxu1  ;;  %v4528_v22 = vmul.f32 0.2, %v3717_v23 }
 0x54d   : > { %v3805_v3 = vpop.f32.mrf.mxu0 }
 0x54e   : > { %v3806_v29 = vadd.f32 %v3805_v3, %v11127_v49  ;;  %4873 = vmatpush.bf16.msrb.mxu0 %v4744_v62  ;;  %v4656_v47 = vmax.f32 %v3717_v23, %v4528_v22  ;;  %v11129_v62 = vld [vmem:[#allocation37_spill] sm:$0xff] }
 0x550   : > { %v9605_v27 = vadd.f32 %v3974_v46, %v3806_v29  ;;  %3844 = vmatmul.bf16.gmra.mxu0 %v11128_v37 }
 0x551   : > { %v3718_v17 = vpop.f32.mrf.mxu3  ;;  %v4105_v5 = vpop.f32.mrf.mxu2 }
 0x552   : > { %v3719_v16 = vadd.f32 %v3718_v17, %v9397_v60  ;;  %v9610_v42 = vadd.f32 %v4105_v5, %v9407_v1  ;;  %4874 = vmatpush.bf16.msrb.mxu0 %v9554_v34  ;;  %v11132_v60 = vld [vmem:[#allocation102_spill] sm:$0xff]  ;;  %v11133_v5 = vld [vmem:[#allocation71_spill] sm:$0xff] }
 0x554   : > { %v4530_v59 = vmul.f32 0.2, %v3719_v16 }
 0x555   : > { %v3807_v9 = vpop.f32.mrf.mxu0  ;;  %v3979_v50 = vpop.f32.mrf.mxu1 }
 0x556   : > { %v4658_v24 = vmax.f32 %v3719_v16, %v4530_v59  ;;  %v3808_v46 = vadd.f32 %v3807_v9, %v11129_v62  ;;  %4147 = vmatmul.bf16.gmra.mxu2 %v11130_v45  ;;  %4276 = vmatmul.bf16.gmra.mxu3 %v11131_v6  ;;  %v11136_v45 = vld [vmem:[#allocation84_spill] sm:$0xff]  ;;  %v11137_v6 = vld [vmem:[#allocation103_spill] sm:$0xff] }
 0x557   : > { %4875 = vmatpush.bf16.msrb.mxu0 %v9526_v54 }
 0x558   : > { %v9617_v3 = vadd.f32 %v3976_v4, %v3808_v46  ;;  %4018 = vmatmul.bf16.gmra.mxu1 %v11132_v60  ;;  %v9620_v1 = vpack.c.bf16 %v4658_v24, %v4656_v47  ;;  %v11134_v4 = vld [vmem:[#allocation81_spill] sm:$0xff] }
 0x559   : > { %v3721_v34 = vpop.f32.mrf.mxu3  ;;  %v4108_v49 = vpop.f32.mrf.mxu2 }
 0x55a   : > { %v3722_v29 = vadd.f32 %v3721_v34, %v9413_v2  ;;  %v9624_v23 = vadd.f32 %v4108_v49, %v9425_v41 }
 0x55b   : > { %4876 = vmatpush.bf16.msrb.mxu0 %v9498_v35 }
 0x55c   : > { %v4532_v9 = vmul.f32 0.2, %v3722_v29 }
 0x55d   : > { %v3810_v37 = vpop.f32.mrf.mxu0  ;;  %v3981_v17 = vpop.f32.mrf.mxu1 }
 0x55e   : > { %v3811_v22 = vadd.f32 %v3810_v37, %v11133_v5  ;;  %v4660_v62 = vmax.f32 %v3722_v29, %v4532_v9 }
 0x55f   : > { %4877 = vmatpush.bf16.msrb.mxu0 %v9470_v58  ;;  %v11135_v58 = vld [vmem:[#allocation66_spill] sm:$0xff] }
 0x560   : > { %v9629_v54 = vadd.f32 %v3979_v50, %v3811_v22  ;;  %3849 = vmatmul.bf16.gmra.mxu0 %v11134_v4  ;;  %v11139_v22 = vld [vmem:[#allocation10_spill] sm:$0xff] }
 0x561   : > { %v3723_v16 = vpop.f32.mrf.mxu3  ;;  %v4110_v59 = vpop.f32.mrf.mxu2 }
 0x562   : > { %v3724_v2 = vadd.f32 %v3723_v16, %v9429_v25  ;;  %v9634_v41 = vadd.f32 %v4110_v59, %v9439_v56  ;;  %v11138_v25 = vld [vmem:[#allocation104_spill] sm:$0xff] }
 0x563   : > { %4878 = vmatpush.bf16.msrb.mxu0 %v9442_v20 }
 0x564   : > { %v4534_v35 = vmul.f32 0.2, %v3724_v2 }
 0x565   : > { %v3812_v47 = vpop.f32.mrf.mxu0  ;;  %v3984_v24 = vpop.f32.mrf.mxu1 }
 0x566   : > { %v4662_v46 = vmax.f32 %v3724_v2, %v4534_v35  ;;  %v3813_v50 = vadd.f32 %v3812_v47, %v11135_v58  ;;  %4152 = vmatmul.bf16.gmra.mxu2 %v11136_v45  ;;  %4281 = vmatmul.bf16.gmra.mxu3 %v11137_v6  ;;  %v11141_v58 = vld [vmem:[#allocation15_spill] sm:$0xff]  ;;  %v11142_v45 = vld [vmem:[#allocation89_spill] sm:$0xff] }
 0x567   : > { %4879 = vmatpush.bf16.msrb.mxu0 %v9410_v13  ;;  %v11140_v13 = vld [vmem:[#allocation86_spill] sm:$0xff] }
 0x568   : > { %v9641_v60 = vadd.f32 %v3981_v17, %v3813_v50  ;;  %4023 = vmatmul.bf16.gmra.mxu1 %v11138_v25  ;;  %v9644_v56 = vpack.c.bf16 %v4662_v46, %v4660_v62  ;;  %v11144_v25 = vld [vmem:[#allocation107_spill] sm:$0xff] }
 0x569   : > { %v3726_v20 = vpop.f32.mrf.mxu3  ;;  %v4113_v34 = vpop.f32.mrf.mxu2 }
 0x56a   : > { %v3727_v49 = vadd.f32 %v3726_v20, %v9445_v38  ;;  %v9648_v29 = vadd.f32 %v4113_v34, %v9455_v7 }
 0x56c   : > { %v4536_v9 = vmul.f32 0.2, %v3727_v49 }
 0x56d   : > { %v3815_v37 = vpop.f32.mrf.mxu0  ;;  %v3986_v5 = vpop.f32.mrf.mxu1 }
 0x56e   : > { %v3816_v4 = vadd.f32 %v3815_v37, %v11139_v22  ;;  %v4664_v62 = vmax.f32 %v3727_v49, %v4536_v9 }
 0x570   : > { %v9651_v16 = vadd.f32 %v3984_v24, %v3816_v4  ;;  %3854 = vmatmul.bf16.gmra.mxu0 %v11140_v13  ;;  %v11143_v24 = vld [vmem:[#allocation105_spill] sm:$0xff]  ;;  %v11145_v4 = vld [vmem:[#allocation26_spill] sm:$0xff] }
 0x571   : > { %v3728_v17 = vpop.f32.mrf.mxu3  ;;  %v4115_v59 = vpop.f32.mrf.mxu2 }
 0x572   : > { %v3729_v2 = vadd.f32 %v3728_v17, %v9459_v10  ;;  %v9656_v35 = vadd.f32 %v4115_v59, %v9467_v14  ;;  %v11146_v59 = vld [vmem:[#allocation108_spill] sm:$0xff] }
 0x574   : > { %v4538_v38 = vmul.f32 0.2, %v3729_v2 }
 0x575   : > { %v3817_v47 = vpop.f32.mrf.mxu0  ;;  %v3989_v7 = vpop.f32.mrf.mxu1 }
 0x576   : > { %v4666_v46 = vmax.f32 %v3729_v2, %v4538_v38  ;;  %v3818_v50 = vadd.f32 %v3817_v47, %v11141_v58  ;;  %4157 = vmatmul.bf16.gmra.mxu2 %v11142_v45  ;;  %4286 = vmatmul.bf16.gmra.mxu3 %v11143_v24  ;;  %v11148_v24 = vld [vmem:[#allocation94_spill] sm:$0xff] }
 0x578   : > { %v9661_v6 = vadd.f32 %v3986_v5, %v3818_v50  ;;  %4028 = vmatmul.bf16.gmra.mxu1 %v11144_v25  ;;  %v9664_v20 = vpack.c.bf16 %v4666_v46, %v4664_v62  ;;  %v11147_v50 = vld [vmem:[#allocation45_spill] sm:$0xff] }
 0x579   : > { %v3731_v10 = vpop.f32.mrf.mxu3  ;;  %v4118_v14 = vpop.f32.mrf.mxu2 }
 0x57a   : > { %v3732_v34 = vadd.f32 %v3731_v10, %v9473_v31  ;;  %v9668_v37 = vadd.f32 %v4118_v14, %v9483_v44  ;;  %v11150_v10 = vld [vmem:[#allocation111_spill] sm:$0xff] }
 0x57c   : > { %v4540_v2 = vmul.f32 0.2, %v3732_v34 }
 0x57d   : > { %v3820_v49 = vpop.f32.mrf.mxu0  ;;  %v3991_v22 = vpop.f32.mrf.mxu1 }
 0x57e   : > { %v3821_v13 = vadd.f32 %v3820_v49, %v11145_v4  ;;  %v4668_v46 = vmax.f32 %v3732_v34, %v4540_v2  ;;  %v11152_v2 = vld [vmem:[#allocation114_spill] sm:$0xff] }
 0x580   : > { %v9671_v17 = vadd.f32 %v3989_v7, %v3821_v13  ;;  %3859 = vmatmul.bf16.gmra.mxu0 %v11146_v59  ;;  %v11149_v7 = vld [vmem:[#allocation110_spill] sm:$0xff]  ;;  %v11151_v59 = vld [vmem:[#allocation53_spill] sm:$0xff] }
 0x581   : > { %v3733_v5 = vpop.f32.mrf.mxu3  ;;  %v4120_v9 = vpop.f32.mrf.mxu2 }
 0x582   : > { %v3734_v38 = vadd.f32 %v3733_v5, %v9487_v26  ;;  %v9676_v47 = vadd.f32 %v4120_v9, %v9495_v0 }
 0x584   : > { %v4542_v31 = vmul.f32 0.2, %v3734_v38 }
 0x585   : > { %v3822_v62 = vpop.f32.mrf.mxu0  ;;  %v3994_v44 = vpop.f32.mrf.mxu1 }
 0x586   : > { %v4670_v58 = vmax.f32 %v3734_v38, %v4542_v31  ;;  %v3823_v45 = vadd.f32 %v3822_v62, %v11147_v50  ;;  %4162 = vmatmul.bf16.gmra.mxu2 %v11148_v24  ;;  %4291 = vmatmul.bf16.gmra.mxu3 %v11149_v7  ;;  %v11153_v24 = vld [vmem:[#allocation20_spill] sm:$0xff] }
 0x588   : > { %v9681_v25 = vadd.f32 %v3991_v22, %v3823_v45  ;;  %4033 = vmatmul.bf16.gmra.mxu1 %v11150_v10  ;;  %v9684_v14 = vpack.c.bf16 %v4670_v58, %v4668_v46  ;;  %v11154_v10 = vld [vmem:[#allocation99_spill] sm:$0xff] }
 0x589   : > { %v3736_v26 = vpop.f32.mrf.mxu3  ;;  %v4123_v0 = vpop.f32.mrf.mxu2 }
 0x58a   : > { %v3737_v49 = vadd.f32 %v3736_v26, %v9501_v48  ;;  %v9688_v4 = vadd.f32 %v4123_v0, %v9511_v57  ;;  %v11156_v0 = vld [vmem:[#allocation118_spill] sm:$0xff] }
 0x58c   : > { %v4544_v31 = vmul.f32 0.2, %v3737_v49 }
 0x58d   : > { %v3825_v34 = vpop.f32.mrf.mxu0  ;;  %v3996_v13 = vpop.f32.mrf.mxu1 }
 0x58e   : > { %v3826_v5 = vadd.f32 %v3825_v34, %v11151_v59  ;;  %v4672_v50 = vmax.f32 %v3737_v49, %v4544_v31 }
 0x590   : > { %v9691_v9 = vadd.f32 %v3994_v44, %v3826_v5  ;;  %3864 = vmatmul.bf16.gmra.mxu0 %v11152_v2  ;;  %v11155_v44 = vld [vmem:[#allocation117_spill] sm:$0xff] }
 0x591   : > { %v3738_v22 = vpop.f32.mrf.mxu3  ;;  %v4125_v38 = vpop.f32.mrf.mxu2 }
 0x592   : > { %v3739_v62 = vadd.f32 %v3738_v22, %v9515_v40  ;;  %v9696_v46 = vadd.f32 %v4125_v38, %v9523_v61  ;;  %v11157_v22 = vld [vmem:[#allocation63_spill] sm:$0xff] }
 0x594   : > { %v4546_v48 = vmul.f32 0.2, %v3739_v62 }
 0x595   : > { %v3827_v58 = vpop.f32.mrf.mxu0  ;;  %v3999_v57 = vpop.f32.mrf.mxu1 }
 0x596   : > { %v4674_v45 = vmax.f32 %v3739_v62, %v4546_v48  ;;  %v3828_v7 = vadd.f32 %v3827_v58, %v11153_v24  ;;  %4167 = vmatmul.bf16.gmra.mxu2 %v11154_v10  ;;  %4296 = vmatmul.bf16.gmra.mxu3 %v11155_v44  ;;  %v11158_v62 = vld [vmem:[#allocation121_spill] sm:$0xff] }
 0x598   : > { %v9701_v26 = vadd.f32 %v3996_v13, %v3828_v7  ;;  %4038 = vmatmul.bf16.gmra.mxu1 %v11156_v0  ;;  %v9704_v34 = vpack.c.bf16 %v4674_v45, %v4672_v50 }
 0x599   : > { %v3741_v40 = vpop.f32.mrf.mxu3  ;;  %v4128_v61 = vpop.f32.mrf.mxu2 }
 0x59a   : > { %v9707_v59 = vadd.f32 %v4128_v61, %v9539_v18  ;;  %v3742_v2 = vadd.f32 %v3741_v40, %v9529_v55  ;;  %v11159_v55 = vld [vmem:[#allocation59_spill] sm:$0xff]  ;;  %v11160_v40 = vld [vmem:[#allocation22_spill] sm:$0xff] }
 0x59c   : > { %v4548_v58 = vmul.f32 0.2, %v3742_v2 }
 0x59d   : > { %v3830_v5 = vpop.f32.mrf.mxu0  ;;  %v4001_v49 = vpop.f32.mrf.mxu1 }
 0x59e   : > { %v3831_v38 = vadd.f32 %v3830_v5, %v11157_v22  ;;  %v4676_v10 = vmax.f32 %v3742_v2, %v4548_v58  ;;  %v11162_v5 = vld [vmem:[#allocation125_spill] sm:$0xff] }
 0x5a0   : > { %v9711_v31 = vadd.f32 %v3999_v57, %v3831_v38  ;;  %3869 = vmatmul.bf16.gmra.mxu0 %v11158_v62  ;;  %v11161_v57 = vld [vmem:[#allocation123_spill] sm:$0xff] }
 0x5a1   : > { %v3743_v13 = vpop.f32.mrf.mxu3  ;;  %v4130_v48 = vpop.f32.mrf.mxu2 }
 0x5a2   : > { %v3744_v50 = vadd.f32 %v3743_v13, %v9543_v63  ;;  %v9716_v45 = vadd.f32 %v4130_v48, %v9551_v32  ;;  %v11163_v48 = vld [vmem:[#allocation41_spill] sm:$0xff] }
 0x5a4   : > { %v4550_v18 = vmul.f32 0.2, %v3744_v50 }
 0x5a5   : > { %v3832_v24 = vpop.f32.mrf.mxu0  ;;  %v4004_v7 = vpop.f32.mrf.mxu1 }
 0x5a6   : > { %v4678_v44 = vmax.f32 %v3744_v50, %v4550_v18  ;;  %v3833_v0 = vadd.f32 %v3832_v24, %v11159_v55  ;;  %4172 = vmatmul.bf16.gmra.mxu2 %v11160_v40  ;;  %4301 = vmatmul.bf16.gmra.mxu3 %v11161_v57  ;;  %v11164_v18 = vld [vmem:[#allocation35_spill] sm:$0xff] }
 0x5a8   : > { %v9721_v61 = vadd.f32 %v4001_v49, %v3833_v0  ;;  %4043 = vmatmul.bf16.gmra.mxu1 %v11162_v5  ;;  %v9724_v22 = vpack.c.bf16 %v4678_v44, %v4676_v10 }
 0x5a9   : > { %v3746_v63 = vpop.f32.mrf.mxu3  ;;  %v4133_v32 = vpop.f32.mrf.mxu2 }
 0x5aa   : > { %v9727_v38 = vadd.f32 %v4133_v32, %v9567_v39  ;;  %v3747_v13 = vadd.f32 %v3746_v63, %v9557_v53  ;;  %v11165_v53 = vld [vmem:[#allocation49_spill] sm:$0xff] }
 0x5ab   : > { %v11166_v32 = vld [vmem:[#allocation129_spill] sm:$0xff] }
 0x5ac   : > { %v4552_v55 = vmul.f32 0.2, %v3747_v13 }
 0x5ad   : > { %v3835_v62 = vpop.f32.mrf.mxu0  ;;  %v4006_v2 = vpop.f32.mrf.mxu1 }
 0x5ae   : > { %v3836_v58 = vadd.f32 %v3835_v62, %v11163_v48  ;;  %v4680_v57 = vmax.f32 %v3747_v13, %v4552_v55  ;;  %v11168_v48 = vld [vmem:[#allocation131_spill] sm:$0xff] }
 0x5af   : > { %v11169_v55 = vld [vmem:[#allocation31_spill] sm:$0xff] }
 0x5b0   : > { %v9731_v50 = vadd.f32 %v4004_v7, %v3836_v58  ;;  %3874 = vmatmul.bf16.gmra.mxu0 %v11164_v18  ;;  %v11167_v7 = vld [vmem:[#allocation130_spill] sm:$0xff] }
 0x5b1   : > { %v3748_v49 = vpop.f32.mrf.mxu3  ;;  %v4135_v24 = vpop.f32.mrf.mxu2 }
 0x5b2   : > { %v3749_v10 = vadd.f32 %v3748_v49, %v9571_v33  ;;  %v9736_v44 = vadd.f32 %v4135_v24, %v9579_v8 }
 0x5b4   : > { %v4554_v39 = vmul.f32 0.2, %v3749_v10 }
 0x5b5   : > { %v3837_v0 = vpop.f32.mrf.mxu0  ;;  %v4009_v40 = vpop.f32.mrf.mxu1 }
 0x5b6   : > { %v4682_v5 = vmax.f32 %v3749_v10, %v4554_v39  ;;  %v3838_v63 = vadd.f32 %v3837_v0, %v11165_v53  ;;  %4177 = vmatmul.bf16.gmra.mxu2 %v11166_v32  ;;  %4306 = vmatmul.bf16.gmra.mxu3 %v11167_v7  ;;  %v11170_v0 = vld [vmem:[#allocation135_spill] sm:$0xff] }
 0x5b8   : > { %v9741_v62 = vadd.f32 %v4006_v2, %v3838_v63  ;;  %4048 = vmatmul.bf16.gmra.mxu1 %v11168_v48  ;;  %v4760_v58 = vpack.c.bf16 %v4682_v5, %v4680_v57 }
 0x5b9   : > { %v3751_v33 = vpop.f32.mrf.mxu3  ;;  %v4138_v18 = vpop.f32.mrf.mxu2 }
 0x5ba   : > { %v9745_v8 = vadd.f32 %v4138_v18, %v9587_v28  ;;  %v3752_v13 = vadd.f32 %v3751_v33, %v9583_v52  ;;  %v11171_v52 = vld [vmem:[#allocation65_spill] sm:$0xff] }
 0x5bc   : > { %v4556_v63 = vmul.f32 0.2, %v3752_v13 }
 0x5bd   : > { %v3840_v49 = vpop.f32.mrf.mxu0  ;;  %v4011_v24 = vpop.f32.mrf.mxu1 }
 0x5be   : > { %v3841_v10 = vadd.f32 %v3840_v49, %v11169_v55  ;;  %v4684_v48 = vmax.f32 %v3752_v13, %v4556_v63  ;;  %v11172_v49 = vld [vmem:[#allocation138_spill] sm:$0xff] }
 0x5c0   : > { %v9749_v39 = vadd.f32 %v4009_v40, %v3841_v10  ;;  %3879 = vmatmul.bf16.gmra.mxu0 %v11170_v0  ;;  %v11173_v40 = vld [vmem:[#allocation139_spill] sm:$0xff]  ;;  %v11174_v0 = vld [vmem:[#allocation140_spill] sm:$0xff] }
 0x5c1   : > { %v3753_v2 = vpop.f32.mrf.mxu3  ;;  %v4140_v53 = vpop.f32.mrf.mxu2 }
 0x5c2   : > { %v3754_v57 = vadd.f32 %v3753_v2, %v9591_v43  ;;  %v9754_v5 = vadd.f32 %v4140_v53, %v9597_v51 }
 0x5c4   : > { %v4558_v28 = vmul.f32 0.2, %v3754_v57 }
 0x5c5   : > { %v3842_v32 = vpop.f32.mrf.mxu0  ;;  %v4014_v7 = vpop.f32.mrf.mxu1 }
 0x5c6   : > { %v4686_v18 = vmax.f32 %v3754_v57, %v4558_v28  ;;  %v3843_v33 = vadd.f32 %v3842_v32, %v11171_v52  ;;  %4182 = vmatmul.bf16.gmra.mxu2 %v11172_v49  ;;  %4311 = vmatmul.bf16.gmra.mxu3 %v11173_v40  ;;  %v11175_v57 = vld [vmem:[#allocation145_spill] sm:$0xff] }
 0x5c8   : > { %v4762_v55 = vpack.c.bf16 %v4686_v18, %v4684_v48  ;;  %v9759_v10 = vadd.f32 %v4011_v24, %v3843_v33  ;;  %4053 = vmatmul.bf16.gmra.mxu1 %v11174_v0  ;;  %v11176_v48 = vld [vmem:[#allocation144_spill] sm:$0xff] }
 0x5c9   : > { %v4143_v43 = vpop.f32.mrf.mxu2  ;;  %v4272_v2 = vpop.f32.mrf.mxu3 }
 0x5ca   : > { %v9763_v51 = vadd.f32 %v4143_v43, %v9605_v27  ;;  %v4273_v53 = vadd.f32 %v4272_v2, %v9602_v21  ;;  %4896 = vmatpush.bf16.msrb.mxu1 %v4762_v55  ;;  %v11178_v43 = vld [vmem:[#allocation147_spill] sm:$0xff]  ;;  %v11179_v2 = vld [vmem:[#allocation148_spill] sm:$0xff] }
 0x5cc   : > { %v4433_v52 = vmul.f32 0.2, %v4273_v53 }
 0x5cd   : > { %v3845_v13 = vpop.f32.mrf.mxu0  ;;  %v4016_v63 = vpop.f32.mrf.mxu1 }
 0x5ce   : > { %v3846_v28 = vadd.f32 %v3845_v13, %v11175_v57  ;;  %4897 = vmatpush.bf16.msrb.mxu1 %v4760_v58  ;;  %v4561_v55 = vmax.f32 %v4273_v53, %v4433_v52  ;;  %v11177_v58 = vld [vmem:[#allocation150_spill] sm:$0xff] }
 0x5d0   : > { %v9767_v32 = vadd.f32 %v4014_v7, %v3846_v28  ;;  %3884 = vmatmul.bf16.gmra.mxu0 %v11176_v48 }
 0x5d1   : > { %v4145_v24 = vpop.f32.mrf.mxu2  ;;  %v4274_v18 = vpop.f32.mrf.mxu3 }
 0x5d2   : > { %v9771_v33 = vadd.f32 %v4145_v24, %v9617_v3  ;;  %v4275_v27 = vadd.f32 %v4274_v18, %v9610_v42  ;;  %4898 = vmatpush.bf16.msrb.mxu1 %v9724_v22  ;;  %v11180_v3 = vld [vmem:[#allocation149_spill] sm:$0xff]  ;;  %v11181_v18 = vld [vmem:[#allocation154_spill] sm:$0xff] }
 0x5d4   : > { %v4435_v21 = vmul.f32 0.2, %v4275_v27 }
 0x5d5   : > { %v3847_v49 = vpop.f32.mrf.mxu0  ;;  %v4019_v40 = vpop.f32.mrf.mxu1 }
 0x5d6   : > { %v4563_v0 = vmax.f32 %v4275_v27, %v4435_v21  ;;  %v3848_v7 = vadd.f32 %v3847_v49, %v11177_v58  ;;  %4187 = vmatmul.bf16.gmra.mxu2 %v11178_v43  ;;  %4316 = vmatmul.bf16.gmra.mxu3 %v11179_v2  ;;  %v11184_v43 = vld [vmem:[#allocation156_spill] sm:$0xff] }
 0x5d7   : > { %4899 = vmatpush.bf16.msrb.mxu1 %v9704_v34 }
 0x5d8   : > { %v9779_v13 = vadd.f32 %v4016_v63, %v3848_v7  ;;  %4058 = vmatmul.bf16.gmra.mxu1 %v11180_v3  ;;  %v9782_v42 = vpack.c.bf16 %v4563_v0, %v4561_v55  ;;  %v11182_v63 = vld [vmem:[#allocation153_spill] sm:$0xff] }
 0x5d9   : > { %v4148_v22 = vpop.f32.mrf.mxu2  ;;  %v4277_v57 = vpop.f32.mrf.mxu3 }
 0x5da   : > { %v9785_v28 = vadd.f32 %v4148_v22, %v9629_v54  ;;  %v4278_v53 = vadd.f32 %v4277_v57, %v9624_v23 }
 0x5db   : > { %4900 = vmatpush.bf16.msrb.mxu1 %v9684_v14 }
 0x5dc   : > { %v4437_v49 = vmul.f32 0.2, %v4278_v53 }
 0x5dd   : > { %v3850_v48 = vpop.f32.mrf.mxu0  ;;  %v4021_v24 = vpop.f32.mrf.mxu1 }
 0x5de   : > { %v3851_v52 = vadd.f32 %v3850_v48, %v11181_v18  ;;  %v4565_v58 = vmax.f32 %v4278_v53, %v4437_v49  ;;  %v11186_v48 = vld [vmem:[#allocation133_spill] sm:$0xff] }
 0x5df   : > { %4901 = vmatpush.bf16.msrb.mxu1 %v9664_v20 }
 0x5e0   : > { %v9791_v34 = vadd.f32 %v4019_v40, %v3851_v52  ;;  %3889 = vmatmul.bf16.gmra.mxu0 %v11182_v63  ;;  %v11183_v40 = vld [vmem:[#allocation155_spill] sm:$0xff] }
 0x5e1   : > { %v4150_v27 = vpop.f32.mrf.mxu2  ;;  %v4279_v21 = vpop.f32.mrf.mxu3 }
 0x5e2   : > { %v9795_v54 = vadd.f32 %v4150_v27, %v9641_v60  ;;  %v4280_v23 = vadd.f32 %v4279_v21, %v9634_v41  ;;  %v11185_v60 = vld [vmem:[#allocation157_spill] sm:$0xff] }
 0x5e3   : > { %4902 = vmatpush.bf16.msrb.mxu1 %v9644_v56 }
 0x5e4   : > { %v4439_v14 = vmul.f32 0.2, %v4280_v23 }
 0x5e5   : > { %v3852_v55 = vpop.f32.mrf.mxu0  ;;  %v4024_v0 = vpop.f32.mrf.mxu1 }
 0x5e6   : > { %v4567_v7 = vmax.f32 %v4280_v23, %v4439_v14  ;;  %v3853_v20 = vadd.f32 %v3852_v55, %v8668_v11  ;;  %4192 = vmatmul.bf16.gmra.mxu2 %v11183_v40  ;;  %4321 = vmatmul.bf16.gmra.mxu3 %v11184_v43  ;;  %v11190_v40 = vld [vmem:[#allocation161_spill] sm:$0xff] }
 0x5e7   : > { %4903 = vmatpush.bf16.msrb.mxu1 %v9620_v1  ;;  %v11187_v1 = vld [vmem:[#allocation158_spill] sm:$0xff] }
 0x5e8   : > { %v9803_v2 = vadd.f32 %v4021_v24, %v3853_v20  ;;  %4063 = vmatmul.bf16.gmra.mxu1 %v11185_v60  ;;  %v9806_v41 = vpack.c.bf16 %v4567_v7, %v4565_v58  ;;  %v11188_v7 = vld [vmem:[#allocation159_spill] sm:$0xff] }
 0x5e9   : > { %v4153_v56 = vpop.f32.mrf.mxu2  ;;  %v4282_v3 = vpop.f32.mrf.mxu3 }
 0x5ea   : > { %v9809_v22 = vadd.f32 %v4153_v56, %v9651_v16  ;;  %v4283_v57 = vadd.f32 %v4282_v3, %v9648_v29 }
 0x5ec   : > { %v4441_v27 = vmul.f32 0.2, %v4283_v57 }
 0x5ed   : > { %v3855_v11 = vpop.f32.mrf.mxu0  ;;  %v4026_v53 = vpop.f32.mrf.mxu1 }
 0x5ee   : > { %v3856_v18 = vadd.f32 %v3855_v11, %v11186_v48  ;;  %v4569_v29 = vmax.f32 %v4283_v57, %v4441_v27 }
 0x5f0   : > { %v9813_v52 = vadd.f32 %v4024_v0, %v3856_v18  ;;  %3894 = vmatmul.bf16.gmra.mxu0 %v11187_v1  ;;  %v11189_v0 = vld [vmem:[#allocation160_spill] sm:$0xff]  ;;  %v11192_v18 = vld [vmem:[#allocation162_spill] sm:$0xff] }
 0x5f1   : > { %v4155_v24 = vpop.f32.mrf.mxu2  ;;  %v4284_v63 = vpop.f32.mrf.mxu3 }
 0x5f2   : > { %v9817_v21 = vadd.f32 %v4155_v24, %v9661_v6  ;;  %v4285_v49 = vadd.f32 %v4284_v63, %v9656_v35 }
 0x5f4   : > { %v4443_v16 = vmul.f32 0.2, %v4285_v49 }
 0x5f5   : > { %v3857_v23 = vpop.f32.mrf.mxu0  ;;  %v4029_v14 = vpop.f32.mrf.mxu1 }
 0x5f6   : > { %v4571_v55 = vmax.f32 %v4285_v49, %v4443_v16  ;;  %v3858_v58 = vadd.f32 %v3857_v23, %v8726_v12  ;;  %4197 = vmatmul.bf16.gmra.mxu2 %v11188_v7  ;;  %4326 = vmatmul.bf16.gmra.mxu3 %v11189_v0  ;;  %v11191_v12 = vld [vmem:[#allocation126_spill] sm:$0xff]  ;;  %v11195_v7 = vld [vmem:[#allocation165_spill] sm:$0xff] }
 0x5f8   : > { %v9823_v20 = vadd.f32 %v4026_v53, %v3858_v58  ;;  %4068 = vmatmul.bf16.gmra.mxu1 %v11190_v40  ;;  %v9826_v43 = vpack.c.bf16 %v4571_v55, %v4569_v29  ;;  %v11193_v55 = vld [vmem:[#allocation163_spill] sm:$0xff] }
 0x5f9   : > { %v4158_v6 = vpop.f32.mrf.mxu2  ;;  %v4287_v60 = vpop.f32.mrf.mxu3 }
 0x5fa   : > { %v9829_v35 = vadd.f32 %v4158_v6, %v9671_v17  ;;  %v4288_v56 = vadd.f32 %v4287_v60, %v9668_v37 }
 0x5fc   : > { %v4445_v24 = vmul.f32 0.2, %v4288_v56 }
 0x5fd   : > { %v3860_v3 = vpop.f32.mrf.mxu0  ;;  %v4031_v57 = vpop.f32.mrf.mxu1 }
 0x5fe   : > { %v3861_v11 = vadd.f32 %v3860_v3, %v11191_v12  ;;  %v4573_v37 = vmax.f32 %v4288_v56, %v4445_v24 }
 0x600   : > { %v9833_v48 = vadd.f32 %v4029_v14, %v3861_v11  ;;  %3899 = vmatmul.bf16.gmra.mxu0 %v11192_v18  ;;  %v11194_v14 = vld [vmem:[#allocation164_spill] sm:$0xff] }
 0x601   : > { %v4160_v53 = vpop.f32.mrf.mxu2  ;;  %v4289_v1 = vpop.f32.mrf.mxu3 }
 0x602   : > { %v9837_v63 = vadd.f32 %v4160_v53, %v9681_v25  ;;  %v4290_v27 = vadd.f32 %v4289_v1, %v9676_v47 }
 0x604   : > { %v4447_v17 = vmul.f32 0.2, %v4290_v27 }
 0x605   : > { %v3862_v49 = vpop.f32.mrf.mxu0  ;;  %v4034_v16 = vpop.f32.mrf.mxu1 }
 0x606   : > { %v4575_v23 = vmax.f32 %v4290_v27, %v4447_v17  ;;  %v3863_v29 = vadd.f32 %v3862_v49, %v8577_v19  ;;  %4202 = vmatmul.bf16.gmra.mxu2 %v11193_v55  ;;  %4331 = vmatmul.bf16.gmra.mxu3 %v11194_v14  ;;  %v11196_v19 = vld [vmem:[#allocation132_spill] sm:$0xff] }
 0x608   : > { %v9843_v58 = vadd.f32 %v4031_v57, %v3863_v29  ;;  %4073 = vmatmul.bf16.gmra.mxu1 %v11195_v7  ;;  %v9846_v0 = vpack.c.bf16 %v4575_v23, %v4573_v37  ;;  %v11197_v57 = vld [vmem:[#allocation166_spill] sm:$0xff]  ;;  %v11199_v37 = vld [vmem:[#allocation168_spill] sm:$0xff] }
 0x609   : > { %v4163_v25 = vpop.f32.mrf.mxu2  ;;  %v4292_v40 = vpop.f32.mrf.mxu3 }
 0x60a   : > { %v9849_v47 = vadd.f32 %v4163_v25, %v9691_v9  ;;  %v4293_v6 = vadd.f32 %v4292_v40, %v9688_v4  ;;  %v11200_v25 = vld [vmem:[#allocation115_spill] sm:$0xff] }
 0x60c   : > { %v4449_v53 = vmul.f32 0.2, %v4293_v6 }
 0x60d   : > { %v3865_v60 = vpop.f32.mrf.mxu0  ;;  %v9852_v56 = vpop.f32.mrf.mxu1 }
 0x60e   : > { %v3866_v3 = vadd.f32 %v3865_v60, %v11196_v19  ;;  %v4577_v17 = vmax.f32 %v4293_v6, %v4449_v53 }
 0x610   : > { %v9855_v12 = vadd.f32 %v4034_v16, %v3866_v3  ;;  %3904 = vmatmul.bf16.gmra.mxu0 %v11197_v57  ;;  %v11198_v16 = vld [vmem:[#allocation167_spill] sm:$0xff] }
 0x611   : > { %v4165_v11 = vpop.f32.mrf.mxu2  ;;  %v4294_v18 = vpop.f32.mrf.mxu3 }
 0x612   : > { %v9859_v1 = vadd.f32 %v4165_v11, %v9701_v26  ;;  %v4295_v9 = vadd.f32 %v4294_v18, %v9696_v46 }
 0x614   : > { %v4451_v24 = vmul.f32 0.2, %v4295_v9 }
 0x615   : > { %v9862_v27 = vpop.f32.mrf.mxu0  ;;  %v4039_v4 = vpop.f32.mrf.mxu1 }
 0x616   : > { %v4579_v49 = vmax.f32 %v4295_v9, %v4451_v24  ;;  %4207 = vmatmul.bf16.gmra.mxu2 %v8932_v36  ;;  %4336 = vmatmul.bf16.gmra.mxu3 %v11198_v16  ;;  %v11201_v36 = vld [vmem:[#allocation169_spill] sm:$0xff]  ;;  %v11202_v24 = vld [vmem:[#allocation170_spill] sm:$0xff] }
 0x618   : > { %4078 = vmatmul.bf16.gmra.mxu1 %v11199_v37  ;;  %v9867_v23 = vpack.c.bf16 %v4579_v49, %v4577_v17 }
 0x619   : > { %v4168_v29 = vpop.f32.mrf.mxu2  ;;  %v4297_v55 = vpop.f32.mrf.mxu3 }
 0x61a   : > { %v9870_v26 = vadd.f32 %v4168_v29, %v9711_v31  ;;  %v4298_v7 = vadd.f32 %v4297_v55, %v9707_v59  ;;  %v11204_v55 = vld [vmem:[#allocation109_spill] sm:$0xff] }
 0x61c   : > { %v4453_v3 = vmul.f32 0.2, %v4298_v7 }
 0x61d   : > { %v3870_v46 = vpop.f32.mrf.mxu0  ;;  %v9872_v14 = vpop.f32.mrf.mxu1 }
 0x61e   : > { %v3871_v40 = vadd.f32 %v3870_v46, %v11200_v25  ;;  %v4581_v9 = vmax.f32 %v4298_v7, %v4453_v3 }
 0x620   : > { %v9876_v6 = vadd.f32 %v4039_v4, %v3871_v40  ;;  %3909 = vmatmul.bf16.gmra.mxu0 %v11201_v36  ;;  %v11203_v4 = vld [vmem:[#allocation171_spill] sm:$0xff] }
 0x621   : > { %v4170_v60 = vpop.f32.mrf.mxu2  ;;  %v4299_v19 = vpop.f32.mrf.mxu3 }
 0x622   : > { %v9880_v57 = vadd.f32 %v4170_v60, %v9721_v61  ;;  %v4300_v31 = vadd.f32 %v4299_v19, %v9716_v45 }
 0x624   : > { %v4455_v11 = vmul.f32 0.2, %v4300_v31 }
 0x625   : > { %v9883_v18 = vpop.f32.mrf.mxu0  ;;  %v4044_v53 = vpop.f32.mrf.mxu1 }
 0x626   : > { %v4583_v59 = vmax.f32 %v4300_v31, %v4455_v11  ;;  %4212 = vmatmul.bf16.gmra.mxu2 %v8984_v30  ;;  %4341 = vmatmul.bf16.gmra.mxu3 %v11202_v24  ;;  %v11205_v30 = vld [vmem:[#allocation172_spill] sm:$0xff] }
 0x628   : > { %4083 = vmatmul.bf16.gmra.mxu1 %v11203_v4  ;;  %v9888_v17 = vpack.c.bf16 %v4583_v59, %v4581_v9  ;;  %v11206_v9 = vld [vmem:[#allocation173_spill] sm:$0xff]  ;;  %v11208_v59 = vld [vmem:[#allocation175_spill] sm:$0xff] }
 0x629   : > { %v4173_v49 = vpop.f32.mrf.mxu2  ;;  %v4302_v16 = vpop.f32.mrf.mxu3 }
 0x62a   : > { %v9891_v61 = vadd.f32 %v4173_v49, %v9731_v50  ;;  %v4303_v29 = vadd.f32 %v4302_v16, %v9727_v38 }
 0x62c   : > { %v4457_v36 = vmul.f32 0.2, %v4303_v29 }
 0x62d   : > { %v3875_v45 = vpop.f32.mrf.mxu0  ;;  %v9893_v37 = vpop.f32.mrf.mxu1 }
 0x62e   : > { %v3876_v46 = vadd.f32 %v3875_v45, %v11204_v55  ;;  %v4585_v11 = vmax.f32 %v4303_v29, %v4457_v36  ;;  %v11209_v55 = vld [vmem:[#allocation96_spill] sm:$0xff] }
 0x630   : > { %v9897_v7 = vadd.f32 %v4044_v53, %v3876_v46  ;;  %3914 = vmatmul.bf16.gmra.mxu0 %v11205_v30  ;;  %v11207_v53 = vld [vmem:[#allocation174_spill] sm:$0xff]  ;;  %v11210_v30 = vld [vmem:[#allocation176_spill] sm:$0xff] }
 0x631   : > { %v4175_v25 = vpop.f32.mrf.mxu2  ;;  %v4304_v40 = vpop.f32.mrf.mxu3 }
 0x632   : > { %v9901_v60 = vadd.f32 %v4175_v25, %v9741_v62  ;;  %v4305_v50 = vadd.f32 %v4304_v40, %v9736_v44 }
 0x634   : > { %v4459_v19 = vmul.f32 0.2, %v4305_v50 }
 0x635   : > { %v9904_v3 = vpop.f32.mrf.mxu0  ;;  %v4049_v31 = vpop.f32.mrf.mxu1 }
 0x636   : > { %v4587_v38 = vmax.f32 %v4305_v50, %v4459_v19  ;;  %4217 = vmatmul.bf16.gmra.mxu2 %v11206_v9  ;;  %4346 = vmatmul.bf16.gmra.mxu3 %v11207_v53  ;;  %v11211_v53 = vld [vmem:[#allocation177_spill] sm:$0xff] }
 0x638   : > { %4088 = vmatmul.bf16.gmra.mxu1 %v11208_v59  ;;  %v4713_v24 = vpack.c.bf16 %v4587_v38, %v4585_v11 }
 0x639   : > { %v4178_v4 = vpop.f32.mrf.mxu2  ;;  %v4307_v49 = vpop.f32.mrf.mxu3 }
 0x63a   : > { %v9910_v62 = vadd.f32 %v4178_v4, %v9749_v39  ;;  %v4308_v45 = vadd.f32 %v4307_v49, %v9745_v8 }
 0x63c   : > { %v4461_v36 = vmul.f32 0.2, %v4308_v45 }
 0x63d   : > { %v3880_v16 = vpop.f32.mrf.mxu0  ;;  %v9912_v44 = vpop.f32.mrf.mxu1 }
 0x63e   : > { %v3881_v29 = vadd.f32 %v3880_v16, %v11209_v55  ;;  %v4589_v9 = vmax.f32 %v4308_v45, %v4461_v36 }
 0x640   : > { %v9916_v46 = vadd.f32 %v4049_v31, %v3881_v29  ;;  %3919 = vmatmul.bf16.gmra.mxu0 %v11210_v30  ;;  %v11212_v31 = vld [vmem:[#allocation178_spill] sm:$0xff] }
 0x641   : > { %v4180_v25 = vpop.f32.mrf.mxu2  ;;  %v4309_v40 = vpop.f32.mrf.mxu3 }
 0x642   : > { %v9920_v50 = vadd.f32 %v4180_v25, %v9759_v10  ;;  %v4310_v39 = vadd.f32 %v4309_v40, %v9754_v5  ;;  %v5989_v10 = vld [vmem:[%s10442_s9] sm:$0xf]  ;;  %v6203_v5 = vld [vmem:[%s10442_s9 + $0xc] sm:$0xf0]  ;;  %v11213_v25 = vld [vmem:[#allocation55_spill] sm:$0xff] }
 0x643   : > { %v9937_v55 = vor.u32 %v6203_v5, %v5989_v10  ;;  %v11215_v10 = vld [vmem:[#allocation142_spill] sm:$0xff] }
 0x644   : > { %v4463_v19 = vmul.f32 0.2, %v4310_v39 }
 0x645   : > { %v9923_v11 = vpop.f32.mrf.mxu0  ;;  %v4054_v38 = vpop.f32.mrf.mxu1 }
 0x646   : > { %v4591_v8 = vmax.f32 %v4310_v39, %v4463_v19  ;;  %4222 = vmatmul.bf16.gmra.mxu2 %v11211_v53  ;;  %4351 = vmatmul.bf16.gmra.mxu3 %v11212_v31 }
 0x648   : > { %v4715_v59 = vpack.c.bf16 %v4591_v8, %v4589_v9 }
 0x649   : > { %v4183_v4 = vpop.f32.mrf.mxu2  ;;  %v4312_v49 = vpop.f32.mrf.mxu3 }
 0x64a   : > { %v9934_v16 = vadd.f32 %v4183_v4, %v9767_v32  ;;  %v4313_v45 = vadd.f32 %v4312_v49, %v9763_v51 }
 0x64c   : > { %v4465_v9 = vmul.f32 0.2, %v4313_v45 }
 0x64d   : > { %v3885_v29 = vpop.f32.mrf.mxu0  ;;  %v9939_v30 = vpop.f32.mrf.mxu1 }
 0x64e   : > { %v3886_v40 = vadd.f32 %v3885_v29, %v11213_v25  ;;  %v4593_v4 = vmax.f32 %v4313_v45, %v4465_v9  ;;  %v11216_v25 = vld [vmem:[#allocation143_spill] sm:$0xff] }
 0x650   : > { %v9942_v36 = vadd.f32 %v4054_v38, %v3886_v40  ;;  %4832 = vmatmul.bf16.vlgmr.msra.gmra.mxu0 %v9937_v55  ;;  %v11214_v38 = vld [vmem:[#allocation146_spill] sm:$0xff] }
 0x651   : > { %4920 = vmatpush.bf16.msra.mxu0 %v4715_v59  ;;  %v4185_v39 = vpop.f32.mrf.mxu2  ;;  %v4314_v19 = vpop.f32.mrf.mxu3 }
 0x652   : > { %v9946_v32 = vadd.f32 %v4185_v39, %v9779_v13  ;;  %v4315_v51 = vadd.f32 %v4314_v19, %v9771_v33 }
 0x654   : > { %v4467_v8 = vmul.f32 0.2, %v4315_v51 }
 0x655   : > { %4921 = vmatpush.bf16.msra.mxu0 %v4713_v24  ;;  %v9949_v53 = vpop.f32.mrf.mxu0  ;;  %v4059_v31 = vpop.f32.mrf.mxu1 }
 0x656   : > { %v4595_v49 = vmax.f32 %v4315_v51, %v4467_v8  ;;  %4227 = vmatmul.bf16.gmra.mxu2 %v11214_v38  ;;  %4356 = vmatmul.bf16.gmra.mxu3 %v11215_v10  ;;  %v11218_v38 = vld [vmem:[#allocation152_spill] sm:$0xff] }
 0x658   : > { %v9953_v59 = vpack.c.bf16 %v4595_v49, %v4593_v4 }
 0x659   : > { %4922 = vmatpush.bf16.msra.mxu0 %v9888_v17  ;;  %v4188_v5 = vpop.f32.mrf.mxu2  ;;  %v4317_v13 = vpop.f32.mrf.mxu3 }
 0x65a   : > { %v9957_v29 = vadd.f32 %v4188_v5, %v9791_v34  ;;  %v4318_v33 = vadd.f32 %v4317_v13, %v9785_v28 }
 0x65c   : > { %v4469_v9 = vmul.f32 0.2, %v4318_v33 }
 0x65d   : > { %4923 = vmatpush.bf16.msra.mxu0 %v9867_v23  ;;  %v3890_v24 = vpop.f32.mrf.mxu0  ;;  %v9961_v45 = vpop.f32.mrf.mxu1 }
 0x65e   : > { %v3891_v40 = vadd.f32 %v3890_v24, %v11216_v25  ;;  %v4597_v4 = vmax.f32 %v4318_v33, %v4469_v9  ;;  %v11220_v33 = vld [vmem:[#allocation134_spill] sm:$0xff] }
 0x660   : > { %v9964_v39 = vadd.f32 %v4059_v31, %v3891_v40  ;;  %v11217_v31 = vld [vmem:[#allocation62_spill] sm:$0xff] }
 0x661   : > { %4924 = vmatpush.bf16.msra.mxu0 %v9846_v0  ;;  %v4190_v19 = vpop.f32.mrf.mxu2  ;;  %v4319_v17 = vpop.f32.mrf.mxu3 }
 0x662   : > { %v9968_v51 = vadd.f32 %v4190_v19, %v9803_v2  ;;  %v4320_v34 = vadd.f32 %v4319_v17, %v9795_v54 }
 0x664   : > { %v4471_v28 = vmul.f32 0.2, %v4320_v34 }
 0x665   : > { %4925 = vmatpush.bf16.msra.mxu0 %v9826_v43  ;;  %v9972_v23 = vpop.f32.mrf.mxu0  ;;  %v4064_v8 = vpop.f32.mrf.mxu1 }
 0x666   : > { %v4599_v49 = vmax.f32 %v4320_v34, %v4471_v28  ;;  %4232 = vmatmul.bf16.gmra.mxu2 %v11217_v31  ;;  %4361 = vmatmul.bf16.gmra.mxu3 %v11218_v38 }
 0x668   : > { %v9976_v0 = vpack.c.bf16 %v4599_v49, %v4597_v4  ;;  %v11222_v4 = vld [vmem:[#allocation19_spill] sm:$0xff] }
 0x669   : > { %4926 = vmatpush.bf16.msra.mxu0 %v9806_v41  ;;  %v4193_v2 = vpop.f32.mrf.mxu2  ;;  %v4322_v10 = vpop.f32.mrf.mxu3  ;;  %v11223_v49 = vld [vmem:[#allocation151_spill] sm:$0xff] }
 0x66a   : > { %v9980_v54 = vadd.f32 %v4193_v2, %v9813_v52  ;;  %v4323_v43 = vadd.f32 %v4322_v10, %v9809_v22 }
 0x66c   : > { %v4473_v17 = vmul.f32 0.2, %v4323_v43 }
 0x66d   : > { %4927 = vmatpush.bf16.msra.mxu0 %v9782_v42  ;;  %v3895_v5 = vpop.f32.mrf.mxu0  ;;  %v9984_v13 = vpop.f32.mrf.mxu1 }
 0x66e   : > { %11219 = vst [vmem:[#allocation72_spill] sm:$0xff] %v9984_v13  ;;  %v3896_v24 = vadd.f32 %v3895_v5, %v11220_v33  ;;  %v4601_v42 = vmax.f32 %v4323_v43, %v4473_v17  ;;  %v11225_v5 = vld [vmem:[#allocation141_spill] sm:$0xff]  ;;  %v11244_v13 = vld [vmem:[#allocation28_spill] sm:$0xff] }
 0x670   : > { %v9987_v25 = vadd.f32 %v4064_v8, %v3896_v24 }
 0x671   : > { %v4195_v40 = vpop.f32.mrf.mxu2  ;;  %v4324_v19 = vpop.f32.mrf.mxu3 }
 0x672   : > { %v9990_v41 = vadd.f32 %v4195_v40, %v9823_v20  ;;  %v4325_v52 = vadd.f32 %v4324_v19, %v9817_v21 }
 0x674   : > { %v4475_v9 = vmul.f32 0.2, %v4325_v52 }
 0x675   : > { %v9993_v34 = vpop.f32.mrf.mxu0  ;;  %v4069_v22 = vpop.f32.mrf.mxu1 }
 0x676   : > { %11221 = vst [vmem:[#allocation77_spill] sm:$0xff] %v9993_v34  ;;  %v4603_v28 = vmax.f32 %v4325_v52, %v4475_v9  ;;  %4237 = vmatmul.bf16.gmra.mxu2 %v11222_v4  ;;  %4366 = vmatmul.bf16.gmra.mxu3 %v11223_v49  ;;  %v11227_v4 = vld [vmem:[#allocation64_spill] sm:$0xff]  ;;  %v11228_v49 = vld [vmem:[#allocation42_spill] sm:$0xff] }
 0x678   : > { %v9997_v8 = vpack.c.bf16 %v4603_v28, %v4601_v42 }
 0x679   : > { %v4198_v31 = vpop.f32.mrf.mxu2  ;;  %v4327_v38 = vpop.f32.mrf.mxu3 }
 0x67a   : > { %v10000_v2 = vadd.f32 %v4198_v31, %v9833_v48  ;;  %v4328_v20 = vadd.f32 %v4327_v38, %v9829_v35 }
 0x67c   : > { %v4477_v19 = vmul.f32 0.2, %v4328_v20 }
 0x67d   : > { %v3900_v21 = vpop.f32.mrf.mxu0  ;;  %v10003_v10 = vpop.f32.mrf.mxu1 }
 0x67e   : > { %11224 = vst [vmem:[#allocation74_spill] sm:$0xff] %v10003_v10  ;;  %v3901_v33 = vadd.f32 %v3900_v21, %v11225_v5  ;;  %v4605_v35 = vmax.f32 %v4328_v20, %v4477_v19  ;;  %v11238_v10 = vld [vmem:[#allocation30_spill] sm:$0xff] }
 0x680   : > { %v10006_v43 = vadd.f32 %v4069_v22, %v3901_v33  ;;  %v11230_v33 = vld [vmem:[#allocation124_spill] sm:$0xff] }
 0x681   : > { %v4200_v24 = vpop.f32.mrf.mxu2  ;;  %v4329_v40 = vpop.f32.mrf.mxu3 }
 0x682   : > { %v10009_v17 = vadd.f32 %v4200_v24, %v9843_v58  ;;  %v4330_v52 = vadd.f32 %v4329_v40, %v9837_v63 }
 0x684   : > { %v4479_v9 = vmul.f32 0.2, %v4330_v52 }
 0x685   : > { %v10012_v48 = vpop.f32.mrf.mxu0  ;;  %v4074_v42 = vpop.f32.mrf.mxu1 }
 0x686   : > { %11226 = vst [vmem:[#allocation75_spill] sm:$0xff] %v10012_v48  ;;  %v4607_v28 = vmax.f32 %v4330_v52, %v4479_v9  ;;  %4242 = vmatmul.bf16.gmra.mxu2 %v11227_v4  ;;  %4371 = vmatmul.bf16.gmra.mxu3 %v11228_v49 }
 0x688   : > { %v10016_v22 = vpack.c.bf16 %v4607_v28, %v4605_v35 }
 0x689   : > { %v4203_v31 = vpop.f32.mrf.mxu2  ;;  %v4332_v38 = vpop.f32.mrf.mxu3 }
 0x68a   : > { %v10019_v21 = vadd.f32 %v4203_v31, %v9855_v12  ;;  %v4333_v58 = vadd.f32 %v4332_v38, %v9849_v47  ;;  %v11232_v47 = vld [vmem:[#allocation51_spill] sm:$0xff]  ;;  %v11233_v31 = vld [vmem:[#allocation60_spill] sm:$0xff] }
 0x68c   : > { %v4481_v52 = vmul.f32 0.2, %v4333_v58 }
 0x68d   : > { %v3905_v63 = vpop.f32.mrf.mxu0  ;;  %v10022_v5 = vpop.f32.mrf.mxu1 }
 0x68e   : > { %11229 = vst [vmem:[#allocation80_spill] sm:$0xff] %v10022_v5  ;;  %v3906_v24 = vadd.f32 %v3905_v63, %v11230_v33  ;;  %v4609_v4 = vmax.f32 %v4333_v58, %v4481_v52  ;;  %v11234_v5 = vld [vmem:[#allocation116_spill] sm:$0xff] }
 0x690   : > { %v10025_v20 = vadd.f32 %v4074_v42, %v3906_v24 }
 0x691   : > { %v10027_v40 = vpop.f32.mrf.mxu2  ;;  %v4334_v19 = vpop.f32.mrf.mxu3 }
 0x692   : > { %v4335_v9 = vadd.f32 %v4334_v19, %v9859_v1 }
 0x694   : > { %v4483_v35 = vmul.f32 0.2, %v4335_v9 }
 0x695   : > { %v10030_v28 = vpop.f32.mrf.mxu0  ;;  %v4079_v12 = vpop.f32.mrf.mxu1 }
 0x696   : > { %11231 = vst [vmem:[#allocation79_spill] sm:$0xff] %v10030_v28  ;;  %v4611_v49 = vmax.f32 %v4335_v9, %v4483_v35  ;;  %4247 = vmatmul.bf16.gmra.mxu2 %v11232_v47  ;;  %4376 = vmatmul.bf16.gmra.mxu3 %v11233_v31 }
 0x698   : > { %v10034_v38 = vpack.c.bf16 %v4611_v49, %v4609_v4 }
 0x699   : > { %v10036_v42 = vpop.f32.mrf.mxu2  ;;  %v4337_v63 = vpop.f32.mrf.mxu3 }
 0x69a   : > { %v4338_v24 = vadd.f32 %v4337_v63, %v9870_v26  ;;  %v11239_v26 = vld [vmem:[#allocation57_spill] sm:$0xff]  ;;  %v5991_v63 = vld [vmem:[%s10442_s9 + $0x10] sm:$0xf0] }
 0x69c   : > { %v4485_v9 = vmul.f32 0.2, %v4338_v24 }
 0x69d   : > { %v3910_v33 = vpop.f32.mrf.mxu0  ;;  %v10040_v19 = vpop.f32.mrf.mxu1 }
 0x69e   : > { %v3911_v1 = vadd.f32 %v3910_v33, %v11234_v5  ;;  %11235 = vst [vmem:[#allocation32_spill] sm:$0xff] %v10040_v19  ;;  %v4613_v47 = vmax.f32 %v4338_v24, %v4485_v9  ;;  %v11240_v9 = vld [vmem:[#allocation122_spill] sm:$0xff] }
 0x6a0   : > { %v10042_v28 = vadd.f32 %v4079_v12, %v3911_v1  ;;  %v6201_v12 = vld [vmem:[%s10442_s9 + $0x4] sm:$0xf] }
 0x6a1   : > { %v10044_v58 = vpop.f32.mrf.mxu2  ;;  %v4339_v52 = vpop.f32.mrf.mxu3 }
 0x6a2   : > { %11236 = vst [vmem:[#allocation82_spill] sm:$0xff] %v10042_v28  ;;  %v4340_v35 = vadd.f32 %v4339_v52, %v9880_v57  ;;  %v10059_v52 = vor.u32 %v6201_v12, %v5991_v63 }
 0x6a4   : > { %v4487_v4 = vmul.f32 0.2, %v4340_v35  ;;  %4856 = vmatmul.bf16.vlgmr.msra.gmra.mxu1 %v10059_v52 }
 0x6a5   : > { %v10047_v49 = vpop.f32.mrf.mxu0  ;;  %v4084_v5 = vpop.f32.mrf.mxu1 }
 0x6a6   : > { %11237 = vst [vmem:[#allocation83_spill] sm:$0xff] %v10047_v49  ;;  %v4615_v31 = vmax.f32 %v4340_v35, %v4487_v4  ;;  %4252 = vmatmul.bf16.gmra.mxu2 %v11238_v10  ;;  %4381 = vmatmul.bf16.gmra.mxu3 %v11239_v26 }
 0x6a8   : > { %v4727_v33 = vpack.c.bf16 %v4615_v31, %v4613_v47 }
 0x6a9   : > { %v10057_v57 = vpop.f32.mrf.mxu2  ;;  %v4342_v1 = vpop.f32.mrf.mxu3 }
 0x6aa   : > { %v4343_v24 = vadd.f32 %v4342_v1, %v9891_v61  ;;  %v11245_v61 = vld [vmem:[#allocation39_spill] sm:$0xff] }
 0x6ac   : > { %v4489_v19 = vmul.f32 0.2, %v4343_v24 }
 0x6ad   : > { %v3915_v10 = vpop.f32.mrf.mxu0  ;;  %v10069_v31 = vpop.f32.mrf.mxu1 }
 0x6ae   : > { %v3916_v35 = vadd.f32 %v3915_v10, %v11240_v9  ;;  %11242 = vst [vmem:[#allocation85_spill] sm:$0xff] %v10069_v31  ;;  %v4617_v63 = vmax.f32 %v4343_v24, %v4489_v19 }
 0x6b0   : > { %v10064_v4 = vadd.f32 %v4084_v5, %v3916_v35 }
 0x6b1   : > { %v10066_v26 = vpop.f32.mrf.mxu2  ;;  %v4344_v28 = vpop.f32.mrf.mxu3 }
 0x6b2   : > { %11241 = vst [vmem:[#allocation69_spill] sm:$0xff] %v10064_v4  ;;  %v4345_v47 = vadd.f32 %v4344_v28, %v9901_v60  ;;  %v11246_v60 = vld [vmem:[#allocation91_spill] sm:$0xff] }
 0x6b4   : > { %v4491_v49 = vmul.f32 0.2, %v4345_v47 }
 0x6b5   : > { %v10071_v12 = vpop.f32.mrf.mxu0  ;;  %v4089_v35 = vpop.f32.mrf.mxu1 }
 0x6b6   : > { %11243 = vst [vmem:[#allocation76_spill] sm:$0xff] %v10071_v12  ;;  %v4619_v48 = vmax.f32 %v4345_v47, %v4491_v49  ;;  %4257 = vmatmul.bf16.gmra.mxu2 %v11244_v13  ;;  %4386 = vmatmul.bf16.gmra.mxu3 %v11245_v61 }
 0x6b8   : > { %v4729_v1 = vpack.c.bf16 %v4619_v48, %v4617_v63 }
 0x6b9   : > { %v10075_v5 = vpop.f32.mrf.mxu2  ;;  %v4347_v10 = vpop.f32.mrf.mxu3 }
 0x6ba   : > { %v4348_v4 = vadd.f32 %v4347_v10, %v9910_v62 }
 0x6bc   : > { %v4493_v49 = vmul.f32 0.2, %v4348_v4 }
 0x6bd   : > { %v3920_v9 = vpop.f32.mrf.mxu0 }
 0x6be   : > { %v3921_v28 = vadd.f32 %v3920_v9, %v11246_v60  ;;  %v4621_v47 = vmax.f32 %v4348_v4, %v4493_v49 }
 0x6c0   : > { %v10079_v31 = vadd.f32 %v4089_v35, %v3921_v28 }
 0x6c1   : > { %v10081_v34 = vpop.f32.mrf.mxu2  ;;  %v4349_v19 = vpop.f32.mrf.mxu3 }
 0x6c2   : > { %v4350_v13 = vadd.f32 %v4349_v19, %v9920_v50  ;;  %v11247_v19 = vld [vmem:[#allocation56_spill] sm:$0xff] }
 0x6c4   : > { %v4495_v24 = vmul.f32 0.2, %v4350_v13 }
 0x6c6   : > { %v4623_v48 = vmax.f32 %v4350_v13, %v4495_v24  ;;  %4391 = vmatmul.bf16.gmra.mxu3 %v9374_v15 }
 0x6c8   : > { %v4731_v63 = vpack.c.bf16 %v4623_v48, %v4621_v47 }
 0x6c9   : > { %v4223_v61 = vpop.f32.mrf.mxu2  ;;  %v4352_v12 = vpop.f32.mrf.mxu3 }
 0x6ca   : > { %v10086_v62 = vadd.f32 %v4223_v61, %v9942_v36  ;;  %v4353_v10 = vadd.f32 %v4352_v12, %v9934_v16  ;;  %4944 = vmatpush.bf16.msra.mxu1 %v4731_v63  ;;  %v11248_v63 = vld [vmem:[#allocation48_spill] sm:$0xff] }
 0x6cc   : > { %v4497_v60 = vmul.f32 0.2, %v4353_v10 }
 0x6ce   : > { %4945 = vmatpush.bf16.msra.mxu1 %v4729_v1  ;;  %v4625_v28 = vmax.f32 %v4353_v10, %v4497_v60 }
 0x6d1   : > { %v10089_v9 = vpop.f32.mrf.mxu2  ;;  %v4354_v35 = vpop.f32.mrf.mxu3 }
 0x6d2   : > { %v4355_v50 = vadd.f32 %v4354_v35, %v9946_v32  ;;  %4946 = vmatpush.bf16.msra.mxu1 %v4727_v33 }
 0x6d4   : > { %v4499_v4 = vmul.f32 0.2, %v4355_v50 }
 0x6d6   : > { %v4627_v15 = vmax.f32 %v4355_v50, %v4499_v4  ;;  %4396 = vmatmul.bf16.gmra.mxu3 %v11247_v19  ;;  %4947 = vmatpush.bf16.msra.mxu1 %v10034_v38 }
 0x6d8   : > { %v10094_v36 = vpack.c.bf16 %v4627_v15, %v4625_v28  ;;  %v11249_v28 = vld [vmem:[#allocation33_spill] sm:$0xff] }
 0x6d9   : > { %v4228_v49 = vpop.f32.mrf.mxu2  ;;  %v4357_v16 = vpop.f32.mrf.mxu3 }
 0x6da   : > { %v10097_v12 = vadd.f32 %v4228_v49, %v9964_v39  ;;  %v4358_v1 = vadd.f32 %v4357_v16, %v9957_v29  ;;  %4948 = vmatpush.bf16.msra.mxu1 %v10016_v22 }
 0x6dc   : > { %v4501_v13 = vmul.f32 0.2, %v4358_v1 }
 0x6de   : > { %4949 = vmatpush.bf16.msra.mxu1 %v9997_v8  ;;  %v4629_v47 = vmax.f32 %v4358_v1, %v4501_v13 }
 0x6e1   : > { %v10102_v32 = vpop.f32.mrf.mxu2  ;;  %v4359_v33 = vpop.f32.mrf.mxu3 }
 0x6e2   : > { %v4360_v24 = vadd.f32 %v4359_v33, %v9968_v51  ;;  %4950 = vmatpush.bf16.msra.mxu1 %v9976_v0 }
 0x6e4   : > { %v4503_v38 = vmul.f32 0.2, %v4360_v24 }
 0x6e6   : > { %v4631_v48 = vmax.f32 %v4360_v24, %v4503_v38  ;;  %4401 = vmatmul.bf16.gmra.mxu3 %v11248_v63  ;;  %4951 = vmatpush.bf16.msra.mxu1 %v9953_v59  ;;  %v11250_v38 = vld [vmem:[#allocation14_spill] sm:$0xff] }
 0x6e8   : > { %v10108_v29 = vpack.c.bf16 %v4631_v48, %v4629_v47  ;;  %v6005_v47 = vld [vmem:[%s10442_s9 + $0x20] sm:$0xf] }
 0x6e9   : > { %v4233_v39 = vpop.f32.mrf.mxu2  ;;  %v4362_v22 = vpop.f32.mrf.mxu3 }
 0x6ea   : > { %v10111_v8 = vadd.f32 %v4233_v39, %v9987_v25  ;;  %v4363_v61 = vadd.f32 %v4362_v22, %v9980_v54 }
 0x6ec   : > { %v4505_v0 = vmul.f32 0.2, %v4363_v61 }
 0x6ee   : > { %v4633_v50 = vmax.f32 %v4363_v61, %v4505_v0 }
 0x6f1   : > { %v10114_v10 = vpop.f32.mrf.mxu2  ;;  %v4364_v51 = vpop.f32.mrf.mxu3 }
 0x6f2   : > { %v4365_v35 = vadd.f32 %v4364_v51, %v9990_v41 }
 0x6f4   : > { %v4507_v60 = vmul.f32 0.2, %v4365_v35 }
 0x6f6   : > { %v4635_v4 = vmax.f32 %v4365_v35, %v4507_v60  ;;  %4406 = vmatmul.bf16.gmra.mxu3 %v11249_v28 }
 0x6f8   : > { %v10118_v59 = vpack.c.bf16 %v4635_v4, %v4633_v50  ;;  %v6205_v50 = vld [vmem:[%s10442_s9 + $0x24] sm:$0xf] }
 0x6f9   : > { %v4238_v15 = vpop.f32.mrf.mxu2  ;;  %v4367_v19 = vpop.f32.mrf.mxu3 }
 0x6fa   : > { %v10121_v25 = vadd.f32 %v4238_v15, %v10006_v43  ;;  %v4368_v54 = vadd.f32 %v4367_v19, %v10000_v2  ;;  %v6207_v43 = vld [vmem:[%s10442_s9 + $0x2c] sm:$0xf0]  ;;  %v11252_v19 = vld [vmem:[#allocation27_spill] sm:$0xff] }
 0x6fb   : > { %v10136_v39 = vor.u32 %v6207_v43, %v6005_v47  ;;  %v11253_v47 = vld [vmem:[#allocation25_spill] sm:$0xff]  ;;  %v5997_v43 = vld [vmem:[%s10442_s9 + $0x8] sm:$0xf] }
 0x6fc   : > { %v4509_v1 = vmul.f32 0.2, %v4368_v54 }
 0x6fd   : > { %4837 = vmatmul.bf16.gmra.mxu0 %v10136_v39 }
 0x6fe   : > { %v4637_v13 = vmax.f32 %v4368_v54, %v4509_v1  ;;  %v6211_v54 = vld [vmem:[%s10442_s9 + $0x4c] sm:$0xf0] }
 0x701   : > { %v10124_v49 = vpop.f32.mrf.mxu2  ;;  %v4369_v16 = vpop.f32.mrf.mxu3 }
 0x702   : > { %v4370_v41 = vadd.f32 %v4369_v16, %v10009_v17  ;;  %v11251_v17 = vld [vmem:[#allocation23_spill] sm:$0xff] }
 0x703   : > { %v3868_v22 = vadd.f32 %v9862_v27, %v11251_v17  ;;  %v6007_v27 = vld [vmem:[%s10442_s9 + $0x30] sm:$0xf0] }
 0x704   : > { %v4511_v33 = vmul.f32 0.2, %v4370_v41  ;;  %v10153_v28 = vor.u32 %v6205_v50, %v6007_v27  ;;  %v11255_v50 = vld [vmem:[#allocation112_spill] sm:$0xff] }
 0x705   : > { %v4037_v0 = vadd.f32 %v9852_v56, %v3868_v22  ;;  %v3878_v27 = vadd.f32 %v9904_v3, %v11255_v50  ;;  %v6013_v3 = vld [vmem:[%s10442_s9 + $0x28] sm:$0xf] }
 0x706   : > { %v4639_v24 = vmax.f32 %v4370_v41, %v4511_v33  ;;  %4411 = vmatmul.bf16.gmra.mxu3 %v11250_v38  ;;  %4861 = vmatmul.bf16.gmra.mxu1 %v10153_v28 }
 0x707   : > { %v4206_v35 = vadd.f32 %v10027_v40, %v4037_v0  ;;  %v6021_v40 = vld [vmem:[%s10442_s9 + $0x40] sm:$0xf]  ;;  %v5999_v0 = vld [vmem:[%s10442_s9 + $0x18] sm:$0xf0] }
 0x708   : > { %v10134_v2 = vpack.c.bf16 %v4639_v24, %v4637_v13  ;;  %v10165_v41 = vor.u32 %v6211_v54, %v6021_v40  ;;  %v6209_v13 = vld [vmem:[%s10442_s9 + $0x44] sm:$0xf]  ;;  %v6023_v24 = vld [vmem:[%s10442_s9 + $0x50] sm:$0xf0]  ;;  %v4219_v40 = vadd.f32 %v10075_v5, %v9916_v46 }
 0x709   : > { %v4243_v48 = vpop.f32.mrf.mxu2  ;;  %v4372_v63 = vpop.f32.mrf.mxu3  ;;  %v10174_v38 = vor.u32 %v6209_v13, %v6023_v24 }
 0x70a   : > { %v10141_v61 = vadd.f32 %v4243_v48, %v10025_v20  ;;  %v4373_v51 = vadd.f32 %v4372_v63, %v10019_v21  ;;  %v6204_v48 = vld [vmem:[%s10442_s9 + $0x14] sm:$0xf0] }
 0x70b   : > { %v10184_v17 = vor.u32 %v6204_v48, %v5997_v43  ;;  %v6015_v43 = vld [vmem:[%s10442_s9 + $0x38] sm:$0xf0] }
 0x70c   : > { %v4513_v4 = vmul.f32 0.2, %v4373_v51 }
 0x70d   : > { %4842 = vmatmul.bf16.gmra.mxu0 %v10165_v41 }
 0x70e   : > { %v4641_v15 = vmax.f32 %v4373_v51, %v4513_v4  ;;  %v6202_v51 = vld [vmem:[%s10442_s9 + $0xc] sm:$0xf] }
 0x711   : > { %v4374_v60 = vpop.f32.mrf.mxu3 }
 0x712   : > { %v4375_v20 = vadd.f32 %v4374_v60, %v4206_v35  ;;  %v10193_v35 = vor.u32 %v6202_v51, %v5999_v0  ;;  %v11254_v60 = vld [vmem:[#allocation73_spill] sm:$0xff] }
 0x714   : > { %v4515_v21 = vmul.f32 0.2, %v4375_v20 }
 0x716   : > { %v4643_v56 = vmax.f32 %v4375_v20, %v4515_v21  ;;  %4416 = vmatmul.bf16.gmra.mxu3 %v11252_v19  ;;  %4866 = vmatmul.bf16.gmra.mxu1 %v10174_v38  ;;  %v11256_v20 = vld [vmem:[#allocation106_spill] sm:$0xff]  ;;  %v4047_v19 = vadd.f32 %v9893_v37, %v3878_v27  ;;  %v4214_v37 = vadd.f32 %v10057_v57, %v9897_v7 }
 0x717   : > { %v3883_v21 = vadd.f32 %v9923_v11, %v11256_v20 }
 0x718   : > { %v10163_v16 = vpack.c.bf16 %v4643_v56, %v4641_v15  ;;  %v11257_v15 = vld [vmem:[#allocation127_spill] sm:$0xff]  ;;  %v4216_v13 = vadd.f32 %v10066_v26, %v4047_v19 }
 0x719   : > { %v4377_v1 = vpop.f32.mrf.mxu3  ;;  %v3873_v56 = vadd.f32 %v9883_v18, %v11257_v15  ;;  %v4052_v54 = vadd.f32 %v9912_v44, %v3883_v21  ;;  %v6208_v18 = vld [vmem:[%s10442_s9 + $0x34] sm:$0xf0] }
 0x71a   : > { %v10218_v44 = vor.u32 %v6208_v18, %v6013_v3 }
 0x71b   : > { %v4221_v46 = vadd.f32 %v10081_v34, %v4052_v54  ;;  %v4209_v34 = vadd.f32 %v10036_v42, %v9876_v6 }
 0x71d   : > { %4880 = vmatmul.bf16.vlgmr.msrb.gmra.mxu0 %v10184_v17 }
 0x721   : > { %v4379_v33 = vpop.f32.mrf.mxu3 }
 0x726   : > { %4421 = vmatmul.bf16.gmra.mxu3 %v11253_v47  ;;  %4904 = vmatmul.bf16.vlgmr.msrb.gmra.mxu1 %v10193_v35  ;;  %v4042_v47 = vadd.f32 %v9872_v14, %v3873_v56  ;;  %v6206_v14 = vld [vmem:[%s10442_s9 + $0x2c] sm:$0xf]  ;;  %v11258_v56 = vld [vmem:[#allocation24_spill] sm:$0xff] }
 0x727   : > { %v10228_v7 = vor.u32 %v6206_v14, %v6015_v43  ;;  %v3888_v19 = vadd.f32 %v9949_v53, %v11258_v56 }
 0x728   : > { %v4211_v26 = vadd.f32 %v10044_v58, %v4042_v47  ;;  %v6212_v47 = vld [vmem:[%s10442_s9 + $0x54] sm:$0xf0] }
 0x729   : > { %v4382_v63 = vpop.f32.mrf.mxu3 }
 0x72a   : > { %v4383_v48 = vadd.f32 %v4382_v63, %v4214_v37  ;;  %v4380_v58 = vadd.f32 %v4379_v33, %v4211_v26  ;;  %v6031_v37 = vld [vmem:[%s10442_s9 + $0x58] sm:$0xf0] }
 0x72c   : > { %v4521_v50 = vmul.f32 0.2, %v4383_v48  ;;  %v4519_v20 = vmul.f32 0.2, %v4380_v58 }
 0x72d   : > { %4885 = vmatmul.bf16.gmra.mxu0 %v10218_v44 }
 0x72e   : > { %v4649_v54 = vmax.f32 %v4383_v48, %v4521_v50  ;;  %v4647_v42 = vmax.f32 %v4380_v58, %v4519_v20  ;;  %v11262_v20 = vld [vmem:[#allocation72_spill] sm:$0xff] }
 0x731   : > { %v4384_v22 = vpop.f32.mrf.mxu3 }
 0x732   : > { %v4385_v11 = vadd.f32 %v4384_v22, %v4216_v13  ;;  %v4057_v13 = vadd.f32 %v9939_v30, %v3888_v19  ;;  %v6210_v30 = vld [vmem:[%s10442_s9 + $0x4c] sm:$0xf]  ;;  %v3922_v19 = vpop.f32.mrf.mxu0 }
 0x733   : > { %v10252_v26 = vor.u32 %v6210_v30, %v6031_v37 }
 0x734   : > { %v4523_v57 = vmul.f32 0.2, %v4385_v11  ;;  %v4226_v53 = vadd.f32 %v10089_v9, %v4057_v13  ;;  %v11265_v13 = vld [vmem:[#allocation74_spill] sm:$0xff] }
 0x736   : > { %4426 = vmatmul.bf16.gmra.mxu3 %v11254_v60  ;;  %4909 = vmatmul.bf16.gmra.mxu1 %v10228_v7  ;;  %v4378_v60 = vadd.f32 %v4377_v1, %v4209_v34  ;;  %v4651_v63 = vmax.f32 %v4385_v11, %v4523_v57 }
 0x738   : > { %v4745_v33 = vpack.c.bf16 %v4651_v63, %v4649_v54  ;;  %v4091_v54 = vpop.f32.mrf.mxu1 }
 0x739   : > { %v4387_v4 = vpop.f32.mrf.mxu3 }
 0x73a   : > { %v4388_v24 = vadd.f32 %v4387_v4, %v4219_v40  ;;  %v4517_v40 = vmul.f32 0.2, %v4378_v60 }
 0x73c   : > { %v4525_v51 = vmul.f32 0.2, %v4388_v24  ;;  %v4645_v1 = vmax.f32 %v4378_v60, %v4517_v40 }
 0x73e   : > { %v4653_v27 = vmax.f32 %v4388_v24, %v4525_v51  ;;  %v6029_v24 = vld [vmem:[%s10442_s9 + $0x48] sm:$0xf]  ;;  %v4743_v3 = vpack.c.bf16 %v4647_v42, %v4645_v1 }
 0x73f   : > { %v10244_v18 = vor.u32 %v6212_v47, %v6029_v24  ;;  %v11259_v51 = vld [vmem:[#allocation179_spill] sm:$0xff]  ;;  %v4833_v24 = vpop.f32.mrf.mxu0  ;;  %v10286_v47 = vpop.f32.mrf.mxu2 }
 0x740   : > { %v11264_v42 = vld [vmem:[#allocation75_spill] sm:$0xff] }
 0x741   : > { %v4389_v5 = vpop.f32.mrf.mxu3  ;;  %4890 = vmatmul.bf16.gmra.mxu0 %v10244_v18 }
 0x742   : > { %v4390_v0 = vadd.f32 %v4389_v5, %v4221_v46 }
 0x744   : > { %v4527_v22 = vmul.f32 0.2, %v4390_v0 }
 0x746   : > { %v4655_v4 = vmax.f32 %v4390_v0, %v4527_v22  ;;  %4914 = vmatmul.bf16.gmra.mxu1 %v10252_v26  ;;  %v3893_v0 = vadd.f32 %v9972_v23, %v11259_v51 }
 0x748   : > { %v4747_v21 = vpack.c.bf16 %v4655_v4, %v4653_v27  ;;  %v4062_v58 = vadd.f32 %v9961_v45, %v3893_v0  ;;  %v11261_v27 = vld [vmem:[#allocation77_spill] sm:$0xff] }
 0x749   : > { %v4392_v15 = vpop.f32.mrf.mxu3 }
 0x74a   : > { %v4393_v6 = vadd.f32 %v4392_v15, %v10086_v62  ;;  %4968 = vmatpush.bf16.msrb.mxu0 %v4747_v21  ;;  %v4231_v57 = vadd.f32 %v10102_v32, %v4062_v58 }
 0x74c   : > { %v4529_v46 = vmul.f32 0.2, %v4393_v6 }
 0x74e   : > { %4969 = vmatpush.bf16.msrb.mxu0 %v4745_v33  ;;  %v4657_v5 = vmax.f32 %v4393_v6, %v4529_v46 }
 0x751   : > { %v4394_v62 = vpop.f32.mrf.mxu3  ;;  %4928 = vmatmul.bf16.vlgmr.msra.gmra.mxu0 %v9937_v55 }
 0x752   : > { %v4395_v11 = vadd.f32 %v4394_v62, %v4226_v53  ;;  %4970 = vmatpush.bf16.msrb.mxu0 %v4743_v3  ;;  %v4857_v53 = vpop.f32.mrf.mxu1 }
 0x754   : > { %v4531_v9 = vmul.f32 0.2, %v4395_v11 }
 0x756   : > { %v4659_v14 = vmax.f32 %v4395_v11, %v4531_v9  ;;  %4971 = vmatpush.bf16.msrb.mxu0 %v10163_v16  ;;  %4952 = vmatmul.bf16.vlgmr.msra.gmra.mxu1 %v10059_v52  ;;  %v4835_v11 = vpop.f32.mrf.mxu0 }
 0x758   : > { %v10257_v43 = vpack.c.bf16 %v4659_v14, %v4657_v5  ;;  %v4248_v14 = vpop.f32.mrf.mxu2 }
 0x759   : > { %v4397_v48 = vpop.f32.mrf.mxu3 }
 0x75a   : > { %v4398_v34 = vadd.f32 %v4397_v48, %v10097_v12  ;;  %4972 = vmatpush.bf16.msrb.mxu0 %v10134_v2  ;;  %v4859_v5 = vpop.f32.mrf.mxu1 }
 0x75c   : > { %v4533_v60 = vmul.f32 0.2, %v4398_v34 }
 0x75e   : > { %4973 = vmatpush.bf16.msrb.mxu0 %v10118_v59  ;;  %v4661_v23 = vmax.f32 %v4398_v34, %v4533_v60  ;;  %v11260_v59 = vld [vmem:[#allocation137_spill] sm:$0xff] }
 0x75f   : > { %v3898_v32 = vadd.f32 %v11261_v27, %v11260_v59 }
 0x761   : > { %v4399_v22 = vpop.f32.mrf.mxu3  ;;  %v4067_v63 = vadd.f32 %v11262_v20, %v3898_v32  ;;  %4933 = vmatmul.bf16.gmra.mxu0 %v10136_v39  ;;  %v4858_v32 = vadd.f32 %v4857_v53, %v4833_v24 }
 0x762   : > { %v4400_v50 = vadd.f32 %v4399_v22, %v4231_v57  ;;  %4974 = vmatpush.bf16.msrb.mxu0 %v10108_v29 }
 0x763   : > { %v4236_v29 = vadd.f32 %v10114_v10, %v4067_v63  ;;  %v11266_v63 = vld [vmem:[#allocation113_spill] sm:$0xff] }
 0x764   : > { %v4535_v16 = vmul.f32 0.2, %v4400_v50 }
 0x766   : > { %v4663_v12 = vmax.f32 %v4400_v50, %v4535_v16  ;;  %4975 = vmatpush.bf16.msrb.mxu0 %v10094_v36  ;;  %4957 = vmatmul.bf16.gmra.mxu1 %v10153_v28 }
 0x768   : > { %v10270_v2 = vpack.c.bf16 %v4663_v12, %v4661_v23 }
 0x769   : > { %v4402_v45 = vpop.f32.mrf.mxu3 }
 0x76a   : > { %v4403_v4 = vadd.f32 %v4402_v45, %v10111_v8  ;;  %v11263_v8 = vld [vmem:[#allocation128_spill] sm:$0xff] }
 0x76b   : > { %v3903_v33 = vadd.f32 %v11264_v42, %v11263_v8  ;;  %v11269_v42 = vld [vmem:[#allocation120_spill] sm:$0xff] }
 0x76c   : > { %v4537_v21 = vmul.f32 0.2, %v4403_v4 }
 0x76d   : > { %v4072_v1 = vadd.f32 %v11265_v13, %v3903_v33  ;;  %v11270_v33 = vld [vmem:[#allocation83_spill] sm:$0xff]  ;;  %v11271_v13 = vld [vmem:[#allocation85_spill] sm:$0xff] }
 0x76e   : > { %v4665_v36 = vmax.f32 %v4403_v4, %v4537_v21  ;;  %v4860_v4 = vadd.f32 %v4859_v5, %v4835_v11  ;;  %v11276_v11 = vld [vmem:[#allocation69_spill] sm:$0xff] }
 0x76f   : > { %v4241_v39 = vadd.f32 %v10124_v49, %v4072_v1 }
 0x771   : > { %v4404_v55 = vpop.f32.mrf.mxu3  ;;  %4938 = vmatmul.bf16.gmra.mxu0 %v10165_v41  ;;  %v4250_v41 = vpop.f32.mrf.mxu2 }
 0x772   : > { %v4405_v15 = vadd.f32 %v4404_v55, %v4236_v29  ;;  %v11267_v29 = vld [vmem:[#allocation76_spill] sm:$0xff] }
 0x773   : > { %v3918_v55 = vadd.f32 %v11267_v29, %v11266_v63  ;;  %v11278_v29 = vld [vmem:[#allocation82_spill] sm:$0xff] }
 0x774   : > { %v4539_v52 = vmul.f32 0.2, %v4405_v15 }
 0x776   : > { %v4667_v56 = vmax.f32 %v4405_v15, %v4539_v52  ;;  %4962 = vmatmul.bf16.gmra.mxu1 %v10174_v38 }
 0x778   : > { %v10279_v40 = vpack.c.bf16 %v4667_v56, %v4665_v36  ;;  %v11268_v36 = vld [vmem:[#allocation119_spill] sm:$0xff] }
 0x779   : > { %v4407_v6 = vpop.f32.mrf.mxu3  ;;  %v4253_v57 = vpop.f32.mrf.mxu2  ;;  %v3923_v56 = vadd.f32 %v3922_v19, %v11268_v36  ;;  %v11275_v19 = vld [vmem:[#allocation32_spill] sm:$0xff] }
 0x77a   : > { %v4408_v10 = vadd.f32 %v4407_v6, %v10121_v25  ;;  %v4838_v48 = vpop.f32.mrf.mxu0 }
 0x77c   : > { %v4541_v3 = vmul.f32 0.2, %v4408_v10 }
 0x77e   : > { %v4669_v37 = vmax.f32 %v4408_v10, %v4541_v3  ;;  %v3913_v10 = vadd.f32 %v11270_v33, %v11269_v42  ;;  %v11273_v3 = vld [vmem:[#allocation136_spill] sm:$0xff] }
 0x781   : > { %v4409_v28 = vpop.f32.mrf.mxu3  ;;  %4976 = vmatmul.bf16.vlgmr.msrb.gmra.mxu0 %v10184_v17  ;;  %v4255_v16 = vpop.f32.mrf.mxu2 }
 0x782   : > { %v4410_v62 = vadd.f32 %v4409_v28, %v4241_v39  ;;  %v4840_v34 = vpop.f32.mrf.mxu0  ;;  %v4092_v39 = vadd.f32 %v4091_v54, %v3923_v56  ;;  %v11277_v54 = vld [vmem:[#allocation80_spill] sm:$0xff] }
 0x783   : > { %v4862_v0 = vpop.f32.mrf.mxu1 }
 0x784   : > { %v4543_v30 = vmul.f32 0.2, %v4410_v62  ;;  %v4863_v63 = vadd.f32 %v4862_v0, %v4838_v48 }
 0x786   : > { %v4671_v46 = vmax.f32 %v4410_v62, %v4543_v30  ;;  %v11274_v62 = vld [vmem:[#allocation79_spill] sm:$0xff] }
 0x787   : > { %v3908_v30 = vadd.f32 %v11274_v62, %v11273_v3 }
 0x788   : > { %v10290_v25 = vpack.c.bf16 %v4671_v46, %v4669_v37  ;;  %v4082_v37 = vadd.f32 %v11275_v19, %v3913_v10 }
 0x789   : > { %v4412_v9 = vpop.f32.mrf.mxu3  ;;  %v4258_v27 = vpop.f32.mrf.mxu2 }
 0x78a   : > { %v10293_v49 = vadd.f32 %v4412_v9, %v10141_v61  ;;  %v10298_v22 = vpop.f32.mrf.mxu0  ;;  %v4259_v1 = vadd.f32 %v4258_v27, %v10079_v31  ;;  %v4254_v9 = vadd.f32 %v4253_v57, %v11276_v11 }
 0x78b   : > { %v4864_v58 = vpop.f32.mrf.mxu1 }
 0x791   : > { %v10295_v51 = vpop.f32.mrf.mxu3  ;;  %4981 = vmatmul.bf16.gmra.mxu0 %v10218_v44  ;;  %v4260_v24 = vpop.f32.mrf.mxu2 }
 0x792   : > { %v10303_v61 = vpop.f32.mrf.mxu0  ;;  %v4261_v5 = vadd.f32 %v4260_v24, %v4092_v39 }
 0x793   : > { %v10300_v50 = vpop.f32.mrf.mxu1 }
 0x799   : > { %v4417_v38 = vpop.f32.mrf.mxu3 }
 0x79a   : > { %v4881_v45 = vpop.f32.mrf.mxu0 }
 0x79b   : > { %v10305_v12 = vpop.f32.mrf.mxu1  ;;  %v4882_v21 = vadd.f32 %v4881_v45, %v4858_v32 }
 0x79c   : > { %v4870_v19 = vadd.f32 %v10305_v12, %v10303_v61 }
 0x7a1   : > { %v4419_v60 = vpop.f32.mrf.mxu3  ;;  %4986 = vmatmul.bf16.gmra.mxu0 %v10244_v18  ;;  %v4087_v18 = vadd.f32 %v11271_v13, %v3918_v55  ;;  %v4249_v55 = vadd.f32 %v4248_v14, %v11278_v29 }
 0x7a2   : > { %v4883_v20 = vpop.f32.mrf.mxu0 }
 0x7a3   : > { %v4905_v59 = vpop.f32.mrf.mxu1  ;;  %v4884_v44 = vadd.f32 %v4883_v20, %v4860_v4  ;;  %v4256_v28 = vadd.f32 %v4255_v16, %v4087_v18  ;;  %v4077_v16 = vadd.f32 %v11277_v54, %v3908_v30  ;;  %v4418_v36 = vadd.f32 %v4417_v38, %v4249_v55 }
 0x7a4   : > { %v4906_v6 = vadd.f32 %v4905_v59, %v4882_v21  ;;  %v4251_v59 = vadd.f32 %v4250_v41, %v4082_v37  ;;  %v4865_v41 = vadd.f32 %v4864_v58, %v4840_v34  ;;  %v4545_v34 = vmul.f32 0.2, %v10293_v49 }
 0x7a5   : > { %v4549_v14 = vmul.f32 0.2, %v4418_v36  ;;  %v4868_v30 = vadd.f32 %v10300_v50, %v10298_v22 }
 0x7a6   : > { %5016 = vrot.lane.b32.xlu1 %v4906_v6, %s11272_s19  ;;  %v4420_v21 = vadd.f32 %v4419_v60, %v4251_v59  ;;  %v4673_v3 = vmax.f32 %v10293_v49, %v4545_v34 }
 0x7a9   : > { %v4422_v23 = vpop.f32.mrf.mxu3 }
 0x7aa   : > { %v4886_v46 = vpop.f32.mrf.mxu0  ;;  %v4423_v31 = vadd.f32 %v4422_v23, %v4254_v9  ;;  %v4551_v23 = vmul.f32 0.2, %v4420_v21 }
 0x7ab   : > { %v4907_v52 = vpop.f32.mrf.mxu1  ;;  %v4887_v0 = vadd.f32 %v4886_v46, %v4863_v63 }
 0x7ac   : > { %v10311_v8 = vadd.f32 %v4907_v52, %v4884_v44  ;;  %v4246_v52 = vadd.f32 %v10286_v47, %v4077_v16  ;;  %v4553_v57 = vmul.f32 0.2, %v4423_v31 }
 0x7ae   : > { %v4415_v6 = vadd.f32 %v10295_v51, %v4246_v52  ;;  %v4681_v60 = vmax.f32 %v4423_v31, %v4553_v57  ;;  %v4677_v51 = vmax.f32 %v4418_v36, %v4549_v14  ;;  %v5056_v52 = vld [vmem:[%s10443_s10] sm:$0xff] }
 0x7b0   : > { %v4547_v38 = vmul.f32 0.2, %v4415_v6 }
 0x7b1   : > { %v4424_v17 = vpop.f32.mrf.mxu3 }
 0x7b2   : > { %v4425_v45 = vadd.f32 %v4424_v17, %v4256_v28  ;;  %v4888_v42 = vpop.f32.mrf.mxu0  ;;  %v4675_v58 = vmax.f32 %v4415_v6, %v4547_v38  ;;  %v447_v38 = vld [vmem:[%s10690_s3] sm:$0xff] }
 0x7b3   : > { %v4910_v4 = vpop.f32.mrf.mxu1  ;;  %v4889_v10 = vadd.f32 %v4888_v42, %v4865_v41 }
 0x7b4   : > { %v4555_v44 = vmul.f32 0.2, %v4425_v45  ;;  %v10326_v18 = vadd.f32 %v4910_v4, %v4887_v0  ;;  %v4757_v62 = vpack.c.bf16 %v4675_v58, %v4673_v3 }
 0x7b6   : > { %v4683_v33 = vmax.f32 %v4425_v45, %v4555_v44 }
 0x7b8   : > { %v4761_v24 = vpack.c.bf16 %v4683_v33, %v4681_v60 }
 0x7b9   : > { %v4427_v15 = vpop.f32.mrf.mxu3 }
 0x7ba   : > { %v4428_v53 = vadd.f32 %v4427_v15, %v4259_v1  ;;  %v4679_v1 = vmax.f32 %v4420_v21, %v4551_v23 }
 0x7bb   : > { %v4912_v13 = vpop.f32.mrf.mxu1 }
 0x7bc   : > { %v4557_v27 = vmul.f32 0.2, %v4428_v53  ;;  %v10328_v47 = vadd.f32 %v4912_v13, %v4889_v10  ;;  %v4759_v39 = vpack.c.bf16 %v4679_v1, %v4677_v51  ;;  %v5057_v1 = vld [vmem:[%s10443_s10 + $0x8] sm:$0xff] }
 0x7be   : > { %v4685_v56 = vmax.f32 %v4428_v53, %v4557_v27  ;;  %v4891_v28 = vpop.f32.mrf.mxu0 }
 0x7bf   : > { %v4892_v37 = vadd.f32 %v4891_v28, %v4868_v30 }
 0x7c1   : > { %v4429_v32 = vpop.f32.mrf.mxu3 }
 0x7c2   : > { %v4430_v20 = vadd.f32 %v4429_v32, %v4261_v5 }
 0x7c3   : > { %v4915_v53 = vpop.f32.mrf.mxu1 }
 0x7c4   : > { %v4559_v15 = vmul.f32 0.2, %v4430_v20  ;;  %v4916_v5 = vadd.f32 %v4915_v53, %v4892_v37  ;;  %v11281_v53 = vld [vmem:[#allocation8_spill] sm:$0xff] }
 0x7c5   : > { %v5121_v3 = vsel %vm5120_vm7, %v11281_v53, 0.0 }
 0x7c6   : > { %v4687_v17 = vmax.f32 %v4430_v20, %v4559_v15  ;;  %v4893_v46 = vpop.f32.mrf.mxu0  ;;  %5036 = vrot.lane.b32.xlu0 %v4916_v5, %s11279_s20 }
 0x7c7   : > { %v4894_v11 = vadd.f32 %v4893_v46, %v4870_v19  ;;  %v11283_v46 = vld [vmem:[#allocation13_spill] sm:$0xff] }
 0x7c8   : > { %v4763_v48 = vpack.c.bf16 %v4687_v17, %v4685_v56 }
 0x7ca   : > { %4992 = vmatpush.bf16.msrb.mxu1 %v4763_v48 }
 0x7cb   : > { %v4917_v9 = vpop.f32.mrf.mxu1 }
 0x7cc   : > { %v4918_v45 = vadd.f32 %v4917_v9, %v4894_v11 }
 0x7ce   : > { %4993 = vmatpush.bf16.msrb.mxu1 %v4761_v24  ;;  %v4929_v49 = vpop.f32.mrf.mxu0 }
 0x7d2   : > { %4994 = vmatpush.bf16.msrb.mxu1 %v4759_v39 }
 0x7d3   : > { %v4953_v50 = vpop.f32.mrf.mxu1 }
 0x7d4   : > { %v4954_v55 = vadd.f32 %v4953_v50, %v4929_v49 }
 0x7d6   : > { %4995 = vmatpush.bf16.msrb.mxu1 %v4757_v62  ;;  %v4931_v22 = vpop.f32.mrf.mxu0  ;;  %v11282_v62 = vld [vmem:[#allocation9_spill] sm:$0xff] }
 0x7d7   : > { %v5122_v30 = vsel %vm5120_vm7, %v11282_v62, 0.0 }
 0x7d8   : > { %v5123_v37 = vadd.f32 %v5122_v30, %v5121_v3 }
 0x7da   : > { %4996 = vmatpush.bf16.msrb.mxu1 %v10290_v25 }
 0x7db   : > { %v4955_v12 = vpop.f32.mrf.mxu1 }
 0x7dc   : > { %v4956_v57 = vadd.f32 %v4955_v12, %v4931_v22  ;;  %v11284_v12 = vld [vmem:[#allocation12_spill] sm:$0xff] }
 0x7de   : > { %4997 = vmatpush.bf16.msrb.mxu1 %v10279_v40  ;;  %v4934_v61 = vpop.f32.mrf.mxu0 }
 0x7e2   : > { %4998 = vmatpush.bf16.msrb.mxu1 %v10270_v2 }
 0x7e3   : > { %v4958_v25 = vpop.f32.mrf.mxu1 }
 0x7e4   : > { %v4959_v32 = vadd.f32 %v4958_v25, %v4934_v61 }
 0x7e6   : > { %4999 = vmatpush.bf16.msrb.mxu1 %v10257_v43  ;;  %v4936_v59 = vpop.f32.mrf.mxu0 }
 0x7e9   : > { %5000 = vmatmul.bf16.vlgmr.msrb.gmra.mxu1 %v10193_v35 }
 0x7eb   : > { %v4960_v31 = vpop.f32.mrf.mxu1 }
 0x7ec   : > { %v4961_v27 = vadd.f32 %v4960_v31, %v4936_v59 }
 0x7ee   : > { %v4939_v4 = vpop.f32.mrf.mxu0 }
 0x7f0   : > { %5124 = vadd.xlane.f32.xlu0 %v5123_v37 }
 0x7f3   : > { %v4963_v16 = vpop.f32.mrf.mxu1 }
 0x7f4   : > { %v4964_v42 = vadd.f32 %v4963_v16, %v4939_v4 }
 0x7f6   : > { %v4941_v40 = vpop.f32.mrf.mxu0 }
 0x7f9   : > { %5005 = vmatmul.bf16.gmra.mxu1 %v10228_v7 }
 0x7fb   : > { %v4965_v29 = vpop.f32.mrf.mxu1 }
 0x7fc   : > { %v4966_v10 = vadd.f32 %v4965_v29, %v4941_v40 }
 0x7fe   : > { %v4977_v2 = vpop.f32.mrf.mxu0 }
 0x7ff   : > { %v4978_v21 = vadd.f32 %v4977_v2, %v4954_v55 }
 0x806   : > { %v4979_v20 = vpop.f32.mrf.mxu0 }
 0x807   : > { %v4980_v56 = vadd.f32 %v4979_v20, %v4956_v57 }
 0x809   : > { %5010 = vmatmul.bf16.gmra.mxu1 %v10252_v26 }
 0x80e   : > { %v4982_v43 = vpop.f32.mrf.mxu0 }
 0x80f   : > { %v4983_v63 = vadd.f32 %v4982_v43, %v4959_v32 }
 0x816   : > { %v4984_v54 = vpop.f32.mrf.mxu0 }
 0x817   : > { %v4985_v35 = vadd.f32 %v4984_v54, %v4961_v27 }
 0x818   : > { %v5017_v58 = vpop.permute.xlu1 %5016 }
 0x81e   : > { %v4987_v23 = vpop.f32.mrf.mxu0 }
 0x81f   : > { %v4988_v33 = vadd.f32 %v4987_v23, %v4964_v42 }
 0x826   : > { %v4989_v13 = vpop.f32.mrf.mxu0 }
 0x827   : > { %v4990_v14 = vadd.f32 %v4989_v13, %v4966_v10 }
 0x838   : > { %v5037_v5 = vpop.permute.xlu0 %5036 }
 0x866   : > { %v5001_v44 = vpop.f32.mrf.mxu1 }
 0x867   : > { %v5002_v7 = vadd.f32 %v5001_v44, %v4978_v21 }
 0x869   : > { %5020 = vrot.lane.b32.xlu2 %v5002_v7, %s11272_s19 }
 0x86e   : > { %v5003_v15 = vpop.f32.mrf.mxu1 }
 0x86f   : > { %v5004_v41 = vadd.f32 %v5003_v15, %v4980_v56 }
 0x871   : > { %5060 = vperm.xlu2 %6268, %v5056_v52  }
 0x876   : > { %v5006_v26 = vpop.f32.mrf.mxu1 }
 0x877   : > { %v5007_v36 = vadd.f32 %v5006_v26, %v4983_v63 }
 0x879   : > { %5018 = vrot.lane.b32.xlu2 %v10311_v8, %s11272_s19 }
 0x87e   : > { %v5008_v17 = vpop.f32.mrf.mxu1 }
 0x87f   : > { %v10350_v6 = vadd.f32 %v5008_v17, %v4985_v35 }
 0x881   : > { %5022 = vrot.lane.b32.xlu2 %v5004_v41, %s11272_s19 }
 0x886   : > { %v5011_v48 = vpop.f32.mrf.mxu1 }
 0x887   : > { %v5012_v0 = vadd.f32 %v5011_v48, %v4988_v33 }
 0x889   : > { %5038 = vrot.lane.b32.xlu2 %v4918_v45, %s11279_s20  ;;  %5040 = vrot.lane.b32.xlu1 %v5012_v0, %s11279_s20  ;;  %v11285_v0 = vld [vmem:[#allocation6_spill] sm:$0xff] }
 0x88e   : > { %v5013_v8 = vpop.f32.mrf.mxu1 }
 0x88f   : > { %v5014_v60 = vadd.f32 %v5013_v8, %v4990_v14 }
 0x891   : > { %5042 = vrot.lane.b32.xlu2 %v5014_v60, %s11279_s20  ;;  %s5169_s20 = scalar_lea.hbm %s10444_s11, %s6213_s16 }
 0x892   : > { %s5172_s21 = sshll.u32 %s5169_s20, 4  ;;  %s5173_s21 = int_to_ptr.hbm [resolvable:$true] %s5172_s21 }
 0x893   : > { %s6296_s0 = sshra.s32 %s5173_s21, 4  ;;  %s6297_s0 = int_to_ptr.hbm [resolvable:$true] %s6296_s0 }
 0x894   : > { %s6298_s1 = scalar_lea.hbm %s6297_s0, 32  ;;  %p6303_p0 = scmp.lt.s32.totalorder %s6297_s0, %s10444_s11 }
 0x895   : > { %p6299_p11 = scmp.ne.s32.totalorder %s6297_s0, %s6298_s1  ;;  %p6304_p1 = scmp.lt.s32.totalorder %s6302_s4, %s6298_s1 }
 0x897   : > { %p6300_p12 = pnand %p6299_p11, %p6458_p5  ;;  %p6305_p2 = por %p6304_p1, %p6303_p0 }
 0x899   : > { %451 = vperm.xlu2 %6268, %v447_v38   ;;  %p6301_p13 = pneg %p6300_p12 }
 0x89b   : > { %p6306_p3 = pnand %p6305_p2, %p6301_p13 }
 0x8a1   : > { %5065 = vperm.xlu2 %6268, %v5057_v1  }
 0x8c3   : > { %v5021_v24 = vpop.permute.xlu2 %5020 }
 0x8c4   : > { %v5026_v28 = vsel %vm540_vm5, %v5021_v24, %v5017_v58  ;;  %v5024_v9 = vsel %vm540_vm5, %v5017_v58, %v5021_v24  ;;  %v11286_v24 = vld [vmem:[#allocation7_spill] sm:$0xff] }
 0x8c5   : > { %v5028_v11 = vmul.f32 %v11283_v46, %v5026_v28  ;;  %v5033_v61 = vadd.f32 %v5024_v9, %v5007_v36 }
 0x8c7   : > { %v5032_v45 = vadd.f32 %v5028_v11, %v10326_v18 }
 0x8cb   : > { %v5061_v34 = vpop.permute.xlu2 %5060 }
 0x8d3   : > { %v5019_v51 = vpop.permute.xlu2 %5018 }
 0x8db   : > { %v5023_v19 = vpop.permute.xlu2 %5022 }
 0x8dc   : > { %v5027_v21 = vsel %vm540_vm5, %v5023_v19, %v5019_v51  ;;  %v5025_v56 = vsel %vm540_vm5, %v5019_v51, %v5023_v19 }
 0x8dd   : > { %v5030_v44 = vmul.f32 %v11283_v46, %v5027_v21  ;;  %v5035_v3 = vadd.f32 %v5025_v56, %v10350_v6 }
 0x8df   : > { %v5034_v17 = vadd.f32 %v5030_v44, %v10328_v47 }
 0x8e3   : > { %v5039_v31 = vpop.permute.xlu2 %5038 }
 0x8eb   : > { %v5043_v54 = vpop.permute.xlu2 %5042 }
 0x8ec   : > { %v5047_v52 = vsel %vm549_vm2, %v5043_v54, %v5039_v31  ;;  %v5045_v23 = vsel %vm549_vm2, %v5039_v31, %v5043_v54 }
 0x8ed   : > { %v5051_v42 = vmul.f32 %v11284_v12, %v5047_v52  ;;  %v5054_v19 = vadd.f32 %v5045_v23, %v5034_v17 }
 0x8f3   : > { %v452_v7 = vpop.permute.xlu2 %451 }
 0x8f4   : > { %v484_v10 = vadd.f32 %v11285_v0, %v452_v7 }
 0x8f6   : > { %v517_v30 = vmul.f32 %v11281_v53, %v484_v10 }
 0x8fb   : > { %v5041_v49 = vpop.permute.xlu1 %5040  ;;  %v5066_v37 = vpop.permute.xlu2 %5065 }
 0x8fc   : > { %v5044_v22 = vsel %vm549_vm2, %v5037_v5, %v5041_v49  ;;  %v5046_v50 = vsel %vm549_vm2, %v5041_v49, %v5037_v5  ;;  %v5070_v53 = vadd.f32 %v5066_v37, %v5054_v19 }
 0x8fd   : > { %v5049_v59 = vmul.f32 %v11284_v12, %v5046_v50  ;;  %v5052_v25 = vadd.f32 %v5044_v22, %v5032_v45  ;;  %v5055_v45 = vadd.f32 %v5051_v42, %v5035_v3 }
 0x8ff   : > { %v5053_v32 = vadd.f32 %v5049_v59, %v5033_v61  ;;  %v5068_v4 = vadd.f32 %v5061_v34, %v5052_v25  ;;  %v5071_v12 = vadd.f32 %v5066_v37, %v5055_v45 }
 0x901   : > { %v5069_v27 = vadd.f32 %v5061_v34, %v5053_v32  ;;  %v5072_v40 = vadd.f32 2.0, %v5068_v4  ;;  %v507_v34 = vadd.f32 %v11286_v24, %v452_v7 }
 0x903   : > { %v5073_v2 = vadd.f32 2.0, %v5069_v27  ;;  %v5074_v20 = vsub.f32 0.0, %v5072_v40  ;;  %v518_v5 = vmul.f32 %v11282_v62, %v507_v34 }
 0x905   : > { %v5075_v43 = vsub.f32 0.0, %v5073_v2  ;;  %v5076_v18 = vmul.f32 1.442695, %v5074_v20 }
 0x907   : > { %6270 = vpow2.f32 %v5076_v18  ;;  %v5078_v63 = vmul.f32 1.442695, %v5075_v43 }
 0x909   : > { %6272 = vpow2.f32 %v5078_v63 }
 0x90d   : > { %v6271_v35 = vpop.eup %6270 }
 0x90e   : > { %v5080_v16 = vadd.f32 1.0, %v6271_v35 }
 0x90f   : > { %v6273_v29 = vpop.eup %6272 }
 0x910   : > { %v5081_v55 = vadd.f32 1.0, %v6273_v29  ;;  %6274 = vrcp.f32 %v5080_v16  ;;  %v5093_v13 = vand.u32 2147483648, %v5080_v16  ;;  %v5091_v38 = vand.u32 2147483647, %v5080_v16 }
 0x911   : > { %6276 = vlog2.f32 %v5080_v16  ;;  %vm5087_vm9 = vweird.f32 %v5080_v16 }
 0x912   : > { %6278 = vrcp.f32 %v5081_v55  ;;  %v5108_v47 = vand.u32 2147483648, %v5081_v55  ;;  %v5106_v28 = vand.u32 2147483647, %v5081_v55  ;;  %v5094_v46 = vor.u32 1.1754944e-38, %v5093_v13 }
 0x913   : > { %6280 = vlog2.f32 %v5081_v55  ;;  %vm5102_vm12 = vweird.f32 %v5081_v55  ;;  %vm5092_vm13 = vcmp.eq.f32.partialorder %v5091_v38, 8.507059e+37 }
 0x914   : > { %v5109_v49 = vor.u32 1.1754944e-38, %v5108_v47  ;;  %vm5107_vm15 = vcmp.eq.f32.partialorder %v5106_v28, 8.507059e+37 }
 0x916   : > { %v6275_v15 = vpop.eup %6274 }
 0x917   : > { %v6277_v26 = vpop.eup %6276  ;;  %v5083_v36 = vmul.f32 %v6275_v15, %v5080_v16  ;;  %vm5088_vm8 = vweird.f32 %v6275_v15 }
 0x918   : > { %v6279_v57 = vpop.eup %6278  ;;  %v5134_v14 = vmul.f32 0.6931472, %v6277_v26  ;;  %vm5089_vm11 = vmor %vm5087_vm9, %vm5088_vm8 }
 0x919   : > { %v6281_v41 = vpop.eup %6280  ;;  %v5084_v33 = vsub.f32 1.0, %v5083_v36  ;;  %v5098_v48 = vmul.f32 %v6279_v57, %v5081_v55  ;;  %vm5103_vm10 = vweird.f32 %v6279_v57 }
 0x91a   : > { %v5136_v8 = vmul.f32 0.6931472, %v6281_v41  ;;  %vm5104_vm14 = vmor %vm5102_vm12, %vm5103_vm10 }
 0x91b   : > { %v5085_v60 = vmul.f32 %v6275_v15, %v5084_v33  ;;  %v5099_v1 = vsub.f32 1.0, %v5098_v48 }
 0x91c   : > { %v5137_v51 = vadd.f32 %v5136_v8, %v5134_v14 }
 0x91d   : > { %v5086_v58 = vadd.f32 %v6275_v15, %v5085_v60  ;;  %v5100_v39 = vmul.f32 %v6279_v57, %v5099_v1 }
 0x91e   : > { %5138 = vadd.xlane.f32.xlu1 %v5137_v51 }
 0x91f   : > { %v5090_v11 = vsel %vm5089_vm11, %v6275_v15, %v5086_v58  ;;  %v5101_v9 = vadd.f32 %v6279_v57, %v5100_v39 }
 0x920   : > { %v5095_v6 = vsel %vm5092_vm13, %v5094_v46, %v5090_v11 }
 0x921   : > { %v5105_v22 = vsel %vm5104_vm14, %v6279_v57, %v5101_v9  ;;  %v5112_v50 = vmul.f32 %v5095_v6, %v517_v30 }
 0x922   : > { %v5110_v61 = vsel %vm5107_vm15, %v5109_v49, %v5105_v22 }
 0x923   : > { %v5113_v59 = vmul.f32 %v5110_v61, %v518_v5  ;;  %v5114_v25 = vadd.f32 %v5112_v50, %v5070_v53 }
 0x925   : > { %v5115_v32 = vadd.f32 %v5113_v59, %v5071_v12  ;;  %5116 = vst [vmem:[%s6506_s29] sm:$0xff] %v5114_v25 }
 0x927   : > { %5117 = vst [vmem:[%s6506_s29 + $0x8] sm:$0xff] %v5115_v32 }
 0x928   : > { %6309 = shalt.err (!%p6306_p3)
}
 0x929   : > { %s6350_s29 = smov 256   ;;  %s6351_s16 = smov 16   ;;  %v5125_v62 = vpop.xlane.xlu0 %5124  ;;  %vm5152_vm0 = vcmask 0  }
 0x92a   : > { %6222 = dma.vmem_to_hbm [thread:$0]  (%p6458_p5), %s5171_s30, 512, %s5173_s21, %s5155_s27, %s6350_s29, %s6350_s29, %s6351_s16   ;;  %v5126_v4 = vrot.slane %v5125_v62, 4 }
 0x92b   : > { %s5148_s2 = sld [smem:[#allocation2]]  ;;  %s438_s21 = scalar_lea.vmem %s10445_s12, %s6473_s18 }
 0x92c   : > { %v5127_v31 = vadd.f32 %v5126_v4, %v5125_v62 }
 0x92e   : > { %v5128_v27 = vrot.slane %v5127_v31, 2 }
 0x930   : > { %v5129_v40 = vadd.f32 %v5128_v27, %v5127_v31 }
 0x932   : > { %v5130_v2 = vrot.slane %v5129_v40, 1 }
 0x934   : > { %v5131_v20 = vadd.f32 %v5130_v2, %v5129_v40 }
 0x936   : > { %6218 = vpush %v5131_v20 }
 0x967   : > { %s6219_s3 = spop %6218 }
 0x968   : > { %s5149_s14 = smul.f32 %s6219_s3, %s5148_s2 }
 0x991   : > { %v5139_v43 = vpop.xlane.xlu1 %5138 }
 0x992   : > { %v5140_v18 = vrot.slane %v5139_v43, 4 }
 0x994   : > { %v5141_v63 = vadd.f32 %v5140_v18, %v5139_v43 }
 0x996   : > { %v5142_v54 = vrot.slane %v5141_v63, 2 }
 0x998   : > { %v5143_v35 = vadd.f32 %v5142_v54, %v5141_v63 }
 0x99a   : > { %v5144_v16 = vrot.slane %v5143_v35, 1 }
 0x99c   : > { %v5145_v29 = vadd.f32 %v5144_v16, %v5143_v35 }
 0x99e   : > { %6220 = vpush %v5145_v29 }
 0x9cf   : > { %s6221_s5 = spop %6220 }
 0x9d0   : > { %s5147_s19 = ssub.f32 0.0, %s6221_s5 }
 0x9d2   : > { %s5150_s22 = sadd.f32 %s5149_s14, %s5147_s19 }
 0x9d4   : > { %v5151_v55 = vstv %s5150_s22 }
 0x9d5   : > { %5153 = vst.msk [vmem:[%s438_s21] sm:$0x1] %vm5152_vm0, %v5151_v55 }
 0x9d6 PF: > { %p6228_p4 = scmp.ge.s32.totalorder %s6344_s26, 2  ;;  %s5190_s27 = sand.u32 1, %s6332_s23  }
 0x9d7   : > { %s5191_s0 = scalar_lea.sflag [#allocation4], %s5190_s27 }
 0x9d8   : > { %p6225_p5 = pnand %p6228_p4, %p6462_p6 }
 0x9da   : > { %p6226_p7 = pneg %p6225_p5 }
 0x9dc   : > { %6327 = dma.done.wait (%p6226_p7), %s5191_s0, 512  }
 0x9dd   : > { %6329 = vsyncadd (%p6226_p7), %s5191_s0, 4294966784  ;;  %p24_p8 = scmp.ge.s32.totalorder %s6445_s28, 4   ;;  %s11288_s23 = smov %s6336_s24 }
 0x9de   : > { %s11289_s24 = smov %s6340_s25  ;;  %s11290_s25 = smov %s6456_s13 }
 0x9df   : > { %s11291_s26 = smov %s6445_s28  ;;  %26 = sbr.rel (!%p24_p8) target bundleno = 10 (0xa), region = 114 }
 0x9e4   :  { %5203 = vsyncpa [#allocation4], 1 }
 0x9e5   :  { %5205 = vsyncpa [#allocation4 + $0x1], 1 }

</bundles_post_ra>
